<compile_context>
chip_gen: v6e
topology: v6e:2x2x1
jax: 0.10.0
libtpu: 0.0.40
codegen_flags: <defaults>
</compile_context>

<pallas_src>
import jax
import jax.numpy as jnp
from jax.experimental import pallas as pl
from jax.experimental.pallas import tpu as pltpu


def make_vgg_forward(cfg, ksize, N, H0, W0, num_classes=10, eps=1e-5):
    """Builds a fully fused Pallas forward pass for a static cfg / input size."""
    K = ksize
    p = K // 2

    # ---- static per-stage geometry + scratch layout -------------------------
    stages = []          # ('conv', meta) / ('pool', meta), in execution order
    conv_metas = []
    scratch_shapes = []
    H, W, C = H0, W0, 3
    for v in cfg:
        if v == 'M':
            Ho, Wo = H // 2, W // 2
            m = dict(H=H, W=W, C=C, Ho=Ho, Wo=Wo, op='max',
                     pooled_idx=len(scratch_shapes))
            scratch_shapes.append(pltpu.VMEM((N * Ho * Wo, C), jnp.float32))
            stages.append(('pool', m))
            H, W = Ho, Wo
        else:
            Hp, Wp = H + 2 * p, W + 2 * p
            # Rows of the shifted-matmul accumulator that cover every valid
            # output position (padded-layout indices [off, N*Hp*Wp - off)).
            Mr = N * Hp * Wp - 2 * (p * Wp + p)
            m = dict(H=H, W=W, Cin=C, Cout=v, Hp=Hp, Wp=Wp, Mr=Mr,
                     pad_idx=len(scratch_shapes),
                     acc_idx=len(scratch_shapes) + 1,
                     dense_idx=len(scratch_shapes) + 2)
            scratch_shapes.append(pltpu.VMEM((N * Hp * Wp, C), jnp.float32))
            scratch_shapes.append(pltpu.VMEM((Mr, v), jnp.float32))
            scratch_shapes.append(pltpu.VMEM((N * H * W, v), jnp.float32))
            stages.append(('conv', m))
            conv_metas.append(m)
            C = v
    # trailing AvgPool2d(2)
    Ho, Wo = H // 2, W // 2
    m = dict(H=H, W=W, C=C, Ho=Ho, Wo=Wo, op='avg',
             pooled_idx=len(scratch_shapes))
    scratch_shapes.append(pltpu.VMEM((N * Ho * Wo, C), jnp.float32))
    stages.append(('pool', m))
    H, W = Ho, Wo

    # TODO(synk): flatten assumes the final spatial size is 1x1 (true for all
    # standard VGG cfgs at CIFAR-style input sizes); a general NCHW-order
    # flatten for a larger final spatial extent is not implemented.
    assert H == 1 and W == 1, f"expected 1x1 spatial after AvgPool2d(2), got {H}x{W}"
    C_last = C
    n_conv = len(conv_metas)

    # ---- the fused kernel ----------------------------------------------------
    def kernel(*refs):
        x_ref = refs[0]
        conv_refs = refs[1:1 + 3 * n_conv]
        fcw_ref = refs[1 + 3 * n_conv]
        fcb_ref = refs[2 + 3 * n_conv]
        out_ref = refs[3 + 3 * n_conv]
        scratch = refs[4 + 3 * n_conv:]

        src_ref = x_ref          # dense (N*H*W, C) activation ref, f32
        ci = 0
        for kind, m in stages:
            if kind == 'conv':
                w_ref = conv_refs[3 * ci]
                g_ref = conv_refs[3 * ci + 1]
                b_ref = conv_refs[3 * ci + 2]
                ci += 1
                Hs, Ws = m['H'], m['W']
                Hp, Wp = m['Hp'], m['Wp']
                Cout, Mr = m['Cout'], m['Mr']
                pad_ref = scratch[m['pad_idx']]
                acc_ref = scratch[m['acc_idx']]
                dense_ref = scratch[m['dense_idx']]

                # (1) zero-padded input built in VMEM (no wrapper-side jnp.pad).
                pad_ref[...] = jnp.zeros_like(pad_ref)
                for n in range(N):
                    for h in range(Hs):
                        pad_ref[pl.ds(n * Hp * Wp + (h + p) * Wp + p, Ws), :] = (
                            src_ref[pl.ds(n * Hs * Ws + h * Ws, Ws), :])

                # (2) direct conv: K*K whole-batch shifted matmuls on the MXU,
                #     bf16 operands, f32 accumulation.
                acc = jnp.zeros((Mr, Cout), jnp.float32)
                for kh in range(K):
                    for kw in range(K):
                        xs = pad_ref[pl.ds(kh * Wp + kw, Mr), :]
                        acc = acc + jnp.dot(xs.astype(jnp.bfloat16),
                                            w_ref[kh, kw],
                                            preferred_element_type=jnp.float32)
                acc_ref[...] = acc

                # (3) gather the valid output rows into dense (N*H*W, Cout).
                for n in range(N):
                    for h in range(Hs):
                        dense_ref[pl.ds(n * Hs * Ws + h * Ws, Ws), :] = (
                            acc_ref[pl.ds(n * Hp * Wp + h * Wp, Ws), :])

                # (4) BatchNorm2d (train-mode batch statistics) + ReLU, in f32.
                xc = dense_ref[...]
                mean = jnp.mean(xc, axis=0, keepdims=True)
                var = jnp.mean(jnp.square(xc - mean), axis=0, keepdims=True)
                yv = ((xc - mean) * jax.lax.rsqrt(var + eps) * g_ref[...]
                      + b_ref[...])
                dense_ref[...] = jnp.maximum(yv, 0.0)
                src_ref = dense_ref
            else:
                # 2x2 / stride-2 pooling (max or avg) via strided pl.ds reads.
                Hs, Ws, Ho2, Wo2 = m['H'], m['W'], m['Ho'], m['Wo']
                pooled_ref = scratch[m['pooled_idx']]
                for n in range(N):
                    for ho in range(Ho2):
                        base = n * Hs * Ws + 2 * ho * Ws
                        a = src_ref[pl.ds(base, Wo2, stride=2), :]
                        b = src_ref[pl.ds(base + 1, Wo2, stride=2), :]
                        c = src_ref[pl.ds(base + Ws, Wo2, stride=2), :]
                        d = src_ref[pl.ds(base + Ws + 1, Wo2, stride=2), :]
                        if m['op'] == 'max':
                            blk = jnp.maximum(jnp.maximum(a, b),
                                              jnp.maximum(c, d))
                        else:
                            blk = (a + b + c + d) * 0.25
                        pooled_ref[pl.ds(n * Ho2 * Wo2 + ho * Wo2, Wo2), :] = blk
                src_ref = pooled_ref

        # classifier: (N, C_last) @ (C_last, num_classes) + bias
        feats = src_ref[...]
        logits = (jnp.dot(feats.astype(jnp.bfloat16), fcw_ref[...],
                          preferred_element_type=jnp.float32) + fcb_ref[...])
        out_ref[...] = logits.astype(out_ref.dtype)

    # ---- pallas_call plumbing -------------------------------------------------
    in_specs = [pl.BlockSpec((N * H0 * W0, 3), lambda i: (0, 0))]
    for cm in conv_metas:
        in_specs += [
            pl.BlockSpec((K, K, cm['Cin'], cm['Cout']), lambda i: (0, 0, 0, 0)),
            pl.BlockSpec((1, cm['Cout']), lambda i: (0, 0)),
            pl.BlockSpec((1, cm['Cout']), lambda i: (0, 0)),
        ]
    in_specs += [pl.BlockSpec((C_last, num_classes), lambda i: (0, 0)),
                 pl.BlockSpec((1, num_classes), lambda i: (0, 0))]

    call = pl.pallas_call(
        kernel,
        out_shape=jax.ShapeDtypeStruct((N, num_classes), jnp.float32),
        grid=(1,),
        in_specs=in_specs,
        out_specs=pl.BlockSpec((N, num_classes), lambda i: (0, 0)),
        scratch_shapes=scratch_shapes,
        compiler_params=pltpu.CompilerParams(
            dimension_semantics=("arbitrary",)),
    )

    def forward(params, x_nchw):
        # NCHW -> NHWC -> flat (N*H*W, 3); single XLA transform at the boundary.
        x = jnp.transpose(x_nchw, (0, 2, 3, 1)).reshape(N * H0 * W0, 3)
        args = [x.astype(jnp.float32)]
        for (w, g, b) in params["conv"]:
            args += [w.astype(jnp.bfloat16), g, b]
        args += [params["fc_w"].astype(jnp.bfloat16), params["fc_b"]]
        return call(*args)

    return forward


# -----------------------------------------------------------------------------
# Parameters (deterministic, matching VGG._initialize_weights distributions)
# -----------------------------------------------------------------------------
def init_params(key, cfg, ksize, num_classes=10):
    convs = []
    in_c = 3
    for v in cfg:
        if v == 'M':
            continue
        key, sub = jax.random.split(key)
        std = (2.0 / (ksize * ksize * v)) ** 0.5        # normal(0, sqrt(2/n))
        w = std * jax.random.normal(sub, (ksize, ksize, in_c, v), jnp.float32)
        gamma = jnp.full((1, v), 0.5, jnp.float32)      # BN weight = 0.5
        beta = jnp.zeros((1, v), jnp.float32)           # BN bias = 0
        convs.append((w, gamma, beta))
        in_c = v
    key, sub = jax.random.split(key)
    fc_w = 0.01 * jax.random.normal(sub, (in_c, num_classes), jnp.float32)
    fc_b = jnp.zeros((1, num_classes), jnp.float32)
    return {"conv": convs, "fc_w": fc_w, "fc_b": fc_b}


if __name__ == "__main__":
    K_SIZE = 3
    # Small VGG-style cfg (same structure as defaultcfg, scaled down).
    # 2 max-pools + final avg-pool(2): spatial 8 -> 4 -> 2 -> 1, so the flatten
    # size equals cfg[-1], matching nn.Linear(cfg[-1], 10).
    CFG = [16, 16, 'M', 32, 'M', 64]
    N, H0, W0 = 2, 8, 8

    key = jax.random.PRNGKey(0)
    kp, kx = jax.random.split(key)
    params = init_params(kp, CFG, K_SIZE)
    x = jax.random.normal(kx, (N, 3, H0, W0), jnp.float32)  # NCHW, like PyTorch

    fwd = jax.jit(make_vgg_forward(CFG, K_SIZE, N, H0, W0))
    y = fwd(params, x)
    jax.block_until_ready(y)

    assert y.shape == (N, 10), y.shape
    assert bool(jnp.all(jnp.isfinite(y)))
    print("KERNEL_OK")
</pallas_src>

<mosaic_0001>
module attributes {stable_mosaic.version = 11 : i64} {
  func.func @kernel(%arg0: i32, %arg1: memref<128x3xf32, #tpu.memory_space<vmem>>, %arg2: memref<3x3x3x16xbf16, #tpu.memory_space<vmem>>, %arg3: memref<1x16xf32, #tpu.memory_space<vmem>>, %arg4: memref<1x16xf32, #tpu.memory_space<vmem>>, %arg5: memref<3x3x16x16xbf16, #tpu.memory_space<vmem>>, %arg6: memref<1x16xf32, #tpu.memory_space<vmem>>, %arg7: memref<1x16xf32, #tpu.memory_space<vmem>>, %arg8: memref<3x3x16x32xbf16, #tpu.memory_space<vmem>>, %arg9: memref<1x32xf32, #tpu.memory_space<vmem>>, %arg10: memref<1x32xf32, #tpu.memory_space<vmem>>, %arg11: memref<3x3x32x64xbf16, #tpu.memory_space<vmem>>, %arg12: memref<1x64xf32, #tpu.memory_space<vmem>>, %arg13: memref<1x64xf32, #tpu.memory_space<vmem>>, %arg14: memref<64x10xbf16, #tpu.memory_space<vmem>>, %arg15: memref<1x10xf32, #tpu.memory_space<vmem>>, %arg16: memref<2x10xf32, #tpu.memory_space<vmem>>, %arg17: memref<200x3xf32, #tpu.memory_space<vmem>>, %arg18: memref<178x16xf32, #tpu.memory_space<vmem>>, %arg19: memref<128x16xf32, #tpu.memory_space<vmem>>, %arg20: memref<200x16xf32, #tpu.memory_space<vmem>>, %arg21: memref<178x16xf32, #tpu.memory_space<vmem>>, %arg22: memref<128x16xf32, #tpu.memory_space<vmem>>, %arg23: memref<32x16xf32, #tpu.memory_space<vmem>>, %arg24: memref<72x16xf32, #tpu.memory_space<vmem>>, %arg25: memref<58x32xf32, #tpu.memory_space<vmem>>, %arg26: memref<32x32xf32, #tpu.memory_space<vmem>>, %arg27: memref<8x32xf32, #tpu.memory_space<vmem>>, %arg28: memref<32x32xf32, #tpu.memory_space<vmem>>, %arg29: memref<22x64xf32, #tpu.memory_space<vmem>>, %arg30: memref<8x64xf32, #tpu.memory_space<vmem>>, %arg31: memref<2x64xf32, #tpu.memory_space<vmem>>) attributes {dimension_semantics = [#tpu.dimension_semantics<arbitrary>], iteration_bounds = array<i64: 1>, scalar_prefetch = 0 : i64, scratch_operands = 15 : i64, tpu.core_type = #tpu.core_type<tc>, window_params = [{pipeline_mode = #tpu.pipeline_mode<synchronous>, transform_indices = @transform_0, window_bounds = array<i64: 128, 3>}, {pipeline_mode = #tpu.pipeline_mode<synchronous>, transform_indices = @transform_1, window_bounds = array<i64: 3, 3, 3, 16>}, {pipeline_mode = #tpu.pipeline_mode<synchronous>, transform_indices = @transform_2, window_bounds = array<i64: 1, 16>}, {pipeline_mode = #tpu.pipeline_mode<synchronous>, transform_indices = @transform_3, window_bounds = array<i64: 1, 16>}, {pipeline_mode = #tpu.pipeline_mode<synchronous>, transform_indices = @transform_4, window_bounds = array<i64: 3, 3, 16, 16>}, {pipeline_mode = #tpu.pipeline_mode<synchronous>, transform_indices = @transform_5, window_bounds = array<i64: 1, 16>}, {pipeline_mode = #tpu.pipeline_mode<synchronous>, transform_indices = @transform_6, window_bounds = array<i64: 1, 16>}, {pipeline_mode = #tpu.pipeline_mode<synchronous>, transform_indices = @transform_7, window_bounds = array<i64: 3, 3, 16, 32>}, {pipeline_mode = #tpu.pipeline_mode<synchronous>, transform_indices = @transform_8, window_bounds = array<i64: 1, 32>}, {pipeline_mode = #tpu.pipeline_mode<synchronous>, transform_indices = @transform_9, window_bounds = array<i64: 1, 32>}, {pipeline_mode = #tpu.pipeline_mode<synchronous>, transform_indices = @transform_10, window_bounds = array<i64: 3, 3, 32, 64>}, {pipeline_mode = #tpu.pipeline_mode<synchronous>, transform_indices = @transform_11, window_bounds = array<i64: 1, 64>}, {pipeline_mode = #tpu.pipeline_mode<synchronous>, transform_indices = @transform_12, window_bounds = array<i64: 1, 64>}, {pipeline_mode = #tpu.pipeline_mode<synchronous>, transform_indices = @transform_13, window_bounds = array<i64: 64, 10>}, {pipeline_mode = #tpu.pipeline_mode<synchronous>, transform_indices = @transform_14, window_bounds = array<i64: 1, 10>}, {pipeline_mode = #tpu.pipeline_mode<synchronous>, transform_indices = @transform_15, window_bounds = array<i64: 2, 10>}]} {
    %cst = arith.constant 0.000000e+00 : f32
    %0 = vector.broadcast %cst : f32 to vector<200x3xf32>
    %c0 = arith.constant 0 : index
    %c0_0 = arith.constant 0 : index
    %1 = vector.load %arg17[%c0, %c0_0] : memref<200x3xf32, #tpu.memory_space<vmem>>, vector<200x3xf32>
    tpu.vector_store %arg17[%c0, %c0_0], %0 {strides = array<i32>} : memref<200x3xf32, #tpu.memory_space<vmem>>, vector<200x3xf32>,
    %c0_1 = arith.constant 0 : index
    %c0_2 = arith.constant 0 : index
    %2 = vector.load %arg1[%c0_1, %c0_2] : memref<128x3xf32, #tpu.memory_space<vmem>>, vector<8x3xf32>
    %c11 = arith.constant 11 : index
    %c0_3 = arith.constant 0 : index
    %3 = vector.load %arg17[%c11, %c0_3] : memref<200x3xf32, #tpu.memory_space<vmem>>, vector<8x3xf32>
    tpu.vector_store %arg17[%c11, %c0_3], %2 {strides = array<i32>} : memref<200x3xf32, #tpu.memory_space<vmem>>, vector<8x3xf32>,
    %c8 = arith.constant 8 : index
    %c0_4 = arith.constant 0 : index
    %4 = vector.load %arg1[%c8, %c0_4] : memref<128x3xf32, #tpu.memory_space<vmem>>, vector<8x3xf32>
    %c21 = arith.constant 21 : index
    %c0_5 = arith.constant 0 : index
    %5 = vector.load %arg17[%c21, %c0_5] : memref<200x3xf32, #tpu.memory_space<vmem>>, vector<8x3xf32>
    tpu.vector_store %arg17[%c21, %c0_5], %4 {strides = array<i32>} : memref<200x3xf32, #tpu.memory_space<vmem>>, vector<8x3xf32>,
    %c16 = arith.constant 16 : index
    %c0_6 = arith.constant 0 : index
    %6 = vector.load %arg1[%c16, %c0_6] : memref<128x3xf32, #tpu.memory_space<vmem>>, vector<8x3xf32>
    %c31 = arith.constant 31 : index
    %c0_7 = arith.constant 0 : index
    %7 = vector.load %arg17[%c31, %c0_7] : memref<200x3xf32, #tpu.memory_space<vmem>>, vector<8x3xf32>
    tpu.vector_store %arg17[%c31, %c0_7], %6 {strides = array<i32>} : memref<200x3xf32, #tpu.memory_space<vmem>>, vector<8x3xf32>,
    %c24 = arith.constant 24 : index
    %c0_8 = arith.constant 0 : index
    %8 = vector.load %arg1[%c24, %c0_8] : memref<128x3xf32, #tpu.memory_space<vmem>>, vector<8x3xf32>
    %c41 = arith.constant 41 : index
    %c0_9 = arith.constant 0 : index
    %9 = vector.load %arg17[%c41, %c0_9] : memref<200x3xf32, #tpu.memory_space<vmem>>, vector<8x3xf32>
    tpu.vector_store %arg17[%c41, %c0_9], %8 {strides = array<i32>} : memref<200x3xf32, #tpu.memory_space<vmem>>, vector<8x3xf32>,
    %c32 = arith.constant 32 : index
    %c0_10 = arith.constant 0 : index
    %10 = vector.load %arg1[%c32, %c0_10] : memref<128x3xf32, #tpu.memory_space<vmem>>, vector<8x3xf32>
    %c51 = arith.constant 51 : index
    %c0_11 = arith.constant 0 : index
    %11 = vector.load %arg17[%c51, %c0_11] : memref<200x3xf32, #tpu.memory_space<vmem>>, vector<8x3xf32>
    tpu.vector_store %arg17[%c51, %c0_11], %10 {strides = array<i32>} : memref<200x3xf32, #tpu.memory_space<vmem>>, vector<8x3xf32>,
    %c40 = arith.constant 40 : index
    %c0_12 = arith.constant 0 : index
    %12 = vector.load %arg1[%c40, %c0_12] : memref<128x3xf32, #tpu.memory_space<vmem>>, vector<8x3xf32>
    %c61 = arith.constant 61 : index
    %c0_13 = arith.constant 0 : index
    %13 = vector.load %arg17[%c61, %c0_13] : memref<200x3xf32, #tpu.memory_space<vmem>>, vector<8x3xf32>
    tpu.vector_store %arg17[%c61, %c0_13], %12 {strides = array<i32>} : memref<200x3xf32, #tpu.memory_space<vmem>>, vector<8x3xf32>,
    %c48 = arith.constant 48 : index
    %c0_14 = arith.constant 0 : index
    %14 = vector.load %arg1[%c48, %c0_14] : memref<128x3xf32, #tpu.memory_space<vmem>>, vector<8x3xf32>
    %c71 = arith.constant 71 : index
    %c0_15 = arith.constant 0 : index
    %15 = vector.load %arg17[%c71, %c0_15] : memref<200x3xf32, #tpu.memory_space<vmem>>, vector<8x3xf32>
    tpu.vector_store %arg17[%c71, %c0_15], %14 {strides = array<i32>} : memref<200x3xf32, #tpu.memory_space<vmem>>, vector<8x3xf32>,
    %c56 = arith.constant 56 : index
    %c0_16 = arith.constant 0 : index
    %16 = vector.load %arg1[%c56, %c0_16] : memref<128x3xf32, #tpu.memory_space<vmem>>, vector<8x3xf32>
    %c81 = arith.constant 81 : index
    %c0_17 = arith.constant 0 : index
    %17 = vector.load %arg17[%c81, %c0_17] : memref<200x3xf32, #tpu.memory_space<vmem>>, vector<8x3xf32>
    tpu.vector_store %arg17[%c81, %c0_17], %16 {strides = array<i32>} : memref<200x3xf32, #tpu.memory_space<vmem>>, vector<8x3xf32>,
    %c64 = arith.constant 64 : index
    %c0_18 = arith.constant 0 : index
    %18 = vector.load %arg1[%c64, %c0_18] : memref<128x3xf32, #tpu.memory_space<vmem>>, vector<8x3xf32>
    %c111 = arith.constant 111 : index
    %c0_19 = arith.constant 0 : index
    %19 = vector.load %arg17[%c111, %c0_19] : memref<200x3xf32, #tpu.memory_space<vmem>>, vector<8x3xf32>
    tpu.vector_store %arg17[%c111, %c0_19], %18 {strides = array<i32>} : memref<200x3xf32, #tpu.memory_space<vmem>>, vector<8x3xf32>,
    %c72 = arith.constant 72 : index
    %c0_20 = arith.constant 0 : index
    %20 = vector.load %arg1[%c72, %c0_20] : memref<128x3xf32, #tpu.memory_space<vmem>>, vector<8x3xf32>
    %c121 = arith.constant 121 : index
    %c0_21 = arith.constant 0 : index
    %21 = vector.load %arg17[%c121, %c0_21] : memref<200x3xf32, #tpu.memory_space<vmem>>, vector<8x3xf32>
    tpu.vector_store %arg17[%c121, %c0_21], %20 {strides = array<i32>} : memref<200x3xf32, #tpu.memory_space<vmem>>, vector<8x3xf32>,
    %c80 = arith.constant 80 : index
    %c0_22 = arith.constant 0 : index
    %22 = vector.load %arg1[%c80, %c0_22] : memref<128x3xf32, #tpu.memory_space<vmem>>, vector<8x3xf32>
    %c131 = arith.constant 131 : index
    %c0_23 = arith.constant 0 : index
    %23 = vector.load %arg17[%c131, %c0_23] : memref<200x3xf32, #tpu.memory_space<vmem>>, vector<8x3xf32>
    tpu.vector_store %arg17[%c131, %c0_23], %22 {strides = array<i32>} : memref<200x3xf32, #tpu.memory_space<vmem>>, vector<8x3xf32>,
    %c88 = arith.constant 88 : index
    %c0_24 = arith.constant 0 : index
    %24 = vector.load %arg1[%c88, %c0_24] : memref<128x3xf32, #tpu.memory_space<vmem>>, vector<8x3xf32>
    %c141 = arith.constant 141 : index
    %c0_25 = arith.constant 0 : index
    %25 = vector.load %arg17[%c141, %c0_25] : memref<200x3xf32, #tpu.memory_space<vmem>>, vector<8x3xf32>
    tpu.vector_store %arg17[%c141, %c0_25], %24 {strides = array<i32>} : memref<200x3xf32, #tpu.memory_space<vmem>>, vector<8x3xf32>,
    %c96 = arith.constant 96 : index
    %c0_26 = arith.constant 0 : index
    %26 = vector.load %arg1[%c96, %c0_26] : memref<128x3xf32, #tpu.memory_space<vmem>>, vector<8x3xf32>
    %c151 = arith.constant 151 : index
    %c0_27 = arith.constant 0 : index
    %27 = vector.load %arg17[%c151, %c0_27] : memref<200x3xf32, #tpu.memory_space<vmem>>, vector<8x3xf32>
    tpu.vector_store %arg17[%c151, %c0_27], %26 {strides = array<i32>} : memref<200x3xf32, #tpu.memory_space<vmem>>, vector<8x3xf32>,
    %c104 = arith.constant 104 : index
    %c0_28 = arith.constant 0 : index
    %28 = vector.load %arg1[%c104, %c0_28] : memref<128x3xf32, #tpu.memory_space<vmem>>, vector<8x3xf32>
    %c161 = arith.constant 161 : index
    %c0_29 = arith.constant 0 : index
    %29 = vector.load %arg17[%c161, %c0_29] : memref<200x3xf32, #tpu.memory_space<vmem>>, vector<8x3xf32>
    tpu.vector_store %arg17[%c161, %c0_29], %28 {strides = array<i32>} : memref<200x3xf32, #tpu.memory_space<vmem>>, vector<8x3xf32>,
    %c112 = arith.constant 112 : index
    %c0_30 = arith.constant 0 : index
    %30 = vector.load %arg1[%c112, %c0_30] : memref<128x3xf32, #tpu.memory_space<vmem>>, vector<8x3xf32>
    %c171 = arith.constant 171 : index
    %c0_31 = arith.constant 0 : index
    %31 = vector.load %arg17[%c171, %c0_31] : memref<200x3xf32, #tpu.memory_space<vmem>>, vector<8x3xf32>
    tpu.vector_store %arg17[%c171, %c0_31], %30 {strides = array<i32>} : memref<200x3xf32, #tpu.memory_space<vmem>>, vector<8x3xf32>,
    %c120 = arith.constant 120 : index
    %c0_32 = arith.constant 0 : index
    %32 = vector.load %arg1[%c120, %c0_32] : memref<128x3xf32, #tpu.memory_space<vmem>>, vector<8x3xf32>
    %c181 = arith.constant 181 : index
    %c0_33 = arith.constant 0 : index
    %33 = vector.load %arg17[%c181, %c0_33] : memref<200x3xf32, #tpu.memory_space<vmem>>, vector<8x3xf32>
    tpu.vector_store %arg17[%c181, %c0_33], %32 {strides = array<i32>} : memref<200x3xf32, #tpu.memory_space<vmem>>, vector<8x3xf32>,
    %cst_34 = arith.constant 0.000000e+00 : f32
    %34 = vector.broadcast %cst_34 : f32 to vector<178x16xf32>
    %c0_35 = arith.constant 0 : index
    %c0_36 = arith.constant 0 : index
    %35 = vector.load %arg17[%c0_35, %c0_36] : memref<200x3xf32, #tpu.memory_space<vmem>>, vector<178x3xf32>
    %36 = arith.truncf %35 : vector<178x3xf32> to vector<178x3xbf16>
    %c0_37 = arith.constant 0 : index
    %c0_38 = arith.constant 0 : index
    %c0_39 = arith.constant 0 : index
    %c0_40 = arith.constant 0 : index
    %37 = vector.load %arg2[%c0_37, %c0_38, %c0_39, %c0_40] : memref<3x3x3x16xbf16, #tpu.memory_space<vmem>>, vector<1x1x3x16xbf16>
    %38 = vector.shape_cast %37 : vector<1x1x3x16xbf16> to vector<3x16xbf16>
    %cst_41 = arith.constant dense<0.000000e+00> : vector<178x16xf32>
    %39 = tpu.matmul %36, %38, %cst_41 {dimension_numbers = #tpu.dot_dimension_numbers<[1], [0], [0], [1], [0, 0, 1, 1], [], []>} : vector<178x3xbf16>, vector<3x16xbf16>, vector<178x16xf32> -> vector<178x16xf32>
    %40 = arith.addf %34, %39 : vector<178x16xf32>
    %c1 = arith.constant 1 : index
    %c0_42 = arith.constant 0 : index
    %41 = vector.load %arg17[%c1, %c0_42] : memref<200x3xf32, #tpu.memory_space<vmem>>, vector<178x3xf32>
    %42 = arith.truncf %41 : vector<178x3xf32> to vector<178x3xbf16>
    %c0_43 = arith.constant 0 : index
    %c1_44 = arith.constant 1 : index
    %c0_45 = arith.constant 0 : index
    %c0_46 = arith.constant 0 : index
    %43 = vector.load %arg2[%c0_43, %c1_44, %c0_45, %c0_46] : memref<3x3x3x16xbf16, #tpu.memory_space<vmem>>, vector<1x1x3x16xbf16>
    %44 = vector.shape_cast %43 : vector<1x1x3x16xbf16> to vector<3x16xbf16>
    %cst_47 = arith.constant dense<0.000000e+00> : vector<178x16xf32>
    %45 = tpu.matmul %42, %44, %cst_47 {dimension_numbers = #tpu.dot_dimension_numbers<[1], [0], [0], [1], [0, 0, 1, 1], [], []>} : vector<178x3xbf16>, vector<3x16xbf16>, vector<178x16xf32> -> vector<178x16xf32>
    %46 = arith.addf %40, %45 : vector<178x16xf32>
    %c2 = arith.constant 2 : index
    %c0_48 = arith.constant 0 : index
    %47 = vector.load %arg17[%c2, %c0_48] : memref<200x3xf32, #tpu.memory_space<vmem>>, vector<178x3xf32>
    %48 = arith.truncf %47 : vector<178x3xf32> to vector<178x3xbf16>
    %c0_49 = arith.constant 0 : index
    %c2_50 = arith.constant 2 : index
    %c0_51 = arith.constant 0 : index
    %c0_52 = arith.constant 0 : index
    %49 = vector.load %arg2[%c0_49, %c2_50, %c0_51, %c0_52] : memref<3x3x3x16xbf16, #tpu.memory_space<vmem>>, vector<1x1x3x16xbf16>
    %50 = vector.shape_cast %49 : vector<1x1x3x16xbf16> to vector<3x16xbf16>
    %cst_53 = arith.constant dense<0.000000e+00> : vector<178x16xf32>
    %51 = tpu.matmul %48, %50, %cst_53 {dimension_numbers = #tpu.dot_dimension_numbers<[1], [0], [0], [1], [0, 0, 1, 1], [], []>} : vector<178x3xbf16>, vector<3x16xbf16>, vector<178x16xf32> -> vector<178x16xf32>
    %52 = arith.addf %46, %51 : vector<178x16xf32>
    %c10 = arith.constant 10 : index
    %c0_54 = arith.constant 0 : index
    %53 = vector.load %arg17[%c10, %c0_54] : memref<200x3xf32, #tpu.memory_space<vmem>>, vector<178x3xf32>
    %54 = arith.truncf %53 : vector<178x3xf32> to vector<178x3xbf16>
    %c1_55 = arith.constant 1 : index
    %c0_56 = arith.constant 0 : index
    %c0_57 = arith.constant 0 : index
    %c0_58 = arith.constant 0 : index
    %55 = vector.load %arg2[%c1_55, %c0_56, %c0_57, %c0_58] : memref<3x3x3x16xbf16, #tpu.memory_space<vmem>>, vector<1x1x3x16xbf16>
    %56 = vector.shape_cast %55 : vector<1x1x3x16xbf16> to vector<3x16xbf16>
    %cst_59 = arith.constant dense<0.000000e+00> : vector<178x16xf32>
    %57 = tpu.matmul %54, %56, %cst_59 {dimension_numbers = #tpu.dot_dimension_numbers<[1], [0], [0], [1], [0, 0, 1, 1], [], []>} : vector<178x3xbf16>, vector<3x16xbf16>, vector<178x16xf32> -> vector<178x16xf32>
    %58 = arith.addf %52, %57 : vector<178x16xf32>
    %c11_60 = arith.constant 11 : index
    %c0_61 = arith.constant 0 : index
    %59 = vector.load %arg17[%c11_60, %c0_61] : memref<200x3xf32, #tpu.memory_space<vmem>>, vector<178x3xf32>
    %60 = arith.truncf %59 : vector<178x3xf32> to vector<178x3xbf16>
    %c1_62 = arith.constant 1 : index
    %c1_63 = arith.constant 1 : index
    %c0_64 = arith.constant 0 : index
    %c0_65 = arith.constant 0 : index
    %61 = vector.load %arg2[%c1_62, %c1_63, %c0_64, %c0_65] : memref<3x3x3x16xbf16, #tpu.memory_space<vmem>>, vector<1x1x3x16xbf16>
    %62 = vector.shape_cast %61 : vector<1x1x3x16xbf16> to vector<3x16xbf16>
    %cst_66 = arith.constant dense<0.000000e+00> : vector<178x16xf32>
    %63 = tpu.matmul %60, %62, %cst_66 {dimension_numbers = #tpu.dot_dimension_numbers<[1], [0], [0], [1], [0, 0, 1, 1], [], []>} : vector<178x3xbf16>, vector<3x16xbf16>, vector<178x16xf32> -> vector<178x16xf32>
    %64 = arith.addf %58, %63 : vector<178x16xf32>
    %c12 = arith.constant 12 : index
    %c0_67 = arith.constant 0 : index
    %65 = vector.load %arg17[%c12, %c0_67] : memref<200x3xf32, #tpu.memory_space<vmem>>, vector<178x3xf32>
    %66 = arith.truncf %65 : vector<178x3xf32> to vector<178x3xbf16>
    %c1_68 = arith.constant 1 : index
    %c2_69 = arith.constant 2 : index
    %c0_70 = arith.constant 0 : index
    %c0_71 = arith.constant 0 : index
    %67 = vector.load %arg2[%c1_68, %c2_69, %c0_70, %c0_71] : memref<3x3x3x16xbf16, #tpu.memory_space<vmem>>, vector<1x1x3x16xbf16>
    %68 = vector.shape_cast %67 : vector<1x1x3x16xbf16> to vector<3x16xbf16>
    %cst_72 = arith.constant dense<0.000000e+00> : vector<178x16xf32>
    %69 = tpu.matmul %66, %68, %cst_72 {dimension_numbers = #tpu.dot_dimension_numbers<[1], [0], [0], [1], [0, 0, 1, 1], [], []>} : vector<178x3xbf16>, vector<3x16xbf16>, vector<178x16xf32> -> vector<178x16xf32>
    %70 = arith.addf %64, %69 : vector<178x16xf32>
    %c20 = arith.constant 20 : index
    %c0_73 = arith.constant 0 : index
    %71 = vector.load %arg17[%c20, %c0_73] : memref<200x3xf32, #tpu.memory_space<vmem>>, vector<178x3xf32>
    %72 = arith.truncf %71 : vector<178x3xf32> to vector<178x3xbf16>
    %c2_74 = arith.constant 2 : index
    %c0_75 = arith.constant 0 : index
    %c0_76 = arith.constant 0 : index
    %c0_77 = arith.constant 0 : index
    %73 = vector.load %arg2[%c2_74, %c0_75, %c0_76, %c0_77] : memref<3x3x3x16xbf16, #tpu.memory_space<vmem>>, vector<1x1x3x16xbf16>
    %74 = vector.shape_cast %73 : vector<1x1x3x16xbf16> to vector<3x16xbf16>
    %cst_78 = arith.constant dense<0.000000e+00> : vector<178x16xf32>
    %75 = tpu.matmul %72, %74, %cst_78 {dimension_numbers = #tpu.dot_dimension_numbers<[1], [0], [0], [1], [0, 0, 1, 1], [], []>} : vector<178x3xbf16>, vector<3x16xbf16>, vector<178x16xf32> -> vector<178x16xf32>
    %76 = arith.addf %70, %75 : vector<178x16xf32>
    %c21_79 = arith.constant 21 : index
    %c0_80 = arith.constant 0 : index
    %77 = vector.load %arg17[%c21_79, %c0_80] : memref<200x3xf32, #tpu.memory_space<vmem>>, vector<178x3xf32>
    %78 = arith.truncf %77 : vector<178x3xf32> to vector<178x3xbf16>
    %c2_81 = arith.constant 2 : index
    %c1_82 = arith.constant 1 : index
    %c0_83 = arith.constant 0 : index
    %c0_84 = arith.constant 0 : index
    %79 = vector.load %arg2[%c2_81, %c1_82, %c0_83, %c0_84] : memref<3x3x3x16xbf16, #tpu.memory_space<vmem>>, vector<1x1x3x16xbf16>
    %80 = vector.shape_cast %79 : vector<1x1x3x16xbf16> to vector<3x16xbf16>
    %cst_85 = arith.constant dense<0.000000e+00> : vector<178x16xf32>
    %81 = tpu.matmul %78, %80, %cst_85 {dimension_numbers = #tpu.dot_dimension_numbers<[1], [0], [0], [1], [0, 0, 1, 1], [], []>} : vector<178x3xbf16>, vector<3x16xbf16>, vector<178x16xf32> -> vector<178x16xf32>
    %82 = arith.addf %76, %81 : vector<178x16xf32>
    %c22 = arith.constant 22 : index
    %c0_86 = arith.constant 0 : index
    %83 = vector.load %arg17[%c22, %c0_86] : memref<200x3xf32, #tpu.memory_space<vmem>>, vector<178x3xf32>
    %84 = arith.truncf %83 : vector<178x3xf32> to vector<178x3xbf16>
    %c2_87 = arith.constant 2 : index
    %c2_88 = arith.constant 2 : index
    %c0_89 = arith.constant 0 : index
    %c0_90 = arith.constant 0 : index
    %85 = vector.load %arg2[%c2_87, %c2_88, %c0_89, %c0_90] : memref<3x3x3x16xbf16, #tpu.memory_space<vmem>>, vector<1x1x3x16xbf16>
    %86 = vector.shape_cast %85 : vector<1x1x3x16xbf16> to vector<3x16xbf16>
    %cst_91 = arith.constant dense<0.000000e+00> : vector<178x16xf32>
    %87 = tpu.matmul %84, %86, %cst_91 {dimension_numbers = #tpu.dot_dimension_numbers<[1], [0], [0], [1], [0, 0, 1, 1], [], []>} : vector<178x3xbf16>, vector<3x16xbf16>, vector<178x16xf32> -> vector<178x16xf32>
    %88 = arith.addf %82, %87 : vector<178x16xf32>
    %c0_92 = arith.constant 0 : index
    %c0_93 = arith.constant 0 : index
    %89 = vector.load %arg18[%c0_92, %c0_93] : memref<178x16xf32, #tpu.memory_space<vmem>>, vector<178x16xf32>
    tpu.vector_store %arg18[%c0_92, %c0_93], %88 {strides = array<i32>} : memref<178x16xf32, #tpu.memory_space<vmem>>, vector<178x16xf32>,
    %c0_94 = arith.constant 0 : index
    %c0_95 = arith.constant 0 : index
    %90 = vector.load %arg18[%c0_94, %c0_95] : memref<178x16xf32, #tpu.memory_space<vmem>>, vector<8x16xf32>
    %c0_96 = arith.constant 0 : index
    %c0_97 = arith.constant 0 : index
    %91 = vector.load %arg19[%c0_96, %c0_97] : memref<128x16xf32, #tpu.memory_space<vmem>>, vector<8x16xf32>
    tpu.vector_store %arg19[%c0_96, %c0_97], %90 {strides = array<i32>} : memref<128x16xf32, #tpu.memory_space<vmem>>, vector<8x16xf32>,
    %c10_98 = arith.constant 10 : index
    %c0_99 = arith.constant 0 : index
    %92 = vector.load %arg18[%c10_98, %c0_99] : memref<178x16xf32, #tpu.memory_space<vmem>>, vector<8x16xf32>
    %c8_100 = arith.constant 8 : index
    %c0_101 = arith.constant 0 : index
    %93 = vector.load %arg19[%c8_100, %c0_101] : memref<128x16xf32, #tpu.memory_space<vmem>>, vector<8x16xf32>
    tpu.vector_store %arg19[%c8_100, %c0_101], %92 {strides = array<i32>} : memref<128x16xf32, #tpu.memory_space<vmem>>, vector<8x16xf32>,
    %c20_102 = arith.constant 20 : index
    %c0_103 = arith.constant 0 : index
    %94 = vector.load %arg18[%c20_102, %c0_103] : memref<178x16xf32, #tpu.memory_space<vmem>>, vector<8x16xf32>
    %c16_104 = arith.constant 16 : index
    %c0_105 = arith.constant 0 : index
    %95 = vector.load %arg19[%c16_104, %c0_105] : memref<128x16xf32, #tpu.memory_space<vmem>>, vector<8x16xf32>
    tpu.vector_store %arg19[%c16_104, %c0_105], %94 {strides = array<i32>} : memref<128x16xf32, #tpu.memory_space<vmem>>, vector<8x16xf32>,
    %c30 = arith.constant 30 : index
    %c0_106 = arith.constant 0 : index
    %96 = vector.load %arg18[%c30, %c0_106] : memref<178x16xf32, #tpu.memory_space<vmem>>, vector<8x16xf32>
    %c24_107 = arith.constant 24 : index
    %c0_108 = arith.constant 0 : index
    %97 = vector.load %arg19[%c24_107, %c0_108] : memref<128x16xf32, #tpu.memory_space<vmem>>, vector<8x16xf32>
    tpu.vector_store %arg19[%c24_107, %c0_108], %96 {strides = array<i32>} : memref<128x16xf32, #tpu.memory_space<vmem>>, vector<8x16xf32>,
    %c40_109 = arith.constant 40 : index
    %c0_110 = arith.constant 0 : index
    %98 = vector.load %arg18[%c40_109, %c0_110] : memref<178x16xf32, #tpu.memory_space<vmem>>, vector<8x16xf32>
    %c32_111 = arith.constant 32 : index
    %c0_112 = arith.constant 0 : index
    %99 = vector.load %arg19[%c32_111, %c0_112] : memref<128x16xf32, #tpu.memory_space<vmem>>, vector<8x16xf32>
    tpu.vector_store %arg19[%c32_111, %c0_112], %98 {strides = array<i32>} : memref<128x16xf32, #tpu.memory_space<vmem>>, vector<8x16xf32>,
    %c50 = arith.constant 50 : index
    %c0_113 = arith.constant 0 : index
    %100 = vector.load %arg18[%c50, %c0_113] : memref<178x16xf32, #tpu.memory_space<vmem>>, vector<8x16xf32>
    %c40_114 = arith.constant 40 : index
    %c0_115 = arith.constant 0 : index
    %101 = vector.load %arg19[%c40_114, %c0_115] : memref<128x16xf32, #tpu.memory_space<vmem>>, vector<8x16xf32>
    tpu.vector_store %arg19[%c40_114, %c0_115], %100 {strides = array<i32>} : memref<128x16xf32, #tpu.memory_space<vmem>>, vector<8x16xf32>,
    %c60 = arith.constant 60 : index
    %c0_116 = arith.constant 0 : index
    %102 = vector.load %arg18[%c60, %c0_116] : memref<178x16xf32, #tpu.memory_space<vmem>>, vector<8x16xf32>
    %c48_117 = arith.constant 48 : index
    %c0_118 = arith.constant 0 : index
    %103 = vector.load %arg19[%c48_117, %c0_118] : memref<128x16xf32, #tpu.memory_space<vmem>>, vector<8x16xf32>
    tpu.vector_store %arg19[%c48_117, %c0_118], %102 {strides = array<i32>} : memref<128x16xf32, #tpu.memory_space<vmem>>, vector<8x16xf32>,
    %c70 = arith.constant 70 : index
    %c0_119 = arith.constant 0 : index
    %104 = vector.load %arg18[%c70, %c0_119] : memref<178x16xf32, #tpu.memory_space<vmem>>, vector<8x16xf32>
    %c56_120 = arith.constant 56 : index
    %c0_121 = arith.constant 0 : index
    %105 = vector.load %arg19[%c56_120, %c0_121] : memref<128x16xf32, #tpu.memory_space<vmem>>, vector<8x16xf32>
    tpu.vector_store %arg19[%c56_120, %c0_121], %104 {strides = array<i32>} : memref<128x16xf32, #tpu.memory_space<vmem>>, vector<8x16xf32>,
    %c100 = arith.constant 100 : index
    %c0_122 = arith.constant 0 : index
    %106 = vector.load %arg18[%c100, %c0_122] : memref<178x16xf32, #tpu.memory_space<vmem>>, vector<8x16xf32>
    %c64_123 = arith.constant 64 : index
    %c0_124 = arith.constant 0 : index
    %107 = vector.load %arg19[%c64_123, %c0_124] : memref<128x16xf32, #tpu.memory_space<vmem>>, vector<8x16xf32>
    tpu.vector_store %arg19[%c64_123, %c0_124], %106 {strides = array<i32>} : memref<128x16xf32, #tpu.memory_space<vmem>>, vector<8x16xf32>,
    %c110 = arith.constant 110 : index
    %c0_125 = arith.constant 0 : index
    %108 = vector.load %arg18[%c110, %c0_125] : memref<178x16xf32, #tpu.memory_space<vmem>>, vector<8x16xf32>
    %c72_126 = arith.constant 72 : index
    %c0_127 = arith.constant 0 : index
    %109 = vector.load %arg19[%c72_126, %c0_127] : memref<128x16xf32, #tpu.memory_space<vmem>>, vector<8x16xf32>
    tpu.vector_store %arg19[%c72_126, %c0_127], %108 {strides = array<i32>} : memref<128x16xf32, #tpu.memory_space<vmem>>, vector<8x16xf32>,
    %c120_128 = arith.constant 120 : index
    %c0_129 = arith.constant 0 : index
    %110 = vector.load %arg18[%c120_128, %c0_129] : memref<178x16xf32, #tpu.memory_space<vmem>>, vector<8x16xf32>
    %c80_130 = arith.constant 80 : index
    %c0_131 = arith.constant 0 : index
    %111 = vector.load %arg19[%c80_130, %c0_131] : memref<128x16xf32, #tpu.memory_space<vmem>>, vector<8x16xf32>
    tpu.vector_store %arg19[%c80_130, %c0_131], %110 {strides = array<i32>} : memref<128x16xf32, #tpu.memory_space<vmem>>, vector<8x16xf32>,
    %c130 = arith.constant 130 : index
    %c0_132 = arith.constant 0 : index
    %112 = vector.load %arg18[%c130, %c0_132] : memref<178x16xf32, #tpu.memory_space<vmem>>, vector<8x16xf32>
    %c88_133 = arith.constant 88 : index
    %c0_134 = arith.constant 0 : index
    %113 = vector.load %arg19[%c88_133, %c0_134] : memref<128x16xf32, #tpu.memory_space<vmem>>, vector<8x16xf32>
    tpu.vector_store %arg19[%c88_133, %c0_134], %112 {strides = array<i32>} : memref<128x16xf32, #tpu.memory_space<vmem>>, vector<8x16xf32>,
    %c140 = arith.constant 140 : index
    %c0_135 = arith.constant 0 : index
    %114 = vector.load %arg18[%c140, %c0_135] : memref<178x16xf32, #tpu.memory_space<vmem>>, vector<8x16xf32>
    %c96_136 = arith.constant 96 : index
    %c0_137 = arith.constant 0 : index
    %115 = vector.load %arg19[%c96_136, %c0_137] : memref<128x16xf32, #tpu.memory_space<vmem>>, vector<8x16xf32>
    tpu.vector_store %arg19[%c96_136, %c0_137], %114 {strides = array<i32>} : memref<128x16xf32, #tpu.memory_space<vmem>>, vector<8x16xf32>,
    %c150 = arith.constant 150 : index
    %c0_138 = arith.constant 0 : index
    %116 = vector.load %arg18[%c150, %c0_138] : memref<178x16xf32, #tpu.memory_space<vmem>>, vector<8x16xf32>
    %c104_139 = arith.constant 104 : index
    %c0_140 = arith.constant 0 : index
    %117 = vector.load %arg19[%c104_139, %c0_140] : memref<128x16xf32, #tpu.memory_space<vmem>>, vector<8x16xf32>
    tpu.vector_store %arg19[%c104_139, %c0_140], %116 {strides = array<i32>} : memref<128x16xf32, #tpu.memory_space<vmem>>, vector<8x16xf32>,
    %c160 = arith.constant 160 : index
    %c0_141 = arith.constant 0 : index
    %118 = vector.load %arg18[%c160, %c0_141] : memref<178x16xf32, #tpu.memory_space<vmem>>, vector<8x16xf32>
    %c112_142 = arith.constant 112 : index
    %c0_143 = arith.constant 0 : index
    %119 = vector.load %arg19[%c112_142, %c0_143] : memref<128x16xf32, #tpu.memory_space<vmem>>, vector<8x16xf32>
    tpu.vector_store %arg19[%c112_142, %c0_143], %118 {strides = array<i32>} : memref<128x16xf32, #tpu.memory_space<vmem>>, vector<8x16xf32>,
    %c170 = arith.constant 170 : index
    %c0_144 = arith.constant 0 : index
    %120 = vector.load %arg18[%c170, %c0_144] : memref<178x16xf32, #tpu.memory_space<vmem>>, vector<8x16xf32>
    %c120_145 = arith.constant 120 : index
    %c0_146 = arith.constant 0 : index
    %121 = vector.load %arg19[%c120_145, %c0_146] : memref<128x16xf32, #tpu.memory_space<vmem>>, vector<8x16xf32>
    tpu.vector_store %arg19[%c120_145, %c0_146], %120 {strides = array<i32>} : memref<128x16xf32, #tpu.memory_space<vmem>>, vector<8x16xf32>,
    %c0_147 = arith.constant 0 : index
    %c0_148 = arith.constant 0 : index
    %122 = vector.load %arg19[%c0_147, %c0_148] : memref<128x16xf32, #tpu.memory_space<vmem>>, vector<128x16xf32>
    %cst_149 = arith.constant dense<0.000000e+00> : vector<16xf32>
    %123 = vector.multi_reduction <add>, %122, %cst_149 [0] : vector<128x16xf32> to vector<16xf32>
    %124 = vector.shape_cast %123 : vector<16xf32> to vector<1x16xf32>
    %cst_150 = arith.constant 1.280000e+02 : f32
    %125 = vector.broadcast %cst_150 : f32 to vector<1x16xf32>
    %126 = arith.divf %124, %125 : vector<1x16xf32>
    %127 = vector.broadcast %126 : vector<1x16xf32> to vector<128x16xf32>
    %128 = arith.subf %122, %127 : vector<128x16xf32>
    %129 = arith.mulf %128, %128 : vector<128x16xf32>
    %cst_151 = arith.constant dense<0.000000e+00> : vector<16xf32>
    %130 = vector.multi_reduction <add>, %129, %cst_151 [0] : vector<128x16xf32> to vector<16xf32>
    %131 = vector.shape_cast %130 : vector<16xf32> to vector<1x16xf32>
    %cst_152 = arith.constant 1.280000e+02 : f32
    %132 = vector.broadcast %cst_152 : f32 to vector<1x16xf32>
    %133 = arith.divf %131, %132 : vector<1x16xf32>
    %134 = vector.broadcast %126 : vector<1x16xf32> to vector<128x16xf32>
    %135 = arith.subf %122, %134 : vector<128x16xf32>
    %cst_153 = arith.constant 9.99999974E-6 : f32
    %136 = vector.broadcast %cst_153 : f32 to vector<1x16xf32>
    %137 = arith.addf %133, %136 : vector<1x16xf32>
    %138 = math.rsqrt %137 : vector<1x16xf32>
    %139 = vector.broadcast %138 : vector<1x16xf32> to vector<128x16xf32>
    %140 = arith.mulf %135, %139 : vector<128x16xf32>
    %c0_154 = arith.constant 0 : index
    %c0_155 = arith.constant 0 : index
    %141 = vector.load %arg3[%c0_154, %c0_155] : memref<1x16xf32, #tpu.memory_space<vmem>>, vector<1x16xf32>
    %142 = vector.broadcast %141 : vector<1x16xf32> to vector<128x16xf32>
    %143 = arith.mulf %140, %142 : vector<128x16xf32>
    %c0_156 = arith.constant 0 : index
    %c0_157 = arith.constant 0 : index
    %144 = vector.load %arg4[%c0_156, %c0_157] : memref<1x16xf32, #tpu.memory_space<vmem>>, vector<1x16xf32>
    %145 = vector.broadcast %144 : vector<1x16xf32> to vector<128x16xf32>
    %146 = arith.addf %143, %145 : vector<128x16xf32>
    %cst_158 = arith.constant 0.000000e+00 : f32
    %147 = vector.broadcast %cst_158 : f32 to vector<128x16xf32>
    %148 = arith.maximumf %146, %147 : vector<128x16xf32>
    %c0_159 = arith.constant 0 : index
    %c0_160 = arith.constant 0 : index
    %149 = vector.load %arg19[%c0_159, %c0_160] : memref<128x16xf32, #tpu.memory_space<vmem>>, vector<128x16xf32>
    tpu.vector_store %arg19[%c0_159, %c0_160], %148 {strides = array<i32>} : memref<128x16xf32, #tpu.memory_space<vmem>>, vector<128x16xf32>,
    %cst_161 = arith.constant 0.000000e+00 : f32
    %150 = vector.broadcast %cst_161 : f32 to vector<200x16xf32>
    %c0_162 = arith.constant 0 : index
    %c0_163 = arith.constant 0 : index
    %151 = vector.load %arg20[%c0_162, %c0_163] : memref<200x16xf32, #tpu.memory_space<vmem>>, vector<200x16xf32>
    tpu.vector_store %arg20[%c0_162, %c0_163], %150 {strides = array<i32>} : memref<200x16xf32, #tpu.memory_space<vmem>>, vector<200x16xf32>,
    %c0_164 = arith.constant 0 : index
    %c0_165 = arith.constant 0 : index
    %152 = vector.load %arg19[%c0_164, %c0_165] : memref<128x16xf32, #tpu.memory_space<vmem>>, vector<8x16xf32>
    %c11_166 = arith.constant 11 : index
    %c0_167 = arith.constant 0 : index
    %153 = vector.load %arg20[%c11_166, %c0_167] : memref<200x16xf32, #tpu.memory_space<vmem>>, vector<8x16xf32>
    tpu.vector_store %arg20[%c11_166, %c0_167], %152 {strides = array<i32>} : memref<200x16xf32, #tpu.memory_space<vmem>>, vector<8x16xf32>,
    %c8_168 = arith.constant 8 : index
    %c0_169 = arith.constant 0 : index
    %154 = vector.load %arg19[%c8_168, %c0_169] : memref<128x16xf32, #tpu.memory_space<vmem>>, vector<8x16xf32>
    %c21_170 = arith.constant 21 : index
    %c0_171 = arith.constant 0 : index
    %155 = vector.load %arg20[%c21_170, %c0_171] : memref<200x16xf32, #tpu.memory_space<vmem>>, vector<8x16xf32>
    tpu.vector_store %arg20[%c21_170, %c0_171], %154 {strides = array<i32>} : memref<200x16xf32, #tpu.memory_space<vmem>>, vector<8x16xf32>,
    %c16_172 = arith.constant 16 : index
    %c0_173 = arith.constant 0 : index
    %156 = vector.load %arg19[%c16_172, %c0_173] : memref<128x16xf32, #tpu.memory_space<vmem>>, vector<8x16xf32>
    %c31_174 = arith.constant 31 : index
    %c0_175 = arith.constant 0 : index
    %157 = vector.load %arg20[%c31_174, %c0_175] : memref<200x16xf32, #tpu.memory_space<vmem>>, vector<8x16xf32>
    tpu.vector_store %arg20[%c31_174, %c0_175], %156 {strides = array<i32>} : memref<200x16xf32, #tpu.memory_space<vmem>>, vector<8x16xf32>,
    %c24_176 = arith.constant 24 : index
    %c0_177 = arith.constant 0 : index
    %158 = vector.load %arg19[%c24_176, %c0_177] : memref<128x16xf32, #tpu.memory_space<vmem>>, vector<8x16xf32>
    %c41_178 = arith.constant 41 : index
    %c0_179 = arith.constant 0 : index
    %159 = vector.load %arg20[%c41_178, %c0_179] : memref<200x16xf32, #tpu.memory_space<vmem>>, vector<8x16xf32>
    tpu.vector_store %arg20[%c41_178, %c0_179], %158 {strides = array<i32>} : memref<200x16xf32, #tpu.memory_space<vmem>>, vector<8x16xf32>,
    %c32_180 = arith.constant 32 : index
    %c0_181 = arith.constant 0 : index
    %160 = vector.load %arg19[%c32_180, %c0_181] : memref<128x16xf32, #tpu.memory_space<vmem>>, vector<8x16xf32>
    %c51_182 = arith.constant 51 : index
    %c0_183 = arith.constant 0 : index
    %161 = vector.load %arg20[%c51_182, %c0_183] : memref<200x16xf32, #tpu.memory_space<vmem>>, vector<8x16xf32>
    tpu.vector_store %arg20[%c51_182, %c0_183], %160 {strides = array<i32>} : memref<200x16xf32, #tpu.memory_space<vmem>>, vector<8x16xf32>,
    %c40_184 = arith.constant 40 : index
    %c0_185 = arith.constant 0 : index
    %162 = vector.load %arg19[%c40_184, %c0_185] : memref<128x16xf32, #tpu.memory_space<vmem>>, vector<8x16xf32>
    %c61_186 = arith.constant 61 : index
    %c0_187 = arith.constant 0 : index
    %163 = vector.load %arg20[%c61_186, %c0_187] : memref<200x16xf32, #tpu.memory_space<vmem>>, vector<8x16xf32>
    tpu.vector_store %arg20[%c61_186, %c0_187], %162 {strides = array<i32>} : memref<200x16xf32, #tpu.memory_space<vmem>>, vector<8x16xf32>,
    %c48_188 = arith.constant 48 : index
    %c0_189 = arith.constant 0 : index
    %164 = vector.load %arg19[%c48_188, %c0_189] : memref<128x16xf32, #tpu.memory_space<vmem>>, vector<8x16xf32>
    %c71_190 = arith.constant 71 : index
    %c0_191 = arith.constant 0 : index
    %165 = vector.load %arg20[%c71_190, %c0_191] : memref<200x16xf32, #tpu.memory_space<vmem>>, vector<8x16xf32>
    tpu.vector_store %arg20[%c71_190, %c0_191], %164 {strides = array<i32>} : memref<200x16xf32, #tpu.memory_space<vmem>>, vector<8x16xf32>,
    %c56_192 = arith.constant 56 : index
    %c0_193 = arith.constant 0 : index
    %166 = vector.load %arg19[%c56_192, %c0_193] : memref<128x16xf32, #tpu.memory_space<vmem>>, vector<8x16xf32>
    %c81_194 = arith.constant 81 : index
    %c0_195 = arith.constant 0 : index
    %167 = vector.load %arg20[%c81_194, %c0_195] : memref<200x16xf32, #tpu.memory_space<vmem>>, vector<8x16xf32>
    tpu.vector_store %arg20[%c81_194, %c0_195], %166 {strides = array<i32>} : memref<200x16xf32, #tpu.memory_space<vmem>>, vector<8x16xf32>,
    %c64_196 = arith.constant 64 : index
    %c0_197 = arith.constant 0 : index
    %168 = vector.load %arg19[%c64_196, %c0_197] : memref<128x16xf32, #tpu.memory_space<vmem>>, vector<8x16xf32>
    %c111_198 = arith.constant 111 : index
    %c0_199 = arith.constant 0 : index
    %169 = vector.load %arg20[%c111_198, %c0_199] : memref<200x16xf32, #tpu.memory_space<vmem>>, vector<8x16xf32>
    tpu.vector_store %arg20[%c111_198, %c0_199], %168 {strides = array<i32>} : memref<200x16xf32, #tpu.memory_space<vmem>>, vector<8x16xf32>,
    %c72_200 = arith.constant 72 : index
    %c0_201 = arith.constant 0 : index
    %170 = vector.load %arg19[%c72_200, %c0_201] : memref<128x16xf32, #tpu.memory_space<vmem>>, vector<8x16xf32>
    %c121_202 = arith.constant 121 : index
    %c0_203 = arith.constant 0 : index
    %171 = vector.load %arg20[%c121_202, %c0_203] : memref<200x16xf32, #tpu.memory_space<vmem>>, vector<8x16xf32>
    tpu.vector_store %arg20[%c121_202, %c0_203], %170 {strides = array<i32>} : memref<200x16xf32, #tpu.memory_space<vmem>>, vector<8x16xf32>,
    %c80_204 = arith.constant 80 : index
    %c0_205 = arith.constant 0 : index
    %172 = vector.load %arg19[%c80_204, %c0_205] : memref<128x16xf32, #tpu.memory_space<vmem>>, vector<8x16xf32>
    %c131_206 = arith.constant 131 : index
    %c0_207 = arith.constant 0 : index
    %173 = vector.load %arg20[%c131_206, %c0_207] : memref<200x16xf32, #tpu.memory_space<vmem>>, vector<8x16xf32>
    tpu.vector_store %arg20[%c131_206, %c0_207], %172 {strides = array<i32>} : memref<200x16xf32, #tpu.memory_space<vmem>>, vector<8x16xf32>,
    %c88_208 = arith.constant 88 : index
    %c0_209 = arith.constant 0 : index
    %174 = vector.load %arg19[%c88_208, %c0_209] : memref<128x16xf32, #tpu.memory_space<vmem>>, vector<8x16xf32>
    %c141_210 = arith.constant 141 : index
    %c0_211 = arith.constant 0 : index
    %175 = vector.load %arg20[%c141_210, %c0_211] : memref<200x16xf32, #tpu.memory_space<vmem>>, vector<8x16xf32>
    tpu.vector_store %arg20[%c141_210, %c0_211], %174 {strides = array<i32>} : memref<200x16xf32, #tpu.memory_space<vmem>>, vector<8x16xf32>,
    %c96_212 = arith.constant 96 : index
    %c0_213 = arith.constant 0 : index
    %176 = vector.load %arg19[%c96_212, %c0_213] : memref<128x16xf32, #tpu.memory_space<vmem>>, vector<8x16xf32>
    %c151_214 = arith.constant 151 : index
    %c0_215 = arith.constant 0 : index
    %177 = vector.load %arg20[%c151_214, %c0_215] : memref<200x16xf32, #tpu.memory_space<vmem>>, vector<8x16xf32>
    tpu.vector_store %arg20[%c151_214, %c0_215], %176 {strides = array<i32>} : memref<200x16xf32, #tpu.memory_space<vmem>>, vector<8x16xf32>,
    %c104_216 = arith.constant 104 : index
    %c0_217 = arith.constant 0 : index
    %178 = vector.load %arg19[%c104_216, %c0_217] : memref<128x16xf32, #tpu.memory_space<vmem>>, vector<8x16xf32>
    %c161_218 = arith.constant 161 : index
    %c0_219 = arith.constant 0 : index
    %179 = vector.load %arg20[%c161_218, %c0_219] : memref<200x16xf32, #tpu.memory_space<vmem>>, vector<8x16xf32>
    tpu.vector_store %arg20[%c161_218, %c0_219], %178 {strides = array<i32>} : memref<200x16xf32, #tpu.memory_space<vmem>>, vector<8x16xf32>,
    %c112_220 = arith.constant 112 : index
    %c0_221 = arith.constant 0 : index
    %180 = vector.load %arg19[%c112_220, %c0_221] : memref<128x16xf32, #tpu.memory_space<vmem>>, vector<8x16xf32>
    %c171_222 = arith.constant 171 : index
    %c0_223 = arith.constant 0 : index
    %181 = vector.load %arg20[%c171_222, %c0_223] : memref<200x16xf32, #tpu.memory_space<vmem>>, vector<8x16xf32>
    tpu.vector_store %arg20[%c171_222, %c0_223], %180 {strides = array<i32>} : memref<200x16xf32, #tpu.memory_space<vmem>>, vector<8x16xf32>,
    %c120_224 = arith.constant 120 : index
    %c0_225 = arith.constant 0 : index
    %182 = vector.load %arg19[%c120_224, %c0_225] : memref<128x16xf32, #tpu.memory_space<vmem>>, vector<8x16xf32>
    %c181_226 = arith.constant 181 : index
    %c0_227 = arith.constant 0 : index
    %183 = vector.load %arg20[%c181_226, %c0_227] : memref<200x16xf32, #tpu.memory_space<vmem>>, vector<8x16xf32>
    tpu.vector_store %arg20[%c181_226, %c0_227], %182 {strides = array<i32>} : memref<200x16xf32, #tpu.memory_space<vmem>>, vector<8x16xf32>,
    %cst_228 = arith.constant 0.000000e+00 : f32
    %184 = vector.broadcast %cst_228 : f32 to vector<178x16xf32>
    %c0_229 = arith.constant 0 : index
    %c0_230 = arith.constant 0 : index
    %185 = vector.load %arg20[%c0_229, %c0_230] : memref<200x16xf32, #tpu.memory_space<vmem>>, vector<178x16xf32>
    %186 = arith.truncf %185 : vector<178x16xf32> to vector<178x16xbf16>
    %c0_231 = arith.constant 0 : index
    %c0_232 = arith.constant 0 : index
    %c0_233 = arith.constant 0 : index
    %c0_234 = arith.constant 0 : index
    %187 = vector.load %arg5[%c0_231, %c0_232, %c0_233, %c0_234] : memref<3x3x16x16xbf16, #tpu.memory_space<vmem>>, vector<1x1x16x16xbf16>
    %188 = vector.shape_cast %187 : vector<1x1x16x16xbf16> to vector<16x16xbf16>
    %cst_235 = arith.constant dense<0.000000e+00> : vector<178x16xf32>
    %189 = tpu.matmul %186, %188, %cst_235 {dimension_numbers = #tpu.dot_dimension_numbers<[1], [0], [0], [1], [0, 0, 1, 1], [], []>} : vector<178x16xbf16>, vector<16x16xbf16>, vector<178x16xf32> -> vector<178x16xf32>
    %190 = arith.addf %184, %189 : vector<178x16xf32>
    %c1_236 = arith.constant 1 : index
    %c0_237 = arith.constant 0 : index
    %191 = vector.load %arg20[%c1_236, %c0_237] : memref<200x16xf32, #tpu.memory_space<vmem>>, vector<178x16xf32>
    %192 = arith.truncf %191 : vector<178x16xf32> to vector<178x16xbf16>
    %c0_238 = arith.constant 0 : index
    %c1_239 = arith.constant 1 : index
    %c0_240 = arith.constant 0 : index
    %c0_241 = arith.constant 0 : index
    %193 = vector.load %arg5[%c0_238, %c1_239, %c0_240, %c0_241] : memref<3x3x16x16xbf16, #tpu.memory_space<vmem>>, vector<1x1x16x16xbf16>
    %194 = vector.shape_cast %193 : vector<1x1x16x16xbf16> to vector<16x16xbf16>
    %cst_242 = arith.constant dense<0.000000e+00> : vector<178x16xf32>
    %195 = tpu.matmul %192, %194, %cst_242 {dimension_numbers = #tpu.dot_dimension_numbers<[1], [0], [0], [1], [0, 0, 1, 1], [], []>} : vector<178x16xbf16>, vector<16x16xbf16>, vector<178x16xf32> -> vector<178x16xf32>
    %196 = arith.addf %190, %195 : vector<178x16xf32>
    %c2_243 = arith.constant 2 : index
    %c0_244 = arith.constant 0 : index
    %197 = vector.load %arg20[%c2_243, %c0_244] : memref<200x16xf32, #tpu.memory_space<vmem>>, vector<178x16xf32>
    %198 = arith.truncf %197 : vector<178x16xf32> to vector<178x16xbf16>
    %c0_245 = arith.constant 0 : index
    %c2_246 = arith.constant 2 : index
    %c0_247 = arith.constant 0 : index
    %c0_248 = arith.constant 0 : index
    %199 = vector.load %arg5[%c0_245, %c2_246, %c0_247, %c0_248] : memref<3x3x16x16xbf16, #tpu.memory_space<vmem>>, vector<1x1x16x16xbf16>
    %200 = vector.shape_cast %199 : vector<1x1x16x16xbf16> to vector<16x16xbf16>
    %cst_249 = arith.constant dense<0.000000e+00> : vector<178x16xf32>
    %201 = tpu.matmul %198, %200, %cst_249 {dimension_numbers = #tpu.dot_dimension_numbers<[1], [0], [0], [1], [0, 0, 1, 1], [], []>} : vector<178x16xbf16>, vector<16x16xbf16>, vector<178x16xf32> -> vector<178x16xf32>
    %202 = arith.addf %196, %201 : vector<178x16xf32>
    %c10_250 = arith.constant 10 : index
    %c0_251 = arith.constant 0 : index
    %203 = vector.load %arg20[%c10_250, %c0_251] : memref<200x16xf32, #tpu.memory_space<vmem>>, vector<178x16xf32>
    %204 = arith.truncf %203 : vector<178x16xf32> to vector<178x16xbf16>
    %c1_252 = arith.constant 1 : index
    %c0_253 = arith.constant 0 : index
    %c0_254 = arith.constant 0 : index
    %c0_255 = arith.constant 0 : index
    %205 = vector.load %arg5[%c1_252, %c0_253, %c0_254, %c0_255] : memref<3x3x16x16xbf16, #tpu.memory_space<vmem>>, vector<1x1x16x16xbf16>
    %206 = vector.shape_cast %205 : vector<1x1x16x16xbf16> to vector<16x16xbf16>
    %cst_256 = arith.constant dense<0.000000e+00> : vector<178x16xf32>
    %207 = tpu.matmul %204, %206, %cst_256 {dimension_numbers = #tpu.dot_dimension_numbers<[1], [0], [0], [1], [0, 0, 1, 1], [], []>} : vector<178x16xbf16>, vector<16x16xbf16>, vector<178x16xf32> -> vector<178x16xf32>
    %208 = arith.addf %202, %207 : vector<178x16xf32>
    %c11_257 = arith.constant 11 : index
    %c0_258 = arith.constant 0 : index
    %209 = vector.load %arg20[%c11_257, %c0_258] : memref<200x16xf32, #tpu.memory_space<vmem>>, vector<178x16xf32>
    %210 = arith.truncf %209 : vector<178x16xf32> to vector<178x16xbf16>
    %c1_259 = arith.constant 1 : index
    %c1_260 = arith.constant 1 : index
    %c0_261 = arith.constant 0 : index
    %c0_262 = arith.constant 0 : index
    %211 = vector.load %arg5[%c1_259, %c1_260, %c0_261, %c0_262] : memref<3x3x16x16xbf16, #tpu.memory_space<vmem>>, vector<1x1x16x16xbf16>
    %212 = vector.shape_cast %211 : vector<1x1x16x16xbf16> to vector<16x16xbf16>
    %cst_263 = arith.constant dense<0.000000e+00> : vector<178x16xf32>
    %213 = tpu.matmul %210, %212, %cst_263 {dimension_numbers = #tpu.dot_dimension_numbers<[1], [0], [0], [1], [0, 0, 1, 1], [], []>} : vector<178x16xbf16>, vector<16x16xbf16>, vector<178x16xf32> -> vector<178x16xf32>
    %214 = arith.addf %208, %213 : vector<178x16xf32>
    %c12_264 = arith.constant 12 : index
    %c0_265 = arith.constant 0 : index
    %215 = vector.load %arg20[%c12_264, %c0_265] : memref<200x16xf32, #tpu.memory_space<vmem>>, vector<178x16xf32>
    %216 = arith.truncf %215 : vector<178x16xf32> to vector<178x16xbf16>
    %c1_266 = arith.constant 1 : index
    %c2_267 = arith.constant 2 : index
    %c0_268 = arith.constant 0 : index
    %c0_269 = arith.constant 0 : index
    %217 = vector.load %arg5[%c1_266, %c2_267, %c0_268, %c0_269] : memref<3x3x16x16xbf16, #tpu.memory_space<vmem>>, vector<1x1x16x16xbf16>
    %218 = vector.shape_cast %217 : vector<1x1x16x16xbf16> to vector<16x16xbf16>
    %cst_270 = arith.constant dense<0.000000e+00> : vector<178x16xf32>
    %219 = tpu.matmul %216, %218, %cst_270 {dimension_numbers = #tpu.dot_dimension_numbers<[1], [0], [0], [1], [0, 0, 1, 1], [], []>} : vector<178x16xbf16>, vector<16x16xbf16>, vector<178x16xf32> -> vector<178x16xf32>
    %220 = arith.addf %214, %219 : vector<178x16xf32>
    %c20_271 = arith.constant 20 : index
    %c0_272 = arith.constant 0 : index
    %221 = vector.load %arg20[%c20_271, %c0_272] : memref<200x16xf32, #tpu.memory_space<vmem>>, vector<178x16xf32>
    %222 = arith.truncf %221 : vector<178x16xf32> to vector<178x16xbf16>
    %c2_273 = arith.constant 2 : index
    %c0_274 = arith.constant 0 : index
    %c0_275 = arith.constant 0 : index
    %c0_276 = arith.constant 0 : index
    %223 = vector.load %arg5[%c2_273, %c0_274, %c0_275, %c0_276] : memref<3x3x16x16xbf16, #tpu.memory_space<vmem>>, vector<1x1x16x16xbf16>
    %224 = vector.shape_cast %223 : vector<1x1x16x16xbf16> to vector<16x16xbf16>
    %cst_277 = arith.constant dense<0.000000e+00> : vector<178x16xf32>
    %225 = tpu.matmul %222, %224, %cst_277 {dimension_numbers = #tpu.dot_dimension_numbers<[1], [0], [0], [1], [0, 0, 1, 1], [], []>} : vector<178x16xbf16>, vector<16x16xbf16>, vector<178x16xf32> -> vector<178x16xf32>
    %226 = arith.addf %220, %225 : vector<178x16xf32>
    %c21_278 = arith.constant 21 : index
    %c0_279 = arith.constant 0 : index
    %227 = vector.load %arg20[%c21_278, %c0_279] : memref<200x16xf32, #tpu.memory_space<vmem>>, vector<178x16xf32>
    %228 = arith.truncf %227 : vector<178x16xf32> to vector<178x16xbf16>
    %c2_280 = arith.constant 2 : index
    %c1_281 = arith.constant 1 : index
    %c0_282 = arith.constant 0 : index
    %c0_283 = arith.constant 0 : index
    %229 = vector.load %arg5[%c2_280, %c1_281, %c0_282, %c0_283] : memref<3x3x16x16xbf16, #tpu.memory_space<vmem>>, vector<1x1x16x16xbf16>
    %230 = vector.shape_cast %229 : vector<1x1x16x16xbf16> to vector<16x16xbf16>
    %cst_284 = arith.constant dense<0.000000e+00> : vector<178x16xf32>
    %231 = tpu.matmul %228, %230, %cst_284 {dimension_numbers = #tpu.dot_dimension_numbers<[1], [0], [0], [1], [0, 0, 1, 1], [], []>} : vector<178x16xbf16>, vector<16x16xbf16>, vector<178x16xf32> -> vector<178x16xf32>
    %232 = arith.addf %226, %231 : vector<178x16xf32>
    %c22_285 = arith.constant 22 : index
    %c0_286 = arith.constant 0 : index
    %233 = vector.load %arg20[%c22_285, %c0_286] : memref<200x16xf32, #tpu.memory_space<vmem>>, vector<178x16xf32>
    %234 = arith.truncf %233 : vector<178x16xf32> to vector<178x16xbf16>
    %c2_287 = arith.constant 2 : index
    %c2_288 = arith.constant 2 : index
    %c0_289 = arith.constant 0 : index
    %c0_290 = arith.constant 0 : index
    %235 = vector.load %arg5[%c2_287, %c2_288, %c0_289, %c0_290] : memref<3x3x16x16xbf16, #tpu.memory_space<vmem>>, vector<1x1x16x16xbf16>
    %236 = vector.shape_cast %235 : vector<1x1x16x16xbf16> to vector<16x16xbf16>
    %cst_291 = arith.constant dense<0.000000e+00> : vector<178x16xf32>
    %237 = tpu.matmul %234, %236, %cst_291 {dimension_numbers = #tpu.dot_dimension_numbers<[1], [0], [0], [1], [0, 0, 1, 1], [], []>} : vector<178x16xbf16>, vector<16x16xbf16>, vector<178x16xf32> -> vector<178x16xf32>
    %238 = arith.addf %232, %237 : vector<178x16xf32>
    %c0_292 = arith.constant 0 : index
    %c0_293 = arith.constant 0 : index
    %239 = vector.load %arg21[%c0_292, %c0_293] : memref<178x16xf32, #tpu.memory_space<vmem>>, vector<178x16xf32>
    tpu.vector_store %arg21[%c0_292, %c0_293], %238 {strides = array<i32>} : memref<178x16xf32, #tpu.memory_space<vmem>>, vector<178x16xf32>,
    %c0_294 = arith.constant 0 : index
    %c0_295 = arith.constant 0 : index
    %240 = vector.load %arg21[%c0_294, %c0_295] : memref<178x16xf32, #tpu.memory_space<vmem>>, vector<8x16xf32>
    %c0_296 = arith.constant 0 : index
    %c0_297 = arith.constant 0 : index
    %241 = vector.load %arg22[%c0_296, %c0_297] : memref<128x16xf32, #tpu.memory_space<vmem>>, vector<8x16xf32>
    tpu.vector_store %arg22[%c0_296, %c0_297], %240 {strides = array<i32>} : memref<128x16xf32, #tpu.memory_space<vmem>>, vector<8x16xf32>,
    %c10_298 = arith.constant 10 : index
    %c0_299 = arith.constant 0 : index
    %242 = vector.load %arg21[%c10_298, %c0_299] : memref<178x16xf32, #tpu.memory_space<vmem>>, vector<8x16xf32>
    %c8_300 = arith.constant 8 : index
    %c0_301 = arith.constant 0 : index
    %243 = vector.load %arg22[%c8_300, %c0_301] : memref<128x16xf32, #tpu.memory_space<vmem>>, vector<8x16xf32>
    tpu.vector_store %arg22[%c8_300, %c0_301], %242 {strides = array<i32>} : memref<128x16xf32, #tpu.memory_space<vmem>>, vector<8x16xf32>,
    %c20_302 = arith.constant 20 : index
    %c0_303 = arith.constant 0 : index
    %244 = vector.load %arg21[%c20_302, %c0_303] : memref<178x16xf32, #tpu.memory_space<vmem>>, vector<8x16xf32>
    %c16_304 = arith.constant 16 : index
    %c0_305 = arith.constant 0 : index
    %245 = vector.load %arg22[%c16_304, %c0_305] : memref<128x16xf32, #tpu.memory_space<vmem>>, vector<8x16xf32>
    tpu.vector_store %arg22[%c16_304, %c0_305], %244 {strides = array<i32>} : memref<128x16xf32, #tpu.memory_space<vmem>>, vector<8x16xf32>,
    %c30_306 = arith.constant 30 : index
    %c0_307 = arith.constant 0 : index
    %246 = vector.load %arg21[%c30_306, %c0_307] : memref<178x16xf32, #tpu.memory_space<vmem>>, vector<8x16xf32>
    %c24_308 = arith.constant 24 : index
    %c0_309 = arith.constant 0 : index
    %247 = vector.load %arg22[%c24_308, %c0_309] : memref<128x16xf32, #tpu.memory_space<vmem>>, vector<8x16xf32>
    tpu.vector_store %arg22[%c24_308, %c0_309], %246 {strides = array<i32>} : memref<128x16xf32, #tpu.memory_space<vmem>>, vector<8x16xf32>,
    %c40_310 = arith.constant 40 : index
    %c0_311 = arith.constant 0 : index
    %248 = vector.load %arg21[%c40_310, %c0_311] : memref<178x16xf32, #tpu.memory_space<vmem>>, vector<8x16xf32>
    %c32_312 = arith.constant 32 : index
    %c0_313 = arith.constant 0 : index
    %249 = vector.load %arg22[%c32_312, %c0_313] : memref<128x16xf32, #tpu.memory_space<vmem>>, vector<8x16xf32>
    tpu.vector_store %arg22[%c32_312, %c0_313], %248 {strides = array<i32>} : memref<128x16xf32, #tpu.memory_space<vmem>>, vector<8x16xf32>,
    %c50_314 = arith.constant 50 : index
    %c0_315 = arith.constant 0 : index
    %250 = vector.load %arg21[%c50_314, %c0_315] : memref<178x16xf32, #tpu.memory_space<vmem>>, vector<8x16xf32>
    %c40_316 = arith.constant 40 : index
    %c0_317 = arith.constant 0 : index
    %251 = vector.load %arg22[%c40_316, %c0_317] : memref<128x16xf32, #tpu.memory_space<vmem>>, vector<8x16xf32>
    tpu.vector_store %arg22[%c40_316, %c0_317], %250 {strides = array<i32>} : memref<128x16xf32, #tpu.memory_space<vmem>>, vector<8x16xf32>,
    %c60_318 = arith.constant 60 : index
    %c0_319 = arith.constant 0 : index
    %252 = vector.load %arg21[%c60_318, %c0_319] : memref<178x16xf32, #tpu.memory_space<vmem>>, vector<8x16xf32>
    %c48_320 = arith.constant 48 : index
    %c0_321 = arith.constant 0 : index
    %253 = vector.load %arg22[%c48_320, %c0_321] : memref<128x16xf32, #tpu.memory_space<vmem>>, vector<8x16xf32>
    tpu.vector_store %arg22[%c48_320, %c0_321], %252 {strides = array<i32>} : memref<128x16xf32, #tpu.memory_space<vmem>>, vector<8x16xf32>,
    %c70_322 = arith.constant 70 : index
    %c0_323 = arith.constant 0 : index
    %254 = vector.load %arg21[%c70_322, %c0_323] : memref<178x16xf32, #tpu.memory_space<vmem>>, vector<8x16xf32>
    %c56_324 = arith.constant 56 : index
    %c0_325 = arith.constant 0 : index
    %255 = vector.load %arg22[%c56_324, %c0_325] : memref<128x16xf32, #tpu.memory_space<vmem>>, vector<8x16xf32>
    tpu.vector_store %arg22[%c56_324, %c0_325], %254 {strides = array<i32>} : memref<128x16xf32, #tpu.memory_space<vmem>>, vector<8x16xf32>,
    %c100_326 = arith.constant 100 : index
    %c0_327 = arith.constant 0 : index
    %256 = vector.load %arg21[%c100_326, %c0_327] : memref<178x16xf32, #tpu.memory_space<vmem>>, vector<8x16xf32>
    %c64_328 = arith.constant 64 : index
    %c0_329 = arith.constant 0 : index
    %257 = vector.load %arg22[%c64_328, %c0_329] : memref<128x16xf32, #tpu.memory_space<vmem>>, vector<8x16xf32>
    tpu.vector_store %arg22[%c64_328, %c0_329], %256 {strides = array<i32>} : memref<128x16xf32, #tpu.memory_space<vmem>>, vector<8x16xf32>,
    %c110_330 = arith.constant 110 : index
    %c0_331 = arith.constant 0 : index
    %258 = vector.load %arg21[%c110_330, %c0_331] : memref<178x16xf32, #tpu.memory_space<vmem>>, vector<8x16xf32>
    %c72_332 = arith.constant 72 : index
    %c0_333 = arith.constant 0 : index
    %259 = vector.load %arg22[%c72_332, %c0_333] : memref<128x16xf32, #tpu.memory_space<vmem>>, vector<8x16xf32>
    tpu.vector_store %arg22[%c72_332, %c0_333], %258 {strides = array<i32>} : memref<128x16xf32, #tpu.memory_space<vmem>>, vector<8x16xf32>,
    %c120_334 = arith.constant 120 : index
    %c0_335 = arith.constant 0 : index
    %260 = vector.load %arg21[%c120_334, %c0_335] : memref<178x16xf32, #tpu.memory_space<vmem>>, vector<8x16xf32>
    %c80_336 = arith.constant 80 : index
    %c0_337 = arith.constant 0 : index
    %261 = vector.load %arg22[%c80_336, %c0_337] : memref<128x16xf32, #tpu.memory_space<vmem>>, vector<8x16xf32>
    tpu.vector_store %arg22[%c80_336, %c0_337], %260 {strides = array<i32>} : memref<128x16xf32, #tpu.memory_space<vmem>>, vector<8x16xf32>,
    %c130_338 = arith.constant 130 : index
    %c0_339 = arith.constant 0 : index
    %262 = vector.load %arg21[%c130_338, %c0_339] : memref<178x16xf32, #tpu.memory_space<vmem>>, vector<8x16xf32>
    %c88_340 = arith.constant 88 : index
    %c0_341 = arith.constant 0 : index
    %263 = vector.load %arg22[%c88_340, %c0_341] : memref<128x16xf32, #tpu.memory_space<vmem>>, vector<8x16xf32>
    tpu.vector_store %arg22[%c88_340, %c0_341], %262 {strides = array<i32>} : memref<128x16xf32, #tpu.memory_space<vmem>>, vector<8x16xf32>,
    %c140_342 = arith.constant 140 : index
    %c0_343 = arith.constant 0 : index
    %264 = vector.load %arg21[%c140_342, %c0_343] : memref<178x16xf32, #tpu.memory_space<vmem>>, vector<8x16xf32>
    %c96_344 = arith.constant 96 : index
    %c0_345 = arith.constant 0 : index
    %265 = vector.load %arg22[%c96_344, %c0_345] : memref<128x16xf32, #tpu.memory_space<vmem>>, vector<8x16xf32>
    tpu.vector_store %arg22[%c96_344, %c0_345], %264 {strides = array<i32>} : memref<128x16xf32, #tpu.memory_space<vmem>>, vector<8x16xf32>,
    %c150_346 = arith.constant 150 : index
    %c0_347 = arith.constant 0 : index
    %266 = vector.load %arg21[%c150_346, %c0_347] : memref<178x16xf32, #tpu.memory_space<vmem>>, vector<8x16xf32>
    %c104_348 = arith.constant 104 : index
    %c0_349 = arith.constant 0 : index
    %267 = vector.load %arg22[%c104_348, %c0_349] : memref<128x16xf32, #tpu.memory_space<vmem>>, vector<8x16xf32>
    tpu.vector_store %arg22[%c104_348, %c0_349], %266 {strides = array<i32>} : memref<128x16xf32, #tpu.memory_space<vmem>>, vector<8x16xf32>,
    %c160_350 = arith.constant 160 : index
    %c0_351 = arith.constant 0 : index
    %268 = vector.load %arg21[%c160_350, %c0_351] : memref<178x16xf32, #tpu.memory_space<vmem>>, vector<8x16xf32>
    %c112_352 = arith.constant 112 : index
    %c0_353 = arith.constant 0 : index
    %269 = vector.load %arg22[%c112_352, %c0_353] : memref<128x16xf32, #tpu.memory_space<vmem>>, vector<8x16xf32>
    tpu.vector_store %arg22[%c112_352, %c0_353], %268 {strides = array<i32>} : memref<128x16xf32, #tpu.memory_space<vmem>>, vector<8x16xf32>,
    %c170_354 = arith.constant 170 : index
    %c0_355 = arith.constant 0 : index
    %270 = vector.load %arg21[%c170_354, %c0_355] : memref<178x16xf32, #tpu.memory_space<vmem>>, vector<8x16xf32>
    %c120_356 = arith.constant 120 : index
    %c0_357 = arith.constant 0 : index
    %271 = vector.load %arg22[%c120_356, %c0_357] : memref<128x16xf32, #tpu.memory_space<vmem>>, vector<8x16xf32>
    tpu.vector_store %arg22[%c120_356, %c0_357], %270 {strides = array<i32>} : memref<128x16xf32, #tpu.memory_space<vmem>>, vector<8x16xf32>,
    %c0_358 = arith.constant 0 : index
    %c0_359 = arith.constant 0 : index
    %272 = vector.load %arg22[%c0_358, %c0_359] : memref<128x16xf32, #tpu.memory_space<vmem>>, vector<128x16xf32>
    %cst_360 = arith.constant dense<0.000000e+00> : vector<16xf32>
    %273 = vector.multi_reduction <add>, %272, %cst_360 [0] : vector<128x16xf32> to vector<16xf32>
    %274 = vector.shape_cast %273 : vector<16xf32> to vector<1x16xf32>
    %cst_361 = arith.constant 1.280000e+02 : f32
    %275 = vector.broadcast %cst_361 : f32 to vector<1x16xf32>
    %276 = arith.divf %274, %275 : vector<1x16xf32>
    %277 = vector.broadcast %276 : vector<1x16xf32> to vector<128x16xf32>
    %278 = arith.subf %272, %277 : vector<128x16xf32>
    %279 = arith.mulf %278, %278 : vector<128x16xf32>
    %cst_362 = arith.constant dense<0.000000e+00> : vector<16xf32>
    %280 = vector.multi_reduction <add>, %279, %cst_362 [0] : vector<128x16xf32> to vector<16xf32>
    %281 = vector.shape_cast %280 : vector<16xf32> to vector<1x16xf32>
    %cst_363 = arith.constant 1.280000e+02 : f32
    %282 = vector.broadcast %cst_363 : f32 to vector<1x16xf32>
    %283 = arith.divf %281, %282 : vector<1x16xf32>
    %284 = vector.broadcast %276 : vector<1x16xf32> to vector<128x16xf32>
    %285 = arith.subf %272, %284 : vector<128x16xf32>
    %cst_364 = arith.constant 9.99999974E-6 : f32
    %286 = vector.broadcast %cst_364 : f32 to vector<1x16xf32>
    %287 = arith.addf %283, %286 : vector<1x16xf32>
    %288 = math.rsqrt %287 : vector<1x16xf32>
    %289 = vector.broadcast %288 : vector<1x16xf32> to vector<128x16xf32>
    %290 = arith.mulf %285, %289 : vector<128x16xf32>
    %c0_365 = arith.constant 0 : index
    %c0_366 = arith.constant 0 : index
    %291 = vector.load %arg6[%c0_365, %c0_366] : memref<1x16xf32, #tpu.memory_space<vmem>>, vector<1x16xf32>
    %292 = vector.broadcast %291 : vector<1x16xf32> to vector<128x16xf32>
    %293 = arith.mulf %290, %292 : vector<128x16xf32>
    %c0_367 = arith.constant 0 : index
    %c0_368 = arith.constant 0 : index
    %294 = vector.load %arg7[%c0_367, %c0_368] : memref<1x16xf32, #tpu.memory_space<vmem>>, vector<1x16xf32>
    %295 = vector.broadcast %294 : vector<1x16xf32> to vector<128x16xf32>
    %296 = arith.addf %293, %295 : vector<128x16xf32>
    %cst_369 = arith.constant 0.000000e+00 : f32
    %297 = vector.broadcast %cst_369 : f32 to vector<128x16xf32>
    %298 = arith.maximumf %296, %297 : vector<128x16xf32>
    %c0_370 = arith.constant 0 : index
    %c0_371 = arith.constant 0 : index
    %299 = vector.load %arg22[%c0_370, %c0_371] : memref<128x16xf32, #tpu.memory_space<vmem>>, vector<128x16xf32>
    tpu.vector_store %arg22[%c0_370, %c0_371], %298 {strides = array<i32>} : memref<128x16xf32, #tpu.memory_space<vmem>>, vector<128x16xf32>,
    %c0_372 = arith.constant 0 : index
    %c0_373 = arith.constant 0 : index
    %300 = tpu.strided_load %arg22[%c0_372, %c0_373] {strides = array<i32: 2, 1>} : memref<128x16xf32, #tpu.memory_space<vmem>>, vector<4x16xf32>
    %c1_374 = arith.constant 1 : index
    %c0_375 = arith.constant 0 : index
    %301 = tpu.strided_load %arg22[%c1_374, %c0_375] {strides = array<i32: 2, 1>} : memref<128x16xf32, #tpu.memory_space<vmem>>, vector<4x16xf32>
    %c8_376 = arith.constant 8 : index
    %c0_377 = arith.constant 0 : index
    %302 = tpu.strided_load %arg22[%c8_376, %c0_377] {strides = array<i32: 2, 1>} : memref<128x16xf32, #tpu.memory_space<vmem>>, vector<4x16xf32>
    %c9 = arith.constant 9 : index
    %c0_378 = arith.constant 0 : index
    %303 = tpu.strided_load %arg22[%c9, %c0_378] {strides = array<i32: 2, 1>} : memref<128x16xf32, #tpu.memory_space<vmem>>, vector<4x16xf32>
    %304 = arith.maximumf %300, %301 : vector<4x16xf32>
    %305 = arith.maximumf %302, %303 : vector<4x16xf32>
    %306 = arith.maximumf %304, %305 : vector<4x16xf32>
    %c0_379 = arith.constant 0 : index
    %c0_380 = arith.constant 0 : index
    %307 = vector.load %arg23[%c0_379, %c0_380] : memref<32x16xf32, #tpu.memory_space<vmem>>, vector<4x16xf32>
    tpu.vector_store %arg23[%c0_379, %c0_380], %306 {strides = array<i32>} : memref<32x16xf32, #tpu.memory_space<vmem>>, vector<4x16xf32>,
    %c16_381 = arith.constant 16 : index
    %c0_382 = arith.constant 0 : index
    %308 = tpu.strided_load %arg22[%c16_381, %c0_382] {strides = array<i32: 2, 1>} : memref<128x16xf32, #tpu.memory_space<vmem>>, vector<4x16xf32>
    %c17 = arith.constant 17 : index
    %c0_383 = arith.constant 0 : index
    %309 = tpu.strided_load %arg22[%c17, %c0_383] {strides = array<i32: 2, 1>} : memref<128x16xf32, #tpu.memory_space<vmem>>, vector<4x16xf32>
    %c24_384 = arith.constant 24 : index
    %c0_385 = arith.constant 0 : index
    %310 = tpu.strided_load %arg22[%c24_384, %c0_385] {strides = array<i32: 2, 1>} : memref<128x16xf32, #tpu.memory_space<vmem>>, vector<4x16xf32>
    %c25 = arith.constant 25 : index
    %c0_386 = arith.constant 0 : index
    %311 = tpu.strided_load %arg22[%c25, %c0_386] {strides = array<i32: 2, 1>} : memref<128x16xf32, #tpu.memory_space<vmem>>, vector<4x16xf32>
    %312 = arith.maximumf %308, %309 : vector<4x16xf32>
    %313 = arith.maximumf %310, %311 : vector<4x16xf32>
    %314 = arith.maximumf %312, %313 : vector<4x16xf32>
    %c4 = arith.constant 4 : index
    %c0_387 = arith.constant 0 : index
    %315 = vector.load %arg23[%c4, %c0_387] : memref<32x16xf32, #tpu.memory_space<vmem>>, vector<4x16xf32>
    tpu.vector_store %arg23[%c4, %c0_387], %314 {strides = array<i32>} : memref<32x16xf32, #tpu.memory_space<vmem>>, vector<4x16xf32>,
    %c32_388 = arith.constant 32 : index
    %c0_389 = arith.constant 0 : index
    %316 = tpu.strided_load %arg22[%c32_388, %c0_389] {strides = array<i32: 2, 1>} : memref<128x16xf32, #tpu.memory_space<vmem>>, vector<4x16xf32>
    %c33 = arith.constant 33 : index
    %c0_390 = arith.constant 0 : index
    %317 = tpu.strided_load %arg22[%c33, %c0_390] {strides = array<i32: 2, 1>} : memref<128x16xf32, #tpu.memory_space<vmem>>, vector<4x16xf32>
    %c40_391 = arith.constant 40 : index
    %c0_392 = arith.constant 0 : index
    %318 = tpu.strided_load %arg22[%c40_391, %c0_392] {strides = array<i32: 2, 1>} : memref<128x16xf32, #tpu.memory_space<vmem>>, vector<4x16xf32>
    %c41_393 = arith.constant 41 : index
    %c0_394 = arith.constant 0 : index
    %319 = tpu.strided_load %arg22[%c41_393, %c0_394] {strides = array<i32: 2, 1>} : memref<128x16xf32, #tpu.memory_space<vmem>>, vector<4x16xf32>
    %320 = arith.maximumf %316, %317 : vector<4x16xf32>
    %321 = arith.maximumf %318, %319 : vector<4x16xf32>
    %322 = arith.maximumf %320, %321 : vector<4x16xf32>
    %c8_395 = arith.constant 8 : index
    %c0_396 = arith.constant 0 : index
    %323 = vector.load %arg23[%c8_395, %c0_396] : memref<32x16xf32, #tpu.memory_space<vmem>>, vector<4x16xf32>
    tpu.vector_store %arg23[%c8_395, %c0_396], %322 {strides = array<i32>} : memref<32x16xf32, #tpu.memory_space<vmem>>, vector<4x16xf32>,
    %c48_397 = arith.constant 48 : index
    %c0_398 = arith.constant 0 : index
    %324 = tpu.strided_load %arg22[%c48_397, %c0_398] {strides = array<i32: 2, 1>} : memref<128x16xf32, #tpu.memory_space<vmem>>, vector<4x16xf32>
    %c49 = arith.constant 49 : index
    %c0_399 = arith.constant 0 : index
    %325 = tpu.strided_load %arg22[%c49, %c0_399] {strides = array<i32: 2, 1>} : memref<128x16xf32, #tpu.memory_space<vmem>>, vector<4x16xf32>
    %c56_400 = arith.constant 56 : index
    %c0_401 = arith.constant 0 : index
    %326 = tpu.strided_load %arg22[%c56_400, %c0_401] {strides = array<i32: 2, 1>} : memref<128x16xf32, #tpu.memory_space<vmem>>, vector<4x16xf32>
    %c57 = arith.constant 57 : index
    %c0_402 = arith.constant 0 : index
    %327 = tpu.strided_load %arg22[%c57, %c0_402] {strides = array<i32: 2, 1>} : memref<128x16xf32, #tpu.memory_space<vmem>>, vector<4x16xf32>
    %328 = arith.maximumf %324, %325 : vector<4x16xf32>
    %329 = arith.maximumf %326, %327 : vector<4x16xf32>
    %330 = arith.maximumf %328, %329 : vector<4x16xf32>
    %c12_403 = arith.constant 12 : index
    %c0_404 = arith.constant 0 : index
    %331 = vector.load %arg23[%c12_403, %c0_404] : memref<32x16xf32, #tpu.memory_space<vmem>>, vector<4x16xf32>
    tpu.vector_store %arg23[%c12_403, %c0_404], %330 {strides = array<i32>} : memref<32x16xf32, #tpu.memory_space<vmem>>, vector<4x16xf32>,
    %c64_405 = arith.constant 64 : index
    %c0_406 = arith.constant 0 : index
    %332 = tpu.strided_load %arg22[%c64_405, %c0_406] {strides = array<i32: 2, 1>} : memref<128x16xf32, #tpu.memory_space<vmem>>, vector<4x16xf32>
    %c65 = arith.constant 65 : index
    %c0_407 = arith.constant 0 : index
    %333 = tpu.strided_load %arg22[%c65, %c0_407] {strides = array<i32: 2, 1>} : memref<128x16xf32, #tpu.memory_space<vmem>>, vector<4x16xf32>
    %c72_408 = arith.constant 72 : index
    %c0_409 = arith.constant 0 : index
    %334 = tpu.strided_load %arg22[%c72_408, %c0_409] {strides = array<i32: 2, 1>} : memref<128x16xf32, #tpu.memory_space<vmem>>, vector<4x16xf32>
    %c73 = arith.constant 73 : index
    %c0_410 = arith.constant 0 : index
    %335 = tpu.strided_load %arg22[%c73, %c0_410] {strides = array<i32: 2, 1>} : memref<128x16xf32, #tpu.memory_space<vmem>>, vector<4x16xf32>
    %336 = arith.maximumf %332, %333 : vector<4x16xf32>
    %337 = arith.maximumf %334, %335 : vector<4x16xf32>
    %338 = arith.maximumf %336, %337 : vector<4x16xf32>
    %c16_411 = arith.constant 16 : index
    %c0_412 = arith.constant 0 : index
    %339 = vector.load %arg23[%c16_411, %c0_412] : memref<32x16xf32, #tpu.memory_space<vmem>>, vector<4x16xf32>
    tpu.vector_store %arg23[%c16_411, %c0_412], %338 {strides = array<i32>} : memref<32x16xf32, #tpu.memory_space<vmem>>, vector<4x16xf32>,
    %c80_413 = arith.constant 80 : index
    %c0_414 = arith.constant 0 : index
    %340 = tpu.strided_load %arg22[%c80_413, %c0_414] {strides = array<i32: 2, 1>} : memref<128x16xf32, #tpu.memory_space<vmem>>, vector<4x16xf32>
    %c81_415 = arith.constant 81 : index
    %c0_416 = arith.constant 0 : index
    %341 = tpu.strided_load %arg22[%c81_415, %c0_416] {strides = array<i32: 2, 1>} : memref<128x16xf32, #tpu.memory_space<vmem>>, vector<4x16xf32>
    %c88_417 = arith.constant 88 : index
    %c0_418 = arith.constant 0 : index
    %342 = tpu.strided_load %arg22[%c88_417, %c0_418] {strides = array<i32: 2, 1>} : memref<128x16xf32, #tpu.memory_space<vmem>>, vector<4x16xf32>
    %c89 = arith.constant 89 : index
    %c0_419 = arith.constant 0 : index
    %343 = tpu.strided_load %arg22[%c89, %c0_419] {strides = array<i32: 2, 1>} : memref<128x16xf32, #tpu.memory_space<vmem>>, vector<4x16xf32>
    %344 = arith.maximumf %340, %341 : vector<4x16xf32>
    %345 = arith.maximumf %342, %343 : vector<4x16xf32>
    %346 = arith.maximumf %344, %345 : vector<4x16xf32>
    %c20_420 = arith.constant 20 : index
    %c0_421 = arith.constant 0 : index
    %347 = vector.load %arg23[%c20_420, %c0_421] : memref<32x16xf32, #tpu.memory_space<vmem>>, vector<4x16xf32>
    tpu.vector_store %arg23[%c20_420, %c0_421], %346 {strides = array<i32>} : memref<32x16xf32, #tpu.memory_space<vmem>>, vector<4x16xf32>,
    %c96_422 = arith.constant 96 : index
    %c0_423 = arith.constant 0 : index
    %348 = tpu.strided_load %arg22[%c96_422, %c0_423] {strides = array<i32: 2, 1>} : memref<128x16xf32, #tpu.memory_space<vmem>>, vector<4x16xf32>
    %c97 = arith.constant 97 : index
    %c0_424 = arith.constant 0 : index
    %349 = tpu.strided_load %arg22[%c97, %c0_424] {strides = array<i32: 2, 1>} : memref<128x16xf32, #tpu.memory_space<vmem>>, vector<4x16xf32>
    %c104_425 = arith.constant 104 : index
    %c0_426 = arith.constant 0 : index
    %350 = tpu.strided_load %arg22[%c104_425, %c0_426] {strides = array<i32: 2, 1>} : memref<128x16xf32, #tpu.memory_space<vmem>>, vector<4x16xf32>
    %c105 = arith.constant 105 : index
    %c0_427 = arith.constant 0 : index
    %351 = tpu.strided_load %arg22[%c105, %c0_427] {strides = array<i32: 2, 1>} : memref<128x16xf32, #tpu.memory_space<vmem>>, vector<4x16xf32>
    %352 = arith.maximumf %348, %349 : vector<4x16xf32>
    %353 = arith.maximumf %350, %351 : vector<4x16xf32>
    %354 = arith.maximumf %352, %353 : vector<4x16xf32>
    %c24_428 = arith.constant 24 : index
    %c0_429 = arith.constant 0 : index
    %355 = vector.load %arg23[%c24_428, %c0_429] : memref<32x16xf32, #tpu.memory_space<vmem>>, vector<4x16xf32>
    tpu.vector_store %arg23[%c24_428, %c0_429], %354 {strides = array<i32>} : memref<32x16xf32, #tpu.memory_space<vmem>>, vector<4x16xf32>,
    %c112_430 = arith.constant 112 : index
    %c0_431 = arith.constant 0 : index
    %356 = tpu.strided_load %arg22[%c112_430, %c0_431] {strides = array<i32: 2, 1>} : memref<128x16xf32, #tpu.memory_space<vmem>>, vector<4x16xf32>
    %c113 = arith.constant 113 : index
    %c0_432 = arith.constant 0 : index
    %357 = tpu.strided_load %arg22[%c113, %c0_432] {strides = array<i32: 2, 1>} : memref<128x16xf32, #tpu.memory_space<vmem>>, vector<4x16xf32>
    %c120_433 = arith.constant 120 : index
    %c0_434 = arith.constant 0 : index
    %358 = tpu.strided_load %arg22[%c120_433, %c0_434] {strides = array<i32: 2, 1>} : memref<128x16xf32, #tpu.memory_space<vmem>>, vector<4x16xf32>
    %c121_435 = arith.constant 121 : index
    %c0_436 = arith.constant 0 : index
    %359 = tpu.strided_load %arg22[%c121_435, %c0_436] {strides = array<i32: 2, 1>} : memref<128x16xf32, #tpu.memory_space<vmem>>, vector<4x16xf32>
    %360 = arith.maximumf %356, %357 : vector<4x16xf32>
    %361 = arith.maximumf %358, %359 : vector<4x16xf32>
    %362 = arith.maximumf %360, %361 : vector<4x16xf32>
    %c28 = arith.constant 28 : index
    %c0_437 = arith.constant 0 : index
    %363 = vector.load %arg23[%c28, %c0_437] : memref<32x16xf32, #tpu.memory_space<vmem>>, vector<4x16xf32>
    tpu.vector_store %arg23[%c28, %c0_437], %362 {strides = array<i32>} : memref<32x16xf32, #tpu.memory_space<vmem>>, vector<4x16xf32>,
    %cst_438 = arith.constant 0.000000e+00 : f32
    %364 = vector.broadcast %cst_438 : f32 to vector<72x16xf32>
    %c0_439 = arith.constant 0 : index
    %c0_440 = arith.constant 0 : index
    %365 = vector.load %arg24[%c0_439, %c0_440] : memref<72x16xf32, #tpu.memory_space<vmem>>, vector<72x16xf32>
    tpu.vector_store %arg24[%c0_439, %c0_440], %364 {strides = array<i32>} : memref<72x16xf32, #tpu.memory_space<vmem>>, vector<72x16xf32>,
    %c0_441 = arith.constant 0 : index
    %c0_442 = arith.constant 0 : index
    %366 = vector.load %arg23[%c0_441, %c0_442] : memref<32x16xf32, #tpu.memory_space<vmem>>, vector<4x16xf32>
    %c7 = arith.constant 7 : index
    %c0_443 = arith.constant 0 : index
    %367 = vector.load %arg24[%c7, %c0_443] : memref<72x16xf32, #tpu.memory_space<vmem>>, vector<4x16xf32>
    tpu.vector_store %arg24[%c7, %c0_443], %366 {strides = array<i32>} : memref<72x16xf32, #tpu.memory_space<vmem>>, vector<4x16xf32>,
    %c4_444 = arith.constant 4 : index
    %c0_445 = arith.constant 0 : index
    %368 = vector.load %arg23[%c4_444, %c0_445] : memref<32x16xf32, #tpu.memory_space<vmem>>, vector<4x16xf32>
    %c13 = arith.constant 13 : index
    %c0_446 = arith.constant 0 : index
    %369 = vector.load %arg24[%c13, %c0_446] : memref<72x16xf32, #tpu.memory_space<vmem>>, vector<4x16xf32>
    tpu.vector_store %arg24[%c13, %c0_446], %368 {strides = array<i32>} : memref<72x16xf32, #tpu.memory_space<vmem>>, vector<4x16xf32>,
    %c8_447 = arith.constant 8 : index
    %c0_448 = arith.constant 0 : index
    %370 = vector.load %arg23[%c8_447, %c0_448] : memref<32x16xf32, #tpu.memory_space<vmem>>, vector<4x16xf32>
    %c19 = arith.constant 19 : index
    %c0_449 = arith.constant 0 : index
    %371 = vector.load %arg24[%c19, %c0_449] : memref<72x16xf32, #tpu.memory_space<vmem>>, vector<4x16xf32>
    tpu.vector_store %arg24[%c19, %c0_449], %370 {strides = array<i32>} : memref<72x16xf32, #tpu.memory_space<vmem>>, vector<4x16xf32>,
    %c12_450 = arith.constant 12 : index
    %c0_451 = arith.constant 0 : index
    %372 = vector.load %arg23[%c12_450, %c0_451] : memref<32x16xf32, #tpu.memory_space<vmem>>, vector<4x16xf32>
    %c25_452 = arith.constant 25 : index
    %c0_453 = arith.constant 0 : index
    %373 = vector.load %arg24[%c25_452, %c0_453] : memref<72x16xf32, #tpu.memory_space<vmem>>, vector<4x16xf32>
    tpu.vector_store %arg24[%c25_452, %c0_453], %372 {strides = array<i32>} : memref<72x16xf32, #tpu.memory_space<vmem>>, vector<4x16xf32>,
    %c16_454 = arith.constant 16 : index
    %c0_455 = arith.constant 0 : index
    %374 = vector.load %arg23[%c16_454, %c0_455] : memref<32x16xf32, #tpu.memory_space<vmem>>, vector<4x16xf32>
    %c43 = arith.constant 43 : index
    %c0_456 = arith.constant 0 : index
    %375 = vector.load %arg24[%c43, %c0_456] : memref<72x16xf32, #tpu.memory_space<vmem>>, vector<4x16xf32>
    tpu.vector_store %arg24[%c43, %c0_456], %374 {strides = array<i32>} : memref<72x16xf32, #tpu.memory_space<vmem>>, vector<4x16xf32>,
    %c20_457 = arith.constant 20 : index
    %c0_458 = arith.constant 0 : index
    %376 = vector.load %arg23[%c20_457, %c0_458] : memref<32x16xf32, #tpu.memory_space<vmem>>, vector<4x16xf32>
    %c49_459 = arith.constant 49 : index
    %c0_460 = arith.constant 0 : index
    %377 = vector.load %arg24[%c49_459, %c0_460] : memref<72x16xf32, #tpu.memory_space<vmem>>, vector<4x16xf32>
    tpu.vector_store %arg24[%c49_459, %c0_460], %376 {strides = array<i32>} : memref<72x16xf32, #tpu.memory_space<vmem>>, vector<4x16xf32>,
    %c24_461 = arith.constant 24 : index
    %c0_462 = arith.constant 0 : index
    %378 = vector.load %arg23[%c24_461, %c0_462] : memref<32x16xf32, #tpu.memory_space<vmem>>, vector<4x16xf32>
    %c55 = arith.constant 55 : index
    %c0_463 = arith.constant 0 : index
    %379 = vector.load %arg24[%c55, %c0_463] : memref<72x16xf32, #tpu.memory_space<vmem>>, vector<4x16xf32>
    tpu.vector_store %arg24[%c55, %c0_463], %378 {strides = array<i32>} : memref<72x16xf32, #tpu.memory_space<vmem>>, vector<4x16xf32>,
    %c28_464 = arith.constant 28 : index
    %c0_465 = arith.constant 0 : index
    %380 = vector.load %arg23[%c28_464, %c0_465] : memref<32x16xf32, #tpu.memory_space<vmem>>, vector<4x16xf32>
    %c61_466 = arith.constant 61 : index
    %c0_467 = arith.constant 0 : index
    %381 = vector.load %arg24[%c61_466, %c0_467] : memref<72x16xf32, #tpu.memory_space<vmem>>, vector<4x16xf32>
    tpu.vector_store %arg24[%c61_466, %c0_467], %380 {strides = array<i32>} : memref<72x16xf32, #tpu.memory_space<vmem>>, vector<4x16xf32>,
    %cst_468 = arith.constant 0.000000e+00 : f32
    %382 = vector.broadcast %cst_468 : f32 to vector<58x32xf32>
    %c0_469 = arith.constant 0 : index
    %c0_470 = arith.constant 0 : index
    %383 = vector.load %arg24[%c0_469, %c0_470] : memref<72x16xf32, #tpu.memory_space<vmem>>, vector<58x16xf32>
    %384 = arith.truncf %383 : vector<58x16xf32> to vector<58x16xbf16>
    %c0_471 = arith.constant 0 : index
    %c0_472 = arith.constant 0 : index
    %c0_473 = arith.constant 0 : index
    %c0_474 = arith.constant 0 : index
    %385 = vector.load %arg8[%c0_471, %c0_472, %c0_473, %c0_474] : memref<3x3x16x32xbf16, #tpu.memory_space<vmem>>, vector<1x1x16x32xbf16>
    %386 = vector.shape_cast %385 : vector<1x1x16x32xbf16> to vector<16x32xbf16>
    %cst_475 = arith.constant dense<0.000000e+00> : vector<58x32xf32>
    %387 = tpu.matmul %384, %386, %cst_475 {dimension_numbers = #tpu.dot_dimension_numbers<[1], [0], [0], [1], [0, 0, 1, 1], [], []>} : vector<58x16xbf16>, vector<16x32xbf16>, vector<58x32xf32> -> vector<58x32xf32>
    %388 = arith.addf %382, %387 : vector<58x32xf32>
    %c1_476 = arith.constant 1 : index
    %c0_477 = arith.constant 0 : index
    %389 = vector.load %arg24[%c1_476, %c0_477] : memref<72x16xf32, #tpu.memory_space<vmem>>, vector<58x16xf32>
    %390 = arith.truncf %389 : vector<58x16xf32> to vector<58x16xbf16>
    %c0_478 = arith.constant 0 : index
    %c1_479 = arith.constant 1 : index
    %c0_480 = arith.constant 0 : index
    %c0_481 = arith.constant 0 : index
    %391 = vector.load %arg8[%c0_478, %c1_479, %c0_480, %c0_481] : memref<3x3x16x32xbf16, #tpu.memory_space<vmem>>, vector<1x1x16x32xbf16>
    %392 = vector.shape_cast %391 : vector<1x1x16x32xbf16> to vector<16x32xbf16>
    %cst_482 = arith.constant dense<0.000000e+00> : vector<58x32xf32>
    %393 = tpu.matmul %390, %392, %cst_482 {dimension_numbers = #tpu.dot_dimension_numbers<[1], [0], [0], [1], [0, 0, 1, 1], [], []>} : vector<58x16xbf16>, vector<16x32xbf16>, vector<58x32xf32> -> vector<58x32xf32>
    %394 = arith.addf %388, %393 : vector<58x32xf32>
    %c2_483 = arith.constant 2 : index
    %c0_484 = arith.constant 0 : index
    %395 = vector.load %arg24[%c2_483, %c0_484] : memref<72x16xf32, #tpu.memory_space<vmem>>, vector<58x16xf32>
    %396 = arith.truncf %395 : vector<58x16xf32> to vector<58x16xbf16>
    %c0_485 = arith.constant 0 : index
    %c2_486 = arith.constant 2 : index
    %c0_487 = arith.constant 0 : index
    %c0_488 = arith.constant 0 : index
    %397 = vector.load %arg8[%c0_485, %c2_486, %c0_487, %c0_488] : memref<3x3x16x32xbf16, #tpu.memory_space<vmem>>, vector<1x1x16x32xbf16>
    %398 = vector.shape_cast %397 : vector<1x1x16x32xbf16> to vector<16x32xbf16>
    %cst_489 = arith.constant dense<0.000000e+00> : vector<58x32xf32>
    %399 = tpu.matmul %396, %398, %cst_489 {dimension_numbers = #tpu.dot_dimension_numbers<[1], [0], [0], [1], [0, 0, 1, 1], [], []>} : vector<58x16xbf16>, vector<16x32xbf16>, vector<58x32xf32> -> vector<58x32xf32>
    %400 = arith.addf %394, %399 : vector<58x32xf32>
    %c6 = arith.constant 6 : index
    %c0_490 = arith.constant 0 : index
    %401 = vector.load %arg24[%c6, %c0_490] : memref<72x16xf32, #tpu.memory_space<vmem>>, vector<58x16xf32>
    %402 = arith.truncf %401 : vector<58x16xf32> to vector<58x16xbf16>
    %c1_491 = arith.constant 1 : index
    %c0_492 = arith.constant 0 : index
    %c0_493 = arith.constant 0 : index
    %c0_494 = arith.constant 0 : index
    %403 = vector.load %arg8[%c1_491, %c0_492, %c0_493, %c0_494] : memref<3x3x16x32xbf16, #tpu.memory_space<vmem>>, vector<1x1x16x32xbf16>
    %404 = vector.shape_cast %403 : vector<1x1x16x32xbf16> to vector<16x32xbf16>
    %cst_495 = arith.constant dense<0.000000e+00> : vector<58x32xf32>
    %405 = tpu.matmul %402, %404, %cst_495 {dimension_numbers = #tpu.dot_dimension_numbers<[1], [0], [0], [1], [0, 0, 1, 1], [], []>} : vector<58x16xbf16>, vector<16x32xbf16>, vector<58x32xf32> -> vector<58x32xf32>
    %406 = arith.addf %400, %405 : vector<58x32xf32>
    %c7_496 = arith.constant 7 : index
    %c0_497 = arith.constant 0 : index
    %407 = vector.load %arg24[%c7_496, %c0_497] : memref<72x16xf32, #tpu.memory_space<vmem>>, vector<58x16xf32>
    %408 = arith.truncf %407 : vector<58x16xf32> to vector<58x16xbf16>
    %c1_498 = arith.constant 1 : index
    %c1_499 = arith.constant 1 : index
    %c0_500 = arith.constant 0 : index
    %c0_501 = arith.constant 0 : index
    %409 = vector.load %arg8[%c1_498, %c1_499, %c0_500, %c0_501] : memref<3x3x16x32xbf16, #tpu.memory_space<vmem>>, vector<1x1x16x32xbf16>
    %410 = vector.shape_cast %409 : vector<1x1x16x32xbf16> to vector<16x32xbf16>
    %cst_502 = arith.constant dense<0.000000e+00> : vector<58x32xf32>
    %411 = tpu.matmul %408, %410, %cst_502 {dimension_numbers = #tpu.dot_dimension_numbers<[1], [0], [0], [1], [0, 0, 1, 1], [], []>} : vector<58x16xbf16>, vector<16x32xbf16>, vector<58x32xf32> -> vector<58x32xf32>
    %412 = arith.addf %406, %411 : vector<58x32xf32>
    %c8_503 = arith.constant 8 : index
    %c0_504 = arith.constant 0 : index
    %413 = vector.load %arg24[%c8_503, %c0_504] : memref<72x16xf32, #tpu.memory_space<vmem>>, vector<58x16xf32>
    %414 = arith.truncf %413 : vector<58x16xf32> to vector<58x16xbf16>
    %c1_505 = arith.constant 1 : index
    %c2_506 = arith.constant 2 : index
    %c0_507 = arith.constant 0 : index
    %c0_508 = arith.constant 0 : index
    %415 = vector.load %arg8[%c1_505, %c2_506, %c0_507, %c0_508] : memref<3x3x16x32xbf16, #tpu.memory_space<vmem>>, vector<1x1x16x32xbf16>
    %416 = vector.shape_cast %415 : vector<1x1x16x32xbf16> to vector<16x32xbf16>
    %cst_509 = arith.constant dense<0.000000e+00> : vector<58x32xf32>
    %417 = tpu.matmul %414, %416, %cst_509 {dimension_numbers = #tpu.dot_dimension_numbers<[1], [0], [0], [1], [0, 0, 1, 1], [], []>} : vector<58x16xbf16>, vector<16x32xbf16>, vector<58x32xf32> -> vector<58x32xf32>
    %418 = arith.addf %412, %417 : vector<58x32xf32>
    %c12_510 = arith.constant 12 : index
    %c0_511 = arith.constant 0 : index
    %419 = vector.load %arg24[%c12_510, %c0_511] : memref<72x16xf32, #tpu.memory_space<vmem>>, vector<58x16xf32>
    %420 = arith.truncf %419 : vector<58x16xf32> to vector<58x16xbf16>
    %c2_512 = arith.constant 2 : index
    %c0_513 = arith.constant 0 : index
    %c0_514 = arith.constant 0 : index
    %c0_515 = arith.constant 0 : index
    %421 = vector.load %arg8[%c2_512, %c0_513, %c0_514, %c0_515] : memref<3x3x16x32xbf16, #tpu.memory_space<vmem>>, vector<1x1x16x32xbf16>
    %422 = vector.shape_cast %421 : vector<1x1x16x32xbf16> to vector<16x32xbf16>
    %cst_516 = arith.constant dense<0.000000e+00> : vector<58x32xf32>
    %423 = tpu.matmul %420, %422, %cst_516 {dimension_numbers = #tpu.dot_dimension_numbers<[1], [0], [0], [1], [0, 0, 1, 1], [], []>} : vector<58x16xbf16>, vector<16x32xbf16>, vector<58x32xf32> -> vector<58x32xf32>
    %424 = arith.addf %418, %423 : vector<58x32xf32>
    %c13_517 = arith.constant 13 : index
    %c0_518 = arith.constant 0 : index
    %425 = vector.load %arg24[%c13_517, %c0_518] : memref<72x16xf32, #tpu.memory_space<vmem>>, vector<58x16xf32>
    %426 = arith.truncf %425 : vector<58x16xf32> to vector<58x16xbf16>
    %c2_519 = arith.constant 2 : index
    %c1_520 = arith.constant 1 : index
    %c0_521 = arith.constant 0 : index
    %c0_522 = arith.constant 0 : index
    %427 = vector.load %arg8[%c2_519, %c1_520, %c0_521, %c0_522] : memref<3x3x16x32xbf16, #tpu.memory_space<vmem>>, vector<1x1x16x32xbf16>
    %428 = vector.shape_cast %427 : vector<1x1x16x32xbf16> to vector<16x32xbf16>
    %cst_523 = arith.constant dense<0.000000e+00> : vector<58x32xf32>
    %429 = tpu.matmul %426, %428, %cst_523 {dimension_numbers = #tpu.dot_dimension_numbers<[1], [0], [0], [1], [0, 0, 1, 1], [], []>} : vector<58x16xbf16>, vector<16x32xbf16>, vector<58x32xf32> -> vector<58x32xf32>
    %430 = arith.addf %424, %429 : vector<58x32xf32>
    %c14 = arith.constant 14 : index
    %c0_524 = arith.constant 0 : index
    %431 = vector.load %arg24[%c14, %c0_524] : memref<72x16xf32, #tpu.memory_space<vmem>>, vector<58x16xf32>
    %432 = arith.truncf %431 : vector<58x16xf32> to vector<58x16xbf16>
    %c2_525 = arith.constant 2 : index
    %c2_526 = arith.constant 2 : index
    %c0_527 = arith.constant 0 : index
    %c0_528 = arith.constant 0 : index
    %433 = vector.load %arg8[%c2_525, %c2_526, %c0_527, %c0_528] : memref<3x3x16x32xbf16, #tpu.memory_space<vmem>>, vector<1x1x16x32xbf16>
    %434 = vector.shape_cast %433 : vector<1x1x16x32xbf16> to vector<16x32xbf16>
    %cst_529 = arith.constant dense<0.000000e+00> : vector<58x32xf32>
    %435 = tpu.matmul %432, %434, %cst_529 {dimension_numbers = #tpu.dot_dimension_numbers<[1], [0], [0], [1], [0, 0, 1, 1], [], []>} : vector<58x16xbf16>, vector<16x32xbf16>, vector<58x32xf32> -> vector<58x32xf32>
    %436 = arith.addf %430, %435 : vector<58x32xf32>
    %c0_530 = arith.constant 0 : index
    %c0_531 = arith.constant 0 : index
    %437 = vector.load %arg25[%c0_530, %c0_531] : memref<58x32xf32, #tpu.memory_space<vmem>>, vector<58x32xf32>
    tpu.vector_store %arg25[%c0_530, %c0_531], %436 {strides = array<i32>} : memref<58x32xf32, #tpu.memory_space<vmem>>, vector<58x32xf32>,
    %c0_532 = arith.constant 0 : index
    %c0_533 = arith.constant 0 : index
    %438 = vector.load %arg25[%c0_532, %c0_533] : memref<58x32xf32, #tpu.memory_space<vmem>>, vector<4x32xf32>
    %c0_534 = arith.constant 0 : index
    %c0_535 = arith.constant 0 : index
    %439 = vector.load %arg26[%c0_534, %c0_535] : memref<32x32xf32, #tpu.memory_space<vmem>>, vector<4x32xf32>
    tpu.vector_store %arg26[%c0_534, %c0_535], %438 {strides = array<i32>} : memref<32x32xf32, #tpu.memory_space<vmem>>, vector<4x32xf32>,
    %c6_536 = arith.constant 6 : index
    %c0_537 = arith.constant 0 : index
    %440 = vector.load %arg25[%c6_536, %c0_537] : memref<58x32xf32, #tpu.memory_space<vmem>>, vector<4x32xf32>
    %c4_538 = arith.constant 4 : index
    %c0_539 = arith.constant 0 : index
    %441 = vector.load %arg26[%c4_538, %c0_539] : memref<32x32xf32, #tpu.memory_space<vmem>>, vector<4x32xf32>
    tpu.vector_store %arg26[%c4_538, %c0_539], %440 {strides = array<i32>} : memref<32x32xf32, #tpu.memory_space<vmem>>, vector<4x32xf32>,
    %c12_540 = arith.constant 12 : index
    %c0_541 = arith.constant 0 : index
    %442 = vector.load %arg25[%c12_540, %c0_541] : memref<58x32xf32, #tpu.memory_space<vmem>>, vector<4x32xf32>
    %c8_542 = arith.constant 8 : index
    %c0_543 = arith.constant 0 : index
    %443 = vector.load %arg26[%c8_542, %c0_543] : memref<32x32xf32, #tpu.memory_space<vmem>>, vector<4x32xf32>
    tpu.vector_store %arg26[%c8_542, %c0_543], %442 {strides = array<i32>} : memref<32x32xf32, #tpu.memory_space<vmem>>, vector<4x32xf32>,
    %c18 = arith.constant 18 : index
    %c0_544 = arith.constant 0 : index
    %444 = vector.load %arg25[%c18, %c0_544] : memref<58x32xf32, #tpu.memory_space<vmem>>, vector<4x32xf32>
    %c12_545 = arith.constant 12 : index
    %c0_546 = arith.constant 0 : index
    %445 = vector.load %arg26[%c12_545, %c0_546] : memref<32x32xf32, #tpu.memory_space<vmem>>, vector<4x32xf32>
    tpu.vector_store %arg26[%c12_545, %c0_546], %444 {strides = array<i32>} : memref<32x32xf32, #tpu.memory_space<vmem>>, vector<4x32xf32>,
    %c36 = arith.constant 36 : index
    %c0_547 = arith.constant 0 : index
    %446 = vector.load %arg25[%c36, %c0_547] : memref<58x32xf32, #tpu.memory_space<vmem>>, vector<4x32xf32>
    %c16_548 = arith.constant 16 : index
    %c0_549 = arith.constant 0 : index
    %447 = vector.load %arg26[%c16_548, %c0_549] : memref<32x32xf32, #tpu.memory_space<vmem>>, vector<4x32xf32>
    tpu.vector_store %arg26[%c16_548, %c0_549], %446 {strides = array<i32>} : memref<32x32xf32, #tpu.memory_space<vmem>>, vector<4x32xf32>,
    %c42 = arith.constant 42 : index
    %c0_550 = arith.constant 0 : index
    %448 = vector.load %arg25[%c42, %c0_550] : memref<58x32xf32, #tpu.memory_space<vmem>>, vector<4x32xf32>
    %c20_551 = arith.constant 20 : index
    %c0_552 = arith.constant 0 : index
    %449 = vector.load %arg26[%c20_551, %c0_552] : memref<32x32xf32, #tpu.memory_space<vmem>>, vector<4x32xf32>
    tpu.vector_store %arg26[%c20_551, %c0_552], %448 {strides = array<i32>} : memref<32x32xf32, #tpu.memory_space<vmem>>, vector<4x32xf32>,
    %c48_553 = arith.constant 48 : index
    %c0_554 = arith.constant 0 : index
    %450 = vector.load %arg25[%c48_553, %c0_554] : memref<58x32xf32, #tpu.memory_space<vmem>>, vector<4x32xf32>
    %c24_555 = arith.constant 24 : index
    %c0_556 = arith.constant 0 : index
    %451 = vector.load %arg26[%c24_555, %c0_556] : memref<32x32xf32, #tpu.memory_space<vmem>>, vector<4x32xf32>
    tpu.vector_store %arg26[%c24_555, %c0_556], %450 {strides = array<i32>} : memref<32x32xf32, #tpu.memory_space<vmem>>, vector<4x32xf32>,
    %c54 = arith.constant 54 : index
    %c0_557 = arith.constant 0 : index
    %452 = vector.load %arg25[%c54, %c0_557] : memref<58x32xf32, #tpu.memory_space<vmem>>, vector<4x32xf32>
    %c28_558 = arith.constant 28 : index
    %c0_559 = arith.constant 0 : index
    %453 = vector.load %arg26[%c28_558, %c0_559] : memref<32x32xf32, #tpu.memory_space<vmem>>, vector<4x32xf32>
    tpu.vector_store %arg26[%c28_558, %c0_559], %452 {strides = array<i32>} : memref<32x32xf32, #tpu.memory_space<vmem>>, vector<4x32xf32>,
    %c0_560 = arith.constant 0 : index
    %c0_561 = arith.constant 0 : index
    %454 = vector.load %arg26[%c0_560, %c0_561] : memref<32x32xf32, #tpu.memory_space<vmem>>, vector<32x32xf32>
    %cst_562 = arith.constant dense<0.000000e+00> : vector<32xf32>
    %455 = vector.multi_reduction <add>, %454, %cst_562 [0] : vector<32x32xf32> to vector<32xf32>
    %456 = vector.shape_cast %455 : vector<32xf32> to vector<1x32xf32>
    %cst_563 = arith.constant 3.200000e+01 : f32
    %457 = vector.broadcast %cst_563 : f32 to vector<1x32xf32>
    %458 = arith.divf %456, %457 : vector<1x32xf32>
    %459 = vector.broadcast %458 : vector<1x32xf32> to vector<32x32xf32>
    %460 = arith.subf %454, %459 : vector<32x32xf32>
    %461 = arith.mulf %460, %460 : vector<32x32xf32>
    %cst_564 = arith.constant dense<0.000000e+00> : vector<32xf32>
    %462 = vector.multi_reduction <add>, %461, %cst_564 [0] : vector<32x32xf32> to vector<32xf32>
    %463 = vector.shape_cast %462 : vector<32xf32> to vector<1x32xf32>
    %cst_565 = arith.constant 3.200000e+01 : f32
    %464 = vector.broadcast %cst_565 : f32 to vector<1x32xf32>
    %465 = arith.divf %463, %464 : vector<1x32xf32>
    %466 = vector.broadcast %458 : vector<1x32xf32> to vector<32x32xf32>
    %467 = arith.subf %454, %466 : vector<32x32xf32>
    %cst_566 = arith.constant 9.99999974E-6 : f32
    %468 = vector.broadcast %cst_566 : f32 to vector<1x32xf32>
    %469 = arith.addf %465, %468 : vector<1x32xf32>
    %470 = math.rsqrt %469 : vector<1x32xf32>
    %471 = vector.broadcast %470 : vector<1x32xf32> to vector<32x32xf32>
    %472 = arith.mulf %467, %471 : vector<32x32xf32>
    %c0_567 = arith.constant 0 : index
    %c0_568 = arith.constant 0 : index
    %473 = vector.load %arg9[%c0_567, %c0_568] : memref<1x32xf32, #tpu.memory_space<vmem>>, vector<1x32xf32>
    %474 = vector.broadcast %473 : vector<1x32xf32> to vector<32x32xf32>
    %475 = arith.mulf %472, %474 : vector<32x32xf32>
    %c0_569 = arith.constant 0 : index
    %c0_570 = arith.constant 0 : index
    %476 = vector.load %arg10[%c0_569, %c0_570] : memref<1x32xf32, #tpu.memory_space<vmem>>, vector<1x32xf32>
    %477 = vector.broadcast %476 : vector<1x32xf32> to vector<32x32xf32>
    %478 = arith.addf %475, %477 : vector<32x32xf32>
    %cst_571 = arith.constant 0.000000e+00 : f32
    %479 = vector.broadcast %cst_571 : f32 to vector<32x32xf32>
    %480 = arith.maximumf %478, %479 : vector<32x32xf32>
    %c0_572 = arith.constant 0 : index
    %c0_573 = arith.constant 0 : index
    %481 = vector.load %arg26[%c0_572, %c0_573] : memref<32x32xf32, #tpu.memory_space<vmem>>, vector<32x32xf32>
    tpu.vector_store %arg26[%c0_572, %c0_573], %480 {strides = array<i32>} : memref<32x32xf32, #tpu.memory_space<vmem>>, vector<32x32xf32>,
    %c0_574 = arith.constant 0 : index
    %c0_575 = arith.constant 0 : index
    %482 = tpu.strided_load %arg26[%c0_574, %c0_575] {strides = array<i32: 2, 1>} : memref<32x32xf32, #tpu.memory_space<vmem>>, vector<2x32xf32>
    %c1_576 = arith.constant 1 : index
    %c0_577 = arith.constant 0 : index
    %483 = tpu.strided_load %arg26[%c1_576, %c0_577] {strides = array<i32: 2, 1>} : memref<32x32xf32, #tpu.memory_space<vmem>>, vector<2x32xf32>
    %c4_578 = arith.constant 4 : index
    %c0_579 = arith.constant 0 : index
    %484 = tpu.strided_load %arg26[%c4_578, %c0_579] {strides = array<i32: 2, 1>} : memref<32x32xf32, #tpu.memory_space<vmem>>, vector<2x32xf32>
    %c5 = arith.constant 5 : index
    %c0_580 = arith.constant 0 : index
    %485 = tpu.strided_load %arg26[%c5, %c0_580] {strides = array<i32: 2, 1>} : memref<32x32xf32, #tpu.memory_space<vmem>>, vector<2x32xf32>
    %486 = arith.maximumf %482, %483 : vector<2x32xf32>
    %487 = arith.maximumf %484, %485 : vector<2x32xf32>
    %488 = arith.maximumf %486, %487 : vector<2x32xf32>
    %c0_581 = arith.constant 0 : index
    %c0_582 = arith.constant 0 : index
    %489 = vector.load %arg27[%c0_581, %c0_582] : memref<8x32xf32, #tpu.memory_space<vmem>>, vector<2x32xf32>
    tpu.vector_store %arg27[%c0_581, %c0_582], %488 {strides = array<i32>} : memref<8x32xf32, #tpu.memory_space<vmem>>, vector<2x32xf32>,
    %c8_583 = arith.constant 8 : index
    %c0_584 = arith.constant 0 : index
    %490 = tpu.strided_load %arg26[%c8_583, %c0_584] {strides = array<i32: 2, 1>} : memref<32x32xf32, #tpu.memory_space<vmem>>, vector<2x32xf32>
    %c9_585 = arith.constant 9 : index
    %c0_586 = arith.constant 0 : index
    %491 = tpu.strided_load %arg26[%c9_585, %c0_586] {strides = array<i32: 2, 1>} : memref<32x32xf32, #tpu.memory_space<vmem>>, vector<2x32xf32>
    %c12_587 = arith.constant 12 : index
    %c0_588 = arith.constant 0 : index
    %492 = tpu.strided_load %arg26[%c12_587, %c0_588] {strides = array<i32: 2, 1>} : memref<32x32xf32, #tpu.memory_space<vmem>>, vector<2x32xf32>
    %c13_589 = arith.constant 13 : index
    %c0_590 = arith.constant 0 : index
    %493 = tpu.strided_load %arg26[%c13_589, %c0_590] {strides = array<i32: 2, 1>} : memref<32x32xf32, #tpu.memory_space<vmem>>, vector<2x32xf32>
    %494 = arith.maximumf %490, %491 : vector<2x32xf32>
    %495 = arith.maximumf %492, %493 : vector<2x32xf32>
    %496 = arith.maximumf %494, %495 : vector<2x32xf32>
    %c2_591 = arith.constant 2 : index
    %c0_592 = arith.constant 0 : index
    %497 = vector.load %arg27[%c2_591, %c0_592] : memref<8x32xf32, #tpu.memory_space<vmem>>, vector<2x32xf32>
    tpu.vector_store %arg27[%c2_591, %c0_592], %496 {strides = array<i32>} : memref<8x32xf32, #tpu.memory_space<vmem>>, vector<2x32xf32>,
    %c16_593 = arith.constant 16 : index
    %c0_594 = arith.constant 0 : index
    %498 = tpu.strided_load %arg26[%c16_593, %c0_594] {strides = array<i32: 2, 1>} : memref<32x32xf32, #tpu.memory_space<vmem>>, vector<2x32xf32>
    %c17_595 = arith.constant 17 : index
    %c0_596 = arith.constant 0 : index
    %499 = tpu.strided_load %arg26[%c17_595, %c0_596] {strides = array<i32: 2, 1>} : memref<32x32xf32, #tpu.memory_space<vmem>>, vector<2x32xf32>
    %c20_597 = arith.constant 20 : index
    %c0_598 = arith.constant 0 : index
    %500 = tpu.strided_load %arg26[%c20_597, %c0_598] {strides = array<i32: 2, 1>} : memref<32x32xf32, #tpu.memory_space<vmem>>, vector<2x32xf32>
    %c21_599 = arith.constant 21 : index
    %c0_600 = arith.constant 0 : index
    %501 = tpu.strided_load %arg26[%c21_599, %c0_600] {strides = array<i32: 2, 1>} : memref<32x32xf32, #tpu.memory_space<vmem>>, vector<2x32xf32>
    %502 = arith.maximumf %498, %499 : vector<2x32xf32>
    %503 = arith.maximumf %500, %501 : vector<2x32xf32>
    %504 = arith.maximumf %502, %503 : vector<2x32xf32>
    %c4_601 = arith.constant 4 : index
    %c0_602 = arith.constant 0 : index
    %505 = vector.load %arg27[%c4_601, %c0_602] : memref<8x32xf32, #tpu.memory_space<vmem>>, vector<2x32xf32>
    tpu.vector_store %arg27[%c4_601, %c0_602], %504 {strides = array<i32>} : memref<8x32xf32, #tpu.memory_space<vmem>>, vector<2x32xf32>,
    %c24_603 = arith.constant 24 : index
    %c0_604 = arith.constant 0 : index
    %506 = tpu.strided_load %arg26[%c24_603, %c0_604] {strides = array<i32: 2, 1>} : memref<32x32xf32, #tpu.memory_space<vmem>>, vector<2x32xf32>
    %c25_605 = arith.constant 25 : index
    %c0_606 = arith.constant 0 : index
    %507 = tpu.strided_load %arg26[%c25_605, %c0_606] {strides = array<i32: 2, 1>} : memref<32x32xf32, #tpu.memory_space<vmem>>, vector<2x32xf32>
    %c28_607 = arith.constant 28 : index
    %c0_608 = arith.constant 0 : index
    %508 = tpu.strided_load %arg26[%c28_607, %c0_608] {strides = array<i32: 2, 1>} : memref<32x32xf32, #tpu.memory_space<vmem>>, vector<2x32xf32>
    %c29 = arith.constant 29 : index
    %c0_609 = arith.constant 0 : index
    %509 = tpu.strided_load %arg26[%c29, %c0_609] {strides = array<i32: 2, 1>} : memref<32x32xf32, #tpu.memory_space<vmem>>, vector<2x32xf32>
    %510 = arith.maximumf %506, %507 : vector<2x32xf32>
    %511 = arith.maximumf %508, %509 : vector<2x32xf32>
    %512 = arith.maximumf %510, %511 : vector<2x32xf32>
    %c6_610 = arith.constant 6 : index
    %c0_611 = arith.constant 0 : index
    %513 = vector.load %arg27[%c6_610, %c0_611] : memref<8x32xf32, #tpu.memory_space<vmem>>, vector<2x32xf32>
    tpu.vector_store %arg27[%c6_610, %c0_611], %512 {strides = array<i32>} : memref<8x32xf32, #tpu.memory_space<vmem>>, vector<2x32xf32>,
    %cst_612 = arith.constant 0.000000e+00 : f32
    %514 = vector.broadcast %cst_612 : f32 to vector<32x32xf32>
    %c0_613 = arith.constant 0 : index
    %c0_614 = arith.constant 0 : index
    %515 = vector.load %arg28[%c0_613, %c0_614] : memref<32x32xf32, #tpu.memory_space<vmem>>, vector<32x32xf32>
    tpu.vector_store %arg28[%c0_613, %c0_614], %514 {strides = array<i32>} : memref<32x32xf32, #tpu.memory_space<vmem>>, vector<32x32xf32>,
    %c0_615 = arith.constant 0 : index
    %c0_616 = arith.constant 0 : index
    %516 = vector.load %arg27[%c0_615, %c0_616] : memref<8x32xf32, #tpu.memory_space<vmem>>, vector<2x32xf32>
    %c5_617 = arith.constant 5 : index
    %c0_618 = arith.constant 0 : index
    %517 = vector.load %arg28[%c5_617, %c0_618] : memref<32x32xf32, #tpu.memory_space<vmem>>, vector<2x32xf32>
    tpu.vector_store %arg28[%c5_617, %c0_618], %516 {strides = array<i32>} : memref<32x32xf32, #tpu.memory_space<vmem>>, vector<2x32xf32>,
    %c2_619 = arith.constant 2 : index
    %c0_620 = arith.constant 0 : index
    %518 = vector.load %arg27[%c2_619, %c0_620] : memref<8x32xf32, #tpu.memory_space<vmem>>, vector<2x32xf32>
    %c9_621 = arith.constant 9 : index
    %c0_622 = arith.constant 0 : index
    %519 = vector.load %arg28[%c9_621, %c0_622] : memref<32x32xf32, #tpu.memory_space<vmem>>, vector<2x32xf32>
    tpu.vector_store %arg28[%c9_621, %c0_622], %518 {strides = array<i32>} : memref<32x32xf32, #tpu.memory_space<vmem>>, vector<2x32xf32>,
    %c4_623 = arith.constant 4 : index
    %c0_624 = arith.constant 0 : index
    %520 = vector.load %arg27[%c4_623, %c0_624] : memref<8x32xf32, #tpu.memory_space<vmem>>, vector<2x32xf32>
    %c21_625 = arith.constant 21 : index
    %c0_626 = arith.constant 0 : index
    %521 = vector.load %arg28[%c21_625, %c0_626] : memref<32x32xf32, #tpu.memory_space<vmem>>, vector<2x32xf32>
    tpu.vector_store %arg28[%c21_625, %c0_626], %520 {strides = array<i32>} : memref<32x32xf32, #tpu.memory_space<vmem>>, vector<2x32xf32>,
    %c6_627 = arith.constant 6 : index
    %c0_628 = arith.constant 0 : index
    %522 = vector.load %arg27[%c6_627, %c0_628] : memref<8x32xf32, #tpu.memory_space<vmem>>, vector<2x32xf32>
    %c25_629 = arith.constant 25 : index
    %c0_630 = arith.constant 0 : index
    %523 = vector.load %arg28[%c25_629, %c0_630] : memref<32x32xf32, #tpu.memory_space<vmem>>, vector<2x32xf32>
    tpu.vector_store %arg28[%c25_629, %c0_630], %522 {strides = array<i32>} : memref<32x32xf32, #tpu.memory_space<vmem>>, vector<2x32xf32>,
    %cst_631 = arith.constant 0.000000e+00 : f32
    %524 = vector.broadcast %cst_631 : f32 to vector<22x64xf32>
    %c0_632 = arith.constant 0 : index
    %c0_633 = arith.constant 0 : index
    %525 = vector.load %arg28[%c0_632, %c0_633] : memref<32x32xf32, #tpu.memory_space<vmem>>, vector<22x32xf32>
    %526 = arith.truncf %525 : vector<22x32xf32> to vector<22x32xbf16>
    %c0_634 = arith.constant 0 : index
    %c0_635 = arith.constant 0 : index
    %c0_636 = arith.constant 0 : index
    %c0_637 = arith.constant 0 : index
    %527 = vector.load %arg11[%c0_634, %c0_635, %c0_636, %c0_637] : memref<3x3x32x64xbf16, #tpu.memory_space<vmem>>, vector<1x1x32x64xbf16>
    %528 = vector.shape_cast %527 : vector<1x1x32x64xbf16> to vector<32x64xbf16>
    %cst_638 = arith.constant dense<0.000000e+00> : vector<22x64xf32>
    %529 = tpu.matmul %526, %528, %cst_638 {dimension_numbers = #tpu.dot_dimension_numbers<[1], [0], [0], [1], [0, 0, 1, 1], [], []>} : vector<22x32xbf16>, vector<32x64xbf16>, vector<22x64xf32> -> vector<22x64xf32>
    %530 = arith.addf %524, %529 : vector<22x64xf32>
    %c1_639 = arith.constant 1 : index
    %c0_640 = arith.constant 0 : index
    %531 = vector.load %arg28[%c1_639, %c0_640] : memref<32x32xf32, #tpu.memory_space<vmem>>, vector<22x32xf32>
    %532 = arith.truncf %531 : vector<22x32xf32> to vector<22x32xbf16>
    %c0_641 = arith.constant 0 : index
    %c1_642 = arith.constant 1 : index
    %c0_643 = arith.constant 0 : index
    %c0_644 = arith.constant 0 : index
    %533 = vector.load %arg11[%c0_641, %c1_642, %c0_643, %c0_644] : memref<3x3x32x64xbf16, #tpu.memory_space<vmem>>, vector<1x1x32x64xbf16>
    %534 = vector.shape_cast %533 : vector<1x1x32x64xbf16> to vector<32x64xbf16>
    %cst_645 = arith.constant dense<0.000000e+00> : vector<22x64xf32>
    %535 = tpu.matmul %532, %534, %cst_645 {dimension_numbers = #tpu.dot_dimension_numbers<[1], [0], [0], [1], [0, 0, 1, 1], [], []>} : vector<22x32xbf16>, vector<32x64xbf16>, vector<22x64xf32> -> vector<22x64xf32>
    %536 = arith.addf %530, %535 : vector<22x64xf32>
    %c2_646 = arith.constant 2 : index
    %c0_647 = arith.constant 0 : index
    %537 = vector.load %arg28[%c2_646, %c0_647] : memref<32x32xf32, #tpu.memory_space<vmem>>, vector<22x32xf32>
    %538 = arith.truncf %537 : vector<22x32xf32> to vector<22x32xbf16>
    %c0_648 = arith.constant 0 : index
    %c2_649 = arith.constant 2 : index
    %c0_650 = arith.constant 0 : index
    %c0_651 = arith.constant 0 : index
    %539 = vector.load %arg11[%c0_648, %c2_649, %c0_650, %c0_651] : memref<3x3x32x64xbf16, #tpu.memory_space<vmem>>, vector<1x1x32x64xbf16>
    %540 = vector.shape_cast %539 : vector<1x1x32x64xbf16> to vector<32x64xbf16>
    %cst_652 = arith.constant dense<0.000000e+00> : vector<22x64xf32>
    %541 = tpu.matmul %538, %540, %cst_652 {dimension_numbers = #tpu.dot_dimension_numbers<[1], [0], [0], [1], [0, 0, 1, 1], [], []>} : vector<22x32xbf16>, vector<32x64xbf16>, vector<22x64xf32> -> vector<22x64xf32>
    %542 = arith.addf %536, %541 : vector<22x64xf32>
    %c4_653 = arith.constant 4 : index
    %c0_654 = arith.constant 0 : index
    %543 = vector.load %arg28[%c4_653, %c0_654] : memref<32x32xf32, #tpu.memory_space<vmem>>, vector<22x32xf32>
    %544 = arith.truncf %543 : vector<22x32xf32> to vector<22x32xbf16>
    %c1_655 = arith.constant 1 : index
    %c0_656 = arith.constant 0 : index
    %c0_657 = arith.constant 0 : index
    %c0_658 = arith.constant 0 : index
    %545 = vector.load %arg11[%c1_655, %c0_656, %c0_657, %c0_658] : memref<3x3x32x64xbf16, #tpu.memory_space<vmem>>, vector<1x1x32x64xbf16>
    %546 = vector.shape_cast %545 : vector<1x1x32x64xbf16> to vector<32x64xbf16>
    %cst_659 = arith.constant dense<0.000000e+00> : vector<22x64xf32>
    %547 = tpu.matmul %544, %546, %cst_659 {dimension_numbers = #tpu.dot_dimension_numbers<[1], [0], [0], [1], [0, 0, 1, 1], [], []>} : vector<22x32xbf16>, vector<32x64xbf16>, vector<22x64xf32> -> vector<22x64xf32>
    %548 = arith.addf %542, %547 : vector<22x64xf32>
    %c5_660 = arith.constant 5 : index
    %c0_661 = arith.constant 0 : index
    %549 = vector.load %arg28[%c5_660, %c0_661] : memref<32x32xf32, #tpu.memory_space<vmem>>, vector<22x32xf32>
    %550 = arith.truncf %549 : vector<22x32xf32> to vector<22x32xbf16>
    %c1_662 = arith.constant 1 : index
    %c1_663 = arith.constant 1 : index
    %c0_664 = arith.constant 0 : index
    %c0_665 = arith.constant 0 : index
    %551 = vector.load %arg11[%c1_662, %c1_663, %c0_664, %c0_665] : memref<3x3x32x64xbf16, #tpu.memory_space<vmem>>, vector<1x1x32x64xbf16>
    %552 = vector.shape_cast %551 : vector<1x1x32x64xbf16> to vector<32x64xbf16>
    %cst_666 = arith.constant dense<0.000000e+00> : vector<22x64xf32>
    %553 = tpu.matmul %550, %552, %cst_666 {dimension_numbers = #tpu.dot_dimension_numbers<[1], [0], [0], [1], [0, 0, 1, 1], [], []>} : vector<22x32xbf16>, vector<32x64xbf16>, vector<22x64xf32> -> vector<22x64xf32>
    %554 = arith.addf %548, %553 : vector<22x64xf32>
    %c6_667 = arith.constant 6 : index
    %c0_668 = arith.constant 0 : index
    %555 = vector.load %arg28[%c6_667, %c0_668] : memref<32x32xf32, #tpu.memory_space<vmem>>, vector<22x32xf32>
    %556 = arith.truncf %555 : vector<22x32xf32> to vector<22x32xbf16>
    %c1_669 = arith.constant 1 : index
    %c2_670 = arith.constant 2 : index
    %c0_671 = arith.constant 0 : index
    %c0_672 = arith.constant 0 : index
    %557 = vector.load %arg11[%c1_669, %c2_670, %c0_671, %c0_672] : memref<3x3x32x64xbf16, #tpu.memory_space<vmem>>, vector<1x1x32x64xbf16>
    %558 = vector.shape_cast %557 : vector<1x1x32x64xbf16> to vector<32x64xbf16>
    %cst_673 = arith.constant dense<0.000000e+00> : vector<22x64xf32>
    %559 = tpu.matmul %556, %558, %cst_673 {dimension_numbers = #tpu.dot_dimension_numbers<[1], [0], [0], [1], [0, 0, 1, 1], [], []>} : vector<22x32xbf16>, vector<32x64xbf16>, vector<22x64xf32> -> vector<22x64xf32>
    %560 = arith.addf %554, %559 : vector<22x64xf32>
    %c8_674 = arith.constant 8 : index
    %c0_675 = arith.constant 0 : index
    %561 = vector.load %arg28[%c8_674, %c0_675] : memref<32x32xf32, #tpu.memory_space<vmem>>, vector<22x32xf32>
    %562 = arith.truncf %561 : vector<22x32xf32> to vector<22x32xbf16>
    %c2_676 = arith.constant 2 : index
    %c0_677 = arith.constant 0 : index
    %c0_678 = arith.constant 0 : index
    %c0_679 = arith.constant 0 : index
    %563 = vector.load %arg11[%c2_676, %c0_677, %c0_678, %c0_679] : memref<3x3x32x64xbf16, #tpu.memory_space<vmem>>, vector<1x1x32x64xbf16>
    %564 = vector.shape_cast %563 : vector<1x1x32x64xbf16> to vector<32x64xbf16>
    %cst_680 = arith.constant dense<0.000000e+00> : vector<22x64xf32>
    %565 = tpu.matmul %562, %564, %cst_680 {dimension_numbers = #tpu.dot_dimension_numbers<[1], [0], [0], [1], [0, 0, 1, 1], [], []>} : vector<22x32xbf16>, vector<32x64xbf16>, vector<22x64xf32> -> vector<22x64xf32>
    %566 = arith.addf %560, %565 : vector<22x64xf32>
    %c9_681 = arith.constant 9 : index
    %c0_682 = arith.constant 0 : index
    %567 = vector.load %arg28[%c9_681, %c0_682] : memref<32x32xf32, #tpu.memory_space<vmem>>, vector<22x32xf32>
    %568 = arith.truncf %567 : vector<22x32xf32> to vector<22x32xbf16>
    %c2_683 = arith.constant 2 : index
    %c1_684 = arith.constant 1 : index
    %c0_685 = arith.constant 0 : index
    %c0_686 = arith.constant 0 : index
    %569 = vector.load %arg11[%c2_683, %c1_684, %c0_685, %c0_686] : memref<3x3x32x64xbf16, #tpu.memory_space<vmem>>, vector<1x1x32x64xbf16>
    %570 = vector.shape_cast %569 : vector<1x1x32x64xbf16> to vector<32x64xbf16>
    %cst_687 = arith.constant dense<0.000000e+00> : vector<22x64xf32>
    %571 = tpu.matmul %568, %570, %cst_687 {dimension_numbers = #tpu.dot_dimension_numbers<[1], [0], [0], [1], [0, 0, 1, 1], [], []>} : vector<22x32xbf16>, vector<32x64xbf16>, vector<22x64xf32> -> vector<22x64xf32>
    %572 = arith.addf %566, %571 : vector<22x64xf32>
    %c10_688 = arith.constant 10 : index
    %c0_689 = arith.constant 0 : index
    %573 = vector.load %arg28[%c10_688, %c0_689] : memref<32x32xf32, #tpu.memory_space<vmem>>, vector<22x32xf32>
    %574 = arith.truncf %573 : vector<22x32xf32> to vector<22x32xbf16>
    %c2_690 = arith.constant 2 : index
    %c2_691 = arith.constant 2 : index
    %c0_692 = arith.constant 0 : index
    %c0_693 = arith.constant 0 : index
    %575 = vector.load %arg11[%c2_690, %c2_691, %c0_692, %c0_693] : memref<3x3x32x64xbf16, #tpu.memory_space<vmem>>, vector<1x1x32x64xbf16>
    %576 = vector.shape_cast %575 : vector<1x1x32x64xbf16> to vector<32x64xbf16>
    %cst_694 = arith.constant dense<0.000000e+00> : vector<22x64xf32>
    %577 = tpu.matmul %574, %576, %cst_694 {dimension_numbers = #tpu.dot_dimension_numbers<[1], [0], [0], [1], [0, 0, 1, 1], [], []>} : vector<22x32xbf16>, vector<32x64xbf16>, vector<22x64xf32> -> vector<22x64xf32>
    %578 = arith.addf %572, %577 : vector<22x64xf32>
    %c0_695 = arith.constant 0 : index
    %c0_696 = arith.constant 0 : index
    %579 = vector.load %arg29[%c0_695, %c0_696] : memref<22x64xf32, #tpu.memory_space<vmem>>, vector<22x64xf32>
    tpu.vector_store %arg29[%c0_695, %c0_696], %578 {strides = array<i32>} : memref<22x64xf32, #tpu.memory_space<vmem>>, vector<22x64xf32>,
    %c0_697 = arith.constant 0 : index
    %c0_698 = arith.constant 0 : index
    %580 = vector.load %arg29[%c0_697, %c0_698] : memref<22x64xf32, #tpu.memory_space<vmem>>, vector<2x64xf32>
    %c0_699 = arith.constant 0 : index
    %c0_700 = arith.constant 0 : index
    %581 = vector.load %arg30[%c0_699, %c0_700] : memref<8x64xf32, #tpu.memory_space<vmem>>, vector<2x64xf32>
    tpu.vector_store %arg30[%c0_699, %c0_700], %580 {strides = array<i32>} : memref<8x64xf32, #tpu.memory_space<vmem>>, vector<2x64xf32>,
    %c4_701 = arith.constant 4 : index
    %c0_702 = arith.constant 0 : index
    %582 = vector.load %arg29[%c4_701, %c0_702] : memref<22x64xf32, #tpu.memory_space<vmem>>, vector<2x64xf32>
    %c2_703 = arith.constant 2 : index
    %c0_704 = arith.constant 0 : index
    %583 = vector.load %arg30[%c2_703, %c0_704] : memref<8x64xf32, #tpu.memory_space<vmem>>, vector<2x64xf32>
    tpu.vector_store %arg30[%c2_703, %c0_704], %582 {strides = array<i32>} : memref<8x64xf32, #tpu.memory_space<vmem>>, vector<2x64xf32>,
    %c16_705 = arith.constant 16 : index
    %c0_706 = arith.constant 0 : index
    %584 = vector.load %arg29[%c16_705, %c0_706] : memref<22x64xf32, #tpu.memory_space<vmem>>, vector<2x64xf32>
    %c4_707 = arith.constant 4 : index
    %c0_708 = arith.constant 0 : index
    %585 = vector.load %arg30[%c4_707, %c0_708] : memref<8x64xf32, #tpu.memory_space<vmem>>, vector<2x64xf32>
    tpu.vector_store %arg30[%c4_707, %c0_708], %584 {strides = array<i32>} : memref<8x64xf32, #tpu.memory_space<vmem>>, vector<2x64xf32>,
    %c20_709 = arith.constant 20 : index
    %c0_710 = arith.constant 0 : index
    %586 = vector.load %arg29[%c20_709, %c0_710] : memref<22x64xf32, #tpu.memory_space<vmem>>, vector<2x64xf32>
    %c6_711 = arith.constant 6 : index
    %c0_712 = arith.constant 0 : index
    %587 = vector.load %arg30[%c6_711, %c0_712] : memref<8x64xf32, #tpu.memory_space<vmem>>, vector<2x64xf32>
    tpu.vector_store %arg30[%c6_711, %c0_712], %586 {strides = array<i32>} : memref<8x64xf32, #tpu.memory_space<vmem>>, vector<2x64xf32>,
    %c0_713 = arith.constant 0 : index
    %c0_714 = arith.constant 0 : index
    %588 = vector.load %arg30[%c0_713, %c0_714] : memref<8x64xf32, #tpu.memory_space<vmem>>, vector<8x64xf32>
    %cst_715 = arith.constant dense<0.000000e+00> : vector<64xf32>
    %589 = vector.multi_reduction <add>, %588, %cst_715 [0] : vector<8x64xf32> to vector<64xf32>
    %590 = vector.shape_cast %589 : vector<64xf32> to vector<1x64xf32>
    %cst_716 = arith.constant 8.000000e+00 : f32
    %591 = vector.broadcast %cst_716 : f32 to vector<1x64xf32>
    %592 = arith.divf %590, %591 : vector<1x64xf32>
    %593 = vector.broadcast %592 : vector<1x64xf32> to vector<8x64xf32>
    %594 = arith.subf %588, %593 : vector<8x64xf32>
    %595 = arith.mulf %594, %594 : vector<8x64xf32>
    %cst_717 = arith.constant dense<0.000000e+00> : vector<64xf32>
    %596 = vector.multi_reduction <add>, %595, %cst_717 [0] : vector<8x64xf32> to vector<64xf32>
    %597 = vector.shape_cast %596 : vector<64xf32> to vector<1x64xf32>
    %cst_718 = arith.constant 8.000000e+00 : f32
    %598 = vector.broadcast %cst_718 : f32 to vector<1x64xf32>
    %599 = arith.divf %597, %598 : vector<1x64xf32>
    %600 = vector.broadcast %592 : vector<1x64xf32> to vector<8x64xf32>
    %601 = arith.subf %588, %600 : vector<8x64xf32>
    %cst_719 = arith.constant 9.99999974E-6 : f32
    %602 = vector.broadcast %cst_719 : f32 to vector<1x64xf32>
    %603 = arith.addf %599, %602 : vector<1x64xf32>
    %604 = math.rsqrt %603 : vector<1x64xf32>
    %605 = vector.broadcast %604 : vector<1x64xf32> to vector<8x64xf32>
    %606 = arith.mulf %601, %605 : vector<8x64xf32>
    %c0_720 = arith.constant 0 : index
    %c0_721 = arith.constant 0 : index
    %607 = vector.load %arg12[%c0_720, %c0_721] : memref<1x64xf32, #tpu.memory_space<vmem>>, vector<1x64xf32>
    %608 = vector.broadcast %607 : vector<1x64xf32> to vector<8x64xf32>
    %609 = arith.mulf %606, %608 : vector<8x64xf32>
    %c0_722 = arith.constant 0 : index
    %c0_723 = arith.constant 0 : index
    %610 = vector.load %arg13[%c0_722, %c0_723] : memref<1x64xf32, #tpu.memory_space<vmem>>, vector<1x64xf32>
    %611 = vector.broadcast %610 : vector<1x64xf32> to vector<8x64xf32>
    %612 = arith.addf %609, %611 : vector<8x64xf32>
    %cst_724 = arith.constant 0.000000e+00 : f32
    %613 = vector.broadcast %cst_724 : f32 to vector<8x64xf32>
    %614 = arith.maximumf %612, %613 : vector<8x64xf32>
    %c0_725 = arith.constant 0 : index
    %c0_726 = arith.constant 0 : index
    %615 = vector.load %arg30[%c0_725, %c0_726] : memref<8x64xf32, #tpu.memory_space<vmem>>, vector<8x64xf32>
    tpu.vector_store %arg30[%c0_725, %c0_726], %614 {strides = array<i32>} : memref<8x64xf32, #tpu.memory_space<vmem>>, vector<8x64xf32>,
    %c0_727 = arith.constant 0 : index
    %c0_728 = arith.constant 0 : index
    %616 = tpu.strided_load %arg30[%c0_727, %c0_728] {strides = array<i32: 2, 1>} : memref<8x64xf32, #tpu.memory_space<vmem>>, vector<1x64xf32>
    %c1_729 = arith.constant 1 : index
    %c0_730 = arith.constant 0 : index
    %617 = tpu.strided_load %arg30[%c1_729, %c0_730] {strides = array<i32: 2, 1>} : memref<8x64xf32, #tpu.memory_space<vmem>>, vector<1x64xf32>
    %c2_731 = arith.constant 2 : index
    %c0_732 = arith.constant 0 : index
    %618 = tpu.strided_load %arg30[%c2_731, %c0_732] {strides = array<i32: 2, 1>} : memref<8x64xf32, #tpu.memory_space<vmem>>, vector<1x64xf32>
    %c3 = arith.constant 3 : index
    %c0_733 = arith.constant 0 : index
    %619 = tpu.strided_load %arg30[%c3, %c0_733] {strides = array<i32: 2, 1>} : memref<8x64xf32, #tpu.memory_space<vmem>>, vector<1x64xf32>
    %620 = arith.addf %616, %617 : vector<1x64xf32>
    %621 = arith.addf %620, %618 : vector<1x64xf32>
    %622 = arith.addf %621, %619 : vector<1x64xf32>
    %cst_734 = arith.constant 2.500000e-01 : f32
    %623 = vector.broadcast %cst_734 : f32 to vector<1x64xf32>
    %624 = arith.mulf %622, %623 : vector<1x64xf32>
    %c0_735 = arith.constant 0 : index
    %c0_736 = arith.constant 0 : index
    %625 = vector.load %arg31[%c0_735, %c0_736] : memref<2x64xf32, #tpu.memory_space<vmem>>, vector<1x64xf32>
    tpu.vector_store %arg31[%c0_735, %c0_736], %624 {strides = array<i32>} : memref<2x64xf32, #tpu.memory_space<vmem>>, vector<1x64xf32>,
    %c4_737 = arith.constant 4 : index
    %c0_738 = arith.constant 0 : index
    %626 = tpu.strided_load %arg30[%c4_737, %c0_738] {strides = array<i32: 2, 1>} : memref<8x64xf32, #tpu.memory_space<vmem>>, vector<1x64xf32>
    %c5_739 = arith.constant 5 : index
    %c0_740 = arith.constant 0 : index
    %627 = tpu.strided_load %arg30[%c5_739, %c0_740] {strides = array<i32: 2, 1>} : memref<8x64xf32, #tpu.memory_space<vmem>>, vector<1x64xf32>
    %c6_741 = arith.constant 6 : index
    %c0_742 = arith.constant 0 : index
    %628 = tpu.strided_load %arg30[%c6_741, %c0_742] {strides = array<i32: 2, 1>} : memref<8x64xf32, #tpu.memory_space<vmem>>, vector<1x64xf32>
    %c7_743 = arith.constant 7 : index
    %c0_744 = arith.constant 0 : index
    %629 = tpu.strided_load %arg30[%c7_743, %c0_744] {strides = array<i32: 2, 1>} : memref<8x64xf32, #tpu.memory_space<vmem>>, vector<1x64xf32>
    %630 = arith.addf %626, %627 : vector<1x64xf32>
    %631 = arith.addf %630, %628 : vector<1x64xf32>
    %632 = arith.addf %631, %629 : vector<1x64xf32>
    %cst_745 = arith.constant 2.500000e-01 : f32
    %633 = vector.broadcast %cst_745 : f32 to vector<1x64xf32>
    %634 = arith.mulf %632, %633 : vector<1x64xf32>
    %c1_746 = arith.constant 1 : index
    %c0_747 = arith.constant 0 : index
    %635 = vector.load %arg31[%c1_746, %c0_747] : memref<2x64xf32, #tpu.memory_space<vmem>>, vector<1x64xf32>
    tpu.vector_store %arg31[%c1_746, %c0_747], %634 {strides = array<i32>} : memref<2x64xf32, #tpu.memory_space<vmem>>, vector<1x64xf32>,
    %c0_748 = arith.constant 0 : index
    %c0_749 = arith.constant 0 : index
    %636 = vector.load %arg31[%c0_748, %c0_749] : memref<2x64xf32, #tpu.memory_space<vmem>>, vector<2x64xf32>
    %637 = arith.truncf %636 : vector<2x64xf32> to vector<2x64xbf16>
    %c0_750 = arith.constant 0 : index
    %c0_751 = arith.constant 0 : index
    %638 = vector.load %arg14[%c0_750, %c0_751] : memref<64x10xbf16, #tpu.memory_space<vmem>>, vector<64x10xbf16>
    %cst_752 = arith.constant dense<0.000000e+00> : vector<2x10xf32>
    %639 = tpu.matmul %637, %638, %cst_752 {dimension_numbers = #tpu.dot_dimension_numbers<[1], [0], [0], [1], [0, 0, 1, 1], [], []>} : vector<2x64xbf16>, vector<64x10xbf16>, vector<2x10xf32> -> vector<2x10xf32>
    %c0_753 = arith.constant 0 : index
    %c0_754 = arith.constant 0 : index
    %640 = vector.load %arg15[%c0_753, %c0_754] : memref<1x10xf32, #tpu.memory_space<vmem>>, vector<1x10xf32>
    %641 = vector.broadcast %640 : vector<1x10xf32> to vector<2x10xf32>
    %642 = arith.addf %639, %641 : vector<2x10xf32>
    %c0_755 = arith.constant 0 : index
    %c0_756 = arith.constant 0 : index
    %643 = vector.load %arg16[%c0_755, %c0_756] : memref<2x10xf32, #tpu.memory_space<vmem>>, vector<2x10xf32>
    tpu.vector_store %arg16[%c0_755, %c0_756], %642 {strides = array<i32>} : memref<2x10xf32, #tpu.memory_space<vmem>>, vector<2x10xf32>,
    return
  }
  func.func @transform_0(%arg0: i32) -> (i32, i32) {
    %c0_i32 = arith.constant 0 : i32
    %c0_i32_0 = arith.constant 0 : i32
    %c0_i32_1 = arith.constant 0 : i32
    return %c0_i32, %c0_i32_0 : i32, i32
  }
  func.func @transform_1(%arg0: i32) -> (i32, i32, i32, i32) {
    %c0_i32 = arith.constant 0 : i32
    %c0_i32_0 = arith.constant 0 : i32
    %c0_i32_1 = arith.constant 0 : i32
    %c0_i32_2 = arith.constant 0 : i32
    %c0_i32_3 = arith.constant 0 : i32
    return %c0_i32, %c0_i32_0, %c0_i32_1, %c0_i32_2 : i32, i32, i32, i32
  }
  func.func @transform_2(%arg0: i32) -> (i32, i32) {
    %c0_i32 = arith.constant 0 : i32
    %c0_i32_0 = arith.constant 0 : i32
    %c0_i32_1 = arith.constant 0 : i32
    return %c0_i32, %c0_i32_0 : i32, i32
  }
  func.func @transform_3(%arg0: i32) -> (i32, i32) {
    %c0_i32 = arith.constant 0 : i32
    %c0_i32_0 = arith.constant 0 : i32
    %c0_i32_1 = arith.constant 0 : i32
    return %c0_i32, %c0_i32_0 : i32, i32
  }
  func.func @transform_4(%arg0: i32) -> (i32, i32, i32, i32) {
    %c0_i32 = arith.constant 0 : i32
    %c0_i32_0 = arith.constant 0 : i32
    %c0_i32_1 = arith.constant 0 : i32
    %c0_i32_2 = arith.constant 0 : i32
    %c0_i32_3 = arith.constant 0 : i32
    return %c0_i32, %c0_i32_0, %c0_i32_1, %c0_i32_2 : i32, i32, i32, i32
  }
  func.func @transform_5(%arg0: i32) -> (i32, i32) {
    %c0_i32 = arith.constant 0 : i32
    %c0_i32_0 = arith.constant 0 : i32
    %c0_i32_1 = arith.constant 0 : i32
    return %c0_i32, %c0_i32_0 : i32, i32
  }
  func.func @transform_6(%arg0: i32) -> (i32, i32) {
    %c0_i32 = arith.constant 0 : i32
    %c0_i32_0 = arith.constant 0 : i32
    %c0_i32_1 = arith.constant 0 : i32
    return %c0_i32, %c0_i32_0 : i32, i32
  }
  func.func @transform_7(%arg0: i32) -> (i32, i32, i32, i32) {
    %c0_i32 = arith.constant 0 : i32
    %c0_i32_0 = arith.constant 0 : i32
    %c0_i32_1 = arith.constant 0 : i32
    %c0_i32_2 = arith.constant 0 : i32
    %c0_i32_3 = arith.constant 0 : i32
    return %c0_i32, %c0_i32_0, %c0_i32_1, %c0_i32_2 : i32, i32, i32, i32
  }
  func.func @transform_8(%arg0: i32) -> (i32, i32) {
    %c0_i32 = arith.constant 0 : i32
    %c0_i32_0 = arith.constant 0 : i32
    %c0_i32_1 = arith.constant 0 : i32
    return %c0_i32, %c0_i32_0 : i32, i32
  }
  func.func @transform_9(%arg0: i32) -> (i32, i32) {
    %c0_i32 = arith.constant 0 : i32
    %c0_i32_0 = arith.constant 0 : i32
    %c0_i32_1 = arith.constant 0 : i32
    return %c0_i32, %c0_i32_0 : i32, i32
  }
  func.func @transform_10(%arg0: i32) -> (i32, i32, i32, i32) {
    %c0_i32 = arith.constant 0 : i32
    %c0_i32_0 = arith.constant 0 : i32
    %c0_i32_1 = arith.constant 0 : i32
    %c0_i32_2 = arith.constant 0 : i32
    %c0_i32_3 = arith.constant 0 : i32
    return %c0_i32, %c0_i32_0, %c0_i32_1, %c0_i32_2 : i32, i32, i32, i32
  }
  func.func @transform_11(%arg0: i32) -> (i32, i32) {
    %c0_i32 = arith.constant 0 : i32
    %c0_i32_0 = arith.constant 0 : i32
    %c0_i32_1 = arith.constant 0 : i32
    return %c0_i32, %c0_i32_0 : i32, i32
  }
  func.func @transform_12(%arg0: i32) -> (i32, i32) {
    %c0_i32 = arith.constant 0 : i32
    %c0_i32_0 = arith.constant 0 : i32
    %c0_i32_1 = arith.constant 0 : i32
    return %c0_i32, %c0_i32_0 : i32, i32
  }
  func.func @transform_13(%arg0: i32) -> (i32, i32) {
    %c0_i32 = arith.constant 0 : i32
    %c0_i32_0 = arith.constant 0 : i32
    %c0_i32_1 = arith.constant 0 : i32
    return %c0_i32, %c0_i32_0 : i32, i32
  }
  func.func @transform_14(%arg0: i32) -> (i32, i32) {
    %c0_i32 = arith.constant 0 : i32
    %c0_i32_0 = arith.constant 0 : i32
    %c0_i32_1 = arith.constant 0 : i32
    return %c0_i32, %c0_i32_0 : i32, i32
  }
  func.func @transform_15(%arg0: i32) -> (i32, i32) {
    %c0_i32 = arith.constant 0 : i32
    %c0_i32_0 = arith.constant 0 : i32
    %c0_i32_1 = arith.constant 0 : i32
    return %c0_i32, %c0_i32_0 : i32, i32
  }
}

</mosaic_0001>

<bundles_post_ra>
// kernel: forward.1
= control target key start
LH: loop header
LB: loop body
LE: loop exit
PB: predicated region body
PF: predicated region fallthrough
CT: control target
= control target key end

     0   :  { %vm219_vm0 = vcmask 1040384   ;;  %vm220_vm1 = vcmask 1041408   ;;  %vm52_vm2 = vcmask 23552   ;;  %v8286_v1 = vmov 65535   ;;  %s10448_s0 = inlined_call_operand.vmem [shape: f32[128,3], index: 0, kind: input, shape index: {}]   ;;  %s10449_s1 = inlined_call_operand.vmem [shape: bf16[3,3,3,16], index: 1, kind: input, shape index: {}]   ;;  %s10450_s2 = inlined_call_operand.vmem [shape: f32[1,16], index: 2, kind: input, shape index: {}]   ;;  %s10451_s3 = inlined_call_operand.vmem [shape: f32[1,16], index: 3, kind: input, shape index: {}]   ;;  %s10452_s4 = inlined_call_operand.vmem [shape: bf16[3,3,16,16], index: 4, kind: input, shape index: {}]   ;;  %s10453_s5 = inlined_call_operand.vmem [shape: f32[1,16], index: 5, kind: input, shape index: {}]   ;;  %s10454_s6 = inlined_call_operand.vmem [shape: f32[1,16], index: 6, kind: input, shape index: {}]   ;;  %s10455_s7 = inlined_call_operand.vmem [shape: bf16[3,3,16,32], index: 7, kind: input, shape index: {}]   ;;  %s10456_s8 = inlined_call_operand.vmem [shape: f32[1,32], index: 8, kind: input, shape index: {}]   ;;  %s10457_s9 = inlined_call_operand.vmem [shape: f32[1,32], index: 9, kind: input, shape index: {}]   ;;  %s10458_s10 = inlined_call_operand.vmem [shape: bf16[3,3,32,64], index: 10, kind: input, shape index: {}]   ;;  %s10459_s11 = inlined_call_operand.vmem [shape: f32[1,64], index: 11, kind: input, shape index: {}]   ;;  %s10460_s12 = inlined_call_operand.vmem [shape: f32[1,64], index: 12, kind: input, shape index: {}]   ;;  %s10461_s13 = inlined_call_operand.vmem [shape: bf16[64,10], index: 13, kind: input, shape index: {}]   ;;  %s10462_s14 = inlined_call_operand.vmem [shape: f32[1,10], index: 14, kind: input, shape index: {}]   ;;  %s10463_s15 = inlined_call_operand.hbm [shape: f32[2,10], index: 15, kind: output, shape index: {}]  }
   0x1   :  { %v6858_v0 = vld [vmem:[%s10449_s1 + $0x2] sm:$0x3]  ;;  %v221_v2 = vsel %vm219_vm0, 4294967295, %v8286_v1  ;;  %v145_v3 = vld [vmem:[%s10449_s1] sm:$0x3]  ;;  %v80_v5 = vld [vmem:[%s10448_s0 + $0x8] sm:$0xff] }
   0x2   :  { %v78_v4 = vld [vmem:[%s10448_s0] sm:$0xff]  ;;  %v8382_v6 = vsel %vm220_vm1, %v221_v2, 0  ;;  %v10464_v7 = vmov 0.0   ;;  %v82_v9 = vld [vmem:[%s10448_s0 + $0x10] sm:$0xff]  ;;  %v84_v10 = vld [vmem:[%s10448_s0 + $0x18] sm:$0xff] }
   0x3   :  { %53 = vst.msk [vmem:[#allocation2] sm:$0xff] %vm52_vm2, %v10464_v7  ;;  %54 = vst.msk [vmem:[#allocation2 + $0x8] sm:$0xff] %vm52_vm2, %v10464_v7  ;;  %v6883_v8 = vld [vmem:[%s10449_s1 + $0x4] sm:$0x3]  ;;  %v224_v11 = vand.u32 %v6858_v0, %v8382_v6  ;;  %v391_v12 = vand.u32 %v8382_v6, %v145_v3  ;;  %v88_v15 = vld [vmem:[%s10448_s0 + $0x28] sm:$0xff] }
   0x4   :  { %55 = vst.msk [vmem:[#allocation2 + $0x10] sm:$0xff] %vm52_vm2, %v10464_v7  ;;  %56 = vst.msk [vmem:[#allocation2 + $0x18] sm:$0xff] %vm52_vm2, %v10464_v7  ;;  %v8447_v13 = vand.u32 %v6883_v8, %v8382_v6  ;;  %v86_v14 = vld [vmem:[%s10448_s0 + $0x20] sm:$0xff]  ;;  %v90_v16 = vld [vmem:[%s10448_s0 + $0x30] sm:$0xff] }
   0x5   :  { %57 = vst.msk [vmem:[#allocation2 + $0x20] sm:$0xff] %vm52_vm2, %v10464_v7  ;;  %58 = vst.msk [vmem:[#allocation2 + $0x28] sm:$0xff] %vm52_vm2, %v10464_v7  ;;  %v92_v17 = vld [vmem:[%s10448_s0 + $0x38] sm:$0xff]  ;;  %v94_v18 = vld [vmem:[%s10448_s0 + $0x40] sm:$0xff]  ;;  %7570 = vmatprep.subr.bf16.mxu0 %v224_v11  ;;  %7596 = vmatprep.subr.bf16.mxu1 %v391_v12 }
   0x6   :  { %59 = vst.msk [vmem:[#allocation2 + $0x30] sm:$0xff] %vm52_vm2, %v10464_v7  ;;  %60 = vst.msk [vmem:[#allocation2 + $0x38] sm:$0xff] %vm52_vm2, %v10464_v7  ;;  %v96_v19 = vld [vmem:[%s10448_s0 + $0x48] sm:$0xff]  ;;  %v98_v20 = vld [vmem:[%s10448_s0 + $0x50] sm:$0xff]  ;;  %7571 = vmatpush3.bf16.msra.mxu0 %v224_v11  ;;  %7597 = vmatpush3.bf16.msra.mxu1 %v391_v12 }
   0x7   :  { %61 = vst.msk [vmem:[#allocation2 + $0x40] sm:$0xff] %vm52_vm2, %v10464_v7  ;;  %62 = vst.msk [vmem:[#allocation2 + $0x48] sm:$0xff] %vm52_vm2, %v10464_v7  ;;  %v100_v21 = vld [vmem:[%s10448_s0 + $0x58] sm:$0xff]  ;;  %v102_v22 = vld [vmem:[%s10448_s0 + $0x60] sm:$0xff]  ;;  %7622 = vmatprep.subr.bf16.mxu0 %v8447_v13 }
   0x8   :  { %63 = vst.msk [vmem:[#allocation2 + $0x50] sm:$0xff] %vm52_vm2, %v10464_v7  ;;  %64 = vst.msk [vmem:[#allocation2 + $0x58] sm:$0xff] %vm52_vm2, %v10464_v7  ;;  %v104_v23 = vld [vmem:[%s10448_s0 + $0x68] sm:$0xff]  ;;  %v106_v24 = vld [vmem:[%s10448_s0 + $0x70] sm:$0xff] }
   0x9   :  { %65 = vst.msk [vmem:[#allocation2 + $0x60] sm:$0xff] %vm52_vm2, %v10464_v7  ;;  %66 = vst.msk [vmem:[#allocation2 + $0x68] sm:$0xff] %vm52_vm2, %v10464_v7  ;;  %v6896_v25 = vld [vmem:[%s10449_s1 + $0x6] sm:$0x3]  ;;  %v108_v27 = vld [vmem:[%s10448_s0 + $0x78] sm:$0xff] }
   0xa   :  { %67 = vst.msk [vmem:[#allocation2 + $0x70] sm:$0xff] %vm52_vm2, %v10464_v7  ;;  %68 = vst.msk [vmem:[#allocation2 + $0x78] sm:$0xff] %vm52_vm2, %v10464_v7  ;;  %v822_v26 = vand.u32 %v6896_v25, %v8382_v6  ;;  %v6909_v28 = vld [vmem:[%s10449_s1 + $0x8] sm:$0x3]  ;;  %v110_v30 = vld [vmem:[#allocation2] sm:$0xff] }
   0xb   :  { %69 = vst.msk [vmem:[#allocation2 + $0x80] sm:$0xff] %vm52_vm2, %v10464_v7  ;;  %70 = vst.msk [vmem:[#allocation2 + $0x88] sm:$0xff] %vm52_vm2, %v10464_v7  ;;  %v146_v29 = vld [vmem:[#allocation2 + $0x1] sm:$0xff]  ;;  %v6922_v31 = vld [vmem:[%s10449_s1 + $0xa] sm:$0x3]  ;;  %v8514_v47 = vand.u32 %v6909_v28, %v8382_v6 }
   0xc   :  { %71 = vst.msk [vmem:[#allocation2 + $0x90] sm:$0xff] %vm52_vm2, %v10464_v7  ;;  %72 = vst.msk [vmem:[#allocation2 + $0x98] sm:$0xff] %vm52_vm2, %v10464_v7  ;;  %7648 = vmatprep.subr.bf16.mxu1 %v822_v26  ;;  %v8517_v48 = vand.u32 %v6922_v31, %v8382_v6 }
   0xd   :  { %73 = vst.msk [vmem:[#allocation2 + $0xa0] sm:$0xff] %vm52_vm2, %v10464_v7  ;;  %74 = vst.msk [vmem:[#allocation2 + $0xa8] sm:$0xff] %vm52_vm2, %v10464_v7 }
   0xe   :  { %75 = vst.msk [vmem:[#allocation2 + $0xb0] sm:$0xff] %vm52_vm2, %v10464_v7  ;;  %76 = vst.msk [vmem:[#allocation2 + $0xb8] sm:$0xff] %vm52_vm2, %v10464_v7 }
   0xf   :  { %77 = vst.msk [vmem:[#allocation2 + $0xc0] sm:$0xff] %vm52_vm2, %v10464_v7  ;;  %79 = vst.msk [vmem:[#allocation2 + $0xb] sm:$0xff] %vm52_vm2, %v78_v4 }
  0x10   :  { %81 = vst.msk [vmem:[#allocation2 + $0x15] sm:$0xff] %vm52_vm2, %v80_v5  ;;  %83 = vst.msk [vmem:[#allocation2 + $0x1f] sm:$0xff] %vm52_vm2, %v82_v9  ;;  %v157_v63 = vld [vmem:[#allocation2 + $0x59] sm:$0xff]  ;;  %v158_v2 = vld [vmem:[#allocation2 + $0x61] sm:$0xff] }
  0x11   :  { %85 = vst.msk [vmem:[#allocation2 + $0x29] sm:$0xff] %vm52_vm2, %v84_v10  ;;  %87 = vst.msk [vmem:[#allocation2 + $0x33] sm:$0xff] %vm52_vm2, %v86_v14  ;;  %v122_v4 = vld [vmem:[#allocation2 + $0x60] sm:$0xff] }
  0x12   :  { %89 = vst.msk [vmem:[#allocation2 + $0x3d] sm:$0xff] %vm52_vm2, %v88_v15  ;;  %91 = vst.msk [vmem:[#allocation2 + $0x47] sm:$0xff] %vm52_vm2, %v90_v16 }
  0x13   :  { %93 = vst.msk [vmem:[#allocation2 + $0x51] sm:$0xff] %vm52_vm2, %v92_v17  ;;  %95 = vst.msk [vmem:[#allocation2 + $0x6f] sm:$0xff] %vm52_vm2, %v94_v18 }
  0x14   :  { %97 = vst.msk [vmem:[#allocation2 + $0x79] sm:$0xff] %vm52_vm2, %v96_v19  ;;  %99 = vst.msk [vmem:[#allocation2 + $0x83] sm:$0xff] %vm52_vm2, %v98_v20 }
  0x15   :  { %101 = vst.msk [vmem:[#allocation2 + $0x8d] sm:$0xff] %vm52_vm2, %v100_v21  ;;  %103 = vst.msk [vmem:[#allocation2 + $0x97] sm:$0xff] %vm52_vm2, %v102_v22 }
  0x16   :  { %105 = vst.msk [vmem:[#allocation2 + $0xa1] sm:$0xff] %vm52_vm2, %v104_v23  ;;  %107 = vst.msk [vmem:[#allocation2 + $0xab] sm:$0xff] %vm52_vm2, %v106_v24  ;;  %v147_v32 = vld [vmem:[#allocation2 + $0x9] sm:$0xff] }
  0x17   :  { %109 = vst.msk [vmem:[#allocation2 + $0xb5] sm:$0xff] %vm52_vm2, %v108_v27  ;;  %v111_v33 = vld [vmem:[#allocation2 + $0x8] sm:$0xff]  ;;  %v148_v34 = vld [vmem:[#allocation2 + $0x11] sm:$0xff]  ;;  %v169_v35 = vpack.c.bf16 %v147_v32, %v146_v29  ;;  %v149_v37 = vld [vmem:[#allocation2 + $0x19] sm:$0xff] }
  0x18   :  { %v133_v36 = vpack.c.bf16 %v111_v33, %v110_v30  ;;  %v112_v38 = vld [vmem:[#allocation2 + $0x10] sm:$0xff]  ;;  %v113_v39 = vld [vmem:[#allocation2 + $0x18] sm:$0xff]  ;;  %v170_v40 = vpack.c.bf16 %v149_v37, %v148_v34  ;;  %v150_v42 = vld [vmem:[#allocation2 + $0x21] sm:$0xff] }
  0x19   :  { %v134_v41 = vpack.c.bf16 %v113_v39, %v112_v38  ;;  %v151_v43 = vld [vmem:[#allocation2 + $0x29] sm:$0xff]  ;;  %v114_v44 = vld [vmem:[#allocation2 + $0x20] sm:$0xff]  ;;  %7572 = vmatprep.mubr.msk.bf16.mxu0 %vm52_vm2, %v169_v35  ;;  %v152_v50 = vld [vmem:[#allocation2 + $0x31] sm:$0xff] }
  0x1a   :  { %7598 = vmatprep.mubr.msk.bf16.mxu1 %vm52_vm2, %v133_v36  ;;  %v171_v45 = vpack.c.bf16 %v151_v43, %v150_v42  ;;  %v115_v46 = vld [vmem:[#allocation2 + $0x28] sm:$0xff]  ;;  %7573 = vmatmul.mubr.msk.bf16.vlgmr.msra.gmra.mxu0 %vm52_vm2, %v170_v40  ;;  %v153_v51 = vld [vmem:[#allocation2 + $0x39] sm:$0xff]  ;;  %v116_v52 = vld [vmem:[#allocation2 + $0x30] sm:$0xff] }
  0x1b   :  { %7599 = vmatmul.mubr.msk.bf16.vlgmr.msra.gmra.mxu1 %vm52_vm2, %v134_v41  ;;  %v135_v49 = vpack.c.bf16 %v115_v46, %v114_v44  ;;  %7623 = vmatpush3.bf16.msra.mxu0 %v8447_v13  ;;  %v117_v53 = vld [vmem:[#allocation2 + $0x38] sm:$0xff]  ;;  %v154_v54 = vld [vmem:[#allocation2 + $0x41] sm:$0xff]  ;;  %v155_v55 = vld [vmem:[#allocation2 + $0x49] sm:$0xff]  ;;  %v172_v58 = vpack.c.bf16 %v153_v51, %v152_v50 }
  0x1c   :  { %7576 = vmatprep.mubr.msk.bf16.mxu0 %vm52_vm2, %v171_v45  ;;  %v118_v56 = vld [vmem:[#allocation2 + $0x40] sm:$0xff]  ;;  %v119_v57 = vld [vmem:[#allocation2 + $0x48] sm:$0xff]  ;;  %7649 = vmatpush3.bf16.msra.mxu1 %v822_v26  ;;  %v136_v59 = vpack.c.bf16 %v117_v53, %v116_v52  ;;  %v173_v60 = vpack.c.bf16 %v155_v55, %v154_v54  ;;  %v156_v62 = vld [vmem:[#allocation2 + $0x51] sm:$0xff] }
  0x1d   :  { %7602 = vmatprep.mubr.msk.bf16.mxu1 %vm52_vm2, %v135_v49  ;;  %7674 = vmatprep.subr.bf16.mxu0 %v8514_v47  ;;  %v137_v61 = vpack.c.bf16 %v119_v57, %v118_v56  ;;  %v120_v0 = vld [vmem:[#allocation2 + $0x50] sm:$0xff]  ;;  %v121_v1 = vld [vmem:[#allocation2 + $0x58] sm:$0xff]  ;;  %v123_v5 = vld [vmem:[#allocation2 + $0x68] sm:$0xff]  ;;  %v174_v8 = vpack.c.bf16 %v157_v63, %v156_v62 }
  0x1e   :  { %7700 = vmatprep.subr.bf16.mxu1 %v8517_v48  ;;  %v159_v3 = vld [vmem:[#allocation2 + $0x69] sm:$0xff]  ;;  %v138_v9 = vpack.c.bf16 %v121_v1, %v120_v0  ;;  %v139_v11 = vpack.c.bf16 %v123_v5, %v122_v4  ;;  %v160_v12 = vld [vmem:[#allocation2 + $0x71] sm:$0xff]  ;;  %v161_v13 = vld [vmem:[#allocation2 + $0x79] sm:$0xff] }
  0x1f   :  { %v175_v10 = vpack.c.bf16 %v159_v3, %v158_v2  ;;  %v124_v14 = vld [vmem:[#allocation2 + $0x70] sm:$0xff]  ;;  %v125_v15 = vld [vmem:[#allocation2 + $0x78] sm:$0xff]  ;;  %v162_v16 = vld [vmem:[#allocation2 + $0x81] sm:$0xff]  ;;  %v176_v20 = vpack.c.bf16 %v161_v13, %v160_v12 }
  0x20   :  { %v163_v17 = vld [vmem:[#allocation2 + $0x89] sm:$0xff]  ;;  %v126_v18 = vld [vmem:[#allocation2 + $0x80] sm:$0xff]  ;;  %v140_v21 = vpack.c.bf16 %v125_v15, %v124_v14  ;;  %v164_v24 = vld [vmem:[#allocation2 + $0x91] sm:$0xff] }
  0x21   :  { %v127_v19 = vld [vmem:[#allocation2 + $0x88] sm:$0xff]  ;;  %v177_v22 = vpack.c.bf16 %v163_v17, %v162_v16  ;;  %v165_v25 = vld [vmem:[#allocation2 + $0x99] sm:$0xff]  ;;  %v128_v26 = vld [vmem:[#allocation2 + $0x90] sm:$0xff] }
  0x22   :  { %7577 = vmatmul.mubr.msk.bf16.gmra.mxu0 %vm52_vm2, %v172_v58  ;;  %v141_v23 = vpack.c.bf16 %v127_v19, %v126_v18  ;;  %v129_v27 = vld [vmem:[#allocation2 + $0x98] sm:$0xff]  ;;  %v166_v28 = vld [vmem:[#allocation2 + $0xa1] sm:$0xff]  ;;  %v167_v29 = vld [vmem:[#allocation2 + $0xa9] sm:$0xff]  ;;  %v178_v32 = vpack.c.bf16 %v165_v25, %v164_v24 }
  0x23   :  { %7603 = vmatmul.mubr.msk.bf16.gmra.mxu1 %vm52_vm2, %v136_v59  ;;  %7580 = vmatprep.mubr.msk.bf16.mxu0 %vm52_vm2, %v173_v60  ;;  %v130_v30 = vld [vmem:[#allocation2 + $0xa0] sm:$0xff]  ;;  %v131_v31 = vld [vmem:[#allocation2 + $0xa8] sm:$0xff]  ;;  %v142_v33 = vpack.c.bf16 %v129_v27, %v128_v26  ;;  %v179_v34 = vpack.c.bf16 %v167_v29, %v166_v28  ;;  %v168_v36 = vld [vmem:[#allocation2 + $0xb1] sm:$0x3] }
  0x24   :  { %7606 = vmatprep.mubr.msk.bf16.mxu1 %vm52_vm2, %v137_v61  ;;  %v143_v35 = vpack.c.bf16 %v131_v31, %v130_v30  ;;  %v132_v37 = vld [vmem:[#allocation2 + $0xb0] sm:$0x3]  ;;  %v521_v38 = vld [vmem:[#allocation2 + $0x2] sm:$0xff]  ;;  %v523_v40 = vld [vmem:[#allocation2 + $0x12] sm:$0xff]  ;;  %v180_v41 = vpack.c.bf16 %v168_v36, %v168_v36 }
  0x25   :  { %v522_v39 = vld [vmem:[#allocation2 + $0xa] sm:$0xff]  ;;  %v144_v42 = vpack.c.bf16 %v132_v37, %v132_v37  ;;  %v524_v45 = vld [vmem:[#allocation2 + $0x1a] sm:$0xff]  ;;  %v751_v46 = vld [vmem:[#allocation2 + $0x22] sm:$0xff] }
  0x26   :  { %v544_v43 = vpack.c.bf16 %v522_v39, %v521_v38  ;;  %v771_v44 = vpack.c.bf16 %v523_v40, %v522_v39  ;;  %v526_v49 = vld [vmem:[#allocation2 + $0x2a] sm:$0xff]  ;;  %v527_v50 = vld [vmem:[#allocation2 + $0x32] sm:$0xff]  ;;  %v545_v53 = vpack.c.bf16 %v524_v45, %v523_v40  ;;  %v772_v54 = vpack.c.bf16 %v751_v46, %v524_v45  ;;  %v528_v57 = vld [vmem:[#allocation2 + $0x3a] sm:$0xff] }
  0x27   :  { %v6935_v51 = vld [vmem:[%s10449_s1 + $0xc] sm:$0x3]  ;;  %v6948_v52 = vld [vmem:[%s10449_s1 + $0xe] sm:$0x3]  ;;  %v546_v55 = vpack.c.bf16 %v526_v49, %v751_v46  ;;  %v773_v56 = vpack.c.bf16 %v527_v50, %v526_v49  ;;  %v755_v58 = vld [vmem:[#allocation2 + $0x42] sm:$0xff]  ;;  %v547_v63 = vpack.c.bf16 %v528_v57, %v527_v50 }
  0x28   :  { %v8553_v59 = vand.u32 %v6935_v51, %v8382_v6  ;;  %v8556_v60 = vand.u32 %v6948_v52, %v8382_v6  ;;  %v530_v61 = vld [vmem:[#allocation2 + $0x4a] sm:$0xff]  ;;  %v531_v62 = vld [vmem:[#allocation2 + $0x52] sm:$0xff]  ;;  %v774_v0 = vpack.c.bf16 %v755_v58, %v528_v57  ;;  %v532_v3 = vld [vmem:[#allocation2 + $0x5a] sm:$0xff] }
  0x29   :  { %v548_v1 = vpack.c.bf16 %v530_v61, %v755_v58  ;;  %v775_v2 = vpack.c.bf16 %v531_v62, %v530_v61  ;;  %v759_v4 = vld [vmem:[#allocation2 + $0x62] sm:$0xff]  ;;  %v535_v5 = vld [vmem:[#allocation2 + $0x72] sm:$0xff]  ;;  %v538_v13 = vld [vmem:[#allocation2 + $0x8a] sm:$0xff] }
  0x2a   :  { %7581 = vmatmul.mubr.msk.bf16.gmra.mxu0 %vm52_vm2, %v174_v8  ;;  %v776_v8 = vpack.c.bf16 %v759_v4, %v532_v3  ;;  %v763_v12 = vld [vmem:[#allocation2 + $0x82] sm:$0xff]  ;;  %v539_v14 = vld [vmem:[#allocation2 + $0x92] sm:$0xff] }
  0x2b   :  { %7607 = vmatmul.mubr.msk.bf16.gmra.mxu1 %vm52_vm2, %v138_v9  ;;  %7584 = vmatprep.mubr.msk.bf16.mxu0 %vm52_vm2, %v175_v10  ;;  %v552_v17 = vpack.c.bf16 %v538_v13, %v763_v12  ;;  %v779_v18 = vpack.c.bf16 %v539_v14, %v538_v13 }
  0x2c   :  { %7610 = vmatprep.mubr.msk.bf16.mxu1 %vm52_vm2, %v139_v11  ;;  %v536_v11 = vld [vmem:[#allocation2 + $0x7a] sm:$0xff] }
  0x2d   :  { %v551_v15 = vpack.c.bf16 %v536_v11, %v535_v5  ;;  %v778_v16 = vpack.c.bf16 %v763_v12, %v536_v11 }
  0x32   :  { %7585 = vmatmul.mubr.msk.bf16.gmra.mxu0 %vm52_vm2, %v176_v20 }
  0x33   :  { %7611 = vmatmul.mubr.msk.bf16.gmra.mxu1 %vm52_vm2, %v140_v21  ;;  %7588 = vmatprep.mubr.msk.bf16.mxu0 %vm52_vm2, %v177_v22 }
  0x34   :  { %7614 = vmatprep.mubr.msk.bf16.mxu1 %vm52_vm2, %v141_v23 }
  0x3a   :  { %7589 = vmatmul.mubr.msk.bf16.gmra.mxu0 %vm52_vm2, %v178_v32 }
  0x3b   :  { %7615 = vmatmul.mubr.msk.bf16.gmra.mxu1 %vm52_vm2, %v142_v33  ;;  %7592 = vmatprep.mubr.msk.bf16.mxu0 %vm52_vm2, %v179_v34 }
  0x3c   :  { %7618 = vmatprep.mubr.msk.bf16.mxu1 %vm52_vm2, %v143_v35 }
  0x42   :  { %7593 = vmatmul.mubr.msk.bf16.gmra.mxu0 %vm52_vm2, %v180_v41 }
  0x43   :  { %7619 = vmatmul.mubr.msk.bf16.gmra.mxu1 %vm52_vm2, %v144_v42  ;;  %7624 = vmatprep.mubr.msk.bf16.mxu0 %vm52_vm2, %v544_v43 }
  0x44   :  { %7650 = vmatprep.mubr.msk.bf16.mxu1 %vm52_vm2, %v771_v44 }
  0x4a   :  { %7625 = vmatmul.mubr.msk.bf16.vlgmr.msra.gmra.mxu0 %vm52_vm2, %v545_v53 }
  0x4b   :  { %7651 = vmatmul.mubr.msk.bf16.vlgmr.msra.gmra.mxu1 %vm52_vm2, %v772_v54  ;;  %7675 = vmatpush3.bf16.msra.mxu0 %v8514_v47  ;;  %v534_v47 = vld [vmem:[#allocation2 + $0x6a] sm:$0xff] }
  0x4c   :  { %7628 = vmatprep.mubr.msk.bf16.mxu0 %vm52_vm2, %v546_v55  ;;  %7654 = vmatprep.mubr.msk.bf16.mxu1 %vm52_vm2, %v773_v56  ;;  %v550_v9 = vpack.c.bf16 %v534_v47, %v759_v4  ;;  %v777_v10 = vpack.c.bf16 %v535_v5, %v534_v47 }
  0x4d   :  { %7701 = vmatpush3.bf16.msra.mxu1 %v8517_v48  ;;  %7726 = vmatprep.subr.bf16.mxu0 %v8553_v59  ;;  %v549_v48 = vpack.c.bf16 %v532_v3, %v531_v62 }
  0x4e   :  { %7752 = vmatprep.subr.bf16.mxu1 %v8556_v60 }
  0x52   :  { %7629 = vmatmul.mubr.msk.bf16.gmra.mxu0 %vm52_vm2, %v547_v63 }
  0x53   :  { %7655 = vmatmul.mubr.msk.bf16.gmra.mxu1 %vm52_vm2, %v774_v0  ;;  %7632 = vmatprep.mubr.msk.bf16.mxu0 %vm52_vm2, %v548_v1 }
  0x54   :  { %7658 = vmatprep.mubr.msk.bf16.mxu1 %vm52_vm2, %v775_v2 }
  0x5a   :  { %7633 = vmatmul.mubr.msk.bf16.gmra.mxu0 %vm52_vm2, %v549_v48 }
  0x5b   :  { %7659 = vmatmul.mubr.msk.bf16.gmra.mxu1 %vm52_vm2, %v776_v8  ;;  %7636 = vmatprep.mubr.msk.bf16.mxu0 %vm52_vm2, %v550_v9 }
  0x5c   :  { %7662 = vmatprep.mubr.msk.bf16.mxu1 %vm52_vm2, %v777_v10 }
  0x5d   :  { %20 = vsyncpa [#allocation18], 0  ;;  %v540_v19 = vld [vmem:[#allocation2 + $0x9a] sm:$0xff]  ;;  %v767_v20 = vld [vmem:[#allocation2 + $0xa2] sm:$0xff]  ;;  %vm2110_vm3 = vcmask 130048   ;;  %vm2133_vm4 = vcmask 123904  }
  0x5e   :  { %v542_v21 = vld [vmem:[#allocation2 + $0xaa] sm:$0xff]  ;;  %v769_v22 = vld [vmem:[#allocation2 + $0xb2] sm:$0xff]  ;;  %v553_v23 = vpack.c.bf16 %v540_v19, %v539_v14  ;;  %v780_v24 = vpack.c.bf16 %v767_v20, %v540_v19  ;;  %v770_v28 = vld [vmem:[#allocation2 + $0xba] sm:$0x3]  ;;  %2388 = vst.msk [vmem:[#allocation5] sm:$0xff] %vm2110_vm3, %v10464_v7  ;;  %vm4762_vm5 = vcmask 125952  }
  0x5f   :  { %v554_v25 = vpack.c.bf16 %v542_v21, %v767_v20  ;;  %v781_v26 = vpack.c.bf16 %v769_v22, %v542_v21  ;;  %v543_v27 = vld [vmem:[#allocation2 + $0xb2] sm:$0x3]  ;;  %v8582_v32 = vld [vmem:[#allocation2 + $0x14] sm:$0xff]  ;;  %v782_v34 = vpack.c.bf16 %v770_v28, %v770_v28  ;;  %v978_v38 = vld [vmem:[#allocation2 + $0x23] sm:$0xff]  ;;  %2389 = vst.msk [vmem:[#allocation5 + $0x8] sm:$0xff] %vm2110_vm3, %v10464_v7  ;;  %vm5810_vm6 = vcmask 261120  }
  0x60   :  { %v975_v29 = vld [vmem:[#allocation2 + $0xb] sm:$0xff]  ;;  %v976_v30 = vld [vmem:[#allocation2 + $0x13] sm:$0xff]  ;;  %v555_v33 = vpack.c.bf16 %v543_v27, %v543_v27  ;;  %v977_v37 = vld [vmem:[#allocation2 + $0x1b] sm:$0xff]  ;;  %2390 = vst.msk [vmem:[#allocation5 + $0x10] sm:$0xff] %vm2110_vm3, %v10464_v7  ;;  %vm5821_vm7 = vcmask 257024   ;;  %vm5818_vm8 = vcmask 254976  }
  0x61   :  { %v1202_v31 = vld [vmem:[#allocation2 + $0xc] sm:$0xff]  ;;  %v998_v35 = vpack.c.bf16 %v976_v30, %v975_v29  ;;  %v8589_v39 = vld [vmem:[#allocation2 + $0x1c] sm:$0xff]  ;;  %v8591_v40 = vld [vmem:[#allocation2 + $0x24] sm:$0xff]  ;;  %v999_v45 = vpack.c.bf16 %v978_v38, %v977_v37  ;;  %2391 = vst.msk [vmem:[#allocation5 + $0x18] sm:$0xff] %vm2110_vm3, %v10464_v7  ;;  %vm8288_vm9 = vmmov 0   ;;  %vm6680_vm10 = vcmask 521216  }
  0x62   :  { %7637 = vmatmul.mubr.msk.bf16.gmra.mxu0 %vm52_vm2, %v551_v15  ;;  %v1225_v36 = vpack.c.bf16 %v8582_v32, %v1202_v31  ;;  %v979_v41 = vld [vmem:[#allocation2 + $0x2b] sm:$0xff]  ;;  %v980_v42 = vld [vmem:[#allocation2 + $0x33] sm:$0xff]  ;;  %v1226_v46 = vpack.c.bf16 %v8591_v40, %v8589_v39  ;;  %v981_v53 = vld [vmem:[#allocation2 + $0x3b] sm:$0xff]  ;;  %2392 = vst.msk [vmem:[#allocation5 + $0x20] sm:$0xff] %vm2110_vm3, %v10464_v7  ;;  %vm6677_vm11 = vcmask 523264   ;;  %vm6683_vm12 = vcmask 517120  }
  0x63   :  { %7663 = vmatmul.mubr.msk.bf16.gmra.mxu1 %vm52_vm2, %v778_v16  ;;  %7640 = vmatprep.mubr.msk.bf16.mxu0 %vm52_vm2, %v552_v17  ;;  %v8593_v43 = vld [vmem:[#allocation2 + $0x2c] sm:$0xff]  ;;  %v8595_v44 = vld [vmem:[#allocation2 + $0x34] sm:$0xff]  ;;  %v1000_v50 = vpack.c.bf16 %v980_v42, %v979_v41  ;;  %v982_v54 = vld [vmem:[#allocation2 + $0x43] sm:$0xff]  ;;  %2393 = vst.msk [vmem:[#allocation5 + $0x28] sm:$0xff] %vm2110_vm3, %v10464_v7  ;;  %vm6743_vm13 = vcmask 516096   ;;  %vm6842_vm14 = vcmask 74752  }
  0x64   :  { %7666 = vmatprep.mubr.msk.bf16.mxu1 %vm52_vm2, %v779_v18  ;;  %v6961_v49 = vld [vmem:[%s10449_s1 + $0x10] sm:$0x3]  ;;  %v1227_v51 = vpack.c.bf16 %v8595_v44, %v8593_v43  ;;  %v8611_v55 = vld [vmem:[#allocation2 + $0x3c] sm:$0xff]  ;;  %v8613_v56 = vld [vmem:[#allocation2 + $0x44] sm:$0xff]  ;;  %v1001_v62 = vpack.c.bf16 %v982_v54, %v981_v53  ;;  %2394 = vst.msk [vmem:[#allocation5 + $0x30] sm:$0xff] %vm2110_vm3, %v10464_v7 }
  0x65   :  { %v8605_v52 = vand.u32 %v6961_v49, %v8382_v6  ;;  %v983_v57 = vld [vmem:[#allocation2 + $0x4b] sm:$0xff]  ;;  %v984_v58 = vld [vmem:[#allocation2 + $0x53] sm:$0xff]  ;;  %v985_v1 = vld [vmem:[#allocation2 + $0x5b] sm:$0xff]  ;;  %v1452_v49 = vpack.c.bf16 %v8589_v39, %v8582_v32  ;;  %v1454_v32 = vpack.c.bf16 %v8611_v55, %v8595_v44  ;;  %2395 = vst.msk [vmem:[#allocation5 + $0x38] sm:$0xff] %vm2110_vm3, %v10464_v7 }
  0x66   :  { %v8616_v6 = vld [vmem:[#allocation2 + $0x4c] sm:$0xff]  ;;  %v8618_v61 = vld [vmem:[#allocation2 + $0x54] sm:$0xff]  ;;  %v1002_v63 = vpack.c.bf16 %v984_v58, %v983_v57  ;;  %v986_v2 = vld [vmem:[#allocation2 + $0x63] sm:$0xff]  ;;  %v1453_v58 = vpack.c.bf16 %v8593_v43, %v8591_v40  ;;  %2396 = vst.msk [vmem:[#allocation5 + $0x40] sm:$0xff] %vm2110_vm3, %v10464_v7 }
  0x67   :  { %v1229_v0 = vpack.c.bf16 %v8618_v61, %v8616_v6  ;;  %v8632_v3 = vld [vmem:[#allocation2 + $0x64] sm:$0xff]  ;;  %v988_v47 = vld [vmem:[#allocation2 + $0x73] sm:$0xff]  ;;  %v1003_v8 = vpack.c.bf16 %v986_v2, %v985_v1  ;;  %v989_v12 = vld [vmem:[#allocation2 + $0x7b] sm:$0xff]  ;;  %v1455_v40 = vpack.c.bf16 %v8616_v6, %v8613_v56  ;;  %2397 = vst.msk [vmem:[#allocation5 + $0x48] sm:$0xff] %vm2110_vm3, %v10464_v7 }
  0x68   :  { %v987_v4 = vld [vmem:[#allocation2 + $0x6b] sm:$0xff]  ;;  %v8636_v48 = vld [vmem:[#allocation2 + $0x74] sm:$0xff]  ;;  %v990_v13 = vld [vmem:[#allocation2 + $0x83] sm:$0xff]  ;;  %2398 = vst.msk [vmem:[#allocation5 + $0x50] sm:$0xff] %vm2110_vm3, %v10464_v7 }
  0x69   :  { %v8634_v5 = vld [vmem:[#allocation2 + $0x6c] sm:$0xff]  ;;  %v1004_v10 = vpack.c.bf16 %v988_v47, %v987_v4  ;;  %v8646_v14 = vld [vmem:[#allocation2 + $0x7c] sm:$0xff]  ;;  %v8648_v15 = vld [vmem:[#allocation2 + $0x84] sm:$0xff]  ;;  %v1005_v20 = vpack.c.bf16 %v990_v13, %v989_v12  ;;  %2399 = vst.msk [vmem:[#allocation5 + $0x58] sm:$0xff] %vm2110_vm3, %v10464_v7 }
  0x6a   :  { %7641 = vmatmul.mubr.msk.bf16.gmra.mxu0 %vm52_vm2, %v553_v23  ;;  %v1231_v11 = vpack.c.bf16 %v8636_v48, %v8634_v5  ;;  %v991_v16 = vld [vmem:[#allocation2 + $0x8b] sm:$0xff]  ;;  %v992_v17 = vld [vmem:[#allocation2 + $0x93] sm:$0xff]  ;;  %v1232_v21 = vpack.c.bf16 %v8648_v15, %v8646_v14  ;;  %v997_v37 = vld [vmem:[#allocation2 + $0xbb] sm:$0x3]  ;;  %2400 = vst.msk [vmem:[#allocation5 + $0x60] sm:$0xff] %vm2110_vm3, %v10464_v7 }
  0x6b   :  { %7667 = vmatmul.mubr.msk.bf16.gmra.mxu1 %vm52_vm2, %v780_v24  ;;  %7644 = vmatprep.mubr.msk.bf16.mxu0 %vm52_vm2, %v554_v25  ;;  %v8650_v18 = vld [vmem:[#allocation2 + $0x8c] sm:$0xff]  ;;  %v8652_v19 = vld [vmem:[#allocation2 + $0x94] sm:$0xff]  ;;  %v1006_v22 = vpack.c.bf16 %v992_v17, %v991_v16  ;;  %v994_v25 = vld [vmem:[#allocation2 + $0xa3] sm:$0xff]  ;;  %2401 = vst.msk [vmem:[#allocation5 + $0x68] sm:$0xff] %vm2110_vm3, %v10464_v7 }
  0x6c   :  { %7670 = vmatprep.mubr.msk.bf16.mxu1 %vm52_vm2, %v781_v26  ;;  %v1233_v23 = vpack.c.bf16 %v8652_v19, %v8650_v18  ;;  %v993_v24 = vld [vmem:[#allocation2 + $0x9b] sm:$0xff]  ;;  %v8664_v27 = vld [vmem:[#allocation2 + $0xa4] sm:$0xff]  ;;  %v996_v29 = vld [vmem:[#allocation2 + $0xb3] sm:$0xff]  ;;  %2402 = vst.msk [vmem:[#allocation5 + $0x70] sm:$0xff] %vm2110_vm3, %v10464_v7 }
  0x6d   :  { %v8662_v26 = vld [vmem:[#allocation2 + $0x9c] sm:$0xff]  ;;  %v995_v28 = vld [vmem:[#allocation2 + $0xab] sm:$0xff]  ;;  %v8668_v31 = vld [vmem:[#allocation2 + $0xb4] sm:$0xff]  ;;  %2403 = vst.msk [vmem:[#allocation5 + $0x78] sm:$0xff] %vm2110_vm3, %v10464_v7 }
  0x6e   :  { %v8666_v30 = vld [vmem:[#allocation2 + $0xac] sm:$0xff]  ;;  %v1224_v38 = vld [vmem:[#allocation2 + $0xbc] sm:$0x3]  ;;  %2404 = vst.msk [vmem:[#allocation5 + $0x80] sm:$0xff] %vm2110_vm3, %v10464_v7  ;;  %2405 = vst.msk [vmem:[#allocation5 + $0x88] sm:$0xff] %vm2110_vm3, %v10464_v7 }
  0x6f   :  { %v1656_v41 = vld [vmem:[#allocation2 + $0x15] sm:$0xff]  ;;  %v1657_v42 = vld [vmem:[#allocation2 + $0x1d] sm:$0xff]  ;;  %v1659_v53 = vld [vmem:[#allocation2 + $0x2d] sm:$0xff]  ;;  %2406 = vst.msk [vmem:[#allocation5 + $0x90] sm:$0xff] %vm2110_vm3, %v10464_v7 }
  0x70   :  { %v1660_v54 = vld [vmem:[#allocation2 + $0x35] sm:$0xff]  ;;  %v1661_v57 = vld [vmem:[#allocation2 + $0x3d] sm:$0xff]  ;;  %v1667_v2 = vld [vmem:[#allocation2 + $0x6d] sm:$0xff]  ;;  %2407 = vst.msk [vmem:[#allocation5 + $0x98] sm:$0xff] %vm2110_vm3, %v10464_v7 }
  0x71   :  { %v1681_v39 = vpack.c.bf16 %v1661_v57, %v1660_v54  ;;  %v1665_v1 = vld [vmem:[#allocation2 + $0x5d] sm:$0xff]  ;;  %v1668_v4 = vld [vmem:[#allocation2 + $0x75] sm:$0xff]  ;;  %v1674_v13 = vld [vmem:[#allocation2 + $0xa5] sm:$0xff]  ;;  %2408 = vst.msk [vmem:[#allocation5 + $0xa0] sm:$0xff] %vm2110_vm3, %v10464_v7 }
  0x72   :  { %7645 = vmatmul.mubr.msk.bf16.gmra.mxu0 %vm52_vm2, %v555_v33  ;;  %v1007_v33 = vpack.c.bf16 %v994_v25, %v993_v24  ;;  %v1669_v47 = vld [vmem:[#allocation2 + $0x7d] sm:$0xff]  ;;  %v1676_v17 = vld [vmem:[#allocation2 + $0xb5] sm:$0xff]  ;;  %2409 = vst.msk [vmem:[#allocation5 + $0xa8] sm:$0xff] %vm2110_vm3, %v10464_v7  ;;  %2410 = vst.msk [vmem:[#allocation5 + $0xb0] sm:$0xff] %vm2110_vm3, %v10464_v7 }
  0x73   :  { %7671 = vmatmul.mubr.msk.bf16.gmra.mxu1 %vm52_vm2, %v782_v34  ;;  %7676 = vmatprep.mubr.msk.bf16.mxu0 %vm52_vm2, %v998_v35  ;;  %v1234_v34 = vpack.c.bf16 %v8664_v27, %v8662_v26  ;;  %v1008_v35 = vpack.c.bf16 %v996_v29, %v995_v28  ;;  %v1450_v16 = vld [vmem:[#allocation2 + $0xbc] sm:$0xff]  ;;  %2411 = vst.msk [vmem:[#allocation5 + $0xb8] sm:$0xff] %vm2110_vm3, %v10464_v7  ;;  %2412 = vst.msk [vmem:[#allocation5 + $0xc0] sm:$0xff] %vm2110_vm3, %v10464_v7 }
  0x74   :  { %7702 = vmatprep.mubr.msk.bf16.mxu1 %vm52_vm2, %v1225_v36  ;;  %v1235_v36 = vpack.c.bf16 %v8668_v31, %v8666_v30  ;;  %v1883_v24 = vld [vmem:[#allocation2 + $0x16] sm:$0xff]  ;;  %v1884_v25 = vld [vmem:[#allocation2 + $0x1e] sm:$0xff]  ;;  %4848 = vst.msk [vmem:[#allocation9] sm:$0xff] %vm2110_vm3, %v10464_v7  ;;  %4849 = vst.msk [vmem:[#allocation9 + $0x8] sm:$0xff] %vm2110_vm3, %v10464_v7 }
  0x75   :  { %v1906_v29 = vpack.c.bf16 %v1884_v25, %v1883_v24  ;;  %v1901_v24 = vld [vmem:[#allocation2 + $0xa6] sm:$0xff]  ;;  %v1902_v25 = vld [vmem:[#allocation2 + $0xae] sm:$0xff]  ;;  %4850 = vst.msk [vmem:[#allocation9 + $0x10] sm:$0xff] %vm2110_vm3, %v10464_v7  ;;  %4851 = vst.msk [vmem:[#allocation9 + $0x18] sm:$0xff] %vm2110_vm3, %v10464_v7 }
  0x76   :  { %4852 = vst.msk [vmem:[#allocation9 + $0x20] sm:$0xff] %vm2110_vm3, %v10464_v7  ;;  %4853 = vst.msk [vmem:[#allocation9 + $0x28] sm:$0xff] %vm2110_vm3, %v10464_v7 }
  0x77   :  { %4854 = vst.msk [vmem:[#allocation9 + $0x30] sm:$0xff] %vm2110_vm3, %v10464_v7  ;;  %4855 = vst.msk [vmem:[#allocation9 + $0x38] sm:$0xff] %vm2110_vm3, %v10464_v7 }
  0x78   :  { %4856 = vst.msk [vmem:[#allocation9 + $0x40] sm:$0xff] %vm2110_vm3, %v10464_v7 }
  0x7a   :  { %7677 = vmatmul.mubr.msk.bf16.vlgmr.msra.gmra.mxu0 %vm52_vm2, %v999_v45  ;;  %v1009_v45 = vpack.c.bf16 %v997_v37, %v997_v37 }
  0x7b   :  { %7703 = vmatmul.mubr.msk.bf16.vlgmr.msra.gmra.mxu1 %vm52_vm2, %v1226_v46  ;;  %7727 = vmatpush3.bf16.msra.mxu0 %v8553_v59  ;;  %v1228_v59 = vpack.c.bf16 %v8613_v56, %v8611_v55  ;;  %v1236_v46 = vpack.c.bf16 %v1224_v38, %v1224_v38  ;;  %v1457_v56 = vpack.c.bf16 %v8634_v5, %v8632_v3 }
  0x7c   :  { %7680 = vmatprep.mubr.msk.bf16.mxu0 %vm52_vm2, %v1000_v50  ;;  %7706 = vmatprep.mubr.msk.bf16.mxu1 %vm52_vm2, %v1227_v51  ;;  %v1679_v50 = vpack.c.bf16 %v1657_v42, %v1656_v41  ;;  %v1658_v51 = vld [vmem:[#allocation2 + $0x25] sm:$0xff]  ;;  %v1890_v42 = vld [vmem:[#allocation2 + $0x4e] sm:$0xff] }
  0x7d   :  { %7753 = vmatpush3.bf16.msra.mxu1 %v8556_v60  ;;  %7778 = vmatprep.subr.bf16.mxu0 %v8605_v52  ;;  %v8630_v60 = vld [vmem:[#allocation2 + $0x5c] sm:$0xff]  ;;  %v1889_v41 = vld [vmem:[#allocation2 + $0x46] sm:$0xff] }
  0x7e   :  { %v1230_v9 = vpack.c.bf16 %v8632_v3, %v8630_v60  ;;  %v1456_v44 = vpack.c.bf16 %v8630_v60, %v8618_v61  ;;  %v1458_v61 = vpack.c.bf16 %v8646_v14, %v8636_v48  ;;  %v1685_v60 = vpack.c.bf16 %v1669_v47, %v1668_v4  ;;  %v1675_v14 = vld [vmem:[#allocation2 + $0xad] sm:$0xff] }
  0x7f   :  { %v1459_v3 = vpack.c.bf16 %v8650_v18, %v8648_v15  ;;  %v1460_v48 = vpack.c.bf16 %v8662_v26, %v8652_v19  ;;  %v1461_v15 = vpack.c.bf16 %v8666_v30, %v8664_v27  ;;  %v1688_v18 = vpack.c.bf16 %v1675_v14, %v1674_v13  ;;  %v1885_v27 = vld [vmem:[#allocation2 + $0x26] sm:$0xff]  ;;  %v1886_v30 = vld [vmem:[#allocation2 + $0x2e] sm:$0xff]  ;;  %v1900_v13 = vld [vmem:[#allocation2 + $0x9e] sm:$0xff] }
  0x80   :  { %v1462_v19 = vpack.c.bf16 %v1450_v16, %v8668_v31  ;;  %v1887_v31 = vld [vmem:[#allocation2 + $0x36] sm:$0xff]  ;;  %v1909_v57 = vpack.c.bf16 %v1890_v42, %v1889_v41 }
  0x82   :  { %7681 = vmatmul.mubr.msk.bf16.gmra.mxu0 %vm52_vm2, %v1001_v62  ;;  %v1680_v62 = vpack.c.bf16 %v1659_v53, %v1658_v51 }
  0x83   :  { %7707 = vmatmul.mubr.msk.bf16.gmra.mxu1 %vm52_vm2, %v1228_v59  ;;  %7684 = vmatprep.mubr.msk.bf16.mxu0 %vm52_vm2, %v1002_v63  ;;  %v1662_v59 = vld [vmem:[#allocation2 + $0x45] sm:$0xff]  ;;  %v1663_v63 = vld [vmem:[#allocation2 + $0x4d] sm:$0xff] }
  0x84   :  { %7710 = vmatprep.mubr.msk.bf16.mxu1 %vm52_vm2, %v1229_v0  ;;  %v1664_v0 = vld [vmem:[#allocation2 + $0x55] sm:$0xff]  ;;  %v1682_v43 = vpack.c.bf16 %v1663_v63, %v1662_v59 }
  0x85   :  { %v1683_v55 = vpack.c.bf16 %v1665_v1, %v1664_v0  ;;  %v1893_v1 = vld [vmem:[#allocation2 + $0x66] sm:$0xff] }
  0x8a   :  { %7685 = vmatmul.mubr.msk.bf16.gmra.mxu0 %vm52_vm2, %v1003_v8  ;;  %v1670_v8 = vld [vmem:[#allocation2 + $0x85] sm:$0xff] }
  0x8b   :  { %7711 = vmatmul.mubr.msk.bf16.gmra.mxu1 %vm52_vm2, %v1230_v9  ;;  %7688 = vmatprep.mubr.msk.bf16.mxu0 %vm52_vm2, %v1004_v10  ;;  %v1671_v9 = vld [vmem:[#allocation2 + $0x8d] sm:$0xff]  ;;  %v1672_v10 = vld [vmem:[#allocation2 + $0x95] sm:$0xff] }
  0x8c   :  { %7714 = vmatprep.mubr.msk.bf16.mxu1 %vm52_vm2, %v1231_v11  ;;  %v1673_v11 = vld [vmem:[#allocation2 + $0x9d] sm:$0xff]  ;;  %v1686_v5 = vpack.c.bf16 %v1671_v9, %v1670_v8 }
  0x8d   :  { %v1687_v12 = vpack.c.bf16 %v1673_v11, %v1672_v10  ;;  %v1897_v11 = vld [vmem:[#allocation2 + $0x86] sm:$0xff] }
  0x92   :  { %7689 = vmatmul.mubr.msk.bf16.gmra.mxu0 %vm52_vm2, %v1005_v20  ;;  %v1677_v20 = vld [vmem:[#allocation2 + $0xbd] sm:$0xff] }
  0x93   :  { %7715 = vmatmul.mubr.msk.bf16.gmra.mxu1 %vm52_vm2, %v1232_v21  ;;  %7692 = vmatprep.mubr.msk.bf16.mxu0 %vm52_vm2, %v1006_v22  ;;  %v1689_v21 = vpack.c.bf16 %v1677_v20, %v1676_v17  ;;  %v1451_v22 = vld [vmem:[#allocation2 + $0xc4] sm:$0x3] }
  0x94   :  { %7718 = vmatprep.mubr.msk.bf16.mxu1 %vm52_vm2, %v1233_v23  ;;  %v1678_v23 = vld [vmem:[#allocation2 + $0xc5] sm:$0x3]  ;;  %v1463_v26 = vpack.c.bf16 %v1451_v22, %v1451_v22 }
  0x95   :  { %v1690_v28 = vpack.c.bf16 %v1678_v23, %v1678_v23 }
  0x9a   :  { %7693 = vmatmul.mubr.msk.bf16.gmra.mxu0 %vm52_vm2, %v1007_v33  ;;  %v1888_v33 = vld [vmem:[#allocation2 + $0x3e] sm:$0xff] }
  0x9b   :  { %7719 = vmatmul.mubr.msk.bf16.gmra.mxu1 %vm52_vm2, %v1234_v34  ;;  %7696 = vmatprep.mubr.msk.bf16.mxu0 %vm52_vm2, %v1008_v35  ;;  %v1907_v34 = vpack.c.bf16 %v1886_v30, %v1885_v27  ;;  %v1908_v35 = vpack.c.bf16 %v1888_v33, %v1887_v31  ;;  %v1904_v27 = vld [vmem:[#allocation2 + $0xbe] sm:$0xff] }
  0x9c   :  { %7722 = vmatprep.mubr.msk.bf16.mxu1 %vm52_vm2, %v1235_v36 }
  0xa2   :  { %7697 = vmatmul.mubr.msk.bf16.gmra.mxu0 %vm52_vm2, %v1009_v45 }
  0xa3   :  { %7723 = vmatmul.mubr.msk.bf16.gmra.mxu1 %vm52_vm2, %v1236_v46  ;;  %7728 = vmatprep.mubr.msk.bf16.mxu0 %vm52_vm2, %v1452_v49  ;;  %v1891_v49 = vld [vmem:[#allocation2 + $0x56] sm:$0xff] }
  0xa4   :  { %7754 = vmatprep.mubr.msk.bf16.mxu1 %vm52_vm2, %v1679_v50  ;;  %v1892_v50 = vld [vmem:[#allocation2 + $0x5e] sm:$0xff] }
  0xaa   :  { %7729 = vmatmul.mubr.msk.bf16.vlgmr.msra.gmra.mxu0 %vm52_vm2, %v1453_v58 }
  0xab   :  { %7755 = vmatmul.mubr.msk.bf16.vlgmr.msra.gmra.mxu1 %vm52_vm2, %v1680_v62  ;;  %7779 = vmatpush3.bf16.msra.mxu0 %v8605_v52  ;;  %v1666_v52 = vld [vmem:[#allocation2 + $0x65] sm:$0xff]  ;;  %v1910_v62 = vpack.c.bf16 %v1892_v50, %v1891_v49 }
  0xac   :  { %7732 = vmatprep.mubr.msk.bf16.mxu0 %vm52_vm2, %v1454_v32  ;;  %7758 = vmatprep.mubr.msk.bf16.mxu1 %vm52_vm2, %v1681_v39  ;;  %v1684_v6 = vpack.c.bf16 %v1667_v2, %v1666_v52  ;;  %v1896_v52 = vld [vmem:[#allocation2 + $0x7e] sm:$0xff]  ;;  %v1905_v49 = vld [vmem:[#allocation2 + $0xc6] sm:$0x3] }
  0xb2   :  { %7733 = vmatmul.mubr.msk.bf16.gmra.mxu0 %vm52_vm2, %v1455_v40  ;;  %v1894_v40 = vld [vmem:[#allocation2 + $0x6e] sm:$0xff] }
  0xb3   :  { %7759 = vmatmul.mubr.msk.bf16.gmra.mxu1 %vm52_vm2, %v1682_v43  ;;  %7736 = vmatprep.mubr.msk.bf16.mxu0 %vm52_vm2, %v1456_v44 }
  0xb4   :  { %7762 = vmatprep.mubr.msk.bf16.mxu1 %vm52_vm2, %v1683_v55  ;;  %v1895_v55 = vld [vmem:[#allocation2 + $0x76] sm:$0xff] }
  0xba   :  { %7737 = vmatmul.mubr.msk.bf16.gmra.mxu0 %vm52_vm2, %v1457_v56  ;;  %v1911_v56 = vpack.c.bf16 %v1894_v40, %v1893_v1 }
  0xbb   :  { %7763 = vmatmul.mubr.msk.bf16.gmra.mxu1 %vm52_vm2, %v1684_v6  ;;  %7740 = vmatprep.mubr.msk.bf16.mxu0 %vm52_vm2, %v1458_v61  ;;  %v1912_v61 = vpack.c.bf16 %v1896_v52, %v1895_v55 }
  0xbc   :  { %7766 = vmatprep.mubr.msk.bf16.mxu1 %vm52_vm2, %v1685_v60 }
  0xc2   :  { %7741 = vmatmul.mubr.msk.bf16.gmra.mxu0 %vm52_vm2, %v1459_v3  ;;  %v1898_v3 = vld [vmem:[#allocation2 + $0x8e] sm:$0xff] }
  0xc3   :  { %7767 = vmatmul.mubr.msk.bf16.gmra.mxu1 %vm52_vm2, %v1686_v5  ;;  %7744 = vmatprep.mubr.msk.bf16.mxu0 %vm52_vm2, %v1460_v48  ;;  %v1913_v20 = vpack.c.bf16 %v1898_v3, %v1897_v11 }
  0xc4   :  { %7770 = vmatprep.mubr.msk.bf16.mxu1 %vm52_vm2, %v1687_v12  ;;  %v1899_v12 = vld [vmem:[#allocation2 + $0x96] sm:$0xff] }
  0xca   :  { %7745 = vmatmul.mubr.msk.bf16.gmra.mxu0 %vm52_vm2, %v1461_v15  ;;  %v1914_v15 = vpack.c.bf16 %v1900_v13, %v1899_v12 }
  0xcb   :  { %7771 = vmatmul.mubr.msk.bf16.gmra.mxu1 %vm52_vm2, %v1688_v18  ;;  %7748 = vmatprep.mubr.msk.bf16.mxu0 %vm52_vm2, %v1462_v19 }
  0xcc   :  { %7774 = vmatprep.mubr.msk.bf16.mxu1 %vm52_vm2, %v1689_v21 }
  0xd2   :  { %7749 = vmatmul.mubr.msk.bf16.gmra.mxu0 %vm52_vm2, %v1463_v26 }
  0xd3   :  { %7775 = vmatmul.mubr.msk.bf16.gmra.mxu1 %vm52_vm2, %v1690_v28  ;;  %7780 = vmatprep.mubr.msk.bf16.mxu0 %vm52_vm2, %v1906_v29  ;;  %v1903_v29 = vld [vmem:[#allocation2 + $0xb6] sm:$0xff] }
  0xda   :  { %v7574_v36 = vpop.f32.mrf.mxu0  ;;  %7781 = vmatmul.mubr.msk.bf16.vlgmr.msra.gmra.mxu0 %vm52_vm2, %v1907_v34  ;;  %v1915_v34 = vpack.c.bf16 %v1902_v25, %v1901_v24 }
  0xdb   :  { %v7600_v37 = vpop.f32.mrf.mxu1  ;;  %7784 = vmatprep.mubr.msk.bf16.mxu0 %vm52_vm2, %v1908_v35 }
  0xdc   :  { %v8728_v38 = vadd.f32 %v7600_v37, %v7574_v36  ;;  %v260_v45 = vpop.f32.mrf.mxu0  ;;  %v1916_v36 = vpack.c.bf16 %v1904_v27, %v1903_v29 }
  0xdd   :  { %v427_v46 = vpop.f32.mrf.mxu1 }
  0xde   :  { %v8731_v51 = vadd.f32 %v427_v46, %v260_v45  ;;  %v7575_v53 = vpop.f32.mrf.mxu0 }
  0xdf   :  { %v7601_v54 = vpop.f32.mrf.mxu1 }
  0xe0   :  { %v8733_v58 = vadd.f32 %v7601_v54, %v7575_v53  ;;  %v8735_v32 = vpop.f32.mrf.mxu0 }
  0xe1   :  { %v8737_v39 = vpop.f32.mrf.mxu1 }
  0xe2   :  { %v7578_v59 = vpop.f32.mrf.mxu0  ;;  %7785 = vmatmul.mubr.msk.bf16.gmra.mxu0 %vm52_vm2, %v1909_v57 }
  0xe3   :  { %v7604_v63 = vpop.f32.mrf.mxu1  ;;  %7788 = vmatprep.mubr.msk.bf16.mxu0 %vm52_vm2, %v1910_v62 }
  0xe4   :  { %v8740_v0 = vadd.f32 %v7604_v63, %v7578_v59  ;;  %v276_v43 = vpop.f32.mrf.mxu0  ;;  %v1917_v59 = vpack.c.bf16 %v1905_v49, %v1905_v49 }
  0xe5   :  { %v443_v44 = vpop.f32.mrf.mxu1 }
  0xe6   :  { %v8743_v2 = vadd.f32 %v443_v44, %v276_v43  ;;  %v7579_v4 = vpop.f32.mrf.mxu0 }
  0xe7   :  { %v7605_v47 = vpop.f32.mrf.mxu1 }
  0xe8   :  { %v8745_v6 = vadd.f32 %v7605_v47, %v7579_v4  ;;  %v8747_v60 = vpop.f32.mrf.mxu0 }
  0xe9   :  { %v8749_v8 = vpop.f32.mrf.mxu1 }
  0xea   :  { %v7582_v9 = vpop.f32.mrf.mxu0  ;;  %7789 = vmatmul.mubr.msk.bf16.gmra.mxu0 %vm52_vm2, %v1911_v56 }
  0xeb   :  { %v7608_v10 = vpop.f32.mrf.mxu1  ;;  %7792 = vmatprep.mubr.msk.bf16.mxu0 %vm52_vm2, %v1912_v61 }
  0xec   :  { %v292_v5 = vpop.f32.mrf.mxu0 }
  0xed   :  { %v459_v48 = vpop.f32.mrf.mxu1 }
  0xee   :  { %v8753_v14 = vadd.f32 %v459_v48, %v292_v5  ;;  %v7583_v16 = vpop.f32.mrf.mxu0 }
  0xef   :  { %v7609_v17 = vpop.f32.mrf.mxu1 }
  0xf0   :  { %v8755_v18 = vpop.f32.mrf.mxu0 }
  0xf1   :  { %v8757_v19 = vpop.f32.mrf.mxu1 }
  0xf2   :  { %v7586_v21 = vpop.f32.mrf.mxu0  ;;  %7793 = vmatmul.mubr.msk.bf16.gmra.mxu0 %vm52_vm2, %v1913_v20 }
  0xf3   :  { %v7612_v22 = vpop.f32.mrf.mxu1  ;;  %7796 = vmatprep.mubr.msk.bf16.mxu0 %vm52_vm2, %v1914_v15 }
  0xf4   :  { %v8760_v23 = vadd.f32 %v7612_v22, %v7586_v21  ;;  %v308_v26 = vpop.f32.mrf.mxu0 }
  0xf5   :  { %v475_v28 = vpop.f32.mrf.mxu1 }
  0xf6   :  { %v8763_v30 = vadd.f32 %v475_v28, %v308_v26  ;;  %v7587_v31 = vpop.f32.mrf.mxu0 }
  0xf7   :  { %v7613_v33 = vpop.f32.mrf.mxu1 }
  0xf8   :  { %v8765_v35 = vadd.f32 %v7613_v33, %v7587_v31  ;;  %v8767_v37 = vpop.f32.mrf.mxu0 }
  0xf9   :  { %v8769_v41 = vpop.f32.mrf.mxu1 }
  0xfa   :  { %v7590_v42 = vpop.f32.mrf.mxu0  ;;  %7797 = vmatmul.mubr.msk.bf16.gmra.mxu0 %vm52_vm2, %v1915_v34 }
  0xfb   :  { %v7616_v45 = vpop.f32.mrf.mxu1  ;;  %7800 = vmatprep.mubr.msk.bf16.mxu0 %vm52_vm2, %v1916_v36 }
  0xfc   :  { %v8772_v46 = vadd.f32 %v7616_v45, %v7590_v42  ;;  %v324_v50 = vpop.f32.mrf.mxu0 }
  0xfd   :  { %v491_v53 = vpop.f32.mrf.mxu1 }
  0xfe   :  { %v8775_v54 = vadd.f32 %v491_v53, %v324_v50  ;;  %v7591_v57 = vpop.f32.mrf.mxu0 }
  0xff   :  { %v7617_v62 = vpop.f32.mrf.mxu1 }
 0x100   :  { %v8777_v63 = vadd.f32 %v7617_v62, %v7591_v57  ;;  %v8779_v1 = vpop.f32.mrf.mxu0 }
 0x101   :  { %v8781_v40 = vpop.f32.mrf.mxu1 }
 0x102   :  { %v7594_v43 = vpop.f32.mrf.mxu0  ;;  %7801 = vmatmul.mubr.msk.bf16.gmra.mxu0 %vm52_vm2, %v1917_v59 }
 0x103   :  { %v7620_v44 = vpop.f32.mrf.mxu1 }
 0x104   :  { %v8784_v55 = vadd.f32 %v7620_v44, %v7594_v43  ;;  %v340_v52 = vpop.f32.mrf.mxu0 }
 0x105   :  { %v507_v4 = vpop.f32.mrf.mxu1 }
 0x106   :  { %v8786_v47 = vadd.f32 %v507_v4, %v340_v52  ;;  %v7595_v56 = vpop.f32.mrf.mxu0 }
 0x107   :  { %v7621_v61 = vpop.f32.mrf.mxu1 }
 0x108   :  { %v8788_v9 = vpop.f32.mrf.mxu0 }
 0x109   :  { %10466 = vst [vmem:[#allocation20_spill] sm:$0xff] %v8788_v9  ;;  %v8790_v10 = vpop.f32.mrf.mxu1 }
 0x10a   :  { %10467 = vst [vmem:[#allocation21_spill] sm:$0xff] %v8790_v10  ;;  %v7626_v11 = vpop.f32.mrf.mxu0 }
 0x10b   :  { %v7652_v3 = vpop.f32.mrf.mxu1  ;;  %v727_v5 = vadd.f32 %v7626_v11, %v8728_v38 }
 0x10c   :  { %v631_v48 = vpop.f32.mrf.mxu0 }
 0x10d   :  { %v858_v12 = vpop.f32.mrf.mxu1  ;;  %v725_v13 = vadd.f32 %v631_v48, %v8731_v51  ;;  %v8794_v16 = vadd.f32 %v7652_v3, %v727_v5 }
 0x10e   :  { %v7627_v17 = vpop.f32.mrf.mxu0 }
 0x10f   :  { %v7653_v20 = vpop.f32.mrf.mxu1  ;;  %v728_v15 = vadd.f32 %v7627_v17, %v8733_v58  ;;  %v8797_v21 = vadd.f32 %v858_v12, %v725_v13 }
 0x110   :  { %v8799_v22 = vpop.f32.mrf.mxu0 }
 0x111   :  { %v8801_v24 = vpop.f32.mrf.mxu1  ;;  %v8803_v25 = vadd.f32 %v7653_v20, %v728_v15 }
 0x112   :  { %v7630_v26 = vpop.f32.mrf.mxu0 }
 0x113   :  { %v7656_v38 = vpop.f32.mrf.mxu1  ;;  %v731_v28 = vadd.f32 %v7630_v26, %v8740_v0 }
 0x114   :  { %v647_v29 = vpop.f32.mrf.mxu0 }
 0x115   :  { %v874_v51 = vpop.f32.mrf.mxu1  ;;  %v729_v27 = vadd.f32 %v647_v29, %v8743_v2  ;;  %v8807_v31 = vadd.f32 %v7656_v38, %v731_v28 }
 0x116   :  { %v7631_v33 = vpop.f32.mrf.mxu0 }
 0x117   :  { %v7657_v58 = vpop.f32.mrf.mxu1  ;;  %v732_v34 = vadd.f32 %v7631_v33, %v8745_v6  ;;  %v8810_v36 = vadd.f32 %v874_v51, %v729_v27 }
 0x118   :  { %v8812_v42 = vpop.f32.mrf.mxu0 }
 0x119   :  { %v8814_v45 = vpop.f32.mrf.mxu1  ;;  %v8816_v49 = vadd.f32 %v7657_v58, %v732_v34 }
 0x11a   :  { %v7634_v50 = vpop.f32.mrf.mxu0 }
 0x11b   :  { %v7660_v0 = vpop.f32.mrf.mxu1 }
 0x11c   :  { %v663_v53 = vpop.f32.mrf.mxu0 }
 0x11d   :  { %v890_v57 = vpop.f32.mrf.mxu1  ;;  %v733_v2 = vadd.f32 %v663_v53, %v8753_v14 }
 0x11e   :  { %v7635_v6 = vpop.f32.mrf.mxu0 }
 0x11f   :  { %v7661_v62 = vpop.f32.mrf.mxu1  ;;  %v8887_v59 = vadd.f32 %v890_v57, %v733_v2 }
 0x120   :  { %v8889_v43 = vpop.f32.mrf.mxu0 }
 0x121   :  { %v8891_v44 = vpop.f32.mrf.mxu1 }
 0x122   :  { %v7638_v52 = vpop.f32.mrf.mxu0 }
 0x123   :  { %v7664_v4 = vpop.f32.mrf.mxu1  ;;  %v739_v56 = vadd.f32 %v7638_v52, %v8760_v23 }
 0x124   :  { %v679_v61 = vpop.f32.mrf.mxu0 }
 0x125   :  { %v906_v11 = vpop.f32.mrf.mxu1  ;;  %v737_v3 = vadd.f32 %v679_v61, %v8763_v30  ;;  %v8895_v5 = vadd.f32 %v7664_v4, %v739_v56 }
 0x126   :  { %v7639_v48 = vpop.f32.mrf.mxu0 }
 0x127   :  { %v7665_v14 = vpop.f32.mrf.mxu1  ;;  %v740_v12 = vadd.f32 %v7639_v48, %v8765_v35  ;;  %v8898_v13 = vadd.f32 %v906_v11, %v737_v3 }
 0x128   :  { %v8900_v17 = vpop.f32.mrf.mxu0 }
 0x129   :  { %v8902_v20 = vpop.f32.mrf.mxu1  ;;  %v8904_v15 = vadd.f32 %v7665_v14, %v740_v12 }
 0x12a   :  { %v7642_v26 = vpop.f32.mrf.mxu0 }
 0x12b   :  { %v7668_v23 = vpop.f32.mrf.mxu1  ;;  %v743_v38 = vadd.f32 %v7642_v26, %v8772_v46 }
 0x12c   :  { %v695_v28 = vpop.f32.mrf.mxu0 }
 0x12d   :  { %v922_v30 = vpop.f32.mrf.mxu1  ;;  %v741_v29 = vadd.f32 %v695_v28, %v8775_v54  ;;  %v8908_v51 = vadd.f32 %v7668_v23, %v743_v38 }
 0x12e   :  { %v7643_v27 = vpop.f32.mrf.mxu0 }
 0x12f   :  { %v7669_v35 = vpop.f32.mrf.mxu1  ;;  %v744_v33 = vadd.f32 %v7643_v27, %v8777_v63  ;;  %v8911_v58 = vadd.f32 %v922_v30, %v741_v29 }
 0x130   :  { %v8913_v34 = vpop.f32.mrf.mxu0 }
 0x131   :  { %10468 = vst [vmem:[#allocation22_spill] sm:$0xff] %v8913_v34  ;;  %v8915_v50 = vpop.f32.mrf.mxu1  ;;  %v8917_v0 = vadd.f32 %v7669_v35, %v744_v33 }
 0x132   :  { %10469 = vst [vmem:[#allocation23_spill] sm:$0xff] %v8915_v50  ;;  %v7646_v53 = vpop.f32.mrf.mxu0 }
 0x133   :  { %v7672_v46 = vpop.f32.mrf.mxu1  ;;  %v747_v57 = vadd.f32 %v7646_v53, %v8784_v55 }
 0x134   :  { %v711_v2 = vpop.f32.mrf.mxu0 }
 0x135   :  { %v938_v54 = vpop.f32.mrf.mxu1  ;;  %v745_v6 = vadd.f32 %v711_v2, %v8786_v47  ;;  %v8921_v62 = vadd.f32 %v7672_v46, %v747_v57 }
 0x136   :  { %v7647_v52 = vpop.f32.mrf.mxu0 }
 0x137   :  { %v7673_v63 = vpop.f32.mrf.mxu1  ;;  %v8923_v4 = vadd.f32 %v938_v54, %v745_v6 }
 0x138   :  { %v8925_v56 = vpop.f32.mrf.mxu0 }
 0x139   :  { %10470 = vst [vmem:[#allocation24_spill] sm:$0xff] %v8925_v56  ;;  %v8927_v61 = vpop.f32.mrf.mxu1 }
 0x13a   :  { %10471 = vst [vmem:[#allocation25_spill] sm:$0xff] %v8927_v61  ;;  %v7678_v11 = vpop.f32.mrf.mxu0 }
 0x13b   :  { %v7704_v3 = vpop.f32.mrf.mxu1  ;;  %v1181_v48 = vadd.f32 %v7678_v11, %v8794_v16 }
 0x13c   :  { %v1085_v14 = vpop.f32.mrf.mxu0 }
 0x13d   :  { %v1312_v55 = vpop.f32.mrf.mxu1  ;;  %v1179_v12 = vadd.f32 %v1085_v14, %v8797_v21  ;;  %v8931_v26 = vadd.f32 %v7704_v3, %v1181_v48 }
 0x13e   :  { %v7679_v47 = vpop.f32.mrf.mxu0 }
 0x13f   :  { %v7705_v23 = vpop.f32.mrf.mxu1  ;;  %v1182_v38 = vadd.f32 %v7679_v47, %v8803_v25  ;;  %v8934_v28 = vadd.f32 %v1312_v55, %v1179_v12 }
 0x140   :  { %v8936_v30 = vpop.f32.mrf.mxu0 }
 0x141   :  { %v8938_v29 = vpop.f32.mrf.mxu1  ;;  %v8940_v27 = vadd.f32 %v7705_v23, %v1182_v38 }
 0x142   :  { %v7682_v35 = vpop.f32.mrf.mxu0 }
 0x143   :  { %v7708_v16 = vpop.f32.mrf.mxu1  ;;  %v1185_v33 = vadd.f32 %v7682_v35, %v8807_v31 }
 0x144   :  { %v1101_v53 = vpop.f32.mrf.mxu0 }
 0x145   :  { %v1328_v21 = vpop.f32.mrf.mxu1  ;;  %v1183_v46 = vadd.f32 %v1101_v53, %v8810_v36  ;;  %v8944_v57 = vadd.f32 %v7708_v16, %v1185_v33 }
 0x146   :  { %v7683_v2 = vpop.f32.mrf.mxu0 }
 0x147   :  { %v7709_v25 = vpop.f32.mrf.mxu1  ;;  %v1186_v54 = vadd.f32 %v7683_v2, %v8816_v49  ;;  %v8947_v6 = vadd.f32 %v1328_v21, %v1183_v46 }
 0x148   :  { %v8949_v52 = vpop.f32.mrf.mxu0 }
 0x149   :  { %v8951_v63 = vpop.f32.mrf.mxu1  ;;  %v8953_v11 = vadd.f32 %v7709_v25, %v1186_v54 }
 0x14a   :  { %v7686_v3 = vpop.f32.mrf.mxu0 }
 0x14b   :  { %v7712_v31 = vpop.f32.mrf.mxu1 }
 0x14c   :  { %v1117_v48 = vpop.f32.mrf.mxu0 }
 0x14d   :  { %v1344_v14 = vpop.f32.mrf.mxu1  ;;  %v1187_v36 = vadd.f32 %v1117_v48, %v8887_v59 }
 0x14e   :  { %v7687_v55 = vpop.f32.mrf.mxu0 }
 0x14f   :  { %v7713_v12 = vpop.f32.mrf.mxu1  ;;  %v8956_v47 = vadd.f32 %v1344_v14, %v1187_v36 }
 0x150   :  { %v8958_v23 = vpop.f32.mrf.mxu0 }
 0x151   :  { %v8960_v49 = vpop.f32.mrf.mxu1 }
 0x152   :  { %v7690_v38 = vpop.f32.mrf.mxu0 }
 0x153   :  { %v7716_v35 = vpop.f32.mrf.mxu1  ;;  %v1193_v16 = vadd.f32 %v7690_v38, %v8895_v5 }
 0x154   :  { %v1133_v33 = vpop.f32.mrf.mxu0 }
 0x155   :  { %v1360_v53 = vpop.f32.mrf.mxu1  ;;  %v1191_v21 = vadd.f32 %v1133_v33, %v8898_v13  ;;  %v8964_v46 = vadd.f32 %v7716_v35, %v1193_v16 }
 0x156   :  { %v7691_v2 = vpop.f32.mrf.mxu0 }
 0x157   :  { %v7717_v59 = vpop.f32.mrf.mxu1  ;;  %v1194_v25 = vadd.f32 %v7691_v2, %v8904_v15  ;;  %v8967_v54 = vadd.f32 %v1360_v53, %v1191_v21 }
 0x158   :  { %v8969_v3 = vpop.f32.mrf.mxu0 }
 0x159   :  { %10472 = vst [vmem:[#allocation26_spill] sm:$0xff] %v8967_v54  ;;  %v8971_v31 = vpop.f32.mrf.mxu1  ;;  %v8973_v48 = vadd.f32 %v7717_v59, %v1194_v25 }
 0x15a   :  { %10473 = vst [vmem:[#allocation27_spill] sm:$0xff] %v8971_v31  ;;  %v7694_v14 = vpop.f32.mrf.mxu0 }
 0x15b   :  { %10474 = vst [vmem:[#allocation28_spill] sm:$0xff] %v8973_v48  ;;  %v7720_v5 = vpop.f32.mrf.mxu1  ;;  %v1197_v36 = vadd.f32 %v7694_v14, %v8908_v51 }
 0x15c   :  { %v1149_v55 = vpop.f32.mrf.mxu0 }
 0x15d   :  { %v1376_v13 = vpop.f32.mrf.mxu1  ;;  %v1195_v12 = vadd.f32 %v1149_v55, %v8911_v58  ;;  %v8977_v38 = vadd.f32 %v7720_v5, %v1197_v36 }
 0x15e   :  { %v7695_v35 = vpop.f32.mrf.mxu0 }
 0x15f   :  { %10475 = vst [vmem:[#allocation29_spill] sm:$0xff] %v8977_v38  ;;  %v7721_v15 = vpop.f32.mrf.mxu1  ;;  %v1198_v16 = vadd.f32 %v7695_v35, %v8917_v0  ;;  %v8980_v33 = vadd.f32 %v1376_v13, %v1195_v12 }
 0x160   :  { %v8982_v53 = vpop.f32.mrf.mxu0 }
 0x161   :  { %10476 = vst [vmem:[#allocation30_spill] sm:$0xff] %v8980_v33  ;;  %10477 = vst [vmem:[#allocation31_spill] sm:$0xff] %v8982_v53  ;;  %v8984_v21 = vpop.f32.mrf.mxu1  ;;  %v8986_v2 = vadd.f32 %v7721_v15, %v1198_v16 }
 0x162   :  { %10478 = vst [vmem:[#allocation32_spill] sm:$0xff] %v8984_v21  ;;  %v7698_v59 = vpop.f32.mrf.mxu0 }
 0x163   :  { %10479 = vst [vmem:[#allocation33_spill] sm:$0xff] %v8986_v2  ;;  %v7724_v51 = vpop.f32.mrf.mxu1  ;;  %v1201_v25 = vadd.f32 %v7698_v59, %v8921_v62 }
 0x164   :  { %v1165_v14 = vpop.f32.mrf.mxu0 }
 0x165   :  { %v1392_v58 = vpop.f32.mrf.mxu1  ;;  %v1199_v5 = vadd.f32 %v1165_v14, %v8923_v4  ;;  %v8990_v36 = vadd.f32 %v7724_v51, %v1201_v25 }
 0x166   :  { %v7699_v55 = vpop.f32.mrf.mxu0 }
 0x167   :  { %10480 = vst [vmem:[#allocation34_spill] sm:$0xff] %v8990_v36  ;;  %v7725_v0 = vpop.f32.mrf.mxu1  ;;  %v8992_v13 = vadd.f32 %v1392_v58, %v1199_v5 }
 0x168   :  { %v8994_v12 = vpop.f32.mrf.mxu0 }
 0x169   :  { %10481 = vst [vmem:[#allocation35_spill] sm:$0xff] %v8992_v13  ;;  %10482 = vst [vmem:[#allocation36_spill] sm:$0xff] %v8994_v12  ;;  %v8996_v35 = vpop.f32.mrf.mxu1 }
 0x16a   :  { %10483 = vst [vmem:[#allocation37_spill] sm:$0xff] %v8996_v35  ;;  %v7730_v15 = vpop.f32.mrf.mxu0 }
 0x16b   :  { %v7756_v16 = vpop.f32.mrf.mxu1 }
 0x16c   :  { %v1539_v7 = vpop.f32.mrf.mxu0 }
 0x16d   :  { %v1766_v61 = vpop.f32.mrf.mxu1 }
 0x16e   :  { %v7731_v2 = vpop.f32.mrf.mxu0 }
 0x16f   :  { %v7757_v62 = vpop.f32.mrf.mxu1 }
 0x170   :  { %v1542_v59 = vpop.f32.mrf.mxu0 }
 0x171   :  { %v8998_v21 = vpop.f32.mrf.mxu1 }
 0x172   :  { %v7734_v4 = vpop.f32.mrf.mxu0 }
 0x173   :  { %v9000_v51 = vpop.f32.mrf.mxu1 }
 0x174   :  { %v9002_v25 = vpop.f32.mrf.mxu0 }
 0x175   :  { %v9004_v14 = vpop.f32.mrf.mxu1 }
 0x176   :  { %v9006_v58 = vpop.f32.mrf.mxu0 }
 0x177   :  { %v9008_v5 = vpop.f32.mrf.mxu1 }
 0x178   :  { %v9010_v55 = vpop.f32.mrf.mxu0 }
 0x179   :  { %v9012_v0 = vpop.f32.mrf.mxu1 }
 0x17a   :  { %v7738_v35 = vpop.f32.mrf.mxu0 }
 0x17b   :  { %v7764_v13 = vpop.f32.mrf.mxu1 }
 0x17c   :  { %v9014_v36 = vpop.f32.mrf.mxu0 }
 0x17d   :  { %v9016_v12 = vpop.f32.mrf.mxu1 }
 0x17e   :  { %v7739_v33 = vpop.f32.mrf.mxu0 }
 0x17f   :  { %v7765_v56 = vpop.f32.mrf.mxu1 }
 0x180   :  { %v9018_v38 = vpop.f32.mrf.mxu0 }
 0x181   :  { %v9020_v53 = vpop.f32.mrf.mxu1 }
 0x182   :  { %10484 = vst [vmem:[#allocation38_spill] sm:$0xff] %v9020_v53  ;;  %v9022_v10 = vpop.f32.mrf.mxu0 }
 0x183   :  { %v9024_v9 = vpop.f32.mrf.mxu1 }
 0x184   :  { %10485 = vst [vmem:[#allocation39_spill] sm:$0xff] %v9024_v9  ;;  %v9026_v50 = vpop.f32.mrf.mxu0  ;;  %v431_v9 = vadd.f32 %v8737_v39, %v8735_v32  ;;  %v447_v32 = vadd.f32 %v8749_v8, %v8747_v60 }
 0x185   :  { %10486 = vst [vmem:[#allocation40_spill] sm:$0xff] %v9026_v50  ;;  %v9028_v48 = vpop.f32.mrf.mxu1 }
 0x186   :  { %10487 = vst [vmem:[#allocation41_spill] sm:$0xff] %v9028_v48  ;;  %v9030_v35 = vpop.f32.mrf.mxu0 }
 0x187   :  { %10488 = vst [vmem:[#allocation42_spill] sm:$0xff] %v9030_v35  ;;  %v9032_v13 = vpop.f32.mrf.mxu1 }
 0x188   :  { %10489 = vst [vmem:[#allocation43_spill] sm:$0xff] %v9032_v13  ;;  %v9034_v31 = vpop.f32.mrf.mxu0  ;;  %v726_v13 = vadd.f32 %v8799_v22, %v431_v9  ;;  %v1635_v9 = vadd.f32 %v7730_v15, %v8931_v26  ;;  %v463_v26 = vadd.f32 %v8757_v19, %v8755_v18 }
 0x189   :  { %10490 = vst [vmem:[#allocation44_spill] sm:$0xff] %v9034_v31  ;;  %v9036_v33 = vpop.f32.mrf.mxu1 }
 0x18a   :  { %10491 = vst [vmem:[#allocation45_spill] sm:$0xff] %v9036_v33  ;;  %v9038_v56 = vpop.f32.mrf.mxu0 }
 0x18b   :  { %10492 = vst [vmem:[#allocation46_spill] sm:$0xff] %v9038_v56  ;;  %v9040_v54 = vpop.f32.mrf.mxu1 }
 0x18c   :  { %10493 = vst [vmem:[#allocation47_spill] sm:$0xff] %v9040_v54  ;;  %v9042_v53 = vpop.f32.mrf.mxu0 }
 0x18d   :  { %10494 = vst [vmem:[#allocation48_spill] sm:$0xff] %v9042_v53  ;;  %v9044_v34 = vpop.f32.mrf.mxu1  ;;  %v953_v53 = vadd.f32 %v8801_v24, %v726_v13  ;;  %v1862_v13 = vadd.f32 %v7756_v16, %v1635_v9 }
 0x18e   :  { %10495 = vst [vmem:[#allocation49_spill] sm:$0xff] %v9044_v34  ;;  %v9048_v48 = vpop.f32.mrf.mxu0 }
 0x18f   :  { %v9050_v35 = vpop.f32.mrf.mxu1  ;;  %v1180_v39 = vadd.f32 %v8936_v30, %v953_v53 }
 0x190   :  { %10496 = vst [vmem:[#allocation50_spill] sm:$0xff] %v9050_v35  ;;  %v9053_v31 = vpop.f32.mrf.mxu0 }
 0x191   :  { %v9055_v33 = vpop.f32.mrf.mxu1  ;;  %v1407_v24 = vadd.f32 %v8938_v29, %v1180_v39  ;;  %v1647_v39 = vadd.f32 %v9022_v10, %v8964_v46  ;;  %v10508_v46 = vld [vmem:[#allocation28_spill] sm:$0xff] }
 0x192   :  { %10497 = vst [vmem:[#allocation51_spill] sm:$0xff] %v9055_v33  ;;  %v9057_v56 = vpop.f32.mrf.mxu0  ;;  %v730_v33 = vadd.f32 %v8812_v42, %v447_v32 }
 0x193   :  { %10498 = vst [vmem:[#allocation52_spill] sm:$0xff] %v9057_v56  ;;  %v9059_v54 = vpop.f32.mrf.mxu1  ;;  %v1633_v56 = vadd.f32 %v1539_v7, %v8934_v28  ;;  %v1634_v30 = vadd.f32 %v1542_v59, %v1407_v24  ;;  %v1639_v28 = vadd.f32 %v7734_v4, %v8944_v57  ;;  %v1640_v57 = vadd.f32 %v9006_v58, %v8953_v11 }
 0x194   :  { %10499 = vst [vmem:[#allocation53_spill] sm:$0xff] %v9059_v54  ;;  %v9062_v34 = vpop.f32.mrf.mxu0  ;;  %v957_v60 = vadd.f32 %v8814_v45, %v730_v33 }
 0x195   :  { %10500 = vst [vmem:[#allocation54_spill] sm:$0xff] %v9062_v34  ;;  %v9064_v50 = vpop.f32.mrf.mxu1  ;;  %v1860_v8 = vadd.f32 %v1766_v61, %v1633_v56  ;;  %v1861_v45 = vadd.f32 %v8998_v21, %v1634_v30  ;;  %v1867_v11 = vadd.f32 %v9008_v5, %v1640_v57 }
 0x196   :  { %10501 = vst [vmem:[#allocation55_spill] sm:$0xff] %v9064_v50  ;;  %v7751_v22 = vpop.f32.mrf.mxu0  ;;  %v1636_v50 = vadd.f32 %v7731_v2, %v8940_v27  ;;  %v1184_v42 = vadd.f32 %v8949_v52, %v957_v60  ;;  %v734_v27 = vadd.f32 %v8889_v43, %v463_v26  ;;  %v10504_v60 = vld [vmem:[#allocation26_spill] sm:$0xff]  ;;  %v10507_v26 = vld [vmem:[#allocation39_spill] sm:$0xff] }
 0x197   :  { %v7777_v35 = vpop.f32.mrf.mxu1  ;;  %v10502_v22 = vld [vmem:[#allocation22_spill] sm:$0xff]  ;;  %v1874_v10 = vadd.f32 %v10507_v26, %v1647_v39 }
 0x198   :  { %v9072_v54 = vpop.f32.mrf.mxu0  ;;  %v1863_v7 = vadd.f32 %v7757_v62, %v1636_v50  ;;  %v1411_v61 = vadd.f32 %v8951_v63, %v1184_v42  ;;  %v1866_v50 = vadd.f32 %v9000_v51, %v1639_v28  ;;  %v961_v21 = vadd.f32 %v8891_v44, %v734_v27  ;;  %v10510_v28 = vld [vmem:[#allocation23_spill] sm:$0xff] }
 0x199   :  { %v479_v63 = vadd.f32 %v8769_v41, %v8767_v37 }
 0x19a   :  { %v7782_v34 = vpop.f32.mrf.mxu0  ;;  %v1188_v4 = vadd.f32 %v8958_v23, %v961_v21  ;;  %v10514_v21 = vld [vmem:[#allocation21_spill] sm:$0xff] }
 0x19b   :  { %v2089_v53 = vadd.f32 %v7782_v34, %v1862_v13  ;;  %v1637_v34 = vadd.f32 %v9002_v25, %v8947_v6  ;;  %v1638_v6 = vadd.f32 %v9010_v55, %v1411_v61  ;;  %v1641_v55 = vadd.f32 %v9014_v36, %v8956_v47  ;;  %v10503_v13 = vld [vmem:[#allocation38_spill] sm:$0xff]  ;;  %v10512_v61 = vld [vmem:[#allocation44_spill] sm:$0xff] }
 0x19c   :  { %v1993_v15 = vpop.f32.mrf.mxu0  ;;  %v1415_v5 = vadd.f32 %v8960_v49, %v1188_v4  ;;  %v495_v49 = vadd.f32 %v8781_v40, %v8779_v1 }
 0x19d   :  { %2113 = vst.msk [vmem:[#allocation3 + $0x10] sm:$0xff] %vm2110_vm3, %v2089_v53  ;;  %v2087_v29 = vadd.f32 %v1993_v15, %v1860_v8  ;;  %v1864_v2 = vadd.f32 %v9004_v14, %v1637_v34  ;;  %v738_v14 = vadd.f32 %v8900_v17, %v479_v63  ;;  %v1865_v58 = vadd.f32 %v9012_v0, %v1638_v6  ;;  %v10505_v8 = vld [vmem:[#allocation40_spill] sm:$0xff]  ;;  %v10509_v15 = vld [vmem:[#allocation42_spill] sm:$0xff]  ;;  %v10515_v6 = vld [vmem:[#allocation31_spill] sm:$0xff] }
 0x19e   :  { %v7783_v16 = vpop.f32.mrf.mxu0  ;;  %v1868_v47 = vadd.f32 %v9016_v12, %v1641_v55  ;;  %v1642_v36 = vadd.f32 %v9018_v38, %v1415_v5  ;;  %v1645_v30 = vadd.f32 %v10505_v8, %v10504_v60  ;;  %v1648_v42 = vadd.f32 %v10509_v15, %v10508_v46  ;;  %v10528_v46 = vld [vmem:[#allocation36_spill] sm:$0xff] }
 0x19f   :  { %2111 = vst.msk [vmem:[#allocation3] sm:$0xff] %vm2110_vm3, %v2087_v29  ;;  %v2090_v18 = vadd.f32 %v7783_v16, %v1863_v7  ;;  %v965_v0 = vadd.f32 %v8902_v20, %v738_v14  ;;  %v742_v20 = vadd.f32 %v10502_v22, %v495_v49  ;;  %v10523_v49 = vld [vmem:[#allocation32_spill] sm:$0xff] }
 0x1a0   :  { %v1996_v19 = vpop.f32.mrf.mxu0  ;;  %v1869_v38 = vadd.f32 %v10503_v13, %v1642_v36 }
 0x1a1   :  { %2114 = vst.msk [vmem:[#allocation3 + $0x18] sm:$0xff] %vm2110_vm3, %v2090_v18  ;;  %v2088_v52 = vadd.f32 %v1996_v19, %v1861_v45  ;;  %v1192_v32 = vadd.f32 %v8969_v3, %v965_v0  ;;  %v10506_v3 = vld [vmem:[#allocation27_spill] sm:$0xff]  ;;  %v969_v29 = vadd.f32 %v10510_v28, %v742_v20  ;;  %v10511_v18 = vld [vmem:[#allocation41_spill] sm:$0xff]  ;;  %v10522_v0 = vld [vmem:[#allocation48_spill] sm:$0xff] }
 0x1a2   :  { %v7786_v43 = vpop.f32.mrf.mxu0  ;;  %v1872_v19 = vadd.f32 %v10511_v18, %v1645_v30  ;;  %v10525_v20 = vld [vmem:[#allocation33_spill] sm:$0xff] }
 0x1a3   :  { %2112 = vst.msk [vmem:[#allocation3 + $0x8] sm:$0xff] %vm2110_vm3, %v2088_v52  ;;  %v2093_v62 = vadd.f32 %v7786_v43, %v1866_v50  ;;  %v1419_v53 = vadd.f32 %v10506_v3, %v1192_v32  ;;  %v10513_v43 = vld [vmem:[#allocation20_spill] sm:$0xff]  ;;  %v10527_v3 = vld [vmem:[#allocation49_spill] sm:$0xff] }
 0x1a4   :  { %v2009_v59 = vpop.f32.mrf.mxu0 }
 0x1a5   :  { %2117 = vst.msk [vmem:[#allocation3 + $0x30] sm:$0xff] %vm2110_vm3, %v2093_v62  ;;  %v2091_v51 = vadd.f32 %v2009_v59, %v1864_v2  ;;  %v1646_v50 = vadd.f32 %v10512_v61, %v1419_v53  ;;  %v511_v2 = vadd.f32 %v10514_v21, %v10513_v43  ;;  %v1196_v62 = vadd.f32 %v10515_v6, %v969_v29  ;;  %v10516_v59 = vld [vmem:[#allocation43_spill] sm:$0xff]  ;;  %v10530_v29 = vld [vmem:[#allocation34_spill] sm:$0xff] }
 0x1a6   :  { %v2135_v25 = vld [vmem:[#allocation3] sm:$0xff]  ;;  %v7787_v44 = vpop.f32.mrf.mxu0  ;;  %v1875_v4 = vadd.f32 %v10516_v59, %v1648_v42 }
 0x1a7   :  { %2136 = vst.msk [vmem:[#allocation4] sm:$0xff] %vm2110_vm3, %v2135_v25  ;;  %2115 = vst.msk [vmem:[#allocation3 + $0x20] sm:$0xff] %vm2110_vm3, %v2091_v51  ;;  %v2094_v37 = vadd.f32 %v7787_v44, %v1867_v11  ;;  %v10517_v11 = vld [vmem:[#allocation29_spill] sm:$0xff]  ;;  %v10518_v51 = vld [vmem:[#allocation46_spill] sm:$0xff] }
 0x1a8   :  { %v2139_v41 = vld [vmem:[#allocation3 + $0x14] sm:$0xff]  ;;  %v2012_v23 = vpop.f32.mrf.mxu0  ;;  %v1651_v25 = vadd.f32 %v10518_v51, %v10517_v11  ;;  %v10534_v43 = vld [vmem:[#allocation54_spill] sm:$0xff] }
 0x1a9   :  { %2140 = vst.msk [vmem:[#allocation4 + $0x10] sm:$0xff] %vm2110_vm3, %v2139_v41  ;;  %2118 = vst.msk [vmem:[#allocation3 + $0x38] sm:$0xff] %vm2110_vm3, %v2094_v37  ;;  %v2092_v35 = vadd.f32 %v2012_v23, %v1865_v58  ;;  %v10519_v58 = vld [vmem:[#allocation24_spill] sm:$0xff]  ;;  %v10536_v51 = vld [vmem:[#allocation53_spill] sm:$0xff] }
 0x1aa   :  { %v2137_v17 = vld [vmem:[#allocation3 + $0xa] sm:$0xff]  ;;  %v7790_v33 = vpop.f32.mrf.mxu0  ;;  %v746_v55 = vadd.f32 %v10519_v58, %v511_v2  ;;  %v8217_v58 = vld [vmem:[%s10452_s4] sm:$0xff]  }
 0x1ab   :  { %2138 = vst.msk [vmem:[#allocation4 + $0x8] sm:$0xff] %vm2110_vm3, %v2137_v17  ;;  %2116 = vst.msk [vmem:[#allocation3 + $0x28] sm:$0xff] %vm2110_vm3, %v2092_v35  ;;  %v10520_v35 = vld [vmem:[#allocation45_spill] sm:$0xff]  ;;  %v10521_v33 = vld [vmem:[#allocation30_spill] sm:$0xff]  ;;  %7830 = vmatprep.subr.bf16.mxu0 %v8217_v58 }
 0x1ac   :  { %v2025_v56 = vpop.f32.mrf.mxu0  ;;  %v1873_v17 = vadd.f32 %v10520_v35, %v1646_v50  ;;  %v10532_v50 = vld [vmem:[#allocation51_spill] sm:$0xff]  ;;  %7831 = vmatpush3.bf16.msra.mxu0 %v8217_v58 }
 0x1ad   :  { %v2095_v9 = vadd.f32 %v2025_v56, %v1868_v47  ;;  %v1649_v47 = vadd.f32 %v10522_v0, %v10521_v33  ;;  %v1423_v56 = vadd.f32 %v10523_v49, %v1196_v62  ;;  %v10537_v35 = vld [vmem:[#allocation55_spill] sm:$0xff] }
 0x1ae   :  { %v2141_v24 = vld [vmem:[#allocation3 + $0x1e] sm:$0xff]  ;;  %v7791_v12 = vpop.f32.mrf.mxu0 }
 0x1af   :  { %2142 = vst.msk [vmem:[#allocation4 + $0x18] sm:$0xff] %vm2110_vm3, %v2141_v24  ;;  %2119 = vst.msk [vmem:[#allocation3 + $0x40] sm:$0xff] %vm2110_vm3, %v2095_v9  ;;  %v9132_v16 = vld [vmem:[#allocation4] sm:$0xff]  ;;  %v10524_v9 = vld [vmem:[#allocation47_spill] sm:$0xff]  ;;  %v1652_v24 = vadd.f32 %v9048_v48, %v10525_v20  ;;  %v1876_v53 = vadd.f32 %v10527_v3, %v1649_v47  ;;  %v1650_v26 = vadd.f32 %v9053_v31, %v1423_v56 }
 0x1b0   :  { %v2145_v1 = vld [vmem:[#allocation3 + $0x32] sm:$0xff]  ;;  %v2028_v40 = vpop.f32.mrf.mxu0  ;;  %v2183_v44 = vsel %vm2110_vm3, %v9132_v16, 0.0  ;;  %v9152_v37 = vld [vmem:[#allocation4 + $0x10] sm:$0xff]  ;;  %v1878_v22 = vadd.f32 %v10524_v9, %v1651_v25 }
 0x1b1   :  { %2146 = vst.msk [vmem:[#allocation4 + $0x28] sm:$0xff] %vm2110_vm3, %v2145_v1  ;;  %v2096_v7 = vadd.f32 %v2028_v40, %v1869_v38  ;;  %v2186_v12 = vsel %vm2110_vm3, %v9152_v37, 0.0  ;;  %v10526_v38 = vld [vmem:[#allocation25_spill] sm:$0xff] }
 0x1b2   :  { %v9134_v27 = vld [vmem:[#allocation4 + $0x8] sm:$0xff]  ;;  %v2143_v45 = vld [vmem:[#allocation3 + $0x28] sm:$0xff]  ;;  %v7794_v34 = vpop.f32.mrf.mxu0  ;;  %v973_v60 = vadd.f32 %v10526_v38, %v746_v55 }
 0x1b3   :  { %v2184_v57 = vsel %vm2110_vm3, %v9134_v27, 0.0  ;;  %2144 = vst.msk [vmem:[#allocation4 + $0x20] sm:$0xff] %vm2110_vm3, %v2143_v45  ;;  %2120 = vst.msk [vmem:[#allocation3 + $0x48] sm:$0xff] %vm2110_vm3, %v2096_v7  ;;  %v2101_v52 = vadd.f32 %v7794_v34, %v1874_v10  ;;  %v10529_v7 = vld [vmem:[#allocation50_spill] sm:$0xff]  ;;  %v10531_v45 = vld [vmem:[#allocation52_spill] sm:$0xff] }
 0x1b4   :  { %v2041_v63 = vpop.f32.mrf.mxu0  ;;  %v2185_v41 = vadd.f32 %v2184_v57, %v2183_v44  ;;  %v1200_v15 = vadd.f32 %v10528_v46, %v973_v60  ;;  %v1879_v28 = vadd.f32 %v10529_v7, %v1652_v24  ;;  %v1655_v34 = vadd.f32 %v10531_v45, %v10530_v29 }
 0x1b5   :  { %2125 = vst.msk [vmem:[#allocation3 + $0x70] sm:$0xff] %vm2110_vm3, %v2101_v52  ;;  %v2099_v14 = vadd.f32 %v2041_v63, %v1872_v19  ;;  %v1877_v57 = vadd.f32 %v10532_v50, %v1650_v26  ;;  %v10533_v52 = vld [vmem:[#allocation35_spill] sm:$0xff] }
 0x1b6   :  { %v2147_v23 = vld [vmem:[#allocation3 + $0x3c] sm:$0xff]  ;;  %v7795_v5 = vpop.f32.mrf.mxu0  ;;  %v9160_v32 = vld [vmem:[#allocation4 + $0x18] sm:$0xff]  ;;  %v2187_v8 = vadd.f32 %v2186_v12, %v2185_v41  ;;  %v1653_v21 = vadd.f32 %v10534_v43, %v10533_v52  ;;  %v1882_v25 = vadd.f32 %v10536_v51, %v1655_v34  ;;  %v9240_v43 = vld [vmem:[%s10452_s4 + $0x10] sm:$0xff]  }
 0x1b7   :  { %2148 = vst.msk [vmem:[#allocation4 + $0x30] sm:$0xff] %vm2110_vm3, %v2147_v23  ;;  %2123 = vst.msk [vmem:[#allocation3 + $0x60] sm:$0xff] %vm2110_vm3, %v2099_v14  ;;  %v2102_v36 = vadd.f32 %v7795_v5, %v1875_v4  ;;  %v2188_v48 = vsel %vm2110_vm3, %v9160_v32, 0.0  ;;  %v10535_v4 = vld [vmem:[#allocation37_spill] sm:$0xff]  ;;  %v8216_v14 = vld [vmem:[%s10452_s4 + $0x8] sm:$0xff]  }
 0x1b8   :  { %v2044_v39 = vpop.f32.mrf.mxu0  ;;  %v2189_v19 = vadd.f32 %v2188_v48, %v2187_v8  ;;  %v9188_v6 = vld [vmem:[#allocation4 + $0x28] sm:$0xff]  ;;  %v1427_v11 = vadd.f32 %v10535_v4, %v1200_v15  ;;  %7804 = vmatprep.subr.bf16.mxu1 %v8216_v14 }
 0x1b9   :  { %2126 = vst.msk [vmem:[#allocation3 + $0x78] sm:$0xff] %vm2110_vm3, %v2102_v36  ;;  %v2100_v13 = vadd.f32 %v2044_v39, %v1873_v17  ;;  %v1880_v17 = vadd.f32 %v10537_v35, %v1653_v21  ;;  %v2192_v47 = vsel %vm2110_vm3, %v9188_v6, 0.0  ;;  %v1849_v36 = vpop.f32.mrf.mxu1  ;;  %7805 = vmatpush3.bf16.msra.mxu1 %v8216_v14 }
 0x1ba   :  { %v9169_v30 = vld [vmem:[#allocation4 + $0x20] sm:$0xff]  ;;  %v2149_v1 = vld [vmem:[#allocation3 + $0x46] sm:$0xff]  ;;  %v7798_v40 = vpop.f32.mrf.mxu0  ;;  %v1654_v33 = vadd.f32 %v9072_v54, %v1427_v11  ;;  %7856 = vmatprep.subr.bf16.mxu1 %v9240_v43 }
 0x1bb   :  { %2150 = vst.msk [vmem:[#allocation4 + $0x38] sm:$0xff] %vm2110_vm3, %v2149_v1  ;;  %2124 = vst.msk [vmem:[#allocation3 + $0x68] sm:$0xff] %vm2110_vm3, %v2100_v13  ;;  %v2105_v10 = vadd.f32 %v7798_v40, %v1878_v22  ;;  %v2190_v31 = vsel %vm2110_vm3, %v9169_v30, 0.0 }
 0x1bc   :  { %v2057_v42 = vpop.f32.mrf.mxu0  ;;  %v2191_v59 = vadd.f32 %v2190_v31, %v2189_v19  ;;  %v1881_v20 = vadd.f32 %v1849_v36, %v1654_v33 }
 0x1bd   :  { %2129 = vst.msk [vmem:[#allocation3 + $0x90] sm:$0xff] %vm2110_vm3, %v2105_v10  ;;  %v2103_v18 = vadd.f32 %v2057_v42, %v1876_v53 }
 0x1be   :  { %v7799_v61 = vpop.f32.mrf.mxu0  ;;  %v9200_v55 = vld [vmem:[#allocation4 + $0x30] sm:$0xff]  ;;  %v2193_v39 = vadd.f32 %v2192_v47, %v2191_v59 }
 0x1bf   :  { %2127 = vst.msk [vmem:[#allocation3 + $0x80] sm:$0xff] %vm2110_vm3, %v2103_v18  ;;  %v2106_v2 = vadd.f32 %v7799_v61, %v1879_v28  ;;  %v2194_v9 = vsel %vm2110_vm3, %v9200_v55, 0.0 }
 0x1c0   :  { %v2155_v62 = vld [vmem:[#allocation3 + $0x78] sm:$0xff]  ;;  %v2060_v63 = vpop.f32.mrf.mxu0  ;;  %v2195_v38 = vadd.f32 %v2194_v9, %v2193_v39 }
 0x1c1   :  { %2156 = vst.msk [vmem:[#allocation4 + $0x50] sm:$0xff] %vm2110_vm3, %v2155_v62  ;;  %2130 = vst.msk [vmem:[#allocation3 + $0x98] sm:$0xff] %vm2110_vm3, %v2106_v2  ;;  %v2104_v44 = vadd.f32 %v2060_v63, %v1877_v57 }
 0x1c2   :  { %v2151_v41 = vld [vmem:[#allocation3 + $0x64] sm:$0xff]  ;;  %v2153_v23 = vld [vmem:[#allocation3 + $0x6e] sm:$0xff]  ;;  %v7802_v5 = vpop.f32.mrf.mxu0 }
 0x1c3   :  { %2152 = vst.msk [vmem:[#allocation4 + $0x40] sm:$0xff] %vm2110_vm3, %v2151_v41  ;;  %2154 = vst.msk [vmem:[#allocation4 + $0x48] sm:$0xff] %vm2110_vm3, %v2153_v23  ;;  %v2109_v0 = vadd.f32 %v7802_v5, %v1882_v25  ;;  %v9209_v56 = vld [vmem:[#allocation4 + $0x38] sm:$0xff] }
 0x1c4   :  { %2128 = vst.msk [vmem:[#allocation3 + $0x88] sm:$0xff] %vm2110_vm3, %v2104_v44  ;;  %v2073_v49 = vpop.f32.mrf.mxu0  ;;  %v2196_v24 = vsel %vm2110_vm3, %v9209_v56, 0.0 }
 0x1c5   :  { %2134 = vst.msk [vmem:[#allocation3 + $0xb0] sm:$0x3] %vm2133_vm4, %v2109_v0  ;;  %v2107_v54 = vadd.f32 %v2073_v49, %v1880_v17  ;;  %v2197_v3 = vadd.f32 %v2196_v24, %v2195_v38 }
 0x1c6   :  { %v7803_v22 = vpop.f32.mrf.mxu0 }
 0x1c7   :  { %2131 = vst.msk [vmem:[#allocation3 + $0xa0] sm:$0xff] %vm2110_vm3, %v2107_v54 }
 0x1c8   :  { %v2161_v12 = vld [vmem:[#allocation3 + $0x96] sm:$0xff]  ;;  %v2076_v13 = vpop.f32.mrf.mxu0  ;;  %v2177_v15 = vld [vmem:[#allocation4 + $0x50] sm:$0xff] }
 0x1c9   :  { %2162 = vst.msk [vmem:[#allocation4 + $0x68] sm:$0xff] %vm2110_vm3, %v2161_v12  ;;  %v2108_v60 = vadd.f32 %v2076_v13, %v1881_v20  ;;  %v2202_v7 = vsel %vm2110_vm3, %v2177_v15, 0.0 }
 0x1ca   :  { %v2175_v40 = vld [vmem:[#allocation4 + $0x40] sm:$0xff]  ;;  %v2176_v53 = vld [vmem:[#allocation4 + $0x48] sm:$0xff] }
 0x1cb   :  { %v2157_v8 = vld [vmem:[#allocation3 + $0x82] sm:$0xff]  ;;  %v2159_v1 = vld [vmem:[#allocation3 + $0x8c] sm:$0xff]  ;;  %2132 = vst.msk [vmem:[#allocation3 + $0xa8] sm:$0xff] %vm2110_vm3, %v2108_v60  ;;  %v2198_v26 = vsel %vm2110_vm3, %v2175_v40, 0.0  ;;  %v2200_v10 = vsel %vm2110_vm3, %v2176_v53, 0.0 }
 0x1cc   :  { %2158 = vst.msk [vmem:[#allocation4 + $0x58] sm:$0xff] %vm2110_vm3, %v2157_v8  ;;  %2160 = vst.msk [vmem:[#allocation4 + $0x60] sm:$0xff] %vm2110_vm3, %v2159_v1  ;;  %v2199_v48 = vadd.f32 %v2198_v26, %v2197_v3 }
 0x1ce   :  { %v2163_v46 = vld [vmem:[#allocation3 + $0xa0] sm:$0xff]  ;;  %v2201_v42 = vadd.f32 %v2200_v10, %v2199_v48 }
 0x1cf   :  { %2164 = vst.msk [vmem:[#allocation4 + $0x70] sm:$0xff] %vm2110_vm3, %v2163_v46 }
 0x1d0   :  { %v2203_v34 = vadd.f32 %v2202_v7, %v2201_v42  ;;  %v9229_v31 = vld [vmem:[#allocation4 + $0x68] sm:$0xff] }
 0x1d1   :  { %v2208_v52 = vsel %vm2110_vm3, %v9229_v31, 0.0 }
 0x1d2   :  { %v2165_v28 = vld [vmem:[#allocation3 + $0xaa] sm:$0xff] }
 0x1d3   :  { %v2178_v29 = vld [vmem:[#allocation4 + $0x58] sm:$0xff]  ;;  %v9225_v45 = vld [vmem:[#allocation4 + $0x60] sm:$0xff]  ;;  %2166 = vst.msk [vmem:[#allocation4 + $0x78] sm:$0xff] %vm2110_vm3, %v2165_v28 }
 0x1d4   :  { %v2204_v18 = vsel %vm2110_vm3, %v2178_v29, 0.0  ;;  %v2206_v61 = vsel %vm2110_vm3, %v9225_v45, 0.0 }
 0x1d5   :  { %v2205_v19 = vadd.f32 %v2204_v18, %v2203_v34 }
 0x1d6   :  { %v9233_v50 = vld [vmem:[#allocation4 + $0x70] sm:$0xff] }
 0x1d7   :  { %v2207_v57 = vadd.f32 %v2206_v61, %v2205_v19  ;;  %v2210_v2 = vsel %vm2110_vm3, %v9233_v50, 0.0 }
 0x1d9   :  { %v2209_v21 = vadd.f32 %v2208_v52, %v2207_v57 }
 0x1da   :  { %v2182_v62 = vld [vmem:[#allocation4 + $0x78] sm:$0xff] }
 0x1db   :  { %v2211_v63 = vadd.f32 %v2210_v2, %v2209_v21  ;;  %v2212_v59 = vsel %vm2110_vm3, %v2182_v62, 0.0 }
 0x1dd   :  { %v2213_v4 = vadd.f32 %v2212_v59, %v2211_v63 }
 0x1df   :  { %v2214_v11 = vrot.slane %v2213_v4, 4 }
 0x1e1   :  { %v2215_v51 = vadd.f32 %v2214_v11, %v2213_v4 }
 0x1e3   :  { %v2216_v25 = vrot.slane %v2215_v51, 2 }
 0x1e5   :  { %v2217_v44 = vadd.f32 %v2216_v25, %v2215_v51 }
 0x1e7   :  { %v2218_v14 = vrot.slane %v2217_v44, 1 }
 0x1e9   :  { %v2219_v58 = vadd.f32 %v2218_v14, %v2217_v44 }
 0x1eb   :  { %v2221_v41 = vmul.f32 0.0078125, %v2219_v58 }
 0x1ed   :  { %v9247_v23 = vsub.f32 %v9132_v16, %v2221_v41  ;;  %v9250_v5 = vsub.f32 %v9134_v27, %v2221_v41  ;;  %v9253_v35 = vsub.f32 %v9152_v37, %v2221_v41  ;;  %v9256_v17 = vsub.f32 %v9160_v32, %v2221_v41 }
 0x1ee   :  { %v9263_v47 = vsub.f32 %v9169_v30, %v2221_v41  ;;  %v9268_v27 = vsub.f32 %v9188_v6, %v2221_v41  ;;  %v9275_v39 = vsub.f32 %v9200_v55, %v2221_v41  ;;  %v9281_v6 = vsub.f32 %v9209_v56, %v2221_v41 }
 0x1ef   :  { %v2238_v33 = vmul.f32 %v9247_v23, %v9247_v23  ;;  %v2239_v0 = vmul.f32 %v9250_v5, %v9250_v5  ;;  %v2240_v16 = vmul.f32 %v9253_v35, %v9253_v35  ;;  %v2241_v37 = vmul.f32 %v9256_v17, %v9256_v17 }
 0x1f0   :  { %v2242_v30 = vmul.f32 %v9263_v47, %v9263_v47  ;;  %v2243_v22 = vmul.f32 %v9268_v27, %v9268_v27  ;;  %v9286_v12 = vsub.f32 %v2175_v40, %v2221_v41  ;;  %v2244_v55 = vmul.f32 %v9275_v39, %v9275_v39 }
 0x1f1   :  { %v2254_v32 = vsel %vm2110_vm3, %v2238_v33, 0.0  ;;  %v2255_v36 = vsel %vm2110_vm3, %v2239_v0, 0.0  ;;  %v2257_v54 = vsel %vm2110_vm3, %v2240_v16, 0.0  ;;  %v2259_v20 = vsel %vm2110_vm3, %v2241_v37, 0.0 }
 0x1f2   :  { %v2256_v49 = vadd.f32 %v2255_v36, %v2254_v32  ;;  %v2261_v13 = vsel %vm2110_vm3, %v2242_v30, 0.0  ;;  %v2231_v60 = vsub.f32 %v2176_v53, %v2221_v41  ;;  %v2245_v8 = vmul.f32 %v9281_v6, %v9281_v6  ;;  %v9301_v53 = vld [vmem:[%s10452_s4 + $0x18] sm:$0xff]  }
 0x1f3   :  { %v2263_v56 = vsel %vm2110_vm3, %v2243_v22, 0.0  ;;  %v2232_v3 = vsub.f32 %v2177_v15, %v2221_v41  ;;  %v2246_v26 = vmul.f32 %v9286_v12, %v9286_v12  ;;  %v2265_v40 = vsel %vm2110_vm3, %v2244_v55, 0.0  ;;  %7882 = vmatprep.subr.bf16.mxu0 %v9301_v53 }
 0x1f4   :  { %v2258_v9 = vadd.f32 %v2257_v54, %v2256_v49  ;;  %v2233_v10 = vsub.f32 %v2178_v29, %v2221_v41  ;;  %v2247_v46 = vmul.f32 %v2231_v60, %v2231_v60  ;;  %v2267_v42 = vsel %vm2110_vm3, %v2245_v8, 0.0 }
 0x1f5   :  { %v2234_v28 = vsub.f32 %v9225_v45, %v2221_v41  ;;  %v2248_v34 = vmul.f32 %v2232_v3, %v2232_v3  ;;  %v2269_v15 = vsel %vm2110_vm3, %v2246_v26, 0.0  ;;  %v2235_v19 = vsub.f32 %v9229_v31, %v2221_v41 }
 0x1f6   :  { %v2260_v24 = vadd.f32 %v2259_v20, %v2258_v9  ;;  %v2249_v29 = vmul.f32 %v2233_v10, %v2233_v10  ;;  %v2271_v61 = vsel %vm2110_vm3, %v2247_v46, 0.0  ;;  %v2236_v52 = vsub.f32 %v9233_v50, %v2221_v41 }
 0x1f7   :  { %v2250_v21 = vmul.f32 %v2234_v28, %v2234_v28  ;;  %v2273_v2 = vsel %vm2110_vm3, %v2248_v34, 0.0  ;;  %v2237_v59 = vsub.f32 %v2182_v62, %v2221_v41  ;;  %v2251_v45 = vmul.f32 %v2235_v19, %v2235_v19 }
 0x1f8   :  { %v2262_v38 = vadd.f32 %v2261_v13, %v2260_v24  ;;  %v2275_v4 = vsel %vm2110_vm3, %v2249_v29, 0.0  ;;  %v2252_v51 = vmul.f32 %v2236_v52, %v2236_v52 }
 0x1f9   :  { %v2277_v25 = vsel %vm2110_vm3, %v2250_v21, 0.0  ;;  %v2253_v31 = vmul.f32 %v2237_v59, %v2237_v59  ;;  %v2279_v14 = vsel %vm2110_vm3, %v2251_v45, 0.0 }
 0x1fa   :  { %v2264_v1 = vadd.f32 %v2263_v56, %v2262_v38  ;;  %v2281_v33 = vsel %vm2110_vm3, %v2252_v51, 0.0 }
 0x1fb   :  { %v2283_v0 = vsel %vm2110_vm3, %v2253_v31, 0.0 }
 0x1fc   :  { %v2266_v48 = vadd.f32 %v2265_v40, %v2264_v1  ;;  %v6974_v1 = vld [vmem:[%s10450_s2] ss:$0 sm:$0xff] }
 0x1fe   :  { %v2268_v7 = vadd.f32 %v2267_v42, %v2266_v48 }
 0x200   :  { %v2270_v18 = vadd.f32 %v2269_v15, %v2268_v7 }
 0x202   :  { %v2272_v57 = vadd.f32 %v2271_v61, %v2270_v18 }
 0x204   :  { %v2274_v63 = vadd.f32 %v2273_v2, %v2272_v57 }
 0x206   :  { %v2276_v11 = vadd.f32 %v2275_v4, %v2274_v63 }
 0x208   :  { %v2278_v44 = vadd.f32 %v2277_v25, %v2276_v11 }
 0x20a   :  { %v2280_v58 = vadd.f32 %v2279_v14, %v2278_v44 }
 0x20c   :  { %v2282_v50 = vadd.f32 %v2281_v33, %v2280_v58 }
 0x20e   :  { %v2284_v16 = vadd.f32 %v2283_v0, %v2282_v50 }
 0x210   :  { %v2285_v37 = vrot.slane %v2284_v16, 4 }
 0x212   :  { %v2286_v62 = vadd.f32 %v2285_v37, %v2284_v16 }
 0x214   :  { %v2287_v41 = vrot.slane %v2286_v62, 2 }
 0x216   :  { %v2288_v32 = vadd.f32 %v2287_v41, %v2286_v62 }
 0x218   :  { %v2289_v36 = vrot.slane %v2288_v32, 1 }
 0x21a   :  { %v2290_v49 = vadd.f32 %v2289_v36, %v2288_v32 }
 0x21c   :  { %v2291_v30 = vmul.f32 0.0078125, %v2290_v49 }
 0x21e   :  { %v2292_v54 = vadd.f32 1e-05, %v2291_v30 }
 0x220   :  { %8256 = vrsqrt.f32 %v2292_v54 }
 0x22d   :  { %v8257_v9 = vpop.eup %8256 }
 0x22e   :  { %v9316_v22 = vmul.f32 %v8257_v9, %v9247_v23  ;;  %v2295_v20 = vmul.f32 %v8257_v9, %v9250_v5  ;;  %v2296_v24 = vmul.f32 %v8257_v9, %v9253_v35  ;;  %v2297_v55 = vmul.f32 %v8257_v9, %v9256_v17 }
 0x22f   :  { %v2298_v13 = vmul.f32 %v8257_v9, %v9263_v47  ;;  %v2299_v38 = vmul.f32 %v8257_v9, %v9268_v27  ;;  %v2300_v8 = vmul.f32 %v8257_v9, %v9275_v39  ;;  %v2301_v56 = vmul.f32 %v8257_v9, %v9281_v6  ;;  %v6975_v39 = vld [vmem:[%s10451_s3] ss:$0 sm:$0xff] }
 0x230   :  { %v2302_v23 = vmul.f32 %v8257_v9, %v9286_v12  ;;  %v2303_v26 = vmul.f32 %v8257_v9, %v2231_v60  ;;  %v2304_v5 = vmul.f32 %v8257_v9, %v2232_v3  ;;  %v2305_v40 = vmul.f32 %v8257_v9, %v2233_v10 }
 0x231   :  { %v2306_v35 = vmul.f32 %v8257_v9, %v2234_v28  ;;  %v2307_v48 = vmul.f32 %v8257_v9, %v2235_v19  ;;  %v2308_v17 = vmul.f32 %v8257_v9, %v2236_v52  ;;  %v2309_v46 = vmul.f32 %v8257_v9, %v2237_v59 }
 0x232   :  { %v2318_v47 = vmul.f32 %v6974_v1, %v2295_v20  ;;  %v2319_v42 = vmul.f32 %v6974_v1, %v2296_v24  ;;  %v2320_v27 = vmul.f32 %v6974_v1, %v2297_v55  ;;  %v2321_v7 = vmul.f32 %v6974_v1, %v2298_v13 }
 0x233   :  { %v2322_v6 = vmul.f32 %v6974_v1, %v2299_v38  ;;  %v2323_v34 = vmul.f32 %v6974_v1, %v2300_v8  ;;  %v2324_v15 = vmul.f32 %v6974_v1, %v2301_v56  ;;  %v2325_v18 = vmul.f32 %v6974_v1, %v2302_v23 }
 0x234   :  { %v2326_v12 = vmul.f32 %v6974_v1, %v2303_v26  ;;  %v2327_v60 = vmul.f32 %v6974_v1, %v2304_v5  ;;  %v2328_v3 = vmul.f32 %v6974_v1, %v2305_v40  ;;  %v2329_v10 = vmul.f32 %v6974_v1, %v2306_v35 }
 0x235   :  { %v2330_v28 = vmul.f32 %v6974_v1, %v2307_v48  ;;  %v2331_v19 = vmul.f32 %v6974_v1, %v2308_v17  ;;  %v2332_v29 = vmul.f32 %v6974_v1, %v2309_v46  ;;  %v2341_v61 = vadd.f32 %v6975_v39, %v2318_v47 }
 0x236   :  { %v2342_v57 = vadd.f32 %v6975_v39, %v2319_v42  ;;  %v2345_v52 = vadd.f32 %v6975_v39, %v2322_v6  ;;  %v2346_v21 = vadd.f32 %v6975_v39, %v2323_v34  ;;  %v2347_v2 = vadd.f32 %v6975_v39, %v2324_v15 }
 0x237   :  { %v2348_v63 = vadd.f32 %v6975_v39, %v2325_v18  ;;  %v2349_v59 = vadd.f32 %v6975_v39, %v2326_v12  ;;  %v2350_v45 = vadd.f32 %v6975_v39, %v2327_v60  ;;  %v2351_v4 = vadd.f32 %v6975_v39, %v2328_v3 }
 0x238   :  { %v2352_v11 = vadd.f32 %v6975_v39, %v2329_v10  ;;  %v2353_v51 = vadd.f32 %v6975_v39, %v2330_v28  ;;  %v2354_v25 = vadd.f32 %v6975_v39, %v2331_v19  ;;  %v2355_v44 = vadd.f32 %v6975_v39, %v2332_v29 }
 0x239   :  { %v2357_v31 = vmax.f32 %v2341_v61, 0.0  ;;  %v2358_v14 = vmax.f32 %v2342_v57, 0.0  ;;  %v2361_v58 = vmax.f32 %v2345_v52, 0.0  ;;  %v2362_v33 = vmax.f32 %v2346_v21, 0.0 }
 0x23a   :  { %v2363_v50 = vmax.f32 %v2347_v2, 0.0  ;;  %v2364_v0 = vmax.f32 %v2348_v63, 0.0  ;;  %v2365_v16 = vmax.f32 %v2349_v59, 0.0  ;;  %v2366_v37 = vmax.f32 %v2350_v45, 0.0  ;;  %v9370_v2 = vld [vmem:[%s10452_s4 + $0x20] sm:$0xff]   ;;  %v9375_v63 = vld [vmem:[%s10452_s4 + $0x28] sm:$0xff]  }
 0x23b   :  { %v2367_v62 = vmax.f32 %v2351_v4, 0.0  ;;  %v2368_v41 = vmax.f32 %v2352_v11, 0.0  ;;  %v2369_v32 = vmax.f32 %v2353_v51, 0.0  ;;  %v2370_v36 = vmax.f32 %v2354_v25, 0.0  ;;  %2373 = vst.msk [vmem:[#allocation4 + $0x8] sm:$0xff] %vm2110_vm3, %v2357_v31  ;;  %2374 = vst.msk [vmem:[#allocation4 + $0x10] sm:$0xff] %vm2110_vm3, %v2358_v14 }
 0x23c   :  { %2377 = vst.msk [vmem:[#allocation4 + $0x28] sm:$0xff] %vm2110_vm3, %v2361_v58  ;;  %2378 = vst.msk [vmem:[#allocation4 + $0x30] sm:$0xff] %vm2110_vm3, %v2362_v33  ;;  %v2371_v49 = vmax.f32 %v2355_v44, 0.0  ;;  %v2317_v30 = vmul.f32 %v6974_v1, %v9316_v22  ;;  %v2343_v54 = vadd.f32 %v6975_v39, %v2320_v27  ;;  %v2344_v9 = vadd.f32 %v6975_v39, %v2321_v7  ;;  %v2482_v7 = vld [vmem:[#allocation5 + $0x1] sm:$0xff] }
 0x23d   :  { %2379 = vst.msk [vmem:[#allocation4 + $0x38] sm:$0xff] %vm2110_vm3, %v2363_v50  ;;  %2380 = vst.msk [vmem:[#allocation4 + $0x40] sm:$0xff] %vm2110_vm3, %v2364_v0  ;;  %v2494_v0 = vld [vmem:[#allocation5 + $0x61] sm:$0xff] }
 0x23e   :  { %2381 = vst.msk [vmem:[#allocation4 + $0x48] sm:$0xff] %vm2110_vm3, %v2365_v16  ;;  %2382 = vst.msk [vmem:[#allocation4 + $0x50] sm:$0xff] %vm2110_vm3, %v2366_v37  ;;  %v2340_v20 = vadd.f32 %v6975_v39, %v2317_v30  ;;  %v2359_v24 = vmax.f32 %v2343_v54, 0.0  ;;  %v2360_v55 = vmax.f32 %v2344_v9, 0.0  ;;  %v2445_v39 = vld [vmem:[#allocation5] sm:$0xff] }
 0x23f   :  { %2383 = vst.msk [vmem:[#allocation4 + $0x58] sm:$0xff] %vm2110_vm3, %v2367_v62  ;;  %2384 = vst.msk [vmem:[#allocation4 + $0x60] sm:$0xff] %vm2110_vm3, %v2368_v41 }
 0x240   :  { %2385 = vst.msk [vmem:[#allocation4 + $0x68] sm:$0xff] %vm2110_vm3, %v2369_v32  ;;  %2386 = vst.msk [vmem:[#allocation4 + $0x70] sm:$0xff] %vm2110_vm3, %v2370_v36  ;;  %v2356_v13 = vmax.f32 %v2340_v20, 0.0  ;;  %v2457_v32 = vld [vmem:[#allocation5 + $0x60] sm:$0xff] }
 0x241   :  { %2387 = vst.msk [vmem:[#allocation4 + $0x78] sm:$0xff] %vm2110_vm3, %v2371_v49  ;;  %2375 = vst.msk [vmem:[#allocation4 + $0x18] sm:$0xff] %vm2110_vm3, %v2359_v24 }
 0x242   :  { %2376 = vst.msk [vmem:[#allocation4 + $0x20] sm:$0xff] %vm2110_vm3, %v2360_v55  ;;  %2372 = vst.msk [vmem:[#allocation4] sm:$0xff] %vm2110_vm3, %v2356_v13  ;;  %v2415_v22 = vld [vmem:[#allocation4 + $0x8] sm:$0xff]  ;;  %v2417_v38 = vld [vmem:[#allocation4 + $0x10] sm:$0xff] }
 0x243   :  { %v2423_v8 = vld [vmem:[#allocation4 + $0x28] sm:$0xff]  ;;  %2416 = vst.msk [vmem:[#allocation5 + $0x15] sm:$0xff] %vm2110_vm3, %v2415_v22  ;;  %2418 = vst.msk [vmem:[#allocation5 + $0x1f] sm:$0xff] %vm2110_vm3, %v2417_v38  ;;  %v2425_v56 = vld [vmem:[#allocation4 + $0x30] sm:$0xff] }
 0x244   :  { %2424 = vst.msk [vmem:[#allocation5 + $0x3d] sm:$0xff] %vm2110_vm3, %v2423_v8  ;;  %v2427_v1 = vld [vmem:[#allocation4 + $0x38] sm:$0xff]  ;;  %v2429_v23 = vld [vmem:[#allocation4 + $0x40] sm:$0xff]  ;;  %2426 = vst.msk [vmem:[#allocation5 + $0x47] sm:$0xff] %vm2110_vm3, %v2425_v56 }
 0x245   :  { %2428 = vst.msk [vmem:[#allocation5 + $0x51] sm:$0xff] %vm2110_vm3, %v2427_v1  ;;  %2430 = vst.msk [vmem:[#allocation5 + $0x6f] sm:$0xff] %vm2110_vm3, %v2429_v23  ;;  %v2431_v26 = vld [vmem:[#allocation4 + $0x48] sm:$0xff]  ;;  %v2433_v5 = vld [vmem:[#allocation4 + $0x50] sm:$0xff] }
 0x246   :  { %v2435_v40 = vld [vmem:[#allocation4 + $0x58] sm:$0xff]  ;;  %2432 = vst.msk [vmem:[#allocation5 + $0x79] sm:$0xff] %vm2110_vm3, %v2431_v26  ;;  %2434 = vst.msk [vmem:[#allocation5 + $0x83] sm:$0xff] %vm2110_vm3, %v2433_v5  ;;  %v2437_v35 = vld [vmem:[#allocation4 + $0x60] sm:$0xff] }
 0x247   :  { %2436 = vst.msk [vmem:[#allocation5 + $0x8d] sm:$0xff] %vm2110_vm3, %v2435_v40  ;;  %v2439_v48 = vld [vmem:[#allocation4 + $0x68] sm:$0xff]  ;;  %v2441_v17 = vld [vmem:[#allocation4 + $0x70] sm:$0xff]  ;;  %2438 = vst.msk [vmem:[#allocation5 + $0x97] sm:$0xff] %vm2110_vm3, %v2437_v35 }
 0x248   :  { %2440 = vst.msk [vmem:[#allocation5 + $0xa1] sm:$0xff] %vm2110_vm3, %v2439_v48  ;;  %2442 = vst.msk [vmem:[#allocation5 + $0xab] sm:$0xff] %vm2110_vm3, %v2441_v17  ;;  %v2443_v46 = vld [vmem:[#allocation4 + $0x78] sm:$0xff] }
 0x249   :  { %v2419_v47 = vld [vmem:[#allocation4 + $0x18] sm:$0xff]  ;;  %v2421_v42 = vld [vmem:[#allocation4 + $0x20] sm:$0xff]  ;;  %2444 = vst.msk [vmem:[#allocation5 + $0xb5] sm:$0xff] %vm2110_vm3, %v2443_v46 }
 0x24a   :  { %2420 = vst.msk [vmem:[#allocation5 + $0x29] sm:$0xff] %vm2110_vm3, %v2419_v47  ;;  %2422 = vst.msk [vmem:[#allocation5 + $0x33] sm:$0xff] %vm2110_vm3, %v2421_v42  ;;  %v2413_v27 = vld [vmem:[#allocation4] sm:$0xff]  ;;  %v2448_v34 = vld [vmem:[#allocation5 + $0x18] sm:$0xff] }
 0x24b   :  { %2414 = vst.msk [vmem:[#allocation5 + $0xb] sm:$0xff] %vm2110_vm3, %v2413_v27  ;;  %v2485_v6 = vld [vmem:[#allocation5 + $0x19] sm:$0xff]  ;;  %v2486_v15 = vld [vmem:[#allocation5 + $0x21] sm:$0xff]  ;;  %v2491_v44 = vld [vmem:[#allocation5 + $0x49] sm:$0xff] }
 0x24c   :  { %v2449_v61 = vld [vmem:[#allocation5 + $0x20] sm:$0xff]  ;;  %v2454_v14 = vld [vmem:[#allocation5 + $0x48] sm:$0xff]  ;;  %v2492_v16 = vld [vmem:[#allocation5 + $0x51] sm:$0xff] }
 0x24d   :  { %v2490_v4 = vld [vmem:[#allocation5 + $0x41] sm:$0xff]  ;;  %v2455_v37 = vld [vmem:[#allocation5 + $0x50] sm:$0xff]  ;;  %v2456_v62 = vld [vmem:[#allocation5 + $0x58] sm:$0xff] }
 0x24e   :  { %v2453_v31 = vld [vmem:[#allocation5 + $0x40] sm:$0xff]  ;;  %v2509_v33 = vpack.c.bf16 %v2491_v44, %v2490_v4  ;;  %v2495_v41 = vld [vmem:[#allocation5 + $0x69] sm:$0xff]  ;;  %v2473_v30 = vpack.c.bf16 %v2456_v62, %v2455_v37  ;;  %v2496_v20 = vld [vmem:[#allocation5 + $0x71] sm:$0xff] }
 0x24f   :  { %v2472_v50 = vpack.c.bf16 %v2454_v14, %v2453_v31  ;;  %v2458_v36 = vld [vmem:[#allocation5 + $0x68] sm:$0xff]  ;;  %v2511_v54 = vpack.c.bf16 %v2495_v41, %v2494_v0  ;;  %v2497_v24 = vld [vmem:[#allocation5 + $0x79] sm:$0xff]  ;;  %v2459_v55 = vld [vmem:[#allocation5 + $0x70] sm:$0xff] }
 0x250   :  { %v2474_v9 = vpack.c.bf16 %v2458_v36, %v2457_v32  ;;  %v2460_v13 = vld [vmem:[#allocation5 + $0x78] sm:$0xff]  ;;  %v2498_v22 = vld [vmem:[#allocation5 + $0x81] sm:$0xff]  ;;  %v2499_v38 = vld [vmem:[#allocation5 + $0x89] sm:$0xff]  ;;  %v2512_v1 = vpack.c.bf16 %v2497_v24, %v2496_v20 }
 0x251   :  { %v2487_v18 = vld [vmem:[#allocation5 + $0x29] sm:$0xff]  ;;  %v2488_v45 = vld [vmem:[#allocation5 + $0x31] sm:$0xff]  ;;  %v2489_v11 = vld [vmem:[#allocation5 + $0x39] sm:$0xff]  ;;  %v2475_v23 = vpack.c.bf16 %v2460_v13, %v2459_v55  ;;  %v2513_v26 = vpack.c.bf16 %v2499_v38, %v2498_v22 }
 0x252   :  { %v2483_v12 = vld [vmem:[#allocation5 + $0x9] sm:$0xff]  ;;  %v2484_v3 = vld [vmem:[#allocation5 + $0x11] sm:$0xff]  ;;  %v2507_v21 = vpack.c.bf16 %v2487_v18, %v2486_v15  ;;  %v2508_v58 = vpack.c.bf16 %v2489_v11, %v2488_v45  ;;  %v2461_v8 = vld [vmem:[#allocation5 + $0x80] sm:$0xff] }
 0x253   :  { %v2446_v60 = vld [vmem:[#allocation5 + $0x8] sm:$0xff]  ;;  %v2505_v10 = vpack.c.bf16 %v2483_v12, %v2482_v7  ;;  %v2506_v19 = vpack.c.bf16 %v2485_v6, %v2484_v3  ;;  %v2447_v29 = vld [vmem:[#allocation5 + $0x10] sm:$0xff]  ;;  %v2452_v25 = vld [vmem:[#allocation5 + $0x38] sm:$0xff] }
 0x254   :  { %v2468_v28 = vpack.c.bf16 %v2446_v60, %v2445_v39  ;;  %v2450_v57 = vld [vmem:[#allocation5 + $0x28] sm:$0xff]  ;;  %v2469_v52 = vpack.c.bf16 %v2448_v34, %v2447_v29  ;;  %v2451_v51 = vld [vmem:[#allocation5 + $0x30] sm:$0xff]  ;;  %v2501_v35 = vld [vmem:[#allocation5 + $0x99] sm:$0xff] }
 0x255   :  { %7806 = vmatprep.mubr.msk.bf16.mxu1 %vm2110_vm3, %v2505_v10  ;;  %v2470_v59 = vpack.c.bf16 %v2450_v57, %v2449_v61  ;;  %v2462_v56 = vld [vmem:[#allocation5 + $0x88] sm:$0xff]  ;;  %v2500_v40 = vld [vmem:[#allocation5 + $0x91] sm:$0xff]  ;;  %v2465_v42 = vld [vmem:[#allocation5 + $0xa0] sm:$0xff] }
 0x256   :  { %7832 = vmatprep.mubr.msk.bf16.mxu0 %vm2110_vm3, %v2468_v28  ;;  %7807 = vmatmul.mubr.msk.bf16.vlgmr.msra.gmra.mxu1 %vm2110_vm3, %v2506_v19  ;;  %v2476_v5 = vpack.c.bf16 %v2462_v56, %v2461_v8  ;;  %v2463_v48 = vld [vmem:[#allocation5 + $0x90] sm:$0xff]  ;;  %v2464_v17 = vld [vmem:[#allocation5 + $0x98] sm:$0xff]  ;;  %v2502_v46 = vld [vmem:[#allocation5 + $0xa1] sm:$0xff]  ;;  %v2514_v7 = vpack.c.bf16 %v2501_v35, %v2500_v40 }
 0x257   :  { %7833 = vmatmul.mubr.msk.bf16.vlgmr.msra.gmra.mxu0 %vm2110_vm3, %v2469_v52  ;;  %7857 = vmatpush3.bf16.msra.mxu1 %v9240_v43  ;;  %v2471_v43 = vpack.c.bf16 %v2452_v25, %v2451_v51  ;;  %v2503_v47 = vld [vmem:[#allocation5 + $0xa9] sm:$0xff]  ;;  %v2477_v39 = vpack.c.bf16 %v2464_v17, %v2463_v48  ;;  %v2504_v15 = vld [vmem:[#allocation5 + $0xb1] sm:$0x3]  ;;  %v2863_v61 = vld [vmem:[#allocation5 + $0x1a] sm:$0xff] }
 0x258   :  { %7810 = vmatprep.mubr.msk.bf16.mxu1 %vm2110_vm3, %v2507_v21  ;;  %7836 = vmatprep.mubr.msk.bf16.mxu0 %vm2110_vm3, %v2470_v59  ;;  %v2466_v27 = vld [vmem:[#allocation5 + $0xa8] sm:$0xff]  ;;  %v2515_v6 = vpack.c.bf16 %v2503_v47, %v2502_v46  ;;  %v2467_v18 = vld [vmem:[#allocation5 + $0xb0] sm:$0x3]  ;;  %v3092_v3 = vld [vmem:[#allocation5 + $0x12] sm:$0xff]  ;;  %v2516_v10 = vpack.c.bf16 %v2504_v15, %v2504_v15 }
 0x259   :  { %7883 = vmatpush3.bf16.msra.mxu0 %v9301_v53  ;;  %7908 = vmatprep.subr.bf16.mxu1 %v9370_v2  ;;  %v2493_v53 = vld [vmem:[#allocation5 + $0x59] sm:$0xff]  ;;  %v2478_v34 = vpack.c.bf16 %v2466_v27, %v2465_v42  ;;  %v2860_v12 = vld [vmem:[#allocation5 + $0x2] sm:$0xff]  ;;  %v2861_v60 = vld [vmem:[#allocation5 + $0xa] sm:$0xff]  ;;  %v2479_v28 = vpack.c.bf16 %v2467_v18, %v2467_v18  ;;  %v2884_v59 = vpack.c.bf16 %v2863_v61, %v3092_v3 }
 0x25a   :  { %7934 = vmatprep.subr.bf16.mxu0 %v9375_v63  ;;  %v2510_v49 = vpack.c.bf16 %v2493_v53, %v2492_v16  ;;  %v2883_v19 = vpack.c.bf16 %v2861_v60, %v2860_v12  ;;  %v3114_v29 = vpack.c.bf16 %v3092_v3, %v2861_v60  ;;  %v3094_v57 = vld [vmem:[#allocation5 + $0x22] sm:$0xff]  ;;  %v2865_v52 = vld [vmem:[#allocation5 + $0x2a] sm:$0xff]  ;;  %v3096_v21 = vld [vmem:[#allocation5 + $0x32] sm:$0xff] }
 0x25b   :  { %v3115_v45 = vpack.c.bf16 %v3094_v57, %v2863_v61  ;;  %v2885_v4 = vpack.c.bf16 %v2865_v52, %v3094_v57  ;;  %v9408_v11 = vld [vmem:[%s10452_s4 + $0x30] sm:$0xff]   ;;  %v9413_v51 = vld [vmem:[%s10452_s4 + $0x38] sm:$0xff]   ;;  %v3116_v25 = vpack.c.bf16 %v3096_v21, %v2865_v52  ;;  %v3098_v31 = vld [vmem:[#allocation5 + $0x42] sm:$0xff] }
 0x25c   :  { %v2867_v44 = vld [vmem:[#allocation5 + $0x3a] sm:$0xff]  ;;  %v2869_v14 = vld [vmem:[#allocation5 + $0x4a] sm:$0xff]  ;;  %v3104_v37 = vld [vmem:[#allocation5 + $0x72] sm:$0xff] }
 0x25d   :  { %v2873_v16 = vld [vmem:[#allocation5 + $0x6a] sm:$0xff]  ;;  %v2875_v36 = vld [vmem:[#allocation5 + $0x7a] sm:$0xff]  ;;  %v3110_v22 = vld [vmem:[#allocation5 + $0xa2] sm:$0xff] }
 0x25e   :  { %7811 = vmatmul.mubr.msk.bf16.gmra.mxu1 %vm2110_vm3, %v2508_v58  ;;  %v3100_v58 = vld [vmem:[#allocation5 + $0x52] sm:$0xff]  ;;  %v3120_v32 = vpack.c.bf16 %v3104_v37, %v2873_v16  ;;  %v2879_v13 = vld [vmem:[#allocation5 + $0x9a] sm:$0xff]  ;;  %v2881_v38 = vld [vmem:[#allocation5 + $0xaa] sm:$0xff] }
 0x25f   :  { %7837 = vmatmul.mubr.msk.bf16.gmra.mxu0 %vm2110_vm3, %v2471_v43  ;;  %7814 = vmatprep.mubr.msk.bf16.mxu1 %vm2110_vm3, %v2509_v33  ;;  %v2886_v43 = vpack.c.bf16 %v2867_v44, %v3096_v21  ;;  %v3117_v33 = vpack.c.bf16 %v3098_v31, %v2867_v44  ;;  %v3118_v53 = vpack.c.bf16 %v3100_v58, %v2869_v14  ;;  %v3112_v8 = vld [vmem:[#allocation5 + $0xb2] sm:$0xff]  ;;  %v3113_v40 = vld [vmem:[#allocation5 + $0xba] sm:$0x3]  ;;  %v9448_v15 = vld [vmem:[#allocation5 + $0x24] sm:$0xff] }
 0x260   :  { %7840 = vmatprep.mubr.msk.bf16.mxu0 %vm2110_vm3, %v2472_v50  ;;  %v2887_v50 = vpack.c.bf16 %v2869_v14, %v3098_v31  ;;  %v3322_v35 = vld [vmem:[#allocation5 + $0xb] sm:$0xff]  ;;  %v3323_v48 = vld [vmem:[#allocation5 + $0x13] sm:$0xff]  ;;  %v3125_v42 = vpack.c.bf16 %v3113_v40, %v3113_v40  ;;  %v3328_v57 = vld [vmem:[#allocation5 + $0x3b] sm:$0xff] }
 0x261   :  { %v3553_v17 = vld [vmem:[#allocation5 + $0xc] sm:$0xff]  ;;  %v9439_v46 = vld [vmem:[#allocation5 + $0x14] sm:$0xff]  ;;  %v3345_v27 = vpack.c.bf16 %v3323_v48, %v3322_v35  ;;  %v3329_v52 = vld [vmem:[#allocation5 + $0x43] sm:$0xff] }
 0x262   :  { %v3326_v18 = vld [vmem:[#allocation5 + $0x2b] sm:$0xff]  ;;  %v3327_v12 = vld [vmem:[#allocation5 + $0x33] sm:$0xff]  ;;  %v9469_v21 = vld [vmem:[#allocation5 + $0x3c] sm:$0xff] }
 0x263   :  { %v9450_v60 = vld [vmem:[#allocation5 + $0x2c] sm:$0xff]  ;;  %v9452_v3 = vld [vmem:[#allocation5 + $0x34] sm:$0xff] }
 0x264   :  { %v3578_v61 = vpack.c.bf16 %v9452_v3, %v9450_v60  ;;  %v9476_v44 = vld [vmem:[#allocation5 + $0x54] sm:$0xff]  ;;  %v9522_v40 = vld [vmem:[#allocation5 + $0xac] sm:$0xff] }
 0x265   :  { %v9524_v35 = vld [vmem:[#allocation5 + $0xb4] sm:$0xff] }
 0x266   :  { %7815 = vmatmul.mubr.msk.bf16.gmra.mxu1 %vm2110_vm3, %v2510_v49  ;;  %v3106_v49 = vld [vmem:[#allocation5 + $0x82] sm:$0xff] }
 0x267   :  { %7841 = vmatmul.mubr.msk.bf16.gmra.mxu0 %vm2110_vm3, %v2473_v30  ;;  %7818 = vmatprep.mubr.msk.bf16.mxu1 %vm2110_vm3, %v2511_v54  ;;  %v2877_v30 = vld [vmem:[#allocation5 + $0x8a] sm:$0xff]  ;;  %v3108_v54 = vld [vmem:[#allocation5 + $0x92] sm:$0xff]  ;;  %v3121_v20 = vpack.c.bf16 %v3106_v49, %v2875_v36 }
 0x268   :  { %7844 = vmatprep.mubr.msk.bf16.mxu0 %vm2110_vm3, %v2474_v9  ;;  %v2890_v9 = vpack.c.bf16 %v2875_v36, %v3104_v37  ;;  %v2891_v24 = vpack.c.bf16 %v2877_v30, %v3106_v49  ;;  %v3122_v55 = vpack.c.bf16 %v3108_v54, %v2877_v30  ;;  %v2892_v56 = vpack.c.bf16 %v2879_v13, %v3108_v54  ;;  %v9494_v37 = vld [vmem:[#allocation5 + $0x74] sm:$0xff]  ;;  %v3337_v36 = vld [vmem:[#allocation5 + $0x83] sm:$0xff]  ;;  %v3338_v54 = vld [vmem:[#allocation5 + $0x8b] sm:$0xff] }
 0x269   :  { %v9502_v49 = vld [vmem:[#allocation5 + $0x7c] sm:$0xff]  ;;  %v9504_v30 = vld [vmem:[#allocation5 + $0x84] sm:$0xff] }
 0x26e   :  { %7819 = vmatmul.mubr.msk.bf16.gmra.mxu1 %vm2110_vm3, %v2512_v1  ;;  %v3123_v1 = vpack.c.bf16 %v3110_v22, %v2879_v13  ;;  %v3583_v13 = vpack.c.bf16 %v9504_v30, %v9502_v49 }
 0x26f   :  { %7845 = vmatmul.mubr.msk.bf16.gmra.mxu0 %vm2110_vm3, %v2475_v23  ;;  %7822 = vmatprep.mubr.msk.bf16.mxu1 %vm2110_vm3, %v2513_v26  ;;  %v2893_v23 = vpack.c.bf16 %v2881_v38, %v3110_v22  ;;  %v3124_v26 = vpack.c.bf16 %v3112_v8, %v2881_v38  ;;  %v3340_v8 = vld [vmem:[#allocation5 + $0x9b] sm:$0xff] }
 0x270   :  { %7848 = vmatprep.mubr.msk.bf16.mxu0 %vm2110_vm3, %v2476_v5  ;;  %v2882_v5 = vld [vmem:[#allocation5 + $0xb2] sm:$0x3] }
 0x271   :  { %v2894_v47 = vpack.c.bf16 %v2882_v5, %v2882_v5  ;;  %v3343_v5 = vld [vmem:[#allocation5 + $0xb3] sm:$0xff] }
 0x276   :  { %7823 = vmatmul.mubr.msk.bf16.gmra.mxu1 %vm2110_vm3, %v2514_v7  ;;  %v3576_v7 = vpack.c.bf16 %v9439_v46, %v3553_v17 }
 0x277   :  { %7849 = vmatmul.mubr.msk.bf16.gmra.mxu0 %vm2110_vm3, %v2477_v39  ;;  %7826 = vmatprep.mubr.msk.bf16.mxu1 %vm2110_vm3, %v2515_v6  ;;  %v3324_v39 = vld [vmem:[#allocation5 + $0x1b] sm:$0xff]  ;;  %v3325_v6 = vld [vmem:[#allocation5 + $0x23] sm:$0xff] }
 0x278   :  { %7852 = vmatprep.mubr.msk.bf16.mxu0 %vm2110_vm3, %v2478_v34  ;;  %v9446_v34 = vld [vmem:[#allocation5 + $0x1c] sm:$0xff] }
 0x27e   :  { %7827 = vmatmul.mubr.msk.bf16.gmra.mxu1 %vm2110_vm3, %v2516_v10  ;;  %v3346_v10 = vpack.c.bf16 %v3325_v6, %v3324_v39  ;;  %v4015_v39 = vld [vmem:[#allocation5 + $0x15] sm:$0xff]  ;;  %v4016_v6 = vld [vmem:[#allocation5 + $0x1d] sm:$0xff] }
 0x27f   :  { %7853 = vmatmul.mubr.msk.bf16.gmra.mxu0 %vm2110_vm3, %v2479_v28  ;;  %7858 = vmatprep.mubr.msk.bf16.mxu1 %vm2110_vm3, %v2883_v19  ;;  %v3577_v28 = vpack.c.bf16 %v9448_v15, %v9446_v34  ;;  %v3347_v19 = vpack.c.bf16 %v3327_v12, %v3326_v18 }
 0x280   :  { %7884 = vmatprep.mubr.msk.bf16.mxu0 %vm2110_vm3, %v3114_v29  ;;  %v9459_v29 = vld [vmem:[%s10452_s4 + $0x40] sm:$0xff]  }
 0x286   :  { %7859 = vmatmul.mubr.msk.bf16.vlgmr.msra.gmra.mxu1 %vm2110_vm3, %v2884_v59  ;;  %v9471_v59 = vld [vmem:[#allocation5 + $0x44] sm:$0xff] }
 0x287   :  { %7885 = vmatmul.mubr.msk.bf16.vlgmr.msra.gmra.mxu0 %vm2110_vm3, %v3115_v45  ;;  %7909 = vmatpush3.bf16.msra.mxu1 %v9370_v2  ;;  %v2871_v2 = vld [vmem:[#allocation5 + $0x5a] sm:$0xff]  ;;  %v3330_v45 = vld [vmem:[#allocation5 + $0x4b] sm:$0xff]  ;;  %v3579_v31 = vpack.c.bf16 %v9471_v59, %v9469_v21 }
 0x288   :  { %7862 = vmatprep.mubr.msk.bf16.mxu1 %vm2110_vm3, %v2885_v4  ;;  %7888 = vmatprep.mubr.msk.bf16.mxu0 %vm2110_vm3, %v3116_v25  ;;  %v2888_v62 = vpack.c.bf16 %v2871_v2, %v3100_v58  ;;  %v3331_v4 = vld [vmem:[#allocation5 + $0x53] sm:$0xff]  ;;  %v3332_v58 = vld [vmem:[#allocation5 + $0x5b] sm:$0xff] }
 0x289   :  { %7935 = vmatpush3.bf16.msra.mxu0 %v9375_v63  ;;  %7960 = vmatprep.subr.bf16.mxu1 %v9408_v11  ;;  %v3102_v63 = vld [vmem:[#allocation5 + $0x62] sm:$0xff]  ;;  %v9474_v25 = vld [vmem:[#allocation5 + $0x4c] sm:$0xff]  ;;  %v3349_v14 = vpack.c.bf16 %v3331_v4, %v3330_v45  ;;  %v3808_v45 = vpack.c.bf16 %v9450_v60, %v9448_v15 }
 0x28a   :  { %7986 = vmatprep.subr.bf16.mxu0 %v9413_v51  ;;  %v3119_v0 = vpack.c.bf16 %v3102_v63, %v2871_v2  ;;  %v2889_v41 = vpack.c.bf16 %v2873_v16, %v3102_v63  ;;  %v9492_v16 = vld [vmem:[#allocation5 + $0x6c] sm:$0xff]  ;;  %v3810_v15 = vpack.c.bf16 %v9474_v25, %v9471_v59 }
 0x28e   :  { %7863 = vmatmul.mubr.msk.bf16.gmra.mxu1 %vm2110_vm3, %v2886_v43  ;;  %v3333_v43 = vld [vmem:[#allocation5 + $0x63] sm:$0xff] }
 0x28f   :  { %7889 = vmatmul.mubr.msk.bf16.gmra.mxu0 %vm2110_vm3, %v3117_v33  ;;  %7866 = vmatprep.mubr.msk.bf16.mxu1 %vm2110_vm3, %v2887_v50  ;;  %v9486_v33 = vld [vmem:[#allocation5 + $0x5c] sm:$0xff]  ;;  %v9488_v50 = vld [vmem:[#allocation5 + $0x64] sm:$0xff]  ;;  %v3350_v2 = vpack.c.bf16 %v3333_v43, %v3332_v58  ;;  %v4026_v58 = vld [vmem:[#allocation5 + $0x6d] sm:$0xff] }
 0x290   :  { %7892 = vmatprep.mubr.msk.bf16.mxu0 %vm2110_vm3, %v3118_v53  ;;  %v3334_v53 = vld [vmem:[#allocation5 + $0x6b] sm:$0xff]  ;;  %v3581_v63 = vpack.c.bf16 %v9488_v50, %v9486_v33  ;;  %v4027_v43 = vld [vmem:[#allocation5 + $0x75] sm:$0xff]  ;;  %v3812_v59 = vpack.c.bf16 %v9492_v16, %v9488_v50 }
 0x296   :  { %7867 = vmatmul.mubr.msk.bf16.gmra.mxu1 %vm2110_vm3, %v2888_v62 }
 0x297   :  { %7893 = vmatmul.mubr.msk.bf16.gmra.mxu0 %vm2110_vm3, %v3119_v0  ;;  %7870 = vmatprep.mubr.msk.bf16.mxu1 %vm2110_vm3, %v2889_v41  ;;  %v3335_v0 = vld [vmem:[#allocation5 + $0x73] sm:$0xff]  ;;  %v3582_v41 = vpack.c.bf16 %v9494_v37, %v9492_v16 }
 0x298   :  { %7896 = vmatprep.mubr.msk.bf16.mxu0 %vm2110_vm3, %v3120_v32  ;;  %v3351_v62 = vpack.c.bf16 %v3335_v0, %v3334_v53  ;;  %v3336_v32 = vld [vmem:[#allocation5 + $0x7b] sm:$0xff] }
 0x299   :  { %v4028_v53 = vld [vmem:[#allocation5 + $0x7d] sm:$0xff]  ;;  %v4031_v0 = vld [vmem:[#allocation5 + $0x95] sm:$0xff] }
 0x29e   :  { %7871 = vmatmul.mubr.msk.bf16.gmra.mxu1 %vm2110_vm3, %v2890_v9  ;;  %v3339_v9 = vld [vmem:[#allocation5 + $0x93] sm:$0xff] }
 0x29f   :  { %7897 = vmatmul.mubr.msk.bf16.gmra.mxu0 %vm2110_vm3, %v3121_v20  ;;  %7874 = vmatprep.mubr.msk.bf16.mxu1 %vm2110_vm3, %v2891_v24  ;;  %v9506_v20 = vld [vmem:[#allocation5 + $0x8c] sm:$0xff]  ;;  %v9508_v24 = vld [vmem:[#allocation5 + $0x94] sm:$0xff]  ;;  %v3353_v22 = vpack.c.bf16 %v3339_v9, %v3338_v54  ;;  %v4036_v9 = vld [vmem:[#allocation5 + $0xbd] sm:$0xff] }
 0x2a0   :  { %7900 = vmatprep.mubr.msk.bf16.mxu0 %vm2110_vm3, %v3122_v55  ;;  %v3352_v55 = vpack.c.bf16 %v3337_v36, %v3336_v32  ;;  %v3584_v38 = vpack.c.bf16 %v9508_v24, %v9506_v20  ;;  %v3814_v50 = vpack.c.bf16 %v9506_v20, %v9504_v30  ;;  %v4033_v32 = vld [vmem:[#allocation5 + $0xa5] sm:$0xff]  ;;  %v4034_v36 = vld [vmem:[#allocation5 + $0xad] sm:$0xff]  ;;  %v4035_v54 = vld [vmem:[#allocation5 + $0xb5] sm:$0xff] }
 0x2a1   :  { %v4047_v20 = vpack.c.bf16 %v4034_v36, %v4033_v32  ;;  %v4262_v36 = vld [vmem:[#allocation5 + $0x96] sm:$0xff] }
 0x2a6   :  { %7875 = vmatmul.mubr.msk.bf16.gmra.mxu1 %vm2110_vm3, %v2892_v56  ;;  %v3341_v56 = vld [vmem:[#allocation5 + $0xa3] sm:$0xff] }
 0x2a7   :  { %7901 = vmatmul.mubr.msk.bf16.gmra.mxu0 %vm2110_vm3, %v3123_v1  ;;  %7878 = vmatprep.mubr.msk.bf16.mxu1 %vm2110_vm3, %v2893_v23  ;;  %v9518_v1 = vld [vmem:[#allocation5 + $0x9c] sm:$0xff]  ;;  %v9520_v23 = vld [vmem:[#allocation5 + $0xa4] sm:$0xff]  ;;  %v3354_v48 = vpack.c.bf16 %v3341_v56, %v3340_v8 }
 0x2a8   :  { %7904 = vmatprep.mubr.msk.bf16.mxu0 %vm2110_vm3, %v3124_v26  ;;  %v3342_v26 = vld [vmem:[#allocation5 + $0xab] sm:$0xff]  ;;  %v3585_v17 = vpack.c.bf16 %v9520_v23, %v9518_v1  ;;  %v3816_v30 = vpack.c.bf16 %v9522_v40, %v9520_v23  ;;  %v4246_v8 = vld [vmem:[#allocation5 + $0x16] sm:$0xff]  ;;  %v4247_v56 = vld [vmem:[#allocation5 + $0x1e] sm:$0xff] }
 0x2a9   :  { %v4248_v23 = vld [vmem:[#allocation5 + $0x26] sm:$0xff] }
 0x2ae   :  { %7879 = vmatmul.mubr.msk.bf16.gmra.mxu1 %vm2110_vm3, %v2894_v47  ;;  %v3355_v47 = vpack.c.bf16 %v3343_v5, %v3342_v26  ;;  %v4269_v26 = vpack.c.bf16 %v4247_v56, %v4246_v8  ;;  %v4249_v5 = vld [vmem:[#allocation5 + $0x2e] sm:$0xff]  ;;  %v4264_v56 = vld [vmem:[#allocation5 + $0xa6] sm:$0xff] }
 0x2af   :  { %7905 = vmatmul.mubr.msk.bf16.gmra.mxu0 %vm2110_vm3, %v3125_v42  ;;  %7910 = vmatprep.mubr.msk.bf16.mxu1 %vm2110_vm3, %v3345_v27  ;;  %v3586_v42 = vpack.c.bf16 %v9524_v35, %v9522_v40  ;;  %v3344_v27 = vld [vmem:[#allocation5 + $0xbb] sm:$0x3] }
 0x2b0   :  { %7936 = vmatprep.mubr.msk.bf16.mxu0 %vm2110_vm3, %v3576_v7  ;;  %v3575_v7 = vld [vmem:[#allocation5 + $0xbc] sm:$0x3]  ;;  %v3356_v18 = vpack.c.bf16 %v3344_v27, %v3344_v27 }
 0x2b1   :  { %v3587_v12 = vpack.c.bf16 %v3575_v7, %v3575_v7  ;;  %v4250_v40 = vld [vmem:[#allocation5 + $0x36] sm:$0xff] }
 0x2b6   :  { %7911 = vmatmul.mubr.msk.bf16.vlgmr.msra.gmra.mxu1 %vm2110_vm3, %v3346_v10  ;;  %v3807_v10 = vpack.c.bf16 %v9446_v34, %v9439_v46  ;;  %v3809_v46 = vpack.c.bf16 %v9469_v21, %v9452_v3  ;;  %v3811_v3 = vpack.c.bf16 %v9486_v33, %v9476_v44  ;;  %v4044_v33 = vpack.c.bf16 %v4028_v53, %v4027_v43  ;;  %v4259_v43 = vld [vmem:[#allocation5 + $0x7e] sm:$0xff] }
 0x2b7   :  { %7937 = vmatmul.mubr.msk.bf16.vlgmr.msra.gmra.mxu0 %vm2110_vm3, %v3577_v28  ;;  %7961 = vmatpush3.bf16.msra.mxu1 %v9408_v11  ;;  %v3348_v11 = vpack.c.bf16 %v3329_v52, %v3328_v57  ;;  %v4038_v28 = vpack.c.bf16 %v4016_v6, %v4015_v39  ;;  %v4019_v57 = vld [vmem:[#allocation5 + $0x35] sm:$0xff]  ;;  %v4020_v52 = vld [vmem:[#allocation5 + $0x3d] sm:$0xff] }
 0x2b8   :  { %7914 = vmatprep.mubr.msk.bf16.mxu1 %vm2110_vm3, %v3347_v19  ;;  %7940 = vmatprep.mubr.msk.bf16.mxu0 %vm2110_vm3, %v3578_v61  ;;  %v4017_v19 = vld [vmem:[#allocation5 + $0x25] sm:$0xff]  ;;  %v4018_v61 = vld [vmem:[#allocation5 + $0x2d] sm:$0xff]  ;;  %v4040_v34 = vpack.c.bf16 %v4020_v52, %v4019_v57 }
 0x2b9   :  { %7987 = vmatpush3.bf16.msra.mxu0 %v9413_v51  ;;  %8012 = vmatprep.subr.bf16.mxu1 %v9459_v29  ;;  %v3580_v51 = vpack.c.bf16 %v9476_v44, %v9474_v25  ;;  %v4039_v4 = vpack.c.bf16 %v4018_v61, %v4017_v19  ;;  %v3813_v44 = vpack.c.bf16 %v9502_v49, %v9494_v37  ;;  %v3805_v49 = vld [vmem:[#allocation5 + $0xbc] sm:$0xff] }
 0x2ba   :  { %v3815_v37 = vpack.c.bf16 %v9518_v1, %v9508_v24  ;;  %v3817_v24 = vpack.c.bf16 %v3805_v49, %v9524_v35  ;;  %v4251_v35 = vld [vmem:[#allocation5 + $0x3e] sm:$0xff]  ;;  %v4254_v19 = vld [vmem:[#allocation5 + $0x56] sm:$0xff] }
 0x2bb   :  { %v4255_v61 = vld [vmem:[#allocation5 + $0x5e] sm:$0xff] }
 0x2bc   :  { %v4263_v49 = vld [vmem:[#allocation5 + $0x9e] sm:$0xff] }
 0x2be   :  { %7915 = vmatmul.mubr.msk.bf16.gmra.mxu1 %vm2110_vm3, %v3348_v11  ;;  %v4021_v11 = vld [vmem:[#allocation5 + $0x45] sm:$0xff] }
 0x2bf   :  { %7941 = vmatmul.mubr.msk.bf16.gmra.mxu0 %vm2110_vm3, %v3579_v31  ;;  %7918 = vmatprep.mubr.msk.bf16.mxu1 %vm2110_vm3, %v3349_v14  ;;  %v4022_v31 = vld [vmem:[#allocation5 + $0x4d] sm:$0xff]  ;;  %v4023_v14 = vld [vmem:[#allocation5 + $0x55] sm:$0xff] }
 0x2c0   :  { %7944 = vmatprep.mubr.msk.bf16.mxu0 %vm2110_vm3, %v3580_v51  ;;  %v4024_v51 = vld [vmem:[#allocation5 + $0x5d] sm:$0xff]  ;;  %v4041_v60 = vpack.c.bf16 %v4022_v31, %v4021_v11 }
 0x2c1   :  { %v4042_v21 = vpack.c.bf16 %v4024_v51, %v4023_v14 }
 0x2c6   :  { %7919 = vmatmul.mubr.msk.bf16.gmra.mxu1 %vm2110_vm3, %v3350_v2  ;;  %v4029_v2 = vld [vmem:[#allocation5 + $0x85] sm:$0xff] }
 0x2c7   :  { %7945 = vmatmul.mubr.msk.bf16.gmra.mxu0 %vm2110_vm3, %v3581_v63  ;;  %7922 = vmatprep.mubr.msk.bf16.mxu1 %vm2110_vm3, %v3351_v62  ;;  %v4030_v63 = vld [vmem:[#allocation5 + $0x8d] sm:$0xff]  ;;  %v4032_v62 = vld [vmem:[#allocation5 + $0x9d] sm:$0xff] }
 0x2c8   :  { %7948 = vmatprep.mubr.msk.bf16.mxu0 %vm2110_vm3, %v3582_v41  ;;  %v4045_v16 = vpack.c.bf16 %v4030_v63, %v4029_v2  ;;  %v4046_v41 = vpack.c.bf16 %v4032_v62, %v4031_v0 }
 0x2ce   :  { %7923 = vmatmul.mubr.msk.bf16.gmra.mxu1 %vm2110_vm3, %v3352_v55  ;;  %v4048_v55 = vpack.c.bf16 %v4036_v9, %v4035_v54 }
 0x2cf   :  { %7949 = vmatmul.mubr.msk.bf16.gmra.mxu0 %vm2110_vm3, %v3583_v13  ;;  %7926 = vmatprep.mubr.msk.bf16.mxu1 %vm2110_vm3, %v3353_v22  ;;  %v3806_v13 = vld [vmem:[#allocation5 + $0xc4] sm:$0x3] }
 0x2d0   :  { %7952 = vmatprep.mubr.msk.bf16.mxu0 %vm2110_vm3, %v3584_v38  ;;  %v4037_v22 = vld [vmem:[#allocation5 + $0xc5] sm:$0x3]  ;;  %v3818_v38 = vpack.c.bf16 %v3806_v13, %v3806_v13 }
 0x2d1   :  { %v4049_v1 = vpack.c.bf16 %v4037_v22, %v4037_v22 }
 0x2d6   :  { %7927 = vmatmul.mubr.msk.bf16.gmra.mxu1 %vm2110_vm3, %v3354_v48  ;;  %v4270_v48 = vpack.c.bf16 %v4249_v5, %v4248_v23  ;;  %v4266_v5 = vld [vmem:[#allocation5 + $0xb6] sm:$0xff] }
 0x2d7   :  { %7953 = vmatmul.mubr.msk.bf16.gmra.mxu0 %vm2110_vm3, %v3585_v17  ;;  %7930 = vmatprep.mubr.msk.bf16.mxu1 %vm2110_vm3, %v3355_v47  ;;  %v4271_v17 = vpack.c.bf16 %v4251_v35, %v4250_v40  ;;  %v4267_v40 = vld [vmem:[#allocation5 + $0xbe] sm:$0xff] }
 0x2d8   :  { %7956 = vmatprep.mubr.msk.bf16.mxu0 %vm2110_vm3, %v3586_v42 }
 0x2de   :  { %7931 = vmatmul.mubr.msk.bf16.gmra.mxu1 %vm2110_vm3, %v3356_v18  ;;  %v4252_v18 = vld [vmem:[#allocation5 + $0x46] sm:$0xff] }
 0x2df   :  { %7957 = vmatmul.mubr.msk.bf16.gmra.mxu0 %vm2110_vm3, %v3587_v12  ;;  %7962 = vmatprep.mubr.msk.bf16.mxu1 %vm2110_vm3, %v3807_v10  ;;  %v4253_v12 = vld [vmem:[#allocation5 + $0x4e] sm:$0xff] }
 0x2e0   :  { %7988 = vmatprep.mubr.msk.bf16.mxu0 %vm2110_vm3, %v4038_v28 }
 0x2e6   :  { %7963 = vmatmul.mubr.msk.bf16.vlgmr.msra.gmra.mxu1 %vm2110_vm3, %v3808_v45 }
 0x2e7   :  { %7989 = vmatmul.mubr.msk.bf16.vlgmr.msra.gmra.mxu0 %vm2110_vm3, %v4039_v4  ;;  %8013 = vmatpush3.bf16.msra.mxu1 %v9459_v29  ;;  %v4025_v29 = vld [vmem:[#allocation5 + $0x65] sm:$0xff]  ;;  %v4272_v4 = vpack.c.bf16 %v4253_v12, %v4252_v18 }
 0x2e8   :  { %7966 = vmatprep.mubr.msk.bf16.mxu1 %vm2110_vm3, %v3809_v46  ;;  %7992 = vmatprep.mubr.msk.bf16.mxu0 %vm2110_vm3, %v4040_v34  ;;  %v4043_v25 = vpack.c.bf16 %v4026_v58, %v4025_v29  ;;  %v4273_v46 = vpack.c.bf16 %v4255_v61, %v4254_v19  ;;  %v4258_v58 = vld [vmem:[#allocation5 + $0x76] sm:$0xff]  ;;  %v4268_v12 = vld [vmem:[#allocation5 + $0xc6] sm:$0x3] }
 0x2ee   :  { %7967 = vmatmul.mubr.msk.bf16.gmra.mxu1 %vm2110_vm3, %v3810_v15 }
 0x2ef   :  { %7993 = vmatmul.mubr.msk.bf16.gmra.mxu0 %vm2110_vm3, %v4041_v60  ;;  %7970 = vmatprep.mubr.msk.bf16.mxu1 %vm2110_vm3, %v3811_v3  ;;  %v4256_v60 = vld [vmem:[#allocation5 + $0x66] sm:$0xff]  ;;  %v4257_v3 = vld [vmem:[#allocation5 + $0x6e] sm:$0xff] }
 0x2f0   :  { %7996 = vmatprep.mubr.msk.bf16.mxu0 %vm2110_vm3, %v4042_v21 }
 0x2f6   :  { %7971 = vmatmul.mubr.msk.bf16.gmra.mxu1 %vm2110_vm3, %v3812_v59 }
 0x2f7   :  { %7997 = vmatmul.mubr.msk.bf16.gmra.mxu0 %vm2110_vm3, %v4043_v25  ;;  %7974 = vmatprep.mubr.msk.bf16.mxu1 %vm2110_vm3, %v3813_v44  ;;  %v4274_v44 = vpack.c.bf16 %v4257_v3, %v4256_v60 }
 0x2f8   :  { %8000 = vmatprep.mubr.msk.bf16.mxu0 %vm2110_vm3, %v4044_v33  ;;  %v4275_v33 = vpack.c.bf16 %v4259_v43, %v4258_v58 }
 0x2fe   :  { %7975 = vmatmul.mubr.msk.bf16.gmra.mxu1 %vm2110_vm3, %v3814_v50 }
 0x2ff   :  { %8001 = vmatmul.mubr.msk.bf16.gmra.mxu0 %vm2110_vm3, %v4045_v16  ;;  %7978 = vmatprep.mubr.msk.bf16.mxu1 %vm2110_vm3, %v3815_v37  ;;  %v4260_v16 = vld [vmem:[#allocation5 + $0x86] sm:$0xff]  ;;  %v4261_v37 = vld [vmem:[#allocation5 + $0x8e] sm:$0xff] }
 0x300   :  { %8004 = vmatprep.mubr.msk.bf16.mxu0 %vm2110_vm3, %v4046_v41 }
 0x306   :  { %7979 = vmatmul.mubr.msk.bf16.gmra.mxu1 %vm2110_vm3, %v3816_v30  ;;  %v4276_v30 = vpack.c.bf16 %v4261_v37, %v4260_v16 }
 0x307   :  { %8005 = vmatmul.mubr.msk.bf16.gmra.mxu0 %vm2110_vm3, %v4047_v20  ;;  %7982 = vmatprep.mubr.msk.bf16.mxu1 %vm2110_vm3, %v3817_v24  ;;  %v4277_v20 = vpack.c.bf16 %v4263_v49, %v4262_v36 }
 0x308   :  { %8008 = vmatprep.mubr.msk.bf16.mxu0 %vm2110_vm3, %v4048_v55 }
 0x30e   :  { %7983 = vmatmul.mubr.msk.bf16.gmra.mxu1 %vm2110_vm3, %v3818_v38 }
 0x30f   :  { %8009 = vmatmul.mubr.msk.bf16.gmra.mxu0 %vm2110_vm3, %v4049_v1  ;;  %8014 = vmatprep.mubr.msk.bf16.mxu1 %vm2110_vm3, %v4269_v26  ;;  %v4265_v1 = vld [vmem:[#allocation5 + $0xae] sm:$0xff] }
 0x316   :  { %v7808_v47 = vpop.f32.mrf.mxu1  ;;  %8015 = vmatmul.mubr.msk.bf16.vlgmr.msra.gmra.mxu1 %vm2110_vm3, %v4270_v48 }
 0x317   :  { %v7834_v42 = vpop.f32.mrf.mxu0  ;;  %8018 = vmatprep.mubr.msk.bf16.mxu1 %vm2110_vm3, %v4271_v17 }
 0x318   :  { %v9584_v27 = vadd.f32 %v7834_v42, %v7808_v47  ;;  %v2596_v7 = vpop.f32.mrf.mxu1  ;;  %v4278_v47 = vpack.c.bf16 %v4265_v1, %v4264_v56  ;;  %v4279_v42 = vpack.c.bf16 %v4267_v40, %v4266_v5 }
 0x319   :  { %v2766_v39 = vpop.f32.mrf.mxu0 }
 0x31a   :  { %v9587_v6 = vadd.f32 %v2766_v39, %v2596_v7  ;;  %v7809_v10 = vpop.f32.mrf.mxu1 }
 0x31b   :  { %v7835_v28 = vpop.f32.mrf.mxu0 }
 0x31c   :  { %v9589_v57 = vadd.f32 %v7835_v28, %v7809_v10  ;;  %v9591_v52 = vpop.f32.mrf.mxu1 }
 0x31d   :  { %v9593_v45 = vpop.f32.mrf.mxu0 }
 0x31e   :  { %v7812_v34 = vpop.f32.mrf.mxu1  ;;  %8019 = vmatmul.mubr.msk.bf16.gmra.mxu1 %vm2110_vm3, %v4272_v4 }
 0x31f   :  { %v7838_v11 = vpop.f32.mrf.mxu0  ;;  %8022 = vmatprep.mubr.msk.bf16.mxu1 %vm2110_vm3, %v4273_v46  ;;  %v4280_v46 = vpack.c.bf16 %v4268_v12, %v4268_v12 }
 0x320   :  { %v9596_v31 = vadd.f32 %v7838_v11, %v7812_v34  ;;  %v2612_v14 = vpop.f32.mrf.mxu1 }
 0x321   :  { %v2782_v51 = vpop.f32.mrf.mxu0 }
 0x322   :  { %v9599_v15 = vadd.f32 %v2782_v51, %v2612_v14  ;;  %v7813_v21 = vpop.f32.mrf.mxu1 }
 0x323   :  { %v7839_v29 = vpop.f32.mrf.mxu0 }
 0x324   :  { %v9601_v53 = vadd.f32 %v7839_v29, %v7813_v21  ;;  %v9603_v59 = vpop.f32.mrf.mxu1 }
 0x325   :  { %v9605_v25 = vpop.f32.mrf.mxu0 }
 0x326   :  { %v7816_v2 = vpop.f32.mrf.mxu1  ;;  %8023 = vmatmul.mubr.msk.bf16.gmra.mxu1 %vm2110_vm3, %v4274_v44 }
 0x327   :  { %v7842_v63 = vpop.f32.mrf.mxu0  ;;  %8026 = vmatprep.mubr.msk.bf16.mxu1 %vm2110_vm3, %v4275_v33 }
 0x328   :  { %v2628_v0 = vpop.f32.mrf.mxu1 }
 0x329   :  { %v2798_v62 = vpop.f32.mrf.mxu0 }
 0x32a   :  { %v9609_v50 = vadd.f32 %v2798_v62, %v2628_v0  ;;  %v7817_v41 = vpop.f32.mrf.mxu1 }
 0x32b   :  { %v7843_v32 = vpop.f32.mrf.mxu0 }
 0x32c   :  { %v9611_v54 = vpop.f32.mrf.mxu1 }
 0x32d   :  { %v9613_v9 = vpop.f32.mrf.mxu0 }
 0x32e   :  { %v7820_v24 = vpop.f32.mrf.mxu1  ;;  %8027 = vmatmul.mubr.msk.bf16.gmra.mxu1 %vm2110_vm3, %v4276_v30 }
 0x32f   :  { %v7846_v55 = vpop.f32.mrf.mxu0  ;;  %8030 = vmatprep.mubr.msk.bf16.mxu1 %vm2110_vm3, %v4277_v20 }
 0x330   :  { %v9616_v13 = vadd.f32 %v7846_v55, %v7820_v24  ;;  %v2644_v22 = vpop.f32.mrf.mxu1 }
 0x331   :  { %v2814_v38 = vpop.f32.mrf.mxu0 }
 0x332   :  { %v9619_v8 = vadd.f32 %v2814_v38, %v2644_v22  ;;  %v7821_v26 = vpop.f32.mrf.mxu1 }
 0x333   :  { %v7847_v23 = vpop.f32.mrf.mxu0 }
 0x334   :  { %v9621_v35 = vadd.f32 %v7847_v23, %v7821_v26  ;;  %v9623_v48 = vpop.f32.mrf.mxu1 }
 0x335   :  { %v9625_v17 = vpop.f32.mrf.mxu0 }
 0x336   :  { %v7824_v7 = vpop.f32.mrf.mxu1  ;;  %8031 = vmatmul.mubr.msk.bf16.gmra.mxu1 %vm2110_vm3, %v4278_v47 }
 0x337   :  { %v7850_v39 = vpop.f32.mrf.mxu0  ;;  %8034 = vmatprep.mubr.msk.bf16.mxu1 %vm2110_vm3, %v4279_v42 }
 0x338   :  { %v9628_v18 = vadd.f32 %v7850_v39, %v7824_v7  ;;  %v2660_v10 = vpop.f32.mrf.mxu1 }
 0x339   :  { %v2830_v28 = vpop.f32.mrf.mxu0 }
 0x33a   :  { %v9631_v19 = vadd.f32 %v2830_v28, %v2660_v10  ;;  %v7825_v61 = vpop.f32.mrf.mxu1 }
 0x33b   :  { %v7851_v4 = vpop.f32.mrf.mxu0 }
 0x33c   :  { %v9633_v34 = vadd.f32 %v7851_v4, %v7825_v61  ;;  %v9635_v11 = vpop.f32.mrf.mxu1 }
 0x33d   :  { %v9637_v14 = vpop.f32.mrf.mxu0 }
 0x33e   :  { %v7828_v51 = vpop.f32.mrf.mxu1  ;;  %8035 = vmatmul.mubr.msk.bf16.gmra.mxu1 %vm2110_vm3, %v4280_v46 }
 0x33f   :  { %v7854_v60 = vpop.f32.mrf.mxu0 }
 0x340   :  { %v9640_v3 = vadd.f32 %v7854_v60, %v7828_v51  ;;  %v2676_v21 = vpop.f32.mrf.mxu1 }
 0x341   :  { %v2846_v29 = vpop.f32.mrf.mxu0 }
 0x342   :  { %v9642_v58 = vadd.f32 %v2846_v29, %v2676_v21  ;;  %v7829_v43 = vpop.f32.mrf.mxu1 }
 0x343   :  { %v7855_v44 = vpop.f32.mrf.mxu0 }
 0x344   :  { %v9644_v33 = vpop.f32.mrf.mxu1 }
 0x345   :  { %v9646_v2 = vpop.f32.mrf.mxu0 }
 0x346   :  { %v7860_v63 = vpop.f32.mrf.mxu1 }
 0x347   :  { %v7886_v0 = vpop.f32.mrf.mxu0  ;;  %v3070_v62 = vadd.f32 %v7860_v63, %v9584_v27 }
 0x348   :  { %v2974_v16 = vpop.f32.mrf.mxu1 }
 0x349   :  { %v3205_v37 = vpop.f32.mrf.mxu0  ;;  %v9649_v41 = vadd.f32 %v7886_v0, %v3070_v62  ;;  %v3068_v32 = vadd.f32 %v2974_v16, %v9587_v6 }
 0x34a   :  { %v7861_v36 = vpop.f32.mrf.mxu1 }
 0x34b   :  { %v7887_v49 = vpop.f32.mrf.mxu0  ;;  %v9652_v30 = vadd.f32 %v3205_v37, %v3068_v32  ;;  %v3071_v20 = vadd.f32 %v7861_v36, %v9589_v57 }
 0x34c   :  { %v9655_v24 = vpop.f32.mrf.mxu1 }
 0x34d   :  { %v9657_v55 = vpop.f32.mrf.mxu0  ;;  %v9659_v22 = vadd.f32 %v7887_v49, %v3071_v20 }
 0x34e   :  { %v7864_v38 = vpop.f32.mrf.mxu1 }
 0x34f   :  { %v7890_v27 = vpop.f32.mrf.mxu0  ;;  %v3074_v56 = vadd.f32 %v7864_v38, %v9596_v31 }
 0x350   :  { %v2990_v1 = vpop.f32.mrf.mxu1 }
 0x351   :  { %v3221_v26 = vpop.f32.mrf.mxu0  ;;  %v9662_v23 = vadd.f32 %v7890_v27, %v3074_v56  ;;  %v3072_v6 = vadd.f32 %v2990_v1, %v9599_v15 }
 0x352   :  { %v7865_v5 = vpop.f32.mrf.mxu1 }
 0x353   :  { %v7891_v40 = vpop.f32.mrf.mxu0  ;;  %v9665_v47 = vadd.f32 %v3221_v26, %v3072_v6  ;;  %v3075_v57 = vadd.f32 %v7865_v5, %v9601_v53 }
 0x354   :  { %v9668_v42 = vpop.f32.mrf.mxu1 }
 0x355   :  { %v9670_v7 = vpop.f32.mrf.mxu0  ;;  %v9672_v39 = vadd.f32 %v7891_v40, %v3075_v57 }
 0x356   :  { %v7868_v12 = vpop.f32.mrf.mxu1 }
 0x357   :  { %v7894_v31 = vpop.f32.mrf.mxu0 }
 0x358   :  { %v3006_v10 = vpop.f32.mrf.mxu1 }
 0x359   :  { %v3237_v28 = vpop.f32.mrf.mxu0  ;;  %v3076_v61 = vadd.f32 %v3006_v10, %v9609_v50 }
 0x35a   :  { %v7869_v4 = vpop.f32.mrf.mxu1 }
 0x35b   :  { %v7895_v15 = vpop.f32.mrf.mxu0  ;;  %v9675_v46 = vadd.f32 %v3237_v28, %v3076_v61 }
 0x35c   :  { %v9677_v51 = vpop.f32.mrf.mxu1 }
 0x35d   :  { %v9679_v60 = vpop.f32.mrf.mxu0 }
 0x35e   :  { %v7872_v53 = vpop.f32.mrf.mxu1 }
 0x35f   :  { %v7898_v21 = vpop.f32.mrf.mxu0  ;;  %v3082_v29 = vadd.f32 %v7872_v53, %v9616_v13 }
 0x360   :  { %v3022_v43 = vpop.f32.mrf.mxu1 }
 0x361   :  { %v3253_v44 = vpop.f32.mrf.mxu0  ;;  %v9682_v63 = vadd.f32 %v7898_v21, %v3082_v29  ;;  %v3080_v0 = vadd.f32 %v3022_v43, %v9619_v8  ;;  %v2770_v43 = vadd.f32 %v9593_v45, %v9591_v52 }
 0x362   :  { %v7873_v62 = vpop.f32.mrf.mxu1 }
 0x363   :  { %v7899_v50 = vpop.f32.mrf.mxu0  ;;  %v9685_v16 = vadd.f32 %v3253_v44, %v3080_v0  ;;  %v3083_v37 = vadd.f32 %v7873_v62, %v9621_v35 }
 0x364   :  { %v9688_v32 = vpop.f32.mrf.mxu1 }
 0x365   :  { %v9690_v36 = vpop.f32.mrf.mxu0  ;;  %v9692_v49 = vadd.f32 %v7899_v50, %v3083_v37 }
 0x366   :  { %v7876_v20 = vpop.f32.mrf.mxu1 }
 0x367   :  { %v7902_v13 = vpop.f32.mrf.mxu0  ;;  %v3086_v38 = vadd.f32 %v7876_v20, %v9628_v18 }
 0x368   :  { %v3038_v27 = vpop.f32.mrf.mxu1 }
 0x369   :  { %v3269_v56 = vpop.f32.mrf.mxu0  ;;  %v9695_v1 = vadd.f32 %v7902_v13, %v3086_v38  ;;  %v3084_v8 = vadd.f32 %v3038_v27, %v9631_v19 }
 0x36a   :  { %v7877_v26 = vpop.f32.mrf.mxu1 }
 0x36b   :  { %v7903_v6 = vpop.f32.mrf.mxu0  ;;  %v9698_v5 = vadd.f32 %v3269_v56, %v3084_v8  ;;  %v3087_v35 = vadd.f32 %v7877_v26, %v9633_v34 }
 0x36c   :  { %v9701_v40 = vpop.f32.mrf.mxu1 }
 0x36d   :  { %v9703_v57 = vpop.f32.mrf.mxu0  ;;  %v9705_v12 = vadd.f32 %v7903_v6, %v3087_v35 }
 0x36e   :  { %v7880_v31 = vpop.f32.mrf.mxu1 }
 0x36f   :  { %v7906_v18 = vpop.f32.mrf.mxu0  ;;  %v3090_v10 = vadd.f32 %v7880_v31, %v9640_v3  ;;  %v3069_v3 = vadd.f32 %v9655_v24, %v2770_v43  ;;  %v2786_v24 = vadd.f32 %v9605_v25, %v9603_v59 }
 0x370   :  { %v3054_v28 = vpop.f32.mrf.mxu1 }
 0x371   :  { %v3285_v61 = vpop.f32.mrf.mxu0  ;;  %v9708_v4 = vadd.f32 %v7906_v18, %v3090_v10  ;;  %v3088_v19 = vadd.f32 %v3054_v28, %v9642_v58  ;;  %v3300_v27 = vadd.f32 %v9657_v55, %v3069_v3 }
 0x372   :  { %v7881_v15 = vpop.f32.mrf.mxu1 }
 0x373   :  { %v7907_v53 = vpop.f32.mrf.mxu0  ;;  %v9711_v21 = vadd.f32 %v3285_v61, %v3088_v19 }
 0x374   :  { %v9713_v34 = vpop.f32.mrf.mxu1 }
 0x375   :  { %v9715_v29 = vpop.f32.mrf.mxu0 }
 0x376   :  { %v7912_v44 = vpop.f32.mrf.mxu1 }
 0x377   :  { %v7938_v0 = vpop.f32.mrf.mxu0  ;;  %v3532_v62 = vadd.f32 %v7912_v44, %v9649_v41 }
 0x378   :  { %v3436_v50 = vpop.f32.mrf.mxu1 }
 0x379   :  { %v3667_v37 = vpop.f32.mrf.mxu0  ;;  %v9721_v58 = vadd.f32 %v7938_v0, %v3532_v62  ;;  %v3530_v20 = vadd.f32 %v3436_v50, %v9652_v30  ;;  %v3073_v30 = vadd.f32 %v9668_v42, %v2786_v24 }
 0x37a   :  { %v7913_v13 = vpop.f32.mrf.mxu1 }
 0x37b   :  { %v7939_v38 = vpop.f32.mrf.mxu0  ;;  %v9725_v56 = vadd.f32 %v3667_v37, %v3530_v20  ;;  %v3533_v52 = vadd.f32 %v7913_v13, %v9659_v22  ;;  %v3304_v59 = vadd.f32 %v9670_v7, %v3073_v30 }
 0x37c   :  { %v3439_v45 = vpop.f32.mrf.mxu1 }
 0x37d   :  { %v3670_v8 = vpop.f32.mrf.mxu0  ;;  %v9730_v41 = vadd.f32 %v7939_v38, %v3533_v52  ;;  %v3531_v26 = vadd.f32 %v3439_v45, %v3300_v27 }
 0x37e   :  { %v7916_v6 = vpop.f32.mrf.mxu1 }
 0x37f   :  { %v7942_v35 = vpop.f32.mrf.mxu0  ;;  %v9733_v31 = vadd.f32 %v3670_v8, %v3531_v26  ;;  %v3536_v55 = vadd.f32 %v7916_v6, %v9662_v23 }
 0x380   :  { %v3452_v18 = vpop.f32.mrf.mxu1 }
 0x381   :  { %v3683_v10 = vpop.f32.mrf.mxu0  ;;  %v9736_v28 = vadd.f32 %v7942_v35, %v3536_v55  ;;  %v3534_v22 = vadd.f32 %v3452_v18, %v9665_v47 }
 0x382   :  { %v7917_v61 = vpop.f32.mrf.mxu1 }
 0x383   :  { %v7943_v19 = vpop.f32.mrf.mxu0  ;;  %v9740_v25 = vadd.f32 %v3683_v10, %v3534_v22  ;;  %v3537_v15 = vadd.f32 %v7917_v61, %v9672_v39  ;;  %v2834_v10 = vadd.f32 %v9637_v14, %v9635_v11 }
 0x384   :  { %v3455_v53 = vpop.f32.mrf.mxu1 }
 0x385   :  { %v3686_v42 = vpop.f32.mrf.mxu0  ;;  %v9743_v43 = vadd.f32 %v7943_v19, %v3537_v15  ;;  %v3535_v44 = vadd.f32 %v3455_v53, %v3304_v59  ;;  %v3085_v19 = vadd.f32 %v9701_v40, %v2834_v10  ;;  %v2850_v40 = vadd.f32 %v9646_v2, %v9644_v33 }
 0x386   :  { %v7920_v23 = vpop.f32.mrf.mxu1 }
 0x387   :  { %v7946_v0 = vpop.f32.mrf.mxu0  ;;  %v9745_v3 = vadd.f32 %v3686_v42, %v3535_v44  ;;  %v3316_v23 = vadd.f32 %v9703_v57, %v3085_v19 }
 0x388   :  { %v3468_v62 = vpop.f32.mrf.mxu1 }
 0x389   :  { %v3699_v50 = vpop.f32.mrf.mxu0  ;;  %v3538_v47 = vadd.f32 %v3468_v62, %v9675_v46 }
 0x38a   :  { %v7921_v37 = vpop.f32.mrf.mxu1 }
 0x38b   :  { %v7947_v20 = vpop.f32.mrf.mxu0  ;;  %v9748_v7 = vadd.f32 %v3699_v50, %v3538_v47 }
 0x38c   :  { %v9750_v13 = vpop.f32.mrf.mxu1 }
 0x38d   :  { %v9752_v39 = vpop.f32.mrf.mxu0 }
 0x38e   :  { %v7924_v38 = vpop.f32.mrf.mxu1 }
 0x38f   :  { %v7950_v27 = vpop.f32.mrf.mxu0  ;;  %v3544_v52 = vadd.f32 %v7924_v38, %v9682_v63 }
 0x390   :  { %v3484_v45 = vpop.f32.mrf.mxu1 }
 0x391   :  { %v3715_v8 = vpop.f32.mrf.mxu0  ;;  %v9755_v24 = vadd.f32 %v7950_v27, %v3544_v52  ;;  %v3542_v26 = vadd.f32 %v3484_v45, %v9685_v16 }
 0x392   :  { %v7925_v6 = vpop.f32.mrf.mxu1 }
 0x393   :  { %v7951_v46 = vpop.f32.mrf.mxu0  ;;  %v9758_v35 = vadd.f32 %v3715_v8, %v3542_v26  ;;  %v3545_v30 = vadd.f32 %v7925_v6, %v9692_v49 }
 0x394   :  { %v9761_v55 = vpop.f32.mrf.mxu1 }
 0x395   :  { %v9763_v18 = vpop.f32.mrf.mxu0  ;;  %v9767_v63 = vadd.f32 %v7951_v46, %v3545_v30 }
 0x396   :  { %v7928_v22 = vpop.f32.mrf.mxu1 }
 0x397   :  { %v7954_v61 = vpop.f32.mrf.mxu0  ;;  %v3548_v16 = vadd.f32 %v7928_v22, %v9695_v1 }
 0x398   :  { %v3500_v59 = vpop.f32.mrf.mxu1 }
 0x399   :  { %v3731_v15 = vpop.f32.mrf.mxu0  ;;  %v9771_v53 = vadd.f32 %v7954_v61, %v3548_v16  ;;  %v3546_v49 = vadd.f32 %v3500_v59, %v9698_v5  ;;  %v3089_v5 = vadd.f32 %v9713_v34, %v2850_v40 }
 0x39a   :  { %v7929_v42 = vpop.f32.mrf.mxu1 }
 0x39b   :  { %10538 = vst [vmem:[#allocation22_spill] sm:$0xff] %v9771_v53  ;;  %v7955_v44 = vpop.f32.mrf.mxu0  ;;  %v9775_v0 = vadd.f32 %v3731_v15, %v3546_v49  ;;  %v3549_v11 = vadd.f32 %v7929_v42, %v9705_v12  ;;  %v3320_v33 = vadd.f32 %v9715_v29, %v3089_v5 }
 0x39c   :  { %v3503_v14 = vpop.f32.mrf.mxu1 }
 0x39d   :  { %10539 = vst [vmem:[#allocation38_spill] sm:$0xff] %v9775_v0  ;;  %v3734_v62 = vpop.f32.mrf.mxu0  ;;  %v9780_v1 = vadd.f32 %v7955_v44, %v3549_v11  ;;  %v3547_v50 = vadd.f32 %v3503_v14, %v3316_v23 }
 0x39e   :  { %v7932_v47 = vpop.f32.mrf.mxu1 }
 0x39f   :  { %10540 = vst [vmem:[#allocation26_spill] sm:$0xff] %v9780_v1  ;;  %v7958_v37 = vpop.f32.mrf.mxu0  ;;  %v9783_v20 = vadd.f32 %v3734_v62, %v3547_v50  ;;  %v3552_v57 = vadd.f32 %v7932_v47, %v9708_v4 }
 0x3a0   :  { %v3516_v38 = vpop.f32.mrf.mxu1 }
 0x3a1   :  { %10541 = vst [vmem:[#allocation40_spill] sm:$0xff] %v9783_v20  ;;  %v3747_v27 = vpop.f32.mrf.mxu0  ;;  %v9786_v52 = vadd.f32 %v7958_v37, %v3552_v57  ;;  %v3550_v12 = vadd.f32 %v3516_v38, %v9711_v21 }
 0x3a2   :  { %v7933_v45 = vpop.f32.mrf.mxu1 }
 0x3a3   :  { %10542 = vst [vmem:[#allocation27_spill] sm:$0xff] %v9786_v52  ;;  %v7959_v8 = vpop.f32.mrf.mxu0  ;;  %v9790_v2 = vadd.f32 %v3747_v27, %v3550_v12 }
 0x3a4   :  { %v3519_v26 = vpop.f32.mrf.mxu1 }
 0x3a5   :  { %10543 = vst [vmem:[#allocation39_spill] sm:$0xff] %v9790_v2  ;;  %v3750_v6 = vpop.f32.mrf.mxu0  ;;  %v3551_v46 = vadd.f32 %v3519_v26, %v3320_v33 }
 0x3a6   :  { %v7964_v34 = vpop.f32.mrf.mxu1 }
 0x3a7   :  { %v7990_v30 = vpop.f32.mrf.mxu0  ;;  %v9792_v10 = vadd.f32 %v3750_v6, %v3551_v46 }
 0x3a8   :  { %v3898_v4 = vpop.f32.mrf.mxu1 }
 0x3a9   :  { %10544 = vst [vmem:[#allocation28_spill] sm:$0xff] %v9792_v10  ;;  %v4129_v22 = vpop.f32.mrf.mxu0 }
 0x3aa   :  { %v7965_v61 = vpop.f32.mrf.mxu1 }
 0x3ab   :  { %v7991_v19 = vpop.f32.mrf.mxu0 }
 0x3ac   :  { %v3901_v16 = vpop.f32.mrf.mxu1 }
 0x3ad   :  { %v4132_v59 = vpop.f32.mrf.mxu0 }
 0x3ae   :  { %v7968_v21 = vpop.f32.mrf.mxu1 }
 0x3af   :  { %v7994_v15 = vpop.f32.mrf.mxu0 }
 0x3b0   :  { %v3914_v49 = vpop.f32.mrf.mxu1 }
 0x3b1   :  { %v9794_v42 = vpop.f32.mrf.mxu0 }
 0x3b2   :  { %v7969_v29 = vpop.f32.mrf.mxu1 }
 0x3b3   :  { %v9796_v44 = vpop.f32.mrf.mxu0 }
 0x3b4   :  { %v3917_v23 = vpop.f32.mrf.mxu1 }
 0x3b5   :  { %v9798_v11 = vpop.f32.mrf.mxu0 }
 0x3b6   :  { %v7972_v14 = vpop.f32.mrf.mxu1 }
 0x3b7   :  { %v7998_v62 = vpop.f32.mrf.mxu0 }
 0x3b8   :  { %v9800_v40 = vpop.f32.mrf.mxu1 }
 0x3b9   :  { %v9802_v50 = vpop.f32.mrf.mxu0 }
 0x3ba   :  { %v7973_v47 = vpop.f32.mrf.mxu1 }
 0x3bb   :  { %v7999_v37 = vpop.f32.mrf.mxu0 }
 0x3bc   :  { %v9804_v5 = vpop.f32.mrf.mxu1 }
 0x3bd   :  { %v9806_v57 = vpop.f32.mrf.mxu0 }
 0x3be   :  { %v9808_v38 = vpop.f32.mrf.mxu1 }
 0x3bf   :  { %v9810_v27 = vpop.f32.mrf.mxu0 }
 0x3c0   :  { %v9812_v12 = vpop.f32.mrf.mxu1 }
 0x3c1   :  { %v9814_v45 = vpop.f32.mrf.mxu0 }
 0x3c2   :  { %v9816_v8 = vpop.f32.mrf.mxu1 }
 0x3c3   :  { %v9818_v33 = vpop.f32.mrf.mxu0 }
 0x3c4   :  { %10545 = vst [vmem:[#allocation42_spill] sm:$0xff] %v9818_v33  ;;  %v9820_v26 = vpop.f32.mrf.mxu1 }
 0x3c5   :  { %v9822_v6 = vpop.f32.mrf.mxu0 }
 0x3c6   :  { %10546 = vst [vmem:[#allocation23_spill] sm:$0xff] %v9822_v6  ;;  %v9824_v46 = vpop.f32.mrf.mxu1 }
 0x3c7   :  { %10547 = vst [vmem:[#allocation41_spill] sm:$0xff] %v9824_v46  ;;  %v9826_v14 = vpop.f32.mrf.mxu0 }
 0x3c8   :  { %10548 = vst [vmem:[#allocation44_spill] sm:$0xff] %v9826_v14  ;;  %v9828_v62 = vpop.f32.mrf.mxu1  ;;  %v3994_v14 = vadd.f32 %v7964_v34, %v9721_v58  ;;  %v3998_v58 = vadd.f32 %v7968_v21, %v9736_v28 }
 0x3c9   :  { %10549 = vst [vmem:[#allocation20_spill] sm:$0xff] %v9828_v62  ;;  %v9830_v47 = vpop.f32.mrf.mxu0 }
 0x3ca   :  { %10550 = vst [vmem:[#allocation21_spill] sm:$0xff] %v9830_v47  ;;  %v9832_v37 = vpop.f32.mrf.mxu1 }
 0x3cb   :  { %10551 = vst [vmem:[#allocation31_spill] sm:$0xff] %v9832_v37  ;;  %v9834_v10 = vpop.f32.mrf.mxu0  ;;  %v3992_v37 = vadd.f32 %v3898_v4, %v9725_v56 }
 0x3cc   :  { %10552 = vst [vmem:[#allocation43_spill] sm:$0xff] %v9834_v10  ;;  %v9836_v2 = vpop.f32.mrf.mxu1  ;;  %v4225_v10 = vadd.f32 %v7990_v30, %v3994_v14 }
 0x3cd   :  { %10553 = vst [vmem:[#allocation29_spill] sm:$0xff] %v9836_v2  ;;  %v9838_v52 = vpop.f32.mrf.mxu0  ;;  %v3995_v2 = vadd.f32 %v7965_v61, %v9730_v41  ;;  %v4223_v53 = vadd.f32 %v4129_v22, %v3992_v37  ;;  %v3996_v41 = vadd.f32 %v3914_v49, %v9740_v25  ;;  %v3999_v22 = vadd.f32 %v7969_v29, %v9743_v43 }
 0x3ce   :  { %10554 = vst [vmem:[#allocation46_spill] sm:$0xff] %v9838_v52  ;;  %v9840_v20 = vpop.f32.mrf.mxu1 }
 0x3cf   :  { %10555 = vst [vmem:[#allocation24_spill] sm:$0xff] %v9840_v20  ;;  %v9842_v1 = vpop.f32.mrf.mxu0  ;;  %v3993_v20 = vadd.f32 %v3901_v16, %v9733_v31  ;;  %v4230_v43 = vadd.f32 %v9796_v44, %v3999_v22  ;;  %v4000_v16 = vadd.f32 %v9800_v40, %v9748_v7  ;;  %v4006_v44 = vadd.f32 %v9808_v38, %v9755_v24  ;;  %v10563_v22 = vld [vmem:[#allocation38_spill] sm:$0xff] }
 0x3d0   :  { %10556 = vst [vmem:[#allocation45_spill] sm:$0xff] %v9842_v1  ;;  %v9844_v0 = vpop.f32.mrf.mxu1  ;;  %v4007_v24 = vadd.f32 %v9816_v8, %v9767_v63  ;;  %v10559_v8 = vld [vmem:[#allocation42_spill] sm:$0xff] }
 0x3d1   :  { %10557 = vst [vmem:[#allocation30_spill] sm:$0xff] %v9844_v0  ;;  %v9846_v6 = vpop.f32.mrf.mxu0  ;;  %v4226_v0 = vadd.f32 %v7991_v19, %v3995_v2  ;;  %v4224_v4 = vadd.f32 %v4132_v59, %v3993_v20  ;;  %v4231_v7 = vadd.f32 %v9802_v50, %v4000_v16 }
 0x3d2   :  { %10558 = vst [vmem:[#allocation48_spill] sm:$0xff] %v9846_v6  ;;  %v7985_v62 = vpop.f32.mrf.mxu1  ;;  %v2802_v6 = vadd.f32 %v9613_v9, %v9611_v54  ;;  %v4238_v37 = vadd.f32 %v10559_v8, %v4007_v24 }
 0x3d3   :  { %v8011_v47 = vpop.f32.mrf.mxu0 }
 0x3d4   :  { %v9850_v46 = vpop.f32.mrf.mxu1  ;;  %v3077_v30 = vadd.f32 %v9677_v51, %v2802_v6  ;;  %v3997_v51 = vadd.f32 %v3917_v23, %v9745_v3 }
 0x3d6   :  { %v8016_v52 = vpop.f32.mrf.mxu1  ;;  %v3308_v28 = vadd.f32 %v9679_v60, %v3077_v30  ;;  %v4228_v3 = vadd.f32 %v9798_v11, %v3997_v51 }
 0x3d7   :  { %v4456_v1 = vadd.f32 %v8016_v52, %v4225_v10  ;;  %v4229_v10 = vadd.f32 %v7994_v15, %v3998_v58  ;;  %v10560_v58 = vld [vmem:[#allocation22_spill] sm:$0xff] }
 0x3d8   :  { %v4360_v33 = vpop.f32.mrf.mxu1  ;;  %v3539_v20 = vadd.f32 %v9750_v13, %v3308_v28 }
 0x3d9   :  { %4479 = vst.msk [vmem:[#allocation6 + $0x10] sm:$0xff] %vm2110_vm3, %v4456_v1  ;;  %v4454_v56 = vadd.f32 %v4360_v33, %v4223_v53  ;;  %v4227_v53 = vadd.f32 %v9794_v42, %v3996_v41 }
 0x3da   :  { %v8017_v34 = vpop.f32.mrf.mxu1  ;;  %v3770_v59 = vadd.f32 %v9752_v39, %v3539_v20  ;;  %v10567_v20 = vld [vmem:[#allocation31_spill] sm:$0xff] }
 0x3db   :  { %4477 = vst.msk [vmem:[#allocation6] sm:$0xff] %vm2110_vm3, %v4454_v56  ;;  %v4457_v31 = vadd.f32 %v8017_v34, %v4226_v0  ;;  %v2818_v0 = vadd.f32 %v9625_v17, %v9623_v48  ;;  %v10561_v56 = vld [vmem:[#allocation41_spill] sm:$0xff] }
 0x3dc   :  { %v4363_v52 = vpop.f32.mrf.mxu1  ;;  %v4001_v42 = vadd.f32 %v9804_v5, %v3770_v59  ;;  %v4010_v34 = vadd.f32 %v10561_v56, %v10560_v58  ;;  %v10570_v59 = vld [vmem:[#allocation29_spill] sm:$0xff]  ;;  %v10578_v56 = vld [vmem:[#allocation48_spill] sm:$0xff] }
 0x3dd   :  { %4480 = vst.msk [vmem:[#allocation6 + $0x18] sm:$0xff] %vm2110_vm3, %v4457_v31  ;;  %v4455_v54 = vadd.f32 %v4363_v52, %v4224_v4  ;;  %v3081_v19 = vadd.f32 %v9688_v32, %v2818_v0  ;;  %v10562_v52 = vld [vmem:[#allocation23_spill] sm:$0xff] }
 0x3de   :  { %v8020_v9 = vpop.f32.mrf.mxu1  ;;  %v4232_v33 = vadd.f32 %v9806_v57, %v4001_v42 }
 0x3df   :  { %4478 = vst.msk [vmem:[#allocation6 + $0x8] sm:$0xff] %vm2110_vm3, %v4455_v54  ;;  %v4460_v25 = vadd.f32 %v8020_v9, %v4229_v10  ;;  %v3312_v49 = vadd.f32 %v9690_v36, %v3081_v19  ;;  %v4004_v36 = vadd.f32 %v9812_v12, %v9758_v35  ;;  %v10564_v54 = vld [vmem:[#allocation20_spill] sm:$0xff] }
 0x3e0   :  { %v4376_v1 = vpop.f32.mrf.mxu1  ;;  %v4008_v9 = vadd.f32 %v10564_v54, %v10563_v22 }
 0x3e1   :  { %4483 = vst.msk [vmem:[#allocation6 + $0x30] sm:$0xff] %vm2110_vm3, %v4460_v25  ;;  %v4458_v2 = vadd.f32 %v4376_v1, %v4227_v53  ;;  %v3543_v39 = vadd.f32 %v9761_v55, %v3312_v49  ;;  %v4237_v55 = vadd.f32 %v9810_v27, %v4006_v44  ;;  %v4235_v62 = vadd.f32 %v9814_v45, %v4004_v36  ;;  %v10565_v25 = vld [vmem:[#allocation44_spill] sm:$0xff]  ;;  %v10566_v1 = vld [vmem:[#allocation26_spill] sm:$0xff] }
 0x3e2   :  { %v4500_v61 = vld [vmem:[#allocation6] sm:$0xff]  ;;  %v8021_v60 = vpop.f32.mrf.mxu1  ;;  %v4241_v0 = vadd.f32 %v10565_v25, %v4010_v34 }
 0x3e3   :  { %4501 = vst.msk [vmem:[#allocation7] sm:$0xff] %vm2110_vm3, %v4500_v61  ;;  %4481 = vst.msk [vmem:[#allocation6 + $0x20] sm:$0xff] %vm2110_vm3, %v4458_v2  ;;  %v4461_v48 = vadd.f32 %v8021_v60, %v4230_v43  ;;  %v3774_v6 = vadd.f32 %v9763_v18, %v3543_v39  ;;  %v4011_v43 = vadd.f32 %v10567_v20, %v10566_v1  ;;  %v10573_v39 = vld [vmem:[#allocation24_spill] sm:$0xff]  ;;  %v10574_v36 = vld [vmem:[#allocation46_spill] sm:$0xff] }
 0x3e4   :  { %v4504_v17 = vld [vmem:[#allocation6 + $0x14] sm:$0xff]  ;;  %v4379_v13 = vpop.f32.mrf.mxu1 }
 0x3e5   :  { %4505 = vst.msk [vmem:[#allocation7 + $0x10] sm:$0xff] %vm2110_vm3, %v4504_v17  ;;  %4484 = vst.msk [vmem:[#allocation6 + $0x38] sm:$0xff] %vm2110_vm3, %v4461_v48  ;;  %v4459_v21 = vadd.f32 %v4379_v13, %v4228_v3  ;;  %v4005_v47 = vadd.f32 %v9820_v26, %v3774_v6  ;;  %v10568_v48 = vld [vmem:[#allocation21_spill] sm:$0xff]  ;;  %v10569_v13 = vld [vmem:[#allocation40_spill] sm:$0xff] }
 0x3e6   :  { %v4502_v32 = vld [vmem:[#allocation6 + $0xa] sm:$0xff]  ;;  %v8024_v15 = vpop.f32.mrf.mxu1  ;;  %v4239_v17 = vadd.f32 %v10568_v48, %v4008_v9  ;;  %v10576_v6 = vld [vmem:[#allocation30_spill] sm:$0xff] }
 0x3e7   :  { %4503 = vst.msk [vmem:[#allocation7 + $0x8] sm:$0xff] %vm2110_vm3, %v4502_v32  ;;  %4482 = vst.msk [vmem:[#allocation6 + $0x28] sm:$0xff] %vm2110_vm3, %v4459_v21  ;;  %v4236_v10 = vadd.f32 %v10562_v52, %v4005_v47  ;;  %v4009_v21 = vadd.f32 %v10570_v59, %v10569_v13  ;;  %v10577_v47 = vld [vmem:[#allocation45_spill] sm:$0xff] }
 0x3e8   :  { %v4392_v29 = vpop.f32.mrf.mxu1 }
 0x3e9   :  { %v4462_v23 = vadd.f32 %v4392_v29, %v4231_v7  ;;  %v10571_v7 = vld [vmem:[#allocation43_spill] sm:$0xff] }
 0x3ea   :  { %v4506_v11 = vld [vmem:[#allocation6 + $0x1e] sm:$0xff]  ;;  %v8025_v40 = vpop.f32.mrf.mxu1  ;;  %v4242_v42 = vadd.f32 %v10571_v7, %v4011_v43 }
 0x3eb   :  { %4507 = vst.msk [vmem:[#allocation7 + $0x18] sm:$0xff] %vm2110_vm3, %v4506_v11  ;;  %4485 = vst.msk [vmem:[#allocation6 + $0x40] sm:$0xff] %vm2110_vm3, %v4462_v23  ;;  %v9899_v57 = vld [vmem:[#allocation7] sm:$0xff]  ;;  %v10572_v29 = vld [vmem:[#allocation27_spill] sm:$0xff] }
 0x3ec   :  { %v4510_v50 = vld [vmem:[#allocation6 + $0x32] sm:$0xff]  ;;  %v4395_v5 = vpop.f32.mrf.mxu1  ;;  %v4548_v30 = vsel %vm2110_vm3, %v9899_v57, 0.0  ;;  %v9915_v26 = vld [vmem:[#allocation7 + $0x10] sm:$0xff]  ;;  %v4014_v44 = vadd.f32 %v10573_v39, %v10572_v29 }
 0x3ed   :  { %4511 = vst.msk [vmem:[#allocation7 + $0x28] sm:$0xff] %vm2110_vm3, %v4510_v50  ;;  %v4463_v38 = vadd.f32 %v4395_v5, %v4232_v33  ;;  %v4551_v2 = vsel %vm2110_vm3, %v9915_v26, 0.0  ;;  %v4240_v50 = vadd.f32 %v10574_v36, %v4009_v21  ;;  %v10575_v5 = vld [vmem:[#allocation39_spill] sm:$0xff] }
 0x3ee   :  { %v9901_v14 = vld [vmem:[#allocation7 + $0x8] sm:$0xff]  ;;  %v4508_v35 = vld [vmem:[#allocation6 + $0x28] sm:$0xff]  ;;  %v8028_v12 = vpop.f32.mrf.mxu1 }
 0x3ef   :  { %v4549_v18 = vsel %vm2110_vm3, %v9901_v14, 0.0  ;;  %4509 = vst.msk [vmem:[#allocation7 + $0x20] sm:$0xff] %vm2110_vm3, %v4508_v35  ;;  %4486 = vst.msk [vmem:[#allocation6 + $0x48] sm:$0xff] %vm2110_vm3, %v4463_v38  ;;  %v4468_v63 = vadd.f32 %v8028_v12, %v4237_v55  ;;  %v4012_v55 = vadd.f32 %v10576_v6, %v10575_v5 }
 0x3f0   :  { %v4408_v27 = vpop.f32.mrf.mxu1  ;;  %v4550_v4 = vadd.f32 %v4549_v18, %v4548_v30  ;;  %v4245_v18 = vadd.f32 %v10577_v47, %v4014_v44  ;;  %v10579_v30 = vld [vmem:[#allocation28_spill] sm:$0xff] }
 0x3f1   :  { %4491 = vst.msk [vmem:[#allocation6 + $0x70] sm:$0xff] %vm2110_vm3, %v4468_v63  ;;  %v4466_v45 = vadd.f32 %v4408_v27, %v4235_v62  ;;  %v4243_v34 = vadd.f32 %v10578_v56, %v4012_v55 }
 0x3f2   :  { %v4512_v41 = vld [vmem:[#allocation6 + $0x3c] sm:$0xff]  ;;  %v8029_v31 = vpop.f32.mrf.mxu1  ;;  %v9922_v53 = vld [vmem:[#allocation7 + $0x18] sm:$0xff]  ;;  %v4552_v16 = vadd.f32 %v4551_v2, %v4550_v4 }
 0x3f3   :  { %4513 = vst.msk [vmem:[#allocation7 + $0x30] sm:$0xff] %vm2110_vm3, %v4512_v41  ;;  %4489 = vst.msk [vmem:[#allocation6 + $0x60] sm:$0xff] %vm2110_vm3, %v4466_v45  ;;  %v4469_v28 = vadd.f32 %v8029_v31, %v4238_v37  ;;  %v4553_v32 = vsel %vm2110_vm3, %v9922_v53, 0.0  ;;  %v4013_v45 = vadd.f32 %v9850_v46, %v10579_v30  ;;  %v4212_v31 = vpop.f32.mrf.mxu0 }
 0x3f4   :  { %v4411_v51 = vpop.f32.mrf.mxu1  ;;  %v4554_v33 = vadd.f32 %v4553_v32, %v4552_v16  ;;  %v9949_v38 = vld [vmem:[#allocation7 + $0x28] sm:$0xff] }
 0x3f5   :  { %4492 = vst.msk [vmem:[#allocation6 + $0x78] sm:$0xff] %vm2110_vm3, %v4469_v28  ;;  %v4467_v61 = vadd.f32 %v4411_v51, %v4236_v10  ;;  %v4557_v41 = vsel %vm2110_vm3, %v9949_v38, 0.0  ;;  %v4244_v28 = vadd.f32 %v4212_v31, %v4013_v45  ;;  %v8225_v32 = vld [vmem:[%s10455_s7 + $0x8] sm:$0xff]  }
 0x3f6   :  { %v9930_v60 = vld [vmem:[#allocation7 + $0x20] sm:$0xff]  ;;  %v4514_v19 = vld [vmem:[#allocation6 + $0x46] sm:$0xff]  ;;  %v8032_v3 = vpop.f32.mrf.mxu1  ;;  %8038 = vmatprep.subr.bf16.mxu0 %v8225_v32 }
 0x3f7   :  { %4515 = vst.msk [vmem:[#allocation7 + $0x38] sm:$0xff] %vm2110_vm3, %v4514_v19  ;;  %4490 = vst.msk [vmem:[#allocation6 + $0x68] sm:$0xff] %vm2110_vm3, %v4467_v61  ;;  %v4472_v15 = vadd.f32 %v8032_v3, %v4241_v0  ;;  %v4555_v11 = vsel %vm2110_vm3, %v9930_v60, 0.0  ;;  %8039 = vmatpush3.bf16.msra.mxu0 %v8225_v32 }
 0x3f8   :  { %v4424_v49 = vpop.f32.mrf.mxu1  ;;  %v4556_v62 = vadd.f32 %v4555_v11, %v4554_v33 }
 0x3f9   :  { %4495 = vst.msk [vmem:[#allocation6 + $0x90] sm:$0xff] %vm2110_vm3, %v4472_v15  ;;  %v4470_v23 = vadd.f32 %v4424_v49, %v4239_v17  ;;  %v8226_v15 = vld [vmem:[%s10455_s7] sm:$0xff]  }
 0x3fa   :  { %v8033_v40 = vpop.f32.mrf.mxu1  ;;  %v9954_v27 = vld [vmem:[#allocation7 + $0x30] sm:$0xff]  ;;  %v4558_v22 = vadd.f32 %v4557_v41, %v4556_v62  ;;  %8048 = vmatprep.subr.bf16.mxu1 %v8226_v15 }
 0x3fb   :  { %4493 = vst.msk [vmem:[#allocation6 + $0x80] sm:$0xff] %vm2110_vm3, %v4470_v23  ;;  %v4473_v24 = vadd.f32 %v8033_v40, %v4242_v42  ;;  %v4559_v46 = vsel %vm2110_vm3, %v9954_v27, 0.0  ;;  %8049 = vmatpush3.bf16.msra.mxu1 %v8226_v15 }
 0x3fc   :  { %v4520_v35 = vld [vmem:[#allocation6 + $0x78] sm:$0xff]  ;;  %v4427_v12 = vpop.f32.mrf.mxu1  ;;  %v4560_v1 = vadd.f32 %v4559_v46, %v4558_v22 }
 0x3fd   :  { %4521 = vst.msk [vmem:[#allocation7 + $0x50] sm:$0xff] %vm2110_vm3, %v4520_v35  ;;  %4496 = vst.msk [vmem:[#allocation6 + $0x98] sm:$0xff] %vm2110_vm3, %v4473_v24  ;;  %v4471_v63 = vadd.f32 %v4427_v12, %v4240_v50 }
 0x3fe   :  { %v4516_v8 = vld [vmem:[#allocation6 + $0x64] sm:$0xff]  ;;  %v4518_v37 = vld [vmem:[#allocation6 + $0x6e] sm:$0xff]  ;;  %v8036_v58 = vpop.f32.mrf.mxu1 }
 0x3ff   :  { %4517 = vst.msk [vmem:[#allocation7 + $0x40] sm:$0xff] %vm2110_vm3, %v4516_v8  ;;  %4519 = vst.msk [vmem:[#allocation7 + $0x48] sm:$0xff] %vm2110_vm3, %v4518_v37  ;;  %v4476_v4 = vadd.f32 %v8036_v58, %v4245_v18  ;;  %v9964_v10 = vld [vmem:[#allocation7 + $0x38] sm:$0xff] }
 0x400   :  { %4494 = vst.msk [vmem:[#allocation6 + $0x88] sm:$0xff] %vm2110_vm3, %v4471_v63  ;;  %v4440_v52 = vpop.f32.mrf.mxu1  ;;  %v4561_v51 = vsel %vm2110_vm3, %v9964_v10, 0.0  ;;  %v10019_v63 = vld [vmem:[%s10455_s7 + $0x10] sm:$0xff]  }
 0x401   :  { %4499 = vst.msk [vmem:[#allocation6 + $0xb0] sm:$0x3] %vm2133_vm4, %v4476_v4  ;;  %v4474_v54 = vadd.f32 %v4440_v52, %v4243_v34  ;;  %v4562_v19 = vadd.f32 %v4561_v51, %v4560_v1  ;;  %8058 = vmatprep.subr.bf16.mxu0 %v10019_v63  ;;  %v10034_v4 = vld [vmem:[%s10455_s7 + $0x18] sm:$0xff]  }
 0x402   :  { %v8037_v9 = vpop.f32.mrf.mxu1  ;;  %8068 = vmatprep.subr.bf16.mxu1 %v10034_v4 }
 0x403   :  { %4497 = vst.msk [vmem:[#allocation6 + $0xa0] sm:$0xff] %vm2110_vm3, %v4474_v54 }
 0x404   :  { %v4526_v25 = vld [vmem:[#allocation6 + $0x96] sm:$0xff]  ;;  %v4443_v0 = vpop.f32.mrf.mxu1  ;;  %v9984_v59 = vld [vmem:[#allocation7 + $0x50] sm:$0xff] }
 0x405   :  { %4527 = vst.msk [vmem:[#allocation7 + $0x68] sm:$0xff] %vm2110_vm3, %v4526_v25  ;;  %v4475_v20 = vadd.f32 %v4443_v0, %v4244_v28  ;;  %v4567_v49 = vsel %vm2110_vm3, %v9984_v59, 0.0 }
 0x406   :  { %v9973_v61 = vld [vmem:[#allocation7 + $0x40] sm:$0xff]  ;;  %v9978_v3 = vld [vmem:[#allocation7 + $0x48] sm:$0xff] }
 0x407   :  { %v4522_v43 = vld [vmem:[#allocation6 + $0x82] sm:$0xff]  ;;  %v4524_v2 = vld [vmem:[#allocation6 + $0x8c] sm:$0xff]  ;;  %4498 = vst.msk [vmem:[#allocation6 + $0xa8] sm:$0xff] %vm2110_vm3, %v4475_v20  ;;  %v4563_v16 = vsel %vm2110_vm3, %v9973_v61, 0.0  ;;  %v4565_v17 = vsel %vm2110_vm3, %v9978_v3, 0.0 }
 0x408   :  { %4523 = vst.msk [vmem:[#allocation7 + $0x58] sm:$0xff] %vm2110_vm3, %v4522_v43  ;;  %4525 = vst.msk [vmem:[#allocation7 + $0x60] sm:$0xff] %vm2110_vm3, %v4524_v2  ;;  %v4564_v48 = vadd.f32 %v4563_v16, %v4562_v19 }
 0x40a   :  { %v4528_v13 = vld [vmem:[#allocation6 + $0xa0] sm:$0xff]  ;;  %v4566_v21 = vadd.f32 %v4565_v17, %v4564_v48 }
 0x40b   :  { %4529 = vst.msk [vmem:[#allocation7 + $0x70] sm:$0xff] %vm2110_vm3, %v4528_v13 }
 0x40c   :  { %v4568_v39 = vadd.f32 %v4567_v49, %v4566_v21  ;;  %v10002_v23 = vld [vmem:[#allocation7 + $0x68] sm:$0xff] }
 0x40d   :  { %v4573_v50 = vsel %vm2110_vm3, %v10002_v23, 0.0 }
 0x40e   :  { %v4530_v7 = vld [vmem:[#allocation6 + $0xaa] sm:$0xff] }
 0x40f   :  { %v9995_v42 = vld [vmem:[#allocation7 + $0x58] sm:$0xff]  ;;  %v9997_v29 = vld [vmem:[#allocation7 + $0x60] sm:$0xff]  ;;  %4531 = vst.msk [vmem:[#allocation7 + $0x78] sm:$0xff] %vm2110_vm3, %v4530_v7 }
 0x410   :  { %v4569_v44 = vsel %vm2110_vm3, %v9995_v42, 0.0  ;;  %v4571_v40 = vsel %vm2110_vm3, %v9997_v29, 0.0 }
 0x411   :  { %v4570_v11 = vadd.f32 %v4569_v44, %v4568_v39 }
 0x412   :  { %v10006_v33 = vld [vmem:[#allocation7 + $0x70] sm:$0xff] }
 0x413   :  { %v4572_v36 = vadd.f32 %v4571_v40, %v4570_v11  ;;  %v4575_v6 = vsel %vm2110_vm3, %v10006_v33, 0.0 }
 0x415   :  { %v4574_v5 = vadd.f32 %v4573_v50, %v4572_v36 }
 0x416   :  { %v10012_v55 = vld [vmem:[#allocation7 + $0x78] sm:$0xff] }
 0x417   :  { %v4576_v24 = vadd.f32 %v4575_v6, %v4574_v5  ;;  %v4577_v35 = vsel %vm2110_vm3, %v10012_v55, 0.0 }
 0x419   :  { %v4578_v12 = vadd.f32 %v4577_v35, %v4576_v24 }
 0x41b   :  { %v4579_v62 = vrot.slane %v4578_v12, 4 }
 0x41d   :  { %v4580_v47 = vadd.f32 %v4579_v62, %v4578_v12 }
 0x41f   :  { %v4581_v18 = vrot.slane %v4580_v47, 2 }
 0x421   :  { %v4582_v8 = vadd.f32 %v4581_v18, %v4580_v47 }
 0x423   :  { %v4583_v37 = vrot.slane %v4582_v8, 1 }
 0x425   :  { %v4584_v58 = vadd.f32 %v4583_v37, %v4582_v8 }
 0x427   :  { %v4585_v56 = vmul.f32 0.0078125, %v4584_v58 }
 0x429   :  { %v10023_v34 = vsub.f32 %v9899_v57, %v4585_v56  ;;  %v10026_v30 = vsub.f32 %v9901_v14, %v4585_v56  ;;  %v10029_v45 = vsub.f32 %v9915_v26, %v4585_v56  ;;  %v10037_v41 = vsub.f32 %v9922_v53, %v4585_v56 }
 0x42a   :  { %v10045_v14 = vsub.f32 %v9930_v60, %v4585_v56  ;;  %v10050_v52 = vsub.f32 %v9949_v38, %v4585_v56  ;;  %v10057_v9 = vsub.f32 %v9954_v27, %v4585_v56  ;;  %v10063_v38 = vsub.f32 %v9964_v10, %v4585_v56 }
 0x42b   :  { %v4602_v31 = vmul.f32 %v10023_v34, %v10023_v34  ;;  %v4603_v57 = vmul.f32 %v10026_v30, %v10026_v30  ;;  %v4604_v26 = vmul.f32 %v10029_v45, %v10029_v45  ;;  %v4605_v53 = vmul.f32 %v10037_v41, %v10037_v41 }
 0x42c   :  { %v4606_v60 = vmul.f32 %v10045_v14, %v10045_v14  ;;  %v4607_v25 = vmul.f32 %v10050_v52, %v10050_v52  ;;  %v4594_v20 = vsub.f32 %v9973_v61, %v4585_v56  ;;  %v4608_v27 = vmul.f32 %v10057_v9, %v10057_v9 }
 0x42d   :  { %v4618_v22 = vsel %vm2110_vm3, %v4602_v31, 0.0  ;;  %v4619_v54 = vsel %vm2110_vm3, %v4603_v57, 0.0  ;;  %v4621_v28 = vsel %vm2110_vm3, %v4604_v26, 0.0  ;;  %v4623_v0 = vsel %vm2110_vm3, %v4605_v53, 0.0 }
 0x42e   :  { %v4620_v46 = vadd.f32 %v4619_v54, %v4618_v22  ;;  %v4625_v43 = vsel %vm2110_vm3, %v4606_v60, 0.0  ;;  %v4595_v19 = vsub.f32 %v9978_v3, %v4585_v56  ;;  %v4609_v10 = vmul.f32 %v10063_v38, %v10063_v38 }
 0x42f   :  { %v4627_v16 = vsel %vm2110_vm3, %v4607_v25, 0.0  ;;  %v4596_v17 = vsub.f32 %v9984_v59, %v4585_v56  ;;  %v4610_v13 = vmul.f32 %v4594_v20, %v4594_v20  ;;  %v4629_v21 = vsel %vm2110_vm3, %v4608_v27, 0.0 }
 0x430   :  { %v4622_v51 = vadd.f32 %v4621_v28, %v4620_v46  ;;  %v4597_v32 = vsub.f32 %v9995_v42, %v4585_v56  ;;  %v4611_v15 = vmul.f32 %v4595_v19, %v4595_v19  ;;  %v4631_v49 = vsel %vm2110_vm3, %v4609_v10, 0.0 }
 0x431   :  { %v4598_v3 = vsub.f32 %v9997_v29, %v4585_v56  ;;  %v4612_v39 = vmul.f32 %v4596_v17, %v4596_v17  ;;  %v4633_v44 = vsel %vm2110_vm3, %v4610_v13, 0.0  ;;  %v4599_v40 = vsub.f32 %v10002_v23, %v4585_v56 }
 0x432   :  { %v4624_v1 = vadd.f32 %v4623_v0, %v4622_v51  ;;  %v4613_v36 = vmul.f32 %v4597_v32, %v4597_v32  ;;  %v4635_v59 = vsel %vm2110_vm3, %v4611_v15, 0.0  ;;  %v4600_v5 = vsub.f32 %v10006_v33, %v4585_v56 }
 0x433   :  { %v4614_v6 = vmul.f32 %v4598_v3, %v4598_v3  ;;  %v4637_v42 = vsel %vm2110_vm3, %v4612_v39, 0.0  ;;  %v4601_v35 = vsub.f32 %v10012_v55, %v4585_v56  ;;  %v4615_v12 = vmul.f32 %v4599_v40, %v4599_v40 }
 0x434   :  { %v4626_v2 = vadd.f32 %v4625_v43, %v4624_v1  ;;  %v4639_v29 = vsel %vm2110_vm3, %v4613_v36, 0.0  ;;  %v4616_v47 = vmul.f32 %v4600_v5, %v4600_v5 }
 0x435   :  { %v4641_v18 = vsel %vm2110_vm3, %v4614_v6, 0.0  ;;  %v4617_v8 = vmul.f32 %v4601_v35, %v4601_v35  ;;  %v4643_v37 = vsel %vm2110_vm3, %v4615_v12, 0.0 }
 0x436   :  { %v4628_v48 = vadd.f32 %v4627_v16, %v4626_v2  ;;  %v4645_v33 = vsel %vm2110_vm3, %v4616_v47, 0.0 }
 0x437   :  { %v4647_v57 = vsel %vm2110_vm3, %v4617_v8, 0.0 }
 0x438   :  { %v4630_v61 = vadd.f32 %v4629_v21, %v4628_v48  ;;  %v7109_v48 = vld [vmem:[%s10453_s5] ss:$0 sm:$0xff] }
 0x43a   :  { %v4632_v7 = vadd.f32 %v4631_v49, %v4630_v61 }
 0x43c   :  { %v4634_v11 = vadd.f32 %v4633_v44, %v4632_v7 }
 0x43e   :  { %v4636_v50 = vadd.f32 %v4635_v59, %v4634_v11  ;;  %v7110_v11 = vld [vmem:[%s10454_s6] ss:$0 sm:$0xff] }
 0x440   :  { %v4638_v24 = vadd.f32 %v4637_v42, %v4636_v50 }
 0x442   :  { %v4640_v62 = vadd.f32 %v4639_v29, %v4638_v24 }
 0x444   :  { %v4642_v23 = vadd.f32 %v4641_v18, %v4640_v62 }
 0x446   :  { %v4644_v58 = vadd.f32 %v4643_v37, %v4642_v23 }
 0x448   :  { %v4646_v31 = vadd.f32 %v4645_v33, %v4644_v58 }
 0x44a   :  { %v4648_v26 = vadd.f32 %v4647_v57, %v4646_v31 }
 0x44c   :  { %v4649_v53 = vrot.slane %v4648_v26, 4 }
 0x44e   :  { %v4650_v55 = vadd.f32 %v4649_v53, %v4648_v26 }
 0x450   :  { %v4651_v56 = vrot.slane %v4650_v55, 2 }
 0x452   :  { %v4652_v22 = vadd.f32 %v4651_v56, %v4650_v55 }
 0x454   :  { %v4653_v54 = vrot.slane %v4652_v22, 1 }
 0x456   :  { %v4654_v46 = vadd.f32 %v4653_v54, %v4652_v22 }
 0x458   :  { %v4655_v60 = vmul.f32 0.0078125, %v4654_v46 }
 0x45a   :  { %v4656_v28 = vadd.f32 1e-05, %v4655_v60 }
 0x45c   :  { %8258 = vrsqrt.f32 %v4656_v28 }
 0x469   :  { %v8259_v51 = vpop.eup %8258 }
 0x46a   :  { %v4658_v25 = vmul.f32 %v8259_v51, %v10023_v34  ;;  %v4659_v0 = vmul.f32 %v8259_v51, %v10026_v30  ;;  %v4660_v1 = vmul.f32 %v8259_v51, %v10029_v45  ;;  %v4661_v27 = vmul.f32 %v8259_v51, %v10037_v41 }
 0x46b   :  { %v4662_v43 = vmul.f32 %v8259_v51, %v10045_v14  ;;  %v4663_v2 = vmul.f32 %v8259_v51, %v10050_v52  ;;  %v4664_v10 = vmul.f32 %v8259_v51, %v10057_v9  ;;  %v4665_v16 = vmul.f32 %v8259_v51, %v10063_v38 }
 0x46c   :  { %v4666_v13 = vmul.f32 %v8259_v51, %v4594_v20  ;;  %v4667_v34 = vmul.f32 %v8259_v51, %v4595_v19  ;;  %v4668_v21 = vmul.f32 %v8259_v51, %v4596_v17  ;;  %v4669_v30 = vmul.f32 %v8259_v51, %v4597_v32 }
 0x46d   :  { %v4670_v61 = vmul.f32 %v8259_v51, %v4598_v3  ;;  %v4671_v45 = vmul.f32 %v8259_v51, %v4599_v40  ;;  %v4672_v15 = vmul.f32 %v8259_v51, %v4600_v5  ;;  %v4673_v41 = vmul.f32 %v8259_v51, %v4601_v35 }
 0x46e   :  { %v4681_v49 = vmul.f32 %v7109_v48, %v4658_v25  ;;  %v4682_v14 = vmul.f32 %v7109_v48, %v4659_v0  ;;  %v4683_v7 = vmul.f32 %v7109_v48, %v4660_v1  ;;  %v4684_v52 = vmul.f32 %v7109_v48, %v4661_v27 }
 0x46f   :  { %v4685_v39 = vmul.f32 %v7109_v48, %v4662_v43  ;;  %v4686_v9 = vmul.f32 %v7109_v48, %v4663_v2  ;;  %v4687_v44 = vmul.f32 %v7109_v48, %v4664_v10  ;;  %v4688_v38 = vmul.f32 %v7109_v48, %v4665_v16 }
 0x470   :  { %v4689_v20 = vmul.f32 %v7109_v48, %v4666_v13  ;;  %v4690_v19 = vmul.f32 %v7109_v48, %v4667_v34  ;;  %v4691_v17 = vmul.f32 %v7109_v48, %v4668_v21  ;;  %v4692_v32 = vmul.f32 %v7109_v48, %v4669_v30 }
 0x471   :  { %v4693_v3 = vmul.f32 %v7109_v48, %v4670_v61  ;;  %v4694_v40 = vmul.f32 %v7109_v48, %v4671_v45  ;;  %v4695_v36 = vmul.f32 %v7109_v48, %v4672_v15  ;;  %v4696_v59 = vmul.f32 %v7109_v48, %v4673_v41 }
 0x472   :  { %v4704_v50 = vadd.f32 %v7110_v11, %v4681_v49  ;;  %v4705_v5 = vadd.f32 %v7110_v11, %v4682_v14  ;;  %v4706_v6 = vadd.f32 %v7110_v11, %v4683_v7  ;;  %v4707_v42 = vadd.f32 %v7110_v11, %v4684_v52 }
 0x473   :  { %v4708_v24 = vadd.f32 %v7110_v11, %v4685_v39  ;;  %v4709_v35 = vadd.f32 %v7110_v11, %v4686_v9  ;;  %v4710_v12 = vadd.f32 %v7110_v11, %v4687_v44  ;;  %v4711_v29 = vadd.f32 %v7110_v11, %v4688_v38 }
 0x474   :  { %v4712_v62 = vadd.f32 %v7110_v11, %v4689_v20  ;;  %v4713_v47 = vadd.f32 %v7110_v11, %v4690_v19  ;;  %v4714_v18 = vadd.f32 %v7110_v11, %v4691_v17  ;;  %v4715_v23 = vadd.f32 %v7110_v11, %v4692_v32 }
 0x475   :  { %v4716_v8 = vadd.f32 %v7110_v11, %v4693_v3  ;;  %v4717_v37 = vadd.f32 %v7110_v11, %v4694_v40  ;;  %v4718_v58 = vadd.f32 %v7110_v11, %v4695_v36  ;;  %v4719_v33 = vadd.f32 %v7110_v11, %v4696_v59 }
 0x476   :  { %v4720_v31 = vmax.f32 %v4704_v50, 0.0  ;;  %v4721_v57 = vmax.f32 %v4705_v5, 0.0  ;;  %v4722_v26 = vmax.f32 %v4706_v6, 0.0  ;;  %v4723_v53 = vmax.f32 %v4707_v42, 0.0 }
 0x477   :  { %v4724_v55 = vmax.f32 %v4708_v24, 0.0  ;;  %v4725_v56 = vmax.f32 %v4709_v35, 0.0  ;;  %v4726_v22 = vmax.f32 %v4710_v12, 0.0  ;;  %v4727_v54 = vmax.f32 %v4711_v29, 0.0 }
 0x478   :  { %v4728_v46 = vmax.f32 %v4712_v62, 0.0  ;;  %v4729_v60 = vmax.f32 %v4713_v47, 0.0  ;;  %v4730_v28 = vmax.f32 %v4714_v18, 0.0  ;;  %v4731_v51 = vmax.f32 %v4715_v23, 0.0  ;;  %4736 = vst.msk [vmem:[#allocation7] sm:$0xff] %vm2110_vm3, %v4720_v31  ;;  %4737 = vst.msk [vmem:[#allocation7 + $0x8] sm:$0xff] %vm2110_vm3, %v4721_v57 }
 0x479   :  { %4738 = vst.msk [vmem:[#allocation7 + $0x10] sm:$0xff] %vm2110_vm3, %v4722_v26  ;;  %4739 = vst.msk [vmem:[#allocation7 + $0x18] sm:$0xff] %vm2110_vm3, %v4723_v53  ;;  %v4732_v25 = vmax.f32 %v4716_v8, 0.0  ;;  %v4733_v0 = vmax.f32 %v4717_v37, 0.0  ;;  %v4734_v1 = vmax.f32 %v4718_v58, 0.0  ;;  %v4735_v27 = vmax.f32 %v4719_v33, 0.0 }
 0x47a   :  { %4740 = vst.msk [vmem:[#allocation7 + $0x20] sm:$0xff] %vm2110_vm3, %v4724_v55  ;;  %4741 = vst.msk [vmem:[#allocation7 + $0x28] sm:$0xff] %vm2110_vm3, %v4725_v56 }
 0x47b   :  { %4742 = vst.msk [vmem:[#allocation7 + $0x30] sm:$0xff] %vm2110_vm3, %v4726_v22  ;;  %4743 = vst.msk [vmem:[#allocation7 + $0x38] sm:$0xff] %vm2110_vm3, %v4727_v54 }
 0x47c   :  { %4744 = vst.msk [vmem:[#allocation7 + $0x40] sm:$0xff] %vm2110_vm3, %v4728_v46  ;;  %4745 = vst.msk [vmem:[#allocation7 + $0x48] sm:$0xff] %vm2110_vm3, %v4729_v60 }
 0x47d   :  { %4746 = vst.msk [vmem:[#allocation7 + $0x50] sm:$0xff] %vm2110_vm3, %v4730_v28  ;;  %4747 = vst.msk [vmem:[#allocation7 + $0x58] sm:$0xff] %vm2110_vm3, %v4731_v51 }
 0x47e   :  { %4748 = vst.msk [vmem:[#allocation7 + $0x60] sm:$0xff] %vm2110_vm3, %v4732_v25  ;;  %4749 = vst.msk [vmem:[#allocation7 + $0x68] sm:$0xff] %vm2110_vm3, %v4733_v0 }
 0x47f   :  { %4750 = vst.msk [vmem:[#allocation7 + $0x70] sm:$0xff] %vm2110_vm3, %v4734_v1  ;;  %4751 = vst.msk [vmem:[#allocation7 + $0x78] sm:$0xff] %vm2110_vm3, %v4735_v27  ;;  %v4752_v43 = vld [vmem:[#allocation7] ss:$2 sm:$0xf] }
 0x480   :  { %v4754_v2 = vld [vmem:[#allocation7 + $0x1] ss:$2 sm:$0xf]  ;;  %v4756_v10 = vld [vmem:[#allocation7 + $0x8] ss:$2 sm:$0xf] }
 0x481   :  { %v4758_v16 = vld [vmem:[#allocation7 + $0x9] ss:$2 sm:$0xf]  ;;  %v4759_v48 = vmax.f32 %v4752_v43, %v4754_v2  ;;  %v4765_v34 = vld [vmem:[#allocation7 + $0x10] ss:$2 sm:$0xf] }
 0x482   :  { %v4760_v13 = vmax.f32 %v4756_v10, %v4758_v16  ;;  %v4767_v21 = vld [vmem:[#allocation7 + $0x11] ss:$2 sm:$0xf]  ;;  %v4769_v52 = vld [vmem:[#allocation7 + $0x18] ss:$2 sm:$0xf] }
 0x483   :  { %v4772_v14 = vmax.f32 %v4765_v34, %v4767_v21  ;;  %v4771_v39 = vld [vmem:[#allocation7 + $0x19] ss:$2 sm:$0xf]  ;;  %v4777_v44 = vld [vmem:[#allocation7 + $0x20] ss:$2 sm:$0xf] }
 0x484   :  { %v4761_v49 = vmax.f32 %v4759_v48, %v4760_v13  ;;  %v4773_v9 = vmax.f32 %v4769_v52, %v4771_v39  ;;  %v4779_v38 = vld [vmem:[#allocation7 + $0x21] ss:$2 sm:$0xf]  ;;  %v4781_v20 = vld [vmem:[#allocation7 + $0x28] ss:$2 sm:$0xf] }
 0x485   :  { %v4783_v19 = vld [vmem:[#allocation7 + $0x29] ss:$2 sm:$0xf]  ;;  %v4784_v17 = vmax.f32 %v4777_v44, %v4779_v38  ;;  %v4789_v40 = vld [vmem:[#allocation7 + $0x30] ss:$2 sm:$0xf] }
 0x486   :  { %v4837_v30 = vld [vmem:[#allocation7 + $0x70] ss:$2 sm:$0xf]  ;;  %v4839_v61 = vld [vmem:[#allocation7 + $0x71] ss:$2 sm:$0xf]  ;;  %v4774_v32 = vmax.f32 %v4772_v14, %v4773_v9  ;;  %v4785_v3 = vmax.f32 %v4781_v20, %v4783_v19 }
 0x487   :  { %v4841_v45 = vld [vmem:[#allocation7 + $0x78] ss:$2 sm:$0xf]  ;;  %v4843_v15 = vld [vmem:[#allocation7 + $0x79] ss:$2 sm:$0xf]  ;;  %v4844_v41 = vmax.f32 %v4837_v30, %v4839_v61 }
 0x488   :  { %v4845_v7 = vmax.f32 %v4841_v45, %v4843_v15  ;;  %4763 = vst.msk [vmem:[#allocation8] sm:$0xf] %vm4762_vm5, %v4761_v49  ;;  %v4791_v36 = vld [vmem:[#allocation7 + $0x31] ss:$2 sm:$0xf]  ;;  %v4786_v6 = vmax.f32 %v4784_v17, %v4785_v3  ;;  %v4891_v61 = vld [vmem:[#allocation9 + $0x21] sm:$0xff] }
 0x489   :  { %v4793_v59 = vld [vmem:[#allocation7 + $0x38] ss:$2 sm:$0xf]  ;;  %v4795_v50 = vld [vmem:[#allocation7 + $0x39] ss:$2 sm:$0xf]  ;;  %v4796_v5 = vmax.f32 %v4789_v40, %v4791_v36 }
 0x48a   :  { %v4846_v11 = vmax.f32 %v4844_v41, %v4845_v7  ;;  %4775 = vst.msk [vmem:[#allocation8 + $0x4] sm:$0xf] %vm4762_vm5, %v4774_v32  ;;  %v4797_v42 = vmax.f32 %v4793_v59, %v4795_v50  ;;  %v4801_v24 = vld [vmem:[#allocation7 + $0x40] ss:$2 sm:$0xf]  ;;  %v8230_v44 = vld [vmem:[%s10455_s7 + $0x28] sm:$0xff]  }
 0x48b   :  { %v4803_v35 = vld [vmem:[#allocation7 + $0x41] ss:$2 sm:$0xf]  ;;  %v4805_v12 = vld [vmem:[#allocation7 + $0x48] ss:$2 sm:$0xf] }
 0x48c   :  { %4847 = vst.msk [vmem:[#allocation8 + $0x1c] sm:$0xf] %vm4762_vm5, %v4846_v11  ;;  %v4807_v29 = vld [vmem:[#allocation7 + $0x49] ss:$2 sm:$0xf]  ;;  %v4808_v62 = vmax.f32 %v4801_v24, %v4803_v35  ;;  %v4798_v47 = vmax.f32 %v4796_v5, %v4797_v42  ;;  %v10146_v49 = vld [vmem:[#allocation9 + $0x20] sm:$0xff] }
 0x48d   :  { %4787 = vst.msk [vmem:[#allocation8 + $0x8] sm:$0xf] %vm4762_vm5, %v4786_v6  ;;  %v4809_v18 = vmax.f32 %v4805_v12, %v4807_v29  ;;  %v4813_v23 = vld [vmem:[#allocation7 + $0x50] ss:$2 sm:$0xf]  ;;  %v8229_v52 = vld [vmem:[%s10455_s7 + $0x20] sm:$0xff]  }
 0x48e   :  { %v4815_v8 = vld [vmem:[#allocation7 + $0x51] ss:$2 sm:$0xf]  ;;  %v4817_v58 = vld [vmem:[#allocation7 + $0x58] ss:$2 sm:$0xf] }
 0x48f   :  { %v4857_v37 = vld [vmem:[#allocation8] sm:$0xf]  ;;  %v4820_v33 = vmax.f32 %v4813_v23, %v4815_v8  ;;  %4799 = vst.msk [vmem:[#allocation8 + $0xc] sm:$0xf] %vm4762_vm5, %v4798_v47  ;;  %v4810_v31 = vmax.f32 %v4808_v62, %v4809_v18 }
 0x490   :  { %4858 = vst.msk [vmem:[#allocation9 + $0x7] sm:$0xf] %vm4762_vm5, %v4857_v37  ;;  %v4819_v57 = vld [vmem:[#allocation7 + $0x59] ss:$2 sm:$0xf]  ;;  %v5072_v12 = vld [vmem:[#allocation9 + $0x22] sm:$0xff] }
 0x491   :  { %v4825_v26 = vld [vmem:[#allocation7 + $0x60] ss:$2 sm:$0xf]  ;;  %v4821_v53 = vmax.f32 %v4817_v58, %v4819_v57  ;;  %v4827_v55 = vld [vmem:[#allocation7 + $0x61] ss:$2 sm:$0xf] }
 0x492   :  { %v4829_v56 = vld [vmem:[#allocation7 + $0x68] ss:$2 sm:$0xf]  ;;  %4811 = vst.msk [vmem:[#allocation8 + $0x10] sm:$0xf] %vm4762_vm5, %v4810_v31  ;;  %v4832_v54 = vmax.f32 %v4825_v26, %v4827_v55  ;;  %v10174_v6 = vld [vmem:[#allocation9 + $0x1e] sm:$0xff] }
 0x493   :  { %v4831_v22 = vld [vmem:[#allocation7 + $0x69] ss:$2 sm:$0xf]  ;;  %v4871_v46 = vld [vmem:[#allocation8 + $0x1c] sm:$0xf]  ;;  %v4822_v28 = vmax.f32 %v4820_v33, %v4821_v53  ;;  %v8231_v37 = vld [vmem:[%s10455_s7 + $0x30] sm:$0xff]  }
 0x494   :  { %v4859_v60 = vld [vmem:[#allocation8 + $0x4] sm:$0xf]  ;;  %v4833_v51 = vmax.f32 %v4829_v56, %v4831_v22  ;;  %4872 = vst.msk [vmem:[#allocation9 + $0x3d] sm:$0xf] %vm4762_vm5, %v4871_v46  ;;  %v4861_v25 = vld [vmem:[#allocation8 + $0x8] sm:$0xf] }
 0x495   :  { %4860 = vst.msk [vmem:[#allocation9 + $0xd] sm:$0xf] %vm4762_vm5, %v4859_v60  ;;  %4823 = vst.msk [vmem:[#allocation8 + $0x14] sm:$0xf] %vm4762_vm5, %v4822_v28  ;;  %v8232_v58 = vld [vmem:[%s10455_s7 + $0x38] sm:$0xff]  }
 0x496   :  { %v4834_v0 = vmax.f32 %v4832_v54, %v4833_v51  ;;  %4862 = vst.msk [vmem:[#allocation9 + $0x13] sm:$0xf] %vm4762_vm5, %v4861_v25  ;;  %v4863_v1 = vld [vmem:[#allocation8 + $0xc] sm:$0xf]  ;;  %v5283_v51 = vld [vmem:[#allocation9 + $0x1f] sm:$0xff] }
 0x497   :  { %4864 = vst.msk [vmem:[#allocation9 + $0x19] sm:$0xf] %vm4762_vm5, %v4863_v1  ;;  %v4887_v27 = vld [vmem:[#allocation9 + $0x1] sm:$0xff] }
 0x498   :  { %4835 = vst.msk [vmem:[#allocation8 + $0x18] sm:$0xf] %vm4762_vm5, %v4834_v0  ;;  %v4873_v43 = vld [vmem:[#allocation9] sm:$0xff] }
 0x499   :  { %v4865_v2 = vld [vmem:[#allocation8 + $0x10] sm:$0xf]  ;;  %v5068_v20 = vld [vmem:[#allocation9 + $0x2] sm:$0xff] }
 0x49a   :  { %4866 = vst.msk [vmem:[#allocation9 + $0x2b] sm:$0xf] %vm4762_vm5, %v4865_v2  ;;  %v8233_v2 = vld [vmem:[%s10455_s7 + $0x40] sm:$0xff]   ;;  %s8289_s7 = smov [#allocation17]  }
 0x49b   :  { %v5181_v31 = vld [vmem:[#allocation9 + $0x3e] sm:$0x3]  ;;  %s6850_s4 = sshll.u32 %s8289_s7, 4  ;;  %s6851_s4 = int_to_ptr.vmem [resolvable:$true] %s6850_s4 }
 0x49c   :  { %v4888_v10 = vld [vmem:[#allocation9 + $0x9] sm:$0xff]  ;;  %v4867_v34 = vld [vmem:[#allocation8 + $0x14] sm:$0xf]  ;;  %s8264_s24 = scalar_lea.vmem %s6851_s4, 32  ;;  %p8269_p1 = scmp.lt.s32.totalorder %s6851_s4, %s6851_s4 }
 0x49d   :  { %v10136_v16 = vld [vmem:[#allocation9 + $0x8] sm:$0xff]  ;;  %v4895_v48 = vpack.c.bf16 %v4888_v10, %v4887_v27  ;;  %v4889_v21 = vld [vmem:[#allocation9 + $0x11] sm:$0xff]  ;;  %4868 = vst.msk [vmem:[#allocation9 + $0x31] sm:$0xf] %vm4762_vm5, %v4867_v34  ;;  %p8265_p0 = scmp.ne.s32.totalorder %s6851_s4, %s8264_s24  ;;  %p8270_p2 = scmp.lt.s32.totalorder %s8264_s24, %s8264_s24 }
 0x49e   :  { %v4881_v13 = vpack.c.bf16 %v10136_v16, %v4873_v43  ;;  %v10139_v30 = vld [vmem:[#allocation9 + $0x10] sm:$0xff]  ;;  %v4890_v15 = vld [vmem:[#allocation9 + $0x19] sm:$0xff]  ;;  %v5174_v17 = vld [vmem:[#allocation9 + $0x6] sm:$0xff] }
 0x49f   :  { %8040 = vmatprep.mubr.msk.bf16.mxu0 %vm2110_vm3, %v4895_v48  ;;  %v4869_v45 = vld [vmem:[#allocation8 + $0x18] sm:$0xf]  ;;  %v4896_v14 = vpack.c.bf16 %v4890_v15, %v4889_v21  ;;  %v5069_v19 = vld [vmem:[#allocation9 + $0xa] sm:$0xff]  ;;  %v5394_v60 = vpack.c.bf16 %v10139_v30, %v10136_v16  ;;  %v5287_v16 = vld [vmem:[#allocation9 + $0x3f] sm:$0x3]  ;;  %p8271_p3 = por %p8270_p2, %p8269_p1 }
 0x4a0   :  { %8050 = vmatprep.mubr.msk.bf16.mxu1 %vm2110_vm3, %v4881_v13  ;;  %v10144_v41 = vld [vmem:[#allocation9 + $0x18] sm:$0xff]  ;;  %4870 = vst.msk [vmem:[#allocation9 + $0x37] sm:$0xf] %vm4762_vm5, %v4869_v45  ;;  %v10167_v32 = vld [vmem:[#allocation9 + $0xe] sm:$0xff]  ;;  %v5393_v48 = vld [vmem:[#allocation9 + $0x40] sm:$0x3] }
 0x4a1   :  { %v4882_v7 = vpack.c.bf16 %v10144_v41, %v10139_v30  ;;  %v4892_v39 = vld [vmem:[#allocation9 + $0x29] sm:$0xff]  ;;  %8041 = vmatmul.mubr.msk.bf16.vlgmr.msra.gmra.mxu0 %vm2110_vm3, %v4896_v14  ;;  %v5070_v42 = vld [vmem:[#allocation9 + $0x12] sm:$0xff]  ;;  %v5071_v24 = vld [vmem:[#allocation9 + $0x1a] sm:$0xff]  ;;  %v5395_v27 = vpack.c.bf16 %v10146_v49, %v10144_v41  ;;  %p8272_p4 = pnand %p8271_p3, %p8265_p0 }
 0x4a2   :  { %v10154_v9 = vld [vmem:[#allocation9 + $0x28] sm:$0xff]  ;;  %v4897_v38 = vpack.c.bf16 %v4892_v39, %v4891_v61  ;;  %8059 = vmatpush3.bf16.msra.mxu0 %v10019_v63  ;;  %v5076_v63 = vpack.c.bf16 %v5069_v19, %v5068_v20  ;;  %v10176_v35 = vld [vmem:[#allocation9 + $0x16] sm:$0xff]  ;;  %v5077_v18 = vpack.c.bf16 %v5071_v24, %v5070_v42 }
 0x4a3   :  { %8051 = vmatmul.mubr.msk.bf16.vlgmr.msra.gmra.mxu1 %vm2110_vm3, %v4882_v7  ;;  %v4883_v11 = vpack.c.bf16 %v10154_v9, %v10146_v49  ;;  %8078 = vmatprep.subr.bf16.mxu0 %v8229_v52  ;;  %v10178_v62 = vld [vmem:[#allocation9 + $0x26] sm:$0xff]  ;;  %v5183_v23 = vpack.c.bf16 %v10174_v6, %v10176_v35  ;;  %v5281_v56 = vld [vmem:[#allocation9 + $0xf] sm:$0xff]  ;;  %v5282_v28 = vld [vmem:[#allocation9 + $0x17] sm:$0xff]  ;;  %v5712_v42 = vpack.c.bf16 %v10176_v35, %v10167_v32 }
 0x4a4   :  { %8069 = vmatpush3.bf16.msra.mxu1 %v10034_v4  ;;  %8044 = vmatprep.mubr.msk.bf16.mxu0 %vm2110_vm3, %v4897_v38  ;;  %v5182_v4 = vpack.c.bf16 %v10167_v32, %v5174_v17  ;;  %v5073_v29 = vld [vmem:[#allocation9 + $0x2a] sm:$0xff]  ;;  %v5289_v1 = vpack.c.bf16 %v5283_v51, %v5282_v28  ;;  %v5493_v30 = vld [vmem:[#allocation9 + $0x14] sm:$0xff]  ;;  %v5600_v7 = vld [vmem:[#allocation9 + $0x1d] sm:$0xff]  ;;  %v5713_v24 = vpack.c.bf16 %v10178_v62, %v10174_v6  ;;  %v10580_v32 = vmov 0.0  }
 0x4a5   :  { %8054 = vmatprep.mubr.msk.bf16.mxu1 %vm2110_vm3, %v4883_v11  ;;  %8088 = vmatprep.subr.bf16.mxu1 %v8230_v44  ;;  %v10180_v47 = vld [vmem:[#allocation9 + $0x2e] sm:$0xff]  ;;  %v5078_v8 = vpack.c.bf16 %v5073_v29, %v5072_v12  ;;  %v5495_v39 = vld [vmem:[#allocation9 + $0x24] sm:$0xff]  ;;  %5961 = vst.msk [vmem:[#allocation13] sm:$0xff] %vm5810_vm6, %v10580_v32  ;;  %5962 = vst.msk [vmem:[#allocation13 + $0x8] sm:$0xff] %vm5810_vm6, %v10580_v32 }
 0x4a6   :  { %v5184_v33 = vpack.c.bf16 %v10180_v47, %v10178_v62  ;;  %v5280_v55 = vld [vmem:[#allocation9 + $0x7] sm:$0xff]  ;;  %v5285_v0 = vld [vmem:[#allocation9 + $0x2f] sm:$0xff]  ;;  %v5710_v29 = vld [vmem:[#allocation9 + $0x3e] sm:$0xff]  ;;  %5963 = vst.msk [vmem:[#allocation13 + $0x10] sm:$0xff] %vm5810_vm6, %v10580_v32 }
 0x4a7   :  { %v4893_v3 = vld [vmem:[#allocation9 + $0x31] sm:$0xff]  ;;  %v4894_v40 = vld [vmem:[#allocation9 + $0x39] sm:$0x3]  ;;  %v5288_v46 = vpack.c.bf16 %v5281_v56, %v5280_v55  ;;  %v5284_v25 = vld [vmem:[#allocation9 + $0x27] sm:$0xff]  ;;  %5964 = vst.msk [vmem:[#allocation13 + $0x18] sm:$0xff] %vm5810_vm6, %v10580_v32 }
 0x4a8   :  { %v4879_v36 = vld [vmem:[#allocation9 + $0x30] sm:$0xff]  ;;  %v4880_v59 = vld [vmem:[#allocation9 + $0x38] sm:$0x3]  ;;  %v4898_v50 = vpack.c.bf16 %v4894_v40, %v4893_v3  ;;  %v5075_v26 = vld [vmem:[#allocation9 + $0x3a] sm:$0x3]  ;;  %v5290_v43 = vpack.c.bf16 %v5285_v0, %v5284_v25 }
 0x4a9   :  { %v4884_v5 = vpack.c.bf16 %v4880_v59, %v4879_v36  ;;  %v5074_v57 = vld [vmem:[#allocation9 + $0x32] sm:$0xff]  ;;  %v5396_v10 = vpack.c.bf16 %v4879_v36, %v10154_v9  ;;  %v5601_v9 = vld [vmem:[#allocation9 + $0x25] sm:$0xff]  ;;  %v5498_v59 = vld [vmem:[#allocation9 + $0x3c] sm:$0xff] }
 0x4aa   :  { %8045 = vmatmul.mubr.msk.bf16.gmra.mxu0 %vm2110_vm3, %v4898_v50  ;;  %v10196_v53 = vld [vmem:[#allocation9 + $0x36] sm:$0xff]  ;;  %v5079_v22 = vpack.c.bf16 %v5075_v26, %v5074_v57  ;;  %v5492_v21 = vld [vmem:[#allocation9 + $0xc] sm:$0xff]  ;;  %v5607_v17 = vpack.c.bf16 %v5601_v9, %v5600_v7  ;;  %v5499_v36 = vld [vmem:[#allocation9 + $0x44] sm:$0x3] }
 0x4ab   :  { %8055 = vmatmul.mubr.msk.bf16.gmra.mxu1 %vm2110_vm3, %v4884_v5  ;;  %8060 = vmatprep.mubr.msk.bf16.mxu0 %vm2110_vm3, %v5076_v63  ;;  %v5185_v54 = vpack.c.bf16 %v5181_v31, %v10196_v53  ;;  %v5286_v13 = vld [vmem:[#allocation9 + $0x37] sm:$0xff]  ;;  %v5598_v61 = vld [vmem:[#allocation9 + $0xd] sm:$0xff]  ;;  %v5500_v49 = vpack.c.bf16 %v5493_v30, %v5492_v21  ;;  %v5605_v5 = vld [vmem:[#allocation9 + $0x45] sm:$0x3]  ;;  %v5503_v63 = vpack.c.bf16 %v5499_v36, %v5498_v59 }
 0x4ac   :  { %8070 = vmatprep.mubr.msk.bf16.mxu1 %vm2110_vm3, %v5182_v4  ;;  %v5392_v34 = vld [vmem:[#allocation9 + $0x38] sm:$0xff]  ;;  %v5291_v15 = vpack.c.bf16 %v5287_v16, %v5286_v13  ;;  %v5602_v11 = vld [vmem:[#allocation9 + $0x2d] sm:$0xff]  ;;  %v5714_v12 = vpack.c.bf16 %v10196_v53, %v10180_v47 }
 0x4ad   :  { %v5599_v45 = vld [vmem:[#allocation9 + $0x15] sm:$0xff]  ;;  %v5397_v41 = vpack.c.bf16 %v5393_v48, %v5392_v34  ;;  %v5604_v50 = vld [vmem:[#allocation9 + $0x3d] sm:$0xff] }
 0x4ae   :  { %v5606_v14 = vpack.c.bf16 %v5599_v45, %v5598_v61  ;;  %v5497_v38 = vld [vmem:[#allocation9 + $0x34] sm:$0xff]  ;;  %v5609_v4 = vpack.c.bf16 %v5605_v5, %v5604_v50 }
 0x4af   :  { %v5603_v20 = vld [vmem:[#allocation9 + $0x35] sm:$0xff] }
 0x4b0   :  { %v5608_v40 = vpack.c.bf16 %v5603_v20, %v5602_v11 }
 0x4b2   :  { %8061 = vmatmul.mubr.msk.bf16.vlgmr.msra.gmra.mxu0 %vm2110_vm3, %v5077_v18  ;;  %v5711_v18 = vld [vmem:[#allocation9 + $0x46] sm:$0x3] }
 0x4b3   :  { %8071 = vmatmul.mubr.msk.bf16.vlgmr.msra.gmra.mxu1 %vm2110_vm3, %v5183_v23  ;;  %8079 = vmatpush3.bf16.msra.mxu0 %v8229_v52  ;;  %v5494_v52 = vld [vmem:[#allocation9 + $0x1c] sm:$0xff]  ;;  %v5715_v23 = vpack.c.bf16 %v5711_v18, %v5710_v29 }
 0x4b4   :  { %8064 = vmatprep.mubr.msk.bf16.mxu0 %vm2110_vm3, %v5078_v8  ;;  %8074 = vmatprep.mubr.msk.bf16.mxu1 %vm2110_vm3, %v5184_v33  ;;  %v5501_v19 = vpack.c.bf16 %v5495_v39, %v5494_v52  ;;  %v8237_v29 = vld [vmem:[%s10458_s10 + $0x20] sm:$0xff]  }
 0x4b5   :  { %8089 = vmatpush3.bf16.msra.mxu1 %v8230_v44  ;;  %8098 = vmatprep.subr.bf16.mxu0 %v8231_v37  ;;  %v5496_v44 = vld [vmem:[#allocation9 + $0x2c] sm:$0xff] }
 0x4b6   :  { %8108 = vmatprep.subr.bf16.mxu1 %v8232_v58  ;;  %v5502_v3 = vpack.c.bf16 %v5497_v38, %v5496_v44 }
 0x4ba   :  { %8065 = vmatmul.mubr.msk.bf16.gmra.mxu0 %vm2110_vm3, %v5079_v22 }
 0x4bb   :  { %8075 = vmatmul.mubr.msk.bf16.gmra.mxu1 %vm2110_vm3, %v5185_v54  ;;  %8080 = vmatprep.mubr.msk.bf16.mxu0 %vm2110_vm3, %v5288_v46 }
 0x4bc   :  { %8090 = vmatprep.mubr.msk.bf16.mxu1 %vm2110_vm3, %v5394_v60 }
 0x4c2   :  { %8081 = vmatmul.mubr.msk.bf16.vlgmr.msra.gmra.mxu0 %vm2110_vm3, %v5289_v1 }
 0x4c3   :  { %8091 = vmatmul.mubr.msk.bf16.vlgmr.msra.gmra.mxu1 %vm2110_vm3, %v5395_v27  ;;  %8099 = vmatpush3.bf16.msra.mxu0 %v8231_v37 }
 0x4c4   :  { %8084 = vmatprep.mubr.msk.bf16.mxu0 %vm2110_vm3, %v5290_v43  ;;  %8094 = vmatprep.mubr.msk.bf16.mxu1 %vm2110_vm3, %v5396_v10 }
 0x4c5   :  { %8109 = vmatpush3.bf16.msra.mxu1 %v8232_v58  ;;  %8118 = vmatprep.subr.bf16.mxu0 %v8233_v2 }
 0x4ca   :  { %8085 = vmatmul.mubr.msk.bf16.gmra.mxu0 %vm2110_vm3, %v5291_v15 }
 0x4cb   :  { %8095 = vmatmul.mubr.msk.bf16.gmra.mxu1 %vm2110_vm3, %v5397_v41  ;;  %8100 = vmatprep.mubr.msk.bf16.mxu0 %vm2110_vm3, %v5500_v49 }
 0x4cc   :  { %8110 = vmatprep.mubr.msk.bf16.mxu1 %vm2110_vm3, %v5606_v14 }
 0x4d2   :  { %8101 = vmatmul.mubr.msk.bf16.vlgmr.msra.gmra.mxu0 %vm2110_vm3, %v5501_v19 }
 0x4d3   :  { %8111 = vmatmul.mubr.msk.bf16.vlgmr.msra.gmra.mxu1 %vm2110_vm3, %v5607_v17  ;;  %8119 = vmatpush3.bf16.msra.mxu0 %v8233_v2 }
 0x4d4   :  { %8104 = vmatprep.mubr.msk.bf16.mxu0 %vm2110_vm3, %v5502_v3  ;;  %8114 = vmatprep.mubr.msk.bf16.mxu1 %vm2110_vm3, %v5608_v40 }
 0x4da   :  { %8105 = vmatmul.mubr.msk.bf16.gmra.mxu0 %vm2110_vm3, %v5503_v63  ;;  %v8234_v63 = vld [vmem:[%s10458_s10 + $0x18] sm:$0xff]  }
 0x4db   :  { %8115 = vmatmul.mubr.msk.bf16.gmra.mxu1 %vm2110_vm3, %v5609_v4  ;;  %8120 = vmatprep.mubr.msk.bf16.mxu0 %vm2110_vm3, %v5712_v42  ;;  %v8235_v4 = vld [vmem:[%s10458_s10 + $0x10] sm:$0xff]   ;;  %v8236_v42 = vld [vmem:[%s10458_s10 + $0x28] sm:$0xff]  }
 0x4dc   :  { %8128 = vmatprep.subr.bf16.mxu1 %v8234_v63  ;;  %8144 = vmatprep.subr.bf16.mxu0 %v8236_v42 }
 0x4dd   :  { %8129 = vmatpush3.bf16.msra.mxu1 %v8234_v63 }
 0x4de   :  { %8130 = vmatprep.subr.bf16.mxu1 %v8235_v4 }
 0x4e1   :  { %8131 = vmatpush3.bf16.msra.mxu1 %v8235_v4 }
 0x4e2   :  { %8121 = vmatmul.mubr.msk.bf16.vlgmr.msra.gmra.mxu0 %vm2110_vm3, %v5713_v24 }
 0x4e3   :  { %8124 = vmatprep.mubr.msk.bf16.mxu0 %vm2110_vm3, %v5714_v12  ;;  %8145 = vmatpush3.bf16.msra.mxu0 %v8236_v42 }
 0x4e4   :  { %8146 = vmatprep.subr.bf16.mxu0 %v8237_v29 }
 0x4e7   :  { %8147 = vmatpush3.bf16.msra.mxu0 %v8237_v29 }
 0x4ea   :  { %8125 = vmatmul.mubr.msk.bf16.gmra.mxu0 %vm2110_vm3, %v5715_v23 }
 0x561   :  { %v8042_v6 = vpop.f32.mrf.mxu0 }
 0x563   :  { %v8052_v35 = vpop.f32.mrf.mxu1  ;;  %v4954_v62 = vpop.f32.mrf.mxu0 }
 0x564   :  { %v5046_v20 = vadd.f32 %v8052_v35, %v8042_v6 }
 0x565   :  { %v5037_v47 = vpop.f32.mrf.mxu1  ;;  %v8043_v8 = vpop.f32.mrf.mxu0 }
 0x566   :  { %v5038_v3 = vadd.f32 %v5037_v47, %v4954_v62 }
 0x567   :  { %v8053_v37 = vpop.f32.mrf.mxu1  ;;  %v4957_v58 = vpop.f32.mrf.mxu0 }
 0x569   :  { %v5040_v33 = vpop.f32.mrf.mxu1 }
 0x56a   :  { %v8046_v31 = vpop.f32.mrf.mxu0  ;;  %v5041_v24 = vadd.f32 %v5040_v33, %v4957_v58 }
 0x56b   :  { %v8056_v57 = vpop.f32.mrf.mxu1 }
 0x56c   :  { %v4970_v26 = vpop.f32.mrf.mxu0  ;;  %v5062_v18 = vadd.f32 %v8056_v57, %v8046_v31 }
 0x56d   :  { %v5053_v53 = vpop.f32.mrf.mxu1 }
 0x56e   :  { %v10243_v55 = vpop.f32.mrf.mxu0  ;;  %v5054_v8 = vadd.f32 %v5053_v53, %v4970_v26 }
 0x56f   :  { %v10245_v56 = vpop.f32.mrf.mxu1 }
 0x570   :  { %v10247_v22 = vpop.f32.mrf.mxu0  ;;  %v5065_v33 = vadd.f32 %v10245_v56, %v10243_v55 }
 0x571   :  { %v10249_v54 = vpop.f32.mrf.mxu1 }
 0x572   :  { %v8062_v46 = vpop.f32.mrf.mxu0 }
 0x573   :  { %v8072_v60 = vpop.f32.mrf.mxu1  ;;  %v5168_v40 = vadd.f32 %v8062_v46, %v5046_v20 }
 0x574   :  { %v5135_v28 = vpop.f32.mrf.mxu0 }
 0x575   :  { %v5241_v51 = vpop.f32.mrf.mxu1  ;;  %v5166_v50 = vadd.f32 %v5135_v28, %v5038_v3  ;;  %v5274_v12 = vadd.f32 %v8072_v60, %v5168_v40 }
 0x576   :  { %v8063_v25 = vpop.f32.mrf.mxu0 }
 0x577   :  { %v8073_v0 = vpop.f32.mrf.mxu1  ;;  %v5272_v35 = vadd.f32 %v5241_v51, %v5166_v50  ;;  %v5057_v51 = vadd.f32 %v10249_v54, %v10247_v22 }
 0x578   :  { %v5138_v1 = vpop.f32.mrf.mxu0 }
 0x579   :  { %v5244_v27 = vpop.f32.mrf.mxu1  ;;  %v5167_v62 = vadd.f32 %v5138_v1, %v5041_v24 }
 0x57a   :  { %v8066_v43 = vpop.f32.mrf.mxu0 }
 0x57b   :  { %v8076_v2 = vpop.f32.mrf.mxu1  ;;  %v5172_v37 = vadd.f32 %v8066_v43, %v5062_v18  ;;  %v5273_v28 = vadd.f32 %v5244_v27, %v5167_v62 }
 0x57c   :  { %v5151_v10 = vpop.f32.mrf.mxu0 }
 0x57d   :  { %v10251_v16 = vpop.f32.mrf.mxu1  ;;  %v5170_v60 = vadd.f32 %v5151_v10, %v5054_v8  ;;  %v5278_v0 = vadd.f32 %v8076_v2, %v5172_v37 }
 0x57e   :  { %v8067_v48 = vpop.f32.mrf.mxu0 }
 0x57f   :  { %v10253_v13 = vpop.f32.mrf.mxu1  ;;  %v5173_v53 = vadd.f32 %v8067_v48, %v5065_v33 }
 0x580   :  { %v10255_v34 = vpop.f32.mrf.mxu0 }
 0x581   :  { %v10257_v21 = vpop.f32.mrf.mxu1  ;;  %v5171_v55 = vadd.f32 %v10255_v34, %v5057_v51  ;;  %v5279_v20 = vadd.f32 %v10253_v13, %v5173_v53 }
 0x582   :  { %v8082_v30 = vpop.f32.mrf.mxu0 }
 0x583   :  { %v8092_v61 = vpop.f32.mrf.mxu1  ;;  %v5380_v47 = vadd.f32 %v8082_v30, %v5274_v12  ;;  %v5277_v54 = vadd.f32 %v10257_v21, %v5171_v55  ;;  %v10302_v12 = vld [vmem:[%s10458_s10 + $0x8] sm:$0xff]  }
 0x584   :  { %v5347_v45 = vpop.f32.mrf.mxu0  ;;  %8136 = vmatprep.subr.bf16.mxu1 %v10302_v12 }
 0x585   :  { %v5453_v15 = vpop.f32.mrf.mxu1  ;;  %v5378_v58 = vadd.f32 %v5347_v45, %v5272_v35  ;;  %v5486_v25 = vadd.f32 %v8092_v61, %v5380_v47  ;;  %v5276_v45 = vadd.f32 %v10251_v16, %v5170_v60 }
 0x586   :  { %v8083_v41 = vpop.f32.mrf.mxu0 }
 0x587   :  { %v8093_v49 = vpop.f32.mrf.mxu1  ;;  %v5484_v1 = vadd.f32 %v5453_v15, %v5378_v58 }
 0x588   :  { %v5350_v14 = vpop.f32.mrf.mxu0 }
 0x589   :  { %v5456_v7 = vpop.f32.mrf.mxu1  ;;  %v5379_v43 = vadd.f32 %v5350_v14, %v5273_v28 }
 0x58a   :  { %v8086_v52 = vpop.f32.mrf.mxu0 }
 0x58b   :  { %v10259_v39 = vpop.f32.mrf.mxu1  ;;  %v5384_v56 = vadd.f32 %v8086_v52, %v5278_v0  ;;  %v5485_v3 = vadd.f32 %v5456_v7, %v5379_v43 }
 0x58c   :  { %v5363_v9 = vpop.f32.mrf.mxu0 }
 0x58d   :  { %v10261_v44 = vpop.f32.mrf.mxu1  ;;  %v5382_v61 = vadd.f32 %v5363_v9, %v5276_v45  ;;  %v5490_v2 = vadd.f32 %v10259_v39, %v5384_v56 }
 0x58e   :  { %v10263_v38 = vpop.f32.mrf.mxu0 }
 0x58f   :  { %v10265_v11 = vpop.f32.mrf.mxu1  ;;  %v5385_v16 = vadd.f32 %v10263_v38, %v5279_v20  ;;  %v5488_v40 = vadd.f32 %v10261_v44, %v5382_v61 }
 0x590   :  { %v10267_v19 = vpop.f32.mrf.mxu0 }
 0x591   :  { %v10269_v17 = vpop.f32.mrf.mxu1  ;;  %v5383_v9 = vadd.f32 %v10267_v19, %v5277_v54  ;;  %v5491_v39 = vadd.f32 %v10265_v11, %v5385_v16 }
 0x592   :  { %v8102_v36 = vpop.f32.mrf.mxu0 }
 0x593   :  { %v8112_v59 = vpop.f32.mrf.mxu1  ;;  %v5592_v30 = vadd.f32 %v8102_v36, %v5486_v25  ;;  %v5489_v63 = vadd.f32 %v10269_v17, %v5383_v9  ;;  %v10309_v17 = vld [vmem:[%s10458_s10 + $0x48] sm:$0xff]  }
 0x594   :  { %v5559_v5 = vpop.f32.mrf.mxu0  ;;  %8160 = vmatprep.subr.bf16.mxu0 %v10309_v17 }
 0x595   :  { %v5665_v23 = vpop.f32.mrf.mxu1  ;;  %v5590_v27 = vadd.f32 %v5559_v5, %v5484_v1  ;;  %v5698_v22 = vadd.f32 %v8112_v59, %v5592_v30 }
 0x596   :  { %v8103_v6 = vpop.f32.mrf.mxu0 }
 0x597   :  { %v8113_v31 = vpop.f32.mrf.mxu1  ;;  %v5696_v14 = vadd.f32 %v5665_v23, %v5590_v27 }
 0x598   :  { %v5562_v46 = vpop.f32.mrf.mxu0 }
 0x599   :  { %v5668_v10 = vpop.f32.mrf.mxu1  ;;  %v5591_v34 = vadd.f32 %v5562_v46, %v5485_v3 }
 0x59a   :  { %v8106_v57 = vpop.f32.mrf.mxu0 }
 0x59b   :  { %v8116_v48 = vpop.f32.mrf.mxu1  ;;  %v5596_v50 = vadd.f32 %v8106_v57, %v5490_v2  ;;  %v5697_v59 = vadd.f32 %v5668_v10, %v5591_v34 }
 0x59c   :  { %v5575_v26 = vpop.f32.mrf.mxu0 }
 0x59d   :  { %v5681_v7 = vpop.f32.mrf.mxu1  ;;  %v5594_v5 = vadd.f32 %v5575_v26, %v5488_v40  ;;  %v5702_v4 = vadd.f32 %v8116_v48, %v5596_v50 }
 0x59e   :  { %v8107_v41 = vpop.f32.mrf.mxu0 }
 0x59f   :  { %v5597_v44 = vadd.f32 %v8107_v41, %v5491_v39  ;;  %v8117_v24 = vpop.f32.mrf.mxu1  ;;  %v5700_v29 = vadd.f32 %v5681_v7, %v5594_v5 }
 0x5a0   :  { %v5578_v49 = vpop.f32.mrf.mxu0 }
 0x5a1   :  { %v5595_v11 = vadd.f32 %v5578_v49, %v5489_v63  ;;  %v5703_v35 = vadd.f32 %v8117_v24, %v5597_v44  ;;  %v5684_v47 = vpop.f32.mrf.mxu1 }
 0x5a2   :  { %v8122_v15 = vpop.f32.mrf.mxu0 }
 0x5a3   :  { %v5804_v52 = vadd.f32 %v8122_v15, %v5698_v22  ;;  %v5701_v46 = vadd.f32 %v5684_v47, %v5595_v11  ;;  %v7172_v11 = vld [vmem:[%s10456_s8] ss:$0 sm:$0xff] }
 0x5a4   :  { %v5771_v36 = vpop.f32.mrf.mxu0 }
 0x5a5   :  { %5813 = vst.msk [vmem:[#allocation10 + $0x10] sm:$0xff] %vm5810_vm6, %v5804_v52  ;;  %v5802_v13 = vadd.f32 %v5771_v36, %v5696_v14 }
 0x5a6   :  { %v8123_v21 = vpop.f32.mrf.mxu0 }
 0x5a7   :  { %5811 = vst.msk [vmem:[#allocation10] sm:$0xff] %vm5810_vm6, %v5802_v13 }
 0x5a8   :  { %v5774_v38 = vpop.f32.mrf.mxu0 }
 0x5a9   :  { %v5803_v42 = vadd.f32 %v5774_v38, %v5697_v59 }
 0x5aa   :  { %v8126_v19 = vpop.f32.mrf.mxu0 }
 0x5ab   :  { %5812 = vst.msk [vmem:[#allocation10 + $0x8] sm:$0xff] %vm5810_vm6, %v5803_v42  ;;  %v5808_v18 = vadd.f32 %v8126_v19, %v5702_v4 }
 0x5ac   :  { %v5827_v23 = vld [vmem:[#allocation10 + $0x12] sm:$0xf]  ;;  %v5787_v6 = vpop.f32.mrf.mxu0 }
 0x5ad   :  { %5828 = vst.msk [vmem:[#allocation11 + $0xc] sm:$0xf] %vm5821_vm7, %v5827_v23  ;;  %v5806_v62 = vadd.f32 %v5787_v6, %v5700_v29 }
 0x5ae   :  { %5817 = vst.msk [vmem:[#allocation10 + $0x30] sm:$0xff] %vm5810_vm6, %v5808_v18  ;;  %v5820_v8 = vld [vmem:[#allocation10] sm:$0xf]  ;;  %v8127_v37 = vpop.f32.mrf.mxu0 }
 0x5af   :  { %5822 = vst.msk [vmem:[#allocation11] sm:$0xf] %vm5821_vm7, %v5820_v8  ;;  %v5809_v58 = vadd.f32 %v8127_v37, %v5703_v35 }
 0x5b0   :  { %5815 = vst.msk [vmem:[#allocation10 + $0x20] sm:$0xff] %vm5810_vm6, %v5806_v62  ;;  %v5790_v33 = vpop.f32.mrf.mxu0  ;;  %v7173_v62 = vld [vmem:[%s10457_s9] ss:$0 sm:$0xff] }
 0x5b1   :  { %5819 = vst.msk [vmem:[#allocation10 + $0x38] sm:$0x3] %vm5818_vm8, %v5809_v58  ;;  %v5807_v60 = vadd.f32 %v5790_v33, %v5701_v46 }
 0x5b2   :  { %v5823_v31 = vld [vmem:[#allocation10 + $0x6] sm:$0xf]  ;;  %v5825_v57 = vld [vmem:[#allocation10 + $0xc] sm:$0xf] }
 0x5b3   :  { %5824 = vst.msk [vmem:[#allocation11 + $0x4] sm:$0xf] %vm5821_vm7, %v5823_v31  ;;  %5826 = vst.msk [vmem:[#allocation11 + $0x8] sm:$0xf] %vm5821_vm7, %v5825_v57 }
 0x5b4   :  { %5816 = vst.msk [vmem:[#allocation10 + $0x28] sm:$0xff] %vm5810_vm6, %v5807_v60 }
 0x5b5   :  { %v5833_v28 = vld [vmem:[#allocation10 + $0x30] sm:$0xf] }
 0x5b6   :  { %5834 = vst.msk [vmem:[#allocation11 + $0x18] sm:$0xf] %vm5821_vm7, %v5833_v28 }
 0x5b7   :  { %v5829_v25 = vld [vmem:[#allocation10 + $0x24] sm:$0xf] }
 0x5b8   :  { %5830 = vst.msk [vmem:[#allocation11 + $0x10] sm:$0xf] %vm5821_vm7, %v5829_v25  ;;  %v5835_v51 = vld [vmem:[#allocation10 + $0x36] sm:$0xf] }
 0x5b9   :  { %5836 = vst.msk [vmem:[#allocation11 + $0x1c] sm:$0xf] %vm5821_vm7, %v5835_v51 }
 0x5ba   :  { %v5837_v26 = vld [vmem:[#allocation11] sm:$0xff]  ;;  %v5838_v53 = vld [vmem:[#allocation11 + $0x8] sm:$0xff] }
 0x5bb   :  { %v5831_v0 = vld [vmem:[#allocation10 + $0x2a] sm:$0xf]  ;;  %v5841_v1 = vsel %vm5810_vm6, %v5837_v26, 0.0  ;;  %v5842_v43 = vsel %vm5810_vm6, %v5838_v53, 0.0 }
 0x5bc   :  { %5832 = vst.msk [vmem:[#allocation11 + $0x14] sm:$0xf] %vm5821_vm7, %v5831_v0  ;;  %v5843_v55 = vadd.f32 %v5842_v43, %v5841_v1 }
 0x5c0   :  { %v5840_v45 = vld [vmem:[#allocation11 + $0x18] sm:$0xff] }
 0x5c1   :  { %v5846_v41 = vsel %vm5810_vm6, %v5840_v45, 0.0 }
 0x5c3   :  { %v5839_v30 = vld [vmem:[#allocation11 + $0x10] sm:$0xff] }
 0x5c4   :  { %v5844_v56 = vsel %vm5810_vm6, %v5839_v30, 0.0 }
 0x5c5   :  { %v5845_v10 = vadd.f32 %v5844_v56, %v5843_v55 }
 0x5c7   :  { %v5847_v27 = vadd.f32 %v5846_v41, %v5845_v10 }
 0x5c9   :  { %v5848_v61 = vrot.slane %v5847_v27, 4 }
 0x5cb   :  { %v5849_v49 = vadd.f32 %v5848_v61, %v5847_v27 }
 0x5cd   :  { %v5850_v20 = vrot.slane %v5849_v49, 2 }
 0x5cf   :  { %v5851_v3 = vadd.f32 %v5850_v20, %v5849_v49 }
 0x5d1   :  { %v5852_v22 = vrot.slane %v5851_v3, 1 }
 0x5d3   :  { %v5853_v54 = vadd.f32 %v5852_v22, %v5851_v3 }
 0x5d5   :  { %v5855_v2 = vmul.f32 0.03125, %v5853_v54 }
 0x5d7   :  { %v5856_v48 = vsub.f32 %v5837_v26, %v5855_v2  ;;  %v5857_v15 = vsub.f32 %v5838_v53, %v5855_v2  ;;  %v5858_v16 = vsub.f32 %v5839_v30, %v5855_v2  ;;  %v5859_v14 = vsub.f32 %v5840_v45, %v5855_v2 }
 0x5d9   :  { %v5860_v34 = vmul.f32 %v5856_v48, %v5856_v48  ;;  %v5861_v52 = vmul.f32 %v5857_v15, %v5857_v15  ;;  %v5862_v40 = vmul.f32 %v5858_v16, %v5858_v16  ;;  %v5863_v36 = vmul.f32 %v5859_v14, %v5859_v14 }
 0x5db   :  { %v5864_v9 = vsel %vm5810_vm6, %v5860_v34, 0.0  ;;  %v5865_v50 = vsel %vm5810_vm6, %v5861_v52, 0.0  ;;  %v5867_v7 = vsel %vm5810_vm6, %v5862_v40, 0.0  ;;  %v5869_v39 = vsel %vm5810_vm6, %v5863_v36, 0.0 }
 0x5dc   :  { %v5866_v13 = vadd.f32 %v5865_v50, %v5864_v9 }
 0x5de   :  { %v5868_v21 = vadd.f32 %v5867_v7, %v5866_v13 }
 0x5e0   :  { %v5870_v59 = vadd.f32 %v5869_v39, %v5868_v21 }
 0x5e2   :  { %v5871_v5 = vrot.slane %v5870_v59, 4 }
 0x5e4   :  { %v5872_v38 = vadd.f32 %v5871_v5, %v5870_v59 }
 0x5e6   :  { %v5873_v63 = vrot.slane %v5872_v38, 2 }
 0x5e8   :  { %v5874_v4 = vadd.f32 %v5873_v63, %v5872_v38 }
 0x5ea   :  { %v5875_v44 = vrot.slane %v5874_v4, 1 }
 0x5ec   :  { %v5876_v42 = vadd.f32 %v5875_v44, %v5874_v4 }
 0x5ee   :  { %v5877_v24 = vmul.f32 0.03125, %v5876_v42 }
 0x5f0   :  { %v5878_v19 = vadd.f32 1e-05, %v5877_v24 }
 0x5f2   :  { %8260 = vrsqrt.f32 %v5878_v19 }
 0x5ff   :  { %v8261_v29 = vpop.eup %8260 }
 0x600   :  { %v5880_v18 = vmul.f32 %v8261_v29, %v5856_v48  ;;  %v5881_v23 = vmul.f32 %v8261_v29, %v5857_v15  ;;  %v5882_v6 = vmul.f32 %v8261_v29, %v5858_v16  ;;  %v5883_v35 = vmul.f32 %v8261_v29, %v5859_v14 }
 0x602   :  { %v5891_v47 = vmul.f32 %v7172_v11, %v5880_v18  ;;  %v5892_v8 = vmul.f32 %v7172_v11, %v5881_v23  ;;  %v5893_v37 = vmul.f32 %v7172_v11, %v5882_v6  ;;  %v5894_v46 = vmul.f32 %v7172_v11, %v5883_v35  ;;  %v6283_v23 = vld [vmem:[#allocation13 + $0xd] sm:$0xff] }
 0x603   :  { %v8240_v35 = vld [vmem:[%s10458_s10] sm:$0xff]  }
 0x604   :  { %v5902_v58 = vadd.f32 %v7173_v62, %v5891_v47  ;;  %v5903_v33 = vadd.f32 %v7173_v62, %v5892_v8  ;;  %v5904_v60 = vadd.f32 %v7173_v62, %v5893_v37  ;;  %v5905_v31 = vadd.f32 %v7173_v62, %v5894_v46  ;;  %v8241_v62 = vld [vmem:[%s10458_s10 + $0x40] sm:$0xff]   ;;  %v8242_v8 = vld [vmem:[%s10458_s10 + $0x38] sm:$0xff]   ;;  %v8243_v46 = vld [vmem:[%s10458_s10 + $0x68] sm:$0xff]  }
 0x606   :  { %v5906_v57 = vmax.f32 %v5902_v58, 0.0  ;;  %v5907_v28 = vmax.f32 %v5903_v33, 0.0  ;;  %v5908_v25 = vmax.f32 %v5904_v60, 0.0  ;;  %v5909_v51 = vmax.f32 %v5905_v31, 0.0  ;;  %v6204_v33 = vld [vmem:[#allocation13 + $0xc] sm:$0xff] }
 0x608   :  { %5910 = vst.msk [vmem:[#allocation11] sm:$0xff] %vm5810_vm6, %v5906_v57  ;;  %5911 = vst.msk [vmem:[#allocation11 + $0x8] sm:$0xff] %vm5810_vm6, %v5907_v28  ;;  %v8244_v57 = vld [vmem:[%s10458_s10 + $0x30] sm:$0xff]  }
 0x609   :  { %5912 = vst.msk [vmem:[#allocation11 + $0x10] sm:$0xff] %vm5810_vm6, %v5908_v25  ;;  %5913 = vst.msk [vmem:[#allocation11 + $0x18] sm:$0xff] %vm5810_vm6, %v5909_v51  ;;  %v8245_v25 = vld [vmem:[%s10458_s10 + $0x60] sm:$0xff]  }
 0x60f   :  { %v5914_v45 = vld [vmem:[#allocation11] ss:$2 sm:$0x3]  ;;  %v5916_v55 = vld [vmem:[#allocation11 + $0x1] ss:$2 sm:$0x3] }
 0x610   :  { %v5938_v0 = vld [vmem:[#allocation11 + $0x10] ss:$2 sm:$0x3]  ;;  %v5940_v26 = vld [vmem:[#allocation11 + $0x11] ss:$2 sm:$0x3]  ;;  %v5921_v41 = vmax.f32 %v5914_v45, %v5916_v55 }
 0x611   :  { %v5942_v53 = vld [vmem:[#allocation11 + $0x14] ss:$2 sm:$0x3]  ;;  %v5944_v1 = vld [vmem:[#allocation11 + $0x15] ss:$2 sm:$0x3]  ;;  %v5945_v43 = vmax.f32 %v5938_v0, %v5940_v26 }
 0x612   :  { %v5946_v30 = vmax.f32 %v5942_v53, %v5944_v1  ;;  %v5918_v56 = vld [vmem:[#allocation11 + $0x4] ss:$2 sm:$0x3]  ;;  %v5920_v10 = vld [vmem:[#allocation11 + $0x5] ss:$2 sm:$0x3] }
 0x613   :  { %v5922_v61 = vmax.f32 %v5918_v56, %v5920_v10  ;;  %v5926_v49 = vld [vmem:[#allocation11 + $0x8] ss:$2 sm:$0x3]  ;;  %v5928_v20 = vld [vmem:[#allocation11 + $0x9] ss:$2 sm:$0x3] }
 0x614   :  { %v5947_v27 = vmax.f32 %v5945_v43, %v5946_v30  ;;  %v5930_v3 = vld [vmem:[#allocation11 + $0xc] ss:$2 sm:$0x3]  ;;  %v5932_v22 = vld [vmem:[#allocation11 + $0xd] ss:$2 sm:$0x3]  ;;  %v5933_v54 = vmax.f32 %v5926_v49, %v5928_v20 }
 0x615   :  { %v5923_v2 = vmax.f32 %v5921_v41, %v5922_v61  ;;  %v5934_v48 = vmax.f32 %v5930_v3, %v5932_v22  ;;  %v5950_v15 = vld [vmem:[#allocation11 + $0x18] ss:$2 sm:$0x3]  ;;  %v5952_v16 = vld [vmem:[#allocation11 + $0x19] ss:$2 sm:$0x3] }
 0x616   :  { %5948 = vst.msk [vmem:[#allocation12 + $0x4] sm:$0x3] %vm5818_vm8, %v5947_v27  ;;  %v5954_v14 = vld [vmem:[#allocation11 + $0x1c] ss:$2 sm:$0x3]  ;;  %v5957_v52 = vmax.f32 %v5950_v15, %v5952_v16  ;;  %v8246_v0 = vld [vmem:[%s10458_s10 + $0x58] sm:$0xff]  }
 0x617   :  { %v5956_v34 = vld [vmem:[#allocation11 + $0x1d] ss:$2 sm:$0x3]  ;;  %5924 = vst.msk [vmem:[#allocation12] sm:$0x3] %vm5818_vm8, %v5923_v2  ;;  %v5935_v40 = vmax.f32 %v5933_v54, %v5934_v48  ;;  %v8247_v53 = vld [vmem:[%s10458_s10 + $0x88] sm:$0xff]  }
 0x618   :  { %v5958_v36 = vmax.f32 %v5954_v14, %v5956_v34  ;;  %v8248_v10 = vld [vmem:[%s10458_s10 + $0x50] sm:$0xff]   ;;  %v8249_v27 = vld [vmem:[%s10458_s10 + $0x80] sm:$0xff]   ;;  %v8250_v49 = vld [vmem:[%s10458_s10 + $0x78] sm:$0xff]  }
 0x619   :  { %5936 = vst.msk [vmem:[#allocation12 + $0x2] sm:$0x3] %vm5818_vm8, %v5935_v40  ;;  %v8251_v2 = vld [vmem:[%s10458_s10 + $0x70] sm:$0xff]   ;;  %v8252_v34 = vld [vmem:[%s10461_s13 + $0x18] sm:$0xff]   ;;  %v8254_v40 = vld [vmem:[%s10461_s13 + $0x8] sm:$0xff]  }
 0x61a   :  { %v5959_v9 = vmax.f32 %v5957_v52, %v5958_v36  ;;  %v8253_v52 = vld [vmem:[%s10461_s13 + $0x10] sm:$0xff]   ;;  %v8255_v36 = vld [vmem:[%s10461_s13] sm:$0xff]  }
 0x61c   :  { %5960 = vst.msk [vmem:[#allocation12 + $0x6] sm:$0x3] %vm5818_vm8, %v5959_v9 }
 0x61d   :  { %v5969_v50 = vld [vmem:[#allocation12 + $0x4] sm:$0x3] }
 0x61e   :  { %5970 = vst.msk [vmem:[#allocation13 + $0x15] sm:$0x3] %vm5818_vm8, %v5969_v50  ;;  %v5965_v13 = vld [vmem:[#allocation12] sm:$0x3] }
 0x61f   :  { %5966 = vst.msk [vmem:[#allocation13 + $0x5] sm:$0x3] %vm5818_vm8, %v5965_v13 }
 0x620   :  { %v5967_v7 = vld [vmem:[#allocation12 + $0x2] sm:$0x3] }
 0x621   :  { %5968 = vst.msk [vmem:[#allocation13 + $0x9] sm:$0x3] %vm5818_vm8, %v5967_v7 }
 0x623   :  { %v5971_v21 = vld [vmem:[#allocation12 + $0x6] sm:$0x3] }
 0x624   :  { %5972 = vst.msk [vmem:[#allocation13 + $0x19] sm:$0x3] %vm5818_vm8, %v5971_v21 }
 0x625   :  { %v5984_v39 = vld [vmem:[#allocation13 + $0x11] sm:$0x3f] }
 0x626   :  { %v6126_v59 = vld [vmem:[#allocation13 + $0x12] sm:$0x3f]  ;;  %v5982_v5 = vld [vmem:[#allocation13 + $0x1] sm:$0xff]  ;;  %v5986_v42 = vpack.c.bf16 %v5984_v39, %v5984_v39 }
 0x627   :  { %v5973_v38 = vld [vmem:[#allocation13] sm:$0xff]  ;;  %v6128_v24 = vpack.c.bf16 %v6126_v59, %v6126_v59  ;;  %v5975_v37 = vld [vmem:[#allocation13 + $0x10] sm:$0x3f] }
 0x628   :  { %v10350_v63 = vld [vmem:[#allocation13 + $0x9] sm:$0xff]  ;;  %v6520_v22 = vld [vmem:[#allocation13 + $0x11] sm:$0xff] }
 0x629   :  { %v6124_v4 = vld [vmem:[#allocation13 + $0x2] sm:$0xff]  ;;  %v10352_v44 = vld [vmem:[#allocation13 + $0xa] sm:$0xff]  ;;  %v5985_v19 = vpack.c.bf16 %v10350_v63, %v5982_v5  ;;  %v6522_v15 = vpack.c.bf16 %v6520_v22, %v10350_v63 }
 0x62a   :  { %v6127_v29 = vpack.c.bf16 %v10352_v44, %v6124_v4  ;;  %v5974_v11 = vld [vmem:[#allocation13 + $0x8] sm:$0xff]  ;;  %v6441_v60 = vld [vmem:[#allocation13 + $0x10] sm:$0xff] }
 0x62b   :  { %v6282_v18 = vld [vmem:[#allocation13 + $0x5] sm:$0xff]  ;;  %8132 = vmatprep.mubr.msk.bf16.mxu1 %vm5810_vm6, %v5985_v19  ;;  %v5976_v6 = vpack.c.bf16 %v5974_v11, %v5973_v38  ;;  %v6284_v58 = vld [vmem:[#allocation13 + $0x15] sm:$0x3f]  ;;  %v6443_v51 = vpack.c.bf16 %v6441_v60, %v5974_v11 }
 0x62c   :  { %8148 = vmatprep.mubr.msk.bf16.mxu0 %vm5810_vm6, %v6127_v29  ;;  %8133 = vmatmul.mubr.msk.bf16.vlgmr.msra.gmra.mxu1 %vm5810_vm6, %v5986_v42  ;;  %v6285_v47 = vpack.c.bf16 %v6283_v23, %v6282_v18  ;;  %v6286_v31 = vpack.c.bf16 %v6284_v58, %v6284_v58  ;;  %v6205_v26 = vld [vmem:[#allocation13 + $0x14] sm:$0x3f]  ;;  %v6361_v43 = vld [vmem:[#allocation13 + $0x6] sm:$0xff]  ;;  %v6600_v3 = vld [vmem:[#allocation13 + $0x1a] sm:$0x3f] }
 0x62d   :  { %8149 = vmatmul.mubr.msk.bf16.vlgmr.msra.gmra.mxu0 %vm5810_vm6, %v6128_v24  ;;  %8137 = vmatpush3.bf16.msra.mxu1 %v10302_v12  ;;  %v6203_v12 = vld [vmem:[#allocation13 + $0x4] sm:$0xff]  ;;  %v6442_v1 = vld [vmem:[#allocation13 + $0x18] sm:$0x3f]  ;;  %v6362_v30 = vld [vmem:[#allocation13 + $0xe] sm:$0xff]  ;;  %v6207_v45 = vpack.c.bf16 %v6205_v26, %v6205_v26  ;;  %v6602_v48 = vpack.c.bf16 %v6600_v3, %v6600_v3 }
 0x62e   :  { %8140 = vmatprep.mubr.msk.bf16.mxu1 %vm5810_vm6, %v5976_v6  ;;  %8161 = vmatpush3.bf16.msra.mxu0 %v10309_v17  ;;  %v5977_v17 = vpack.c.bf16 %v5975_v37, %v5975_v37  ;;  %v6206_v28 = vpack.c.bf16 %v6204_v33, %v6203_v12  ;;  %v6599_v55 = vld [vmem:[#allocation13 + $0x12] sm:$0xff]  ;;  %v6444_v56 = vpack.c.bf16 %v6442_v1, %v6442_v1 }
 0x62f   :  { %8164 = vmatprep.mubr.msk.bf16.mxu0 %vm5810_vm6, %v6285_v47  ;;  %8138 = vmatprep.subr.bf16.mxu1 %v8240_v35  ;;  %v6364_v41 = vpack.c.bf16 %v6362_v30, %v6361_v43  ;;  %v6601_v61 = vpack.c.bf16 %v6599_v55, %v10352_v44  ;;  %v6363_v20 = vld [vmem:[#allocation13 + $0x16] sm:$0x3f] }
 0x630   :  { %8162 = vmatprep.subr.bf16.mxu0 %v8241_v62  ;;  %v6365_v54 = vpack.c.bf16 %v6363_v20, %v6363_v20  ;;  %v6521_v16 = vld [vmem:[#allocation13 + $0x19] sm:$0x3f] }
 0x631   :  { %8139 = vmatpush3.bf16.msra.mxu1 %v8240_v35  ;;  %v6523_v14 = vpack.c.bf16 %v6521_v16, %v6521_v16 }
 0x632   :  { %8163 = vmatpush3.bf16.msra.mxu0 %v8241_v62  ;;  %8152 = vmatprep.subr.bf16.mxu1 %v8242_v8 }
 0x633   :  { %8176 = vmatprep.subr.bf16.mxu0 %v8243_v46 }
 0x634   :  { %8141 = vmatmul.mubr.msk.bf16.vlgmr.msra.gmra.mxu1 %vm5810_vm6, %v5977_v17 }
 0x635   :  { %8153 = vmatpush3.bf16.msra.mxu1 %v8242_v8  ;;  %8165 = vmatmul.mubr.msk.bf16.vlgmr.msra.gmra.mxu0 %vm5810_vm6, %v6286_v31 }
 0x636   :  { %8156 = vmatprep.mubr.msk.bf16.mxu1 %vm5810_vm6, %v6206_v28  ;;  %8177 = vmatpush3.bf16.msra.mxu0 %v8243_v46 }
 0x637   :  { %8180 = vmatprep.mubr.msk.bf16.mxu0 %vm5810_vm6, %v6443_v51  ;;  %8154 = vmatprep.subr.bf16.mxu1 %v8244_v57 }
 0x638   :  { %8178 = vmatprep.subr.bf16.mxu0 %v8245_v25 }
 0x639   :  { %8155 = vmatpush3.bf16.msra.mxu1 %v8244_v57 }
 0x63a   :  { %8179 = vmatpush3.bf16.msra.mxu0 %v8245_v25  ;;  %8168 = vmatprep.subr.bf16.mxu1 %v8246_v0 }
 0x63b   :  { %8192 = vmatprep.subr.bf16.mxu0 %v8247_v53 }
 0x63c   :  { %8157 = vmatmul.mubr.msk.bf16.vlgmr.msra.gmra.mxu1 %vm5810_vm6, %v6207_v45 }
 0x63d   :  { %8169 = vmatpush3.bf16.msra.mxu1 %v8246_v0  ;;  %8181 = vmatmul.mubr.msk.bf16.vlgmr.msra.gmra.mxu0 %vm5810_vm6, %v6444_v56 }
 0x63e   :  { %8172 = vmatprep.mubr.msk.bf16.mxu1 %vm5810_vm6, %v6364_v41  ;;  %8193 = vmatpush3.bf16.msra.mxu0 %v8247_v53 }
 0x63f   :  { %8196 = vmatprep.mubr.msk.bf16.mxu0 %vm5810_vm6, %v6601_v61  ;;  %8170 = vmatprep.subr.bf16.mxu1 %v8248_v10 }
 0x640   :  { %8194 = vmatprep.subr.bf16.mxu0 %v8249_v27 }
 0x641   :  { %8171 = vmatpush3.bf16.msra.mxu1 %v8248_v10 }
 0x642   :  { %8195 = vmatpush3.bf16.msra.mxu0 %v8249_v27  ;;  %8184 = vmatprep.subr.bf16.mxu1 %v8250_v49 }
 0x644   :  { %8173 = vmatmul.mubr.msk.bf16.vlgmr.msra.gmra.mxu1 %vm5810_vm6, %v6365_v54 }
 0x645   :  { %8185 = vmatpush3.bf16.msra.mxu1 %v8250_v49  ;;  %8197 = vmatmul.mubr.msk.bf16.vlgmr.msra.gmra.mxu0 %vm5810_vm6, %v6602_v48 }
 0x646   :  { %8188 = vmatprep.mubr.msk.bf16.mxu1 %vm5810_vm6, %v6522_v15  ;;  %8186 = vmatprep.subr.bf16.mxu1 %v8251_v2 }
 0x649   :  { %8187 = vmatpush3.bf16.msra.mxu1 %v8251_v2 }
 0x64a   :  { %8200 = vmatprep.subr.bf16.mxu1 %v10580_v32 }
 0x64c   :  { %8189 = vmatmul.mubr.msk.bf16.vlgmr.msra.gmra.mxu1 %vm5810_vm6, %v6523_v14 }
 0x64d   :  { %8208 = vmatprep.mubr.msk.bf16.mxu1 %vm8288_vm9, %v10580_v32  ;;  %8201 = vmatpush3.bf16.msra.mxu1 %v8252_v34 }
 0x64e   :  { %8202 = vmatprep.subr.bf16.mxu1 %v10580_v32 }
 0x651   :  { %8203 = vmatpush3.bf16.msra.mxu1 %v8253_v52 }
 0x652   :  { %8204 = vmatprep.subr.bf16.mxu1 %v10580_v32 }
 0x655   :  { %8205 = vmatpush3.bf16.msra.mxu1 %v8254_v40 }
 0x656   :  { %8206 = vmatprep.subr.bf16.mxu1 %v10580_v32 }
 0x659   :  { %8207 = vmatpush3.bf16.msra.mxu1 %v8255_v36 }
 0x6ec   :  { %v8134_v9 = vpop.f32.mrf.mxu1 }
 0x6ed   :  { %v8150_v50 = vpop.f32.mrf.mxu0 }
 0x6ee   :  { %v6044_v13 = vpop.f32.mrf.mxu1 }
 0x6ef   :  { %v6186_v7 = vpop.f32.mrf.mxu0 }
 0x6f0   :  { %v8135_v21 = vpop.f32.mrf.mxu1 }
 0x6f1   :  { %v8151_v39 = vpop.f32.mrf.mxu0 }
 0x6f2   :  { %v6047_v59 = vpop.f32.mrf.mxu1 }
 0x6f3   :  { %v6189_v5 = vpop.f32.mrf.mxu0 }
 0x6f4   :  { %v8142_v38 = vpop.f32.mrf.mxu1 }
 0x6f5   :  { %v8166_v63 = vpop.f32.mrf.mxu0  ;;  %v6119_v29 = vadd.f32 %v8142_v38, %v8134_v9 }
 0x6f6   :  { %v6110_v4 = vpop.f32.mrf.mxu1 }
 0x6f7   :  { %v6344_v44 = vpop.f32.mrf.mxu0  ;;  %v6111_v32 = vadd.f32 %v6110_v4, %v6044_v13  ;;  %v6202_v35 = vadd.f32 %v8150_v50, %v6119_v29  ;;  %v7243_v29 = vld [vmem:[%s10460_s12] ss:$0 sm:$0xff] }
 0x6f8   :  { %v8143_v42 = vpop.f32.mrf.mxu1 }
 0x6f9   :  { %v8167_v24 = vpop.f32.mrf.mxu0  ;;  %v6200_v37 = vadd.f32 %v6186_v7, %v6111_v32 }
 0x6fa   :  { %v6113_v19 = vpop.f32.mrf.mxu1  ;;  %v7242_v24 = vld [vmem:[%s10459_s11] ss:$0 sm:$0xff] }
 0x6fb   :  { %v6347_v11 = vpop.f32.mrf.mxu0 }
 0x6fc   :  { %v8158_v18 = vpop.f32.mrf.mxu1 }
 0x6fd   :  { %v8182_v23 = vpop.f32.mrf.mxu0  ;;  %v6281_v8 = vadd.f32 %v8158_v18, %v6202_v35 }
 0x6fe   :  { %v6265_v6 = vpop.f32.mrf.mxu1 }
 0x6ff   :  { %v6502_v62 = vpop.f32.mrf.mxu0  ;;  %v6279_v12 = vadd.f32 %v6265_v6, %v6200_v37  ;;  %v6360_v60 = vadd.f32 %v8166_v63, %v6281_v8 }
 0x700   :  { %v8159_v47 = vpop.f32.mrf.mxu1 }
 0x701   :  { %v8183_v46 = vpop.f32.mrf.mxu0  ;;  %v6358_v25 = vadd.f32 %v6344_v44, %v6279_v12 }
 0x702   :  { %v6268_v58 = vpop.f32.mrf.mxu1 }
 0x703   :  { %v6505_v33 = vpop.f32.mrf.mxu0 }
 0x704   :  { %v8174_v17 = vpop.f32.mrf.mxu1 }
 0x705   :  { %v8198_v31 = vpop.f32.mrf.mxu0  ;;  %v6439_v28 = vadd.f32 %v8174_v17, %v6360_v60 }
 0x706   :  { %v6423_v57 = vpop.f32.mrf.mxu1 }
 0x707   :  { %v6660_v51 = vpop.f32.mrf.mxu0  ;;  %v6437_v26 = vadd.f32 %v6423_v57, %v6358_v25  ;;  %v6518_v43 = vadd.f32 %v8182_v23, %v6439_v28 }
 0x708   :  { %v8175_v0 = vpop.f32.mrf.mxu1 }
 0x709   :  { %v8199_v53 = vpop.f32.mrf.mxu0  ;;  %v6516_v55 = vadd.f32 %v6502_v62, %v6437_v26  ;;  %v7244_v0 = vld [vmem:[%s10462_s14] ss:$0 sm:$0xff] }
 0x70a   :  { %v6426_v1 = vpop.f32.mrf.mxu1 }
 0x70b   :  { %v6663_v20 = vpop.f32.mrf.mxu0 }
 0x70c   :  { %v8190_v30 = vpop.f32.mrf.mxu1 }
 0x70d   :  { %v6597_v45 = vadd.f32 %v8190_v30, %v6518_v43 }
 0x70e   :  { %v6581_v56 = vpop.f32.mrf.mxu1 }
 0x70f   :  { %v6676_v10 = vadd.f32 %v8198_v31, %v6597_v45  ;;  %v6595_v41 = vadd.f32 %v6581_v56, %v6516_v55 }
 0x710   :  { %v8191_v27 = vpop.f32.mrf.mxu1 }
 0x711   :  { %6681 = vst.msk [vmem:[#allocation14 + $0x10] sm:$0x3f] %vm6680_vm10, %v6676_v10  ;;  %v6674_v61 = vadd.f32 %v6660_v51, %v6595_v41 }
 0x712   :  { %v6584_v49 = vpop.f32.mrf.mxu1 }
 0x713   :  { %6678 = vst.msk [vmem:[#allocation14] sm:$0xff] %vm6677_vm11, %v6674_v61 }
 0x718   :  { %v6687_v3 = vld [vmem:[#allocation14 + $0x10] sm:$0x3]  ;;  %v6689_v22 = vld [vmem:[#allocation14 + $0x14] sm:$0x3] }
 0x719   :  { %6688 = vst.msk [vmem:[#allocation15 + $0x4] sm:$0x3] %vm6683_vm12, %v6687_v3  ;;  %6690 = vst.msk [vmem:[#allocation15 + $0x6] sm:$0x3] %vm6683_vm12, %v6689_v22 }
 0x71a   :  { %v6682_v54 = vld [vmem:[#allocation14] sm:$0x3]  ;;  %v6685_v2 = vld [vmem:[#allocation14 + $0x4] sm:$0x3] }
 0x71b   :  { %6684 = vst.msk [vmem:[#allocation15] sm:$0x3] %vm6683_vm12, %v6682_v54  ;;  %6686 = vst.msk [vmem:[#allocation15 + $0x2] sm:$0x3] %vm6683_vm12, %v6685_v2 }
 0x722   :  { %v6691_v48 = vld [vmem:[#allocation15] sm:$0xff] }
 0x723   :  { %v6692_v15 = vsel %vm6677_vm11, %v6691_v48, 0.0 }
 0x724   :  { %v6693_v16 = vrot.slane %v6692_v15, 4 }
 0x726   :  { %v6694_v14 = vadd.f32 %v6693_v16, %v6692_v15 }
 0x728   :  { %v6695_v34 = vrot.slane %v6694_v14, 2 }
 0x72a   :  { %v6696_v52 = vadd.f32 %v6695_v34, %v6694_v14 }
 0x72c   :  { %v6697_v40 = vrot.slane %v6696_v52, 1 }
 0x72e   :  { %v6698_v36 = vadd.f32 %v6697_v40, %v6696_v52 }
 0x730   :  { %v6700_v9 = vmul.f32 0.125, %v6698_v36 }
 0x732   :  { %v6701_v50 = vsub.f32 %v6691_v48, %v6700_v9 }
 0x734   :  { %v6702_v13 = vmul.f32 %v6701_v50, %v6701_v50 }
 0x736   :  { %v6703_v7 = vsel %vm6677_vm11, %v6702_v13, 0.0 }
 0x737   :  { %v6704_v21 = vrot.slane %v6703_v7, 4 }
 0x739   :  { %v6705_v39 = vadd.f32 %v6704_v21, %v6703_v7 }
 0x73b   :  { %v6706_v59 = vrot.slane %v6705_v39, 2 }
 0x73d   :  { %v6707_v5 = vadd.f32 %v6706_v59, %v6705_v39 }
 0x73f   :  { %v6708_v38 = vrot.slane %v6707_v5, 1 }
 0x741   :  { %v6709_v63 = vadd.f32 %v6708_v38, %v6707_v5 }
 0x743   :  { %v6710_v4 = vmul.f32 0.125, %v6709_v63 }
 0x745   :  { %v6711_v44 = vadd.f32 1e-05, %v6710_v4 }
 0x747   :  { %8262 = vrsqrt.f32 %v6711_v44 }
 0x754   :  { %v8263_v42 = vpop.eup %8262 }
 0x755   :  { %v6713_v19 = vmul.f32 %v8263_v42, %v6701_v50 }
 0x757   :  { %v6721_v11 = vmul.f32 %v7242_v24, %v6713_v19 }
 0x759   :  { %v6729_v18 = vadd.f32 %v7243_v29, %v6721_v11 }
 0x75b   :  { %v6730_v32 = vmax.f32 %v6729_v18, 0.0 }
 0x75d   :  { %6731 = vst.msk [vmem:[#allocation15] sm:$0xff] %vm6677_vm11, %v6730_v32 }
 0x764   :  { %v6732_v23 = vld [vmem:[#allocation15] ss:$2 sm:$0x1]  ;;  %v6734_v6 = vld [vmem:[#allocation15 + $0x1] ss:$2 sm:$0x1] }
 0x765   :  { %v6736_v35 = vld [vmem:[#allocation15 + $0x2] ss:$2 sm:$0x1]  ;;  %v6739_v62 = vadd.f32 %v6734_v6, %v6732_v23  ;;  %v6746_v47 = vld [vmem:[#allocation15 + $0x4] ss:$2 sm:$0x1] }
 0x766   :  { %v6748_v8 = vld [vmem:[#allocation15 + $0x5] ss:$2 sm:$0x1]  ;;  %v6738_v58 = vld [vmem:[#allocation15 + $0x3] ss:$2 sm:$0x1] }
 0x767   :  { %v6740_v37 = vadd.f32 %v6739_v62, %v6736_v35  ;;  %v6753_v46 = vadd.f32 %v6748_v8, %v6746_v47  ;;  %v6750_v12 = vld [vmem:[#allocation15 + $0x6] ss:$2 sm:$0x1]  ;;  %v6752_v60 = vld [vmem:[#allocation15 + $0x7] ss:$2 sm:$0x1] }
 0x769   :  { %v6741_v33 = vadd.f32 %v6740_v37, %v6738_v58  ;;  %v6754_v17 = vadd.f32 %v6753_v46, %v6750_v12 }
 0x76b   :  { %v6742_v31 = vmul.f32 0.25, %v6741_v33  ;;  %v6755_v57 = vadd.f32 %v6754_v17, %v6752_v60 }
 0x76d   :  { %6744 = vst.msk [vmem:[#allocation16] sm:$0x1] %vm6743_vm13, %v6742_v31  ;;  %v6756_v28 = vmul.f32 0.25, %v6755_v57 }
 0x76f   :  { %6757 = vst.msk [vmem:[#allocation16 + $0x1] sm:$0x1] %vm6743_vm13, %v6756_v28 }
 0x776   :  { %v6758_v25 = vld [vmem:[#allocation16] sm:$0x3] }
 0x777   :  { %v6759_v51 = vpack.c.bf16 %v6758_v25, %v6758_v25 }
 0x779   :  { %8209 = vmatmul.mubr.msk.bf16.vlgmr.msra.gmra.mxu1 %vm6677_vm11, %v6759_v51 }
 0x839   :  { %v6836_v26 = vpop.f32.mrf.mxu1 }
 0x83a   :  { %v6837_v53 = vadd.f32 %v7244_v0, %v6836_v26 }
 0x83b   :  { %v8210_v1 = vpop.f32.mrf.mxu1 }
 0x83c   :  { %6843 = vst.msk [vmem:[#allocation17] sm:$0x3] %vm6842_vm14, %v6837_v53 }
 0x83d   :  { %v6839_v43 = vpop.f32.mrf.mxu1 }
 0x83e   :  { %8275 = shalt.err (!%p8272_p4)
}
 0x83f   :  { %6853 = dma.vmem_to_hbm [thread:$0]  %s6851_s4, 32, %s10463_s15, [#allocation18]   ;;  %v8211_v30 = vpop.f32.mrf.mxu1 }
 0x840   :  { %8284 = dma.done.wait [#allocation18], 32  }
 0x841   :  { %8285 = vsyncadd [#allocation18], 4294967264 }
 0x842   :  { %6857 = vsyncpa [#allocation18], 1 }

</bundles_post_ra>
